<compile_context>
chip_gen: v7x
topology: tpu7x:2x2x1
jax: 0.10.0
libtpu: 0.0.40
codegen_flags: <defaults>
</compile_context>

<pallas_src>
import functools

import jax
import jax.numpy as jnp
from jax import lax
from jax.experimental import pallas as pl
from jax.experimental.pallas import tpu as pltpu

LANE = 128
SUBLANE_BF16 = 16


def _round_up(x, m):
    return (x + m - 1) // m * m


def _tpu_generation_info():
    """Returns (num_tensorcores_per_chip, vmem_limit_bytes), with safe fallbacks."""
    kind = ""
    try:
        kind = jax.devices()[0].device_kind.lower()
    except Exception:
        pass
    is_v7 = ("v7" in kind) or ("7x" in kind)
    n_cores = 1
    vmem_cap = None
    try:
        info = pltpu.get_tpu_info()
        cap = getattr(info, "vmem_capacity_bytes", None)
        if cap is not None:
            vmem_cap = int(cap)
        for attr in ("num_cores", "core_count", "num_tensorcores", "tensorcore_count"):
            v = getattr(info, attr, None)
            if v is not None:
                n_cores = max(1, int(v))
                break
    except Exception:
        pass
    if n_cores == 1 and is_v7:
        n_cores = 2
    if not vmem_cap or vmem_cap <= 0:
        vmem_cap = (64 if is_v7 else 128) * 1024 * 1024
    vmem_limit = int(min(vmem_cap * 3 // 4, 100 * 1024 * 1024))
    return n_cores, vmem_limit


# -----------------------------------------------------------------------------
# Kernel
# -----------------------------------------------------------------------------
def gru_encoder_kernel(maxlen_ref, len_ref, gi0_ref, wbig_ref, bi1_ref,
                       bhn0_ref, bhn1_ref, whead_ref, bhead_ref,
                       out_ref, h_ref,
                       *, hidden_pad, latent_pad, t_blk, unroll):
    Hp = hidden_pad
    Lp = latent_pad
    Bb = out_ref.shape[0]
    b = pl.program_id(0)
    tb = pl.program_id(1)
    n_tb = pl.num_programs(1)

    lengths = len_ref[...]                                        # [Bb, 1] int32

    # Loop-invariant bias broadcasts hoisted off the serial path (JAX does not
    # CSE broadcast_in_dim, so doing this inside the unrolled loop repeats it).
    bi1 = jnp.broadcast_to(bi1_ref[...], (Bb, 3 * Hp))
    bhn0 = jnp.broadcast_to(bhn0_ref[...], (Bb, Hp))
    bhn1 = jnp.broadcast_to(bhn1_ref[...], (Bb, Hp))

    def fused_gh(h):
        # ONE MXU matmul per step (bf16 operands, f32 accumulation):
        #   [h0 | h1] @ [[W_hh0, W_ih1, 0], [0, 0, W_hh1]]  ->  [Bb, 9*Hp]
        return jnp.dot(h.astype(jnp.bfloat16), wbig_ref[...],
                       preferred_element_type=jnp.float32)

    def layer1_update(gh, h1, valid1):
        # Layer-1 GRU cell using precomputed projections inside gh.
        gi1 = gh[:, 3 * Hp:6 * Hp] + bi1
        rz1 = jax.nn.sigmoid(gi1[:, :2 * Hp] + gh[:, 6 * Hp:8 * Hp])  # fused r|z
        r1 = rz1[:, :Hp]
        z1 = rz1[:, Hp:]
        n1 = jnp.tanh(gi1[:, 2 * Hp:] + r1 * (gh[:, 8 * Hp:] + bhn1))
        return jnp.where(valid1, (1.0 - z1) * n1 + z1 * h1, h1)

    @pl.when(tb == 0)
    def _init():
        h_ref[...] = jnp.zeros_like(h_ref)

    t_start = tb * t_blk

    # Skip the whole time block once every sequence in this batch block is done
    # (iteration t == maxlen still carries the lagging layer-1 update, so the
    # block is needed as long as t_start <= maxlen).
    @pl.when(t_start <= maxlen_ref[b])
    def _recurrence():
        def step(tt, h):
            t = t_start + tt
            gh = fused_gh(h)                                       # [Bb, 9Hp]
            h0 = h[:, :Hp]
            h1 = h[:, Hp:]

            # ---- layer 0, global step t (PyTorch gate order r, z, n) ----
            gi0 = gi0_ref[tt].astype(jnp.float32)                  # [Bb, 3Hp]
            rz0 = jax.nn.sigmoid(gi0[:, :2 * Hp] + gh[:, :2 * Hp])  # fused r|z
            r0 = rz0[:, :Hp]
            z0 = rz0[:, Hp:]
            n0 = jnp.tanh(gi0[:, 2 * Hp:] + r0 * (gh[:, 2 * Hp:3 * Hp] + bhn0))
            h0n = jnp.where(t < lengths, (1.0 - z0) * n0 + z0 * h0, h0)

            # ---- layer 1, global step t-1 (wavefront skew) ----
            valid1 = jnp.logical_and(t >= 1, (t - 1) < lengths)
            h1n = layer1_update(gh, h1, valid1)

            return jnp.concatenate([h0n, h1n], axis=-1)            # lane-aligned

        h_ref[...] = lax.fori_loop(0, t_blk, step, h_ref[...], unroll=unroll)

    @pl.when(tb == n_tb - 1)
    def _finalize():
        h = h_ref[...]
        # Epilogue: the lagging layer-1 update for the final global step.
        gh = fused_gh(h)
        t_last = n_tb * t_blk - 1
        h1f = layer1_update(gh, h[:, Hp:], t_last < lengths)

        # Fused output heads: one matmul, one lane-dense store.
        head = jnp.dot(h1f.astype(jnp.bfloat16), whead_ref[...],
                       preferred_element_type=jnp.float32) + bhead_ref[...]
        mu = head[:, :Lp]
        lv = jnp.clip(head[:, Lp:], -10.0, 10.0)
        out_ref[...] = jnp.concatenate([mu, lv], axis=-1)


# -----------------------------------------------------------------------------
# Parameter init (mirrors the module's _init_weights), PyTorch layouts.
# -----------------------------------------------------------------------------
def make_params(key, state_dim, action_dim, latent_dim, hidden_dim):
    input_dim = state_dim + action_dim + 1
    ortho = jax.nn.initializers.orthogonal()
    xavier = jax.nn.initializers.glorot_uniform()
    ks = jax.random.split(key, 6)
    return {
        "w_ih0": ortho(ks[0], (3 * hidden_dim, input_dim), jnp.float32),
        "w_hh0": ortho(ks[1], (3 * hidden_dim, hidden_dim), jnp.float32),
        "b_ih0": jnp.zeros((3 * hidden_dim,), jnp.float32),
        "b_hh0": jnp.zeros((3 * hidden_dim,), jnp.float32),
        "w_ih1": ortho(ks[2], (3 * hidden_dim, hidden_dim), jnp.float32),
        "w_hh1": ortho(ks[3], (3 * hidden_dim, hidden_dim), jnp.float32),
        "b_ih1": jnp.zeros((3 * hidden_dim,), jnp.float32),
        "b_hh1": jnp.zeros((3 * hidden_dim,), jnp.float32),
        "w_mu": xavier(ks[4], (latent_dim, hidden_dim), jnp.float32),
        "b_mu": jnp.zeros((latent_dim,), jnp.float32),
        "w_lv": xavier(ks[5], (latent_dim, hidden_dim), jnp.float32),
        "b_lv": jnp.zeros((latent_dim,), jnp.float32),
    }


# -----------------------------------------------------------------------------
# Weight packing: lane-pad gates, pre-sum r/z biases, build the fused wavefront
# weight [[W_hh0, W_ih1, 0], [0, 0, W_hh1]], bf16-cast matmul operands.
# -----------------------------------------------------------------------------
def _pack_gru_weights(params, hidden_dim, latent_dim):
    H = hidden_dim
    Hp = _round_up(H, LANE)
    Lp = _round_up(latent_dim, LANE)

    def gates_w(w):          # [3H, in] -> (r, z, n) each [in, H]
        return w[:H].T, w[H:2 * H].T, w[2 * H:].T

    def gates_b(b):          # [3H] -> (r, z, n) each [H]
        return b[:H], b[H:2 * H], b[2 * H:]

    def pad_w(wg, rows):     # [in, H] -> [rows, Hp]
        return jnp.pad(wg, ((0, rows - wg.shape[0]), (0, Hp - H)))

    def pad_b(bg):           # [H] -> [Hp]
        return jnp.pad(bg, (0, Hp - H))

    def pack_w3(w, rows):    # [3H, in] -> [rows, 3Hp] with gate-major columns r|z|n
        r, z, n = gates_w(w)
        return jnp.concatenate([pad_w(r, rows), pad_w(z, rows), pad_w(n, rows)], axis=1)

    # layer-0 input projection (hoisted into the wrapper); r/z biases pre-summed
    d_in = params["w_ih0"].shape[1]
    w_ih0 = pack_w3(params["w_ih0"], d_in)                         # [Din, 3Hp] f32
    bi0r, bi0z, bi0n = gates_b(params["b_ih0"])
    bh0r, bh0z, bh0n = gates_b(params["b_hh0"])
    b_i0 = jnp.concatenate([pad_b(bi0r + bh0r), pad_b(bi0z + bh0z),
                            pad_b(bi0n)]).reshape(1, 3 * Hp)

    # fused wavefront weight: rows 0:Hp act on h0, rows Hp:2Hp act on h1
    whh0 = pack_w3(params["w_hh0"], Hp)
    wih1 = pack_w3(params["w_ih1"], Hp)
    whh1 = pack_w3(params["w_hh1"], Hp)
    z3 = jnp.zeros((Hp, 3 * Hp), jnp.float32)
    w_big = jnp.concatenate(
        [jnp.concatenate([whh0, wih1, z3], axis=1),
         jnp.concatenate([z3, z3, whh1], axis=1)], axis=0).astype(jnp.bfloat16)

    bi1r, bi1z, bi1n = gates_b(params["b_ih1"])
    bh1r, bh1z, bh1n = gates_b(params["b_hh1"])
    b_i1 = jnp.concatenate([pad_b(bi1r + bh1r), pad_b(bi1z + bh1z),
                            pad_b(bi1n)]).reshape(1, 3 * Hp)
    b_hn0 = pad_b(bh0n).reshape(1, Hp)
    b_hn1 = pad_b(bh1n).reshape(1, Hp)

    # fused output heads (mu | logvar), lane padded, bf16 operand
    w_head = jnp.concatenate(
        [jnp.pad(params["w_mu"].T, ((0, Hp - H), (0, Lp - latent_dim))),
         jnp.pad(params["w_lv"].T, ((0, Hp - H), (0, Lp - latent_dim)))],
        axis=1).astype(jnp.bfloat16)                               # [Hp, 2Lp]
    b_head = jnp.concatenate(
        [jnp.pad(params["b_mu"], (0, Lp - latent_dim)),
         jnp.pad(params["b_lv"], (0, Lp - latent_dim))]).reshape(1, 2 * Lp)

    return dict(w_ih0=w_ih0, b_i0=b_i0, w_big=w_big, b_i1=b_i1,
                b_hn0=b_hn0, b_hn1=b_hn1, w_head=w_head, b_head=b_head,
                Hp=Hp, Lp=Lp)


# -----------------------------------------------------------------------------
# Forward wrapper
# -----------------------------------------------------------------------------
def trajectory_encoder_forward(params, states, actions, rewards, lengths,
                               *, hidden_dim, latent_dim, time_block=None):
    B, T, _ = states.shape
    packed = _pack_gru_weights(params, hidden_dim, latent_dim)
    Hp, Lp = packed["Hp"], packed["Lp"]

    n_cores, vmem_limit = _tpu_generation_info()

    # ---- batch tiling (generation aware): split B only on 2-TC chips ----
    if n_cores >= 2 and B >= 2 * SUBLANE_BF16:
        B_pad = _round_up(B, 2 * SUBLANE_BF16)
        b_blk = B_pad // 2
    else:
        B_pad = _round_up(B, SUBLANE_BF16)
        b_blk = B_pad
    n_bb = B_pad // b_blk

    # ---- time tiling: stream gi0 through the pipeline in bounded chunks ----
    if time_block is None:
        budget = vmem_limit // 4
        per_step = b_blk * 3 * Hp * 2            # bf16 bytes per time step
        t_blk = int(max(1, min(budget // (2 * per_step), 128, T)))
    else:
        t_blk = int(max(1, min(int(time_block), T)))
    T_pad = _round_up(T, t_blk)
    n_tb = T_pad // t_blk

    # Glue (no hot compute): concat inputs and hoist the layer-0 input
    # projection out of the recurrence as one batched XLA matmul, time-major.
    x = jnp.concatenate([states, actions, rewards[..., None]],
                        axis=-1).astype(jnp.float32)               # [B, T, D_in]
    x_tm = jnp.transpose(x, (1, 0, 2))                             # [T, B, D_in]
    gi0 = jnp.einsum("tbi,ij->tbj", x_tm, packed["w_ih0"]) + packed["b_i0"]
    gi0 = jnp.pad(gi0, ((0, T_pad - T), (0, B_pad - B), (0, 0))).astype(jnp.bfloat16)

    lengths_1d = jnp.pad(lengths.astype(jnp.int32), (0, B_pad - B))
    maxlen_blk = jnp.max(lengths_1d.reshape(n_bb, b_blk), axis=1).astype(jnp.int32)
    lengths2d = lengths_1d.reshape(B_pad, 1)

    unroll = t_blk if t_blk <= 16 else 8

    kernel = functools.partial(gru_encoder_kernel,
                               hidden_pad=Hp, latent_pad=Lp,
                               t_blk=t_blk, unroll=unroll)

    grid_spec = pltpu.PrefetchScalarGridSpec(
        num_scalar_prefetch=1,
        grid=(n_bb, n_tb),
        in_specs=[
            pl.BlockSpec((b_blk, 1), lambda b, tb, ml: (b, 0)),              # lengths
            pl.BlockSpec((t_blk, b_blk, 3 * Hp), lambda b, tb, ml: (tb, b, 0)),  # gi0 chunks
            pl.BlockSpec((2 * Hp, 9 * Hp), lambda b, tb, ml: (0, 0)),        # fused W (bf16)
            pl.BlockSpec((1, 3 * Hp), lambda b, tb, ml: (0, 0)),             # b_i1
            pl.BlockSpec((1, Hp), lambda b, tb, ml: (0, 0)),                 # b_hh0_n
            pl.BlockSpec((1, Hp), lambda b, tb, ml: (0, 0)),                 # b_hh1_n
            pl.BlockSpec((Hp, 2 * Lp), lambda b, tb, ml: (0, 0)),            # head W (bf16)
            pl.BlockSpec((1, 2 * Lp), lambda b, tb, ml: (0, 0)),             # head bias
        ],
        out_specs=pl.BlockSpec((b_blk, 2 * Lp), lambda b, tb, ml: (b, 0)),
        scratch_shapes=[pltpu.VMEM((b_blk, 2 * Hp), jnp.float32)],           # hidden carry
    )

    out = pl.pallas_call(
        kernel,
        out_shape=jax.ShapeDtypeStruct((B_pad, 2 * Lp), jnp.float32),
        grid_spec=grid_spec,
        compiler_params=pltpu.CompilerParams(
            dimension_semantics=("parallel", "arbitrary"),
            vmem_limit_bytes=vmem_limit),
    )(maxlen_blk, lengths2d, gi0, packed["w_big"], packed["b_i1"],
      packed["b_hn0"], packed["b_hn1"], packed["w_head"], packed["b_head"])

    mu = out[:B, :latent_dim]
    logvar = out[:B, Lp:Lp + latent_dim]
    return mu, logvar


# -----------------------------------------------------------------------------
# Pure-JAX reference (unpadded, unfused) for correctness checking
# -----------------------------------------------------------------------------
def reference_forward(params, states, actions, rewards, lengths, *, hidden_dim):
    H = hidden_dim
    x = jnp.concatenate([states, actions, rewards[..., None]], axis=-1)
    B, T, _ = x.shape

    def cell(x_t, h, w_ih, w_hh, b_ih, b_hh):
        gi = x_t @ w_ih.T + b_ih
        gh = h @ w_hh.T + b_hh
        r = jax.nn.sigmoid(gi[:, :H] + gh[:, :H])
        z = jax.nn.sigmoid(gi[:, H:2 * H] + gh[:, H:2 * H])
        n = jnp.tanh(gi[:, 2 * H:] + r * gh[:, 2 * H:])
        return (1.0 - z) * n + z * h

    h0 = jnp.zeros((B, H), jnp.float32)
    h1 = jnp.zeros((B, H), jnp.float32)
    for t in range(T):
        valid = (t < lengths)[:, None]
        h0 = jnp.where(valid, cell(x[:, t], h0, params["w_ih0"], params["w_hh0"],
                                   params["b_ih0"], params["b_hh0"]), h0)
        h1 = jnp.where(valid, cell(h0, h1, params["w_ih1"], params["w_hh1"],
                                   params["b_ih1"], params["b_hh1"]), h1)
    mu = h1 @ params["w_mu"].T + params["b_mu"]
    lv = jnp.clip(h1 @ params["w_lv"].T + params["b_lv"], -10.0, 10.0)
    return mu, lv


if __name__ == "__main__":
    state_dim, action_dim = 6, 3
    hidden_dim, latent_dim = 32, 5
    key = jax.random.PRNGKey(0)
    k_s, k_a, k_r, k_p, k_s2, k_a2, k_r2 = jax.random.split(key, 7)
    params = make_params(k_p, state_dim, action_dim, latent_dim, hidden_dim)

    # --- test 1: small batch, single time block, full-length sequence present ---
    B, T = 2, 8
    states = jax.random.normal(k_s, (B, T, state_dim), jnp.float32)
    actions = jax.random.normal(k_a, (B, T, action_dim), jnp.float32)
    rewards = jax.random.normal(k_r, (B, T), jnp.float32)
    lengths = jnp.array([8, 5], dtype=jnp.int32)

    mu, logvar = trajectory_encoder_forward(
        params, states, actions, rewards, lengths,
        hidden_dim=hidden_dim, latent_dim=latent_dim)
    jax.block_until_ready((mu, logvar))
    mu_ref, lv_ref = reference_forward(params, states, actions, rewards, lengths,
                                       hidden_dim=hidden_dim)
    assert mu.shape == (B, latent_dim) and logvar.shape == (B, latent_dim)
    assert jnp.allclose(mu, mu_ref, atol=5e-2), "mu mismatch vs reference (test 1)"
    assert jnp.allclose(logvar, lv_ref, atol=5e-2), "logvar mismatch vs reference (test 1)"

    # --- test 2: multi time-block streaming + padded-block skip + wavefront ---
    B2, T2 = 3, 20
    states2 = jax.random.normal(k_s2, (B2, T2, state_dim), jnp.float32)
    actions2 = jax.random.normal(k_a2, (B2, T2, action_dim), jnp.float32)
    rewards2 = jax.random.normal(k_r2, (B2, T2), jnp.float32)
    lengths2 = jnp.array([11, 7, 4], dtype=jnp.int32)

    mu2, logvar2 = trajectory_encoder_forward(
        params, states2, actions2, rewards2, lengths2,
        hidden_dim=hidden_dim, latent_dim=latent_dim, time_block=8)
    jax.block_until_ready((mu2, logvar2))
    mu2_ref, lv2_ref = reference_forward(params, states2, actions2, rewards2, lengths2,
                                         hidden_dim=hidden_dim)
    assert jnp.allclose(mu2, mu2_ref, atol=5e-2), "mu mismatch vs reference (test 2)"
    assert jnp.allclose(logvar2, lv2_ref, atol=5e-2), "logvar mismatch vs reference (test 2)"

    print("KERNEL_OK")
</pallas_src>

<mosaic_0001>
module attributes {stable_mosaic.version = 11 : i64} {
  func.func @gru_encoder_kernel(%arg0: i32, %arg1: i32, %arg2: memref<1xi32, #tpu.memory_space<smem>>, %arg3: memref<16x1xi32, #tpu.memory_space<vmem>>, %arg4: memref<8x16x384xbf16, #tpu.memory_space<vmem>>, %arg5: memref<256x1152xbf16, #tpu.memory_space<vmem>>, %arg6: memref<1x384xf32, #tpu.memory_space<vmem>>, %arg7: memref<1x128xf32, #tpu.memory_space<vmem>>, %arg8: memref<1x128xf32, #tpu.memory_space<vmem>>, %arg9: memref<128x256xbf16, #tpu.memory_space<vmem>>, %arg10: memref<1x256xf32, #tpu.memory_space<vmem>>, %arg11: memref<16x256xf32, #tpu.memory_space<vmem>>, %arg12: memref<16x256xf32, #tpu.memory_space<vmem>>) attributes {dimension_semantics = [#tpu.dimension_semantics<parallel>, #tpu.dimension_semantics<arbitrary>], iteration_bounds = array<i64: 1, 1>, scalar_prefetch = 1 : i64, scratch_operands = 1 : i64, tpu.core_type = #tpu.core_type<tc>, window_params = [{transform_indices = @transform_0, window_bounds = array<i64: 16, 1>}, {transform_indices = @transform_1, window_bounds = array<i64: 8, 16, 384>}, {pipeline_mode = #tpu.pipeline_mode<synchronous>, transform_indices = @transform_2, window_bounds = array<i64: 256, 1152>}, {pipeline_mode = #tpu.pipeline_mode<synchronous>, transform_indices = @transform_3, window_bounds = array<i64: 1, 384>}, {pipeline_mode = #tpu.pipeline_mode<synchronous>, transform_indices = @transform_4, window_bounds = array<i64: 1, 128>}, {pipeline_mode = #tpu.pipeline_mode<synchronous>, transform_indices = @transform_5, window_bounds = array<i64: 1, 128>}, {pipeline_mode = #tpu.pipeline_mode<synchronous>, transform_indices = @transform_6, window_bounds = array<i64: 128, 256>}, {pipeline_mode = #tpu.pipeline_mode<synchronous>, transform_indices = @transform_7, window_bounds = array<i64: 1, 256>}, {transform_indices = @transform_8, window_bounds = array<i64: 16, 256>}]} {
    %c0 = arith.constant 0 : index
    %c0_0 = arith.constant 0 : index
    %0 = vector.load %arg3[%c0, %c0_0] : memref<16x1xi32, #tpu.memory_space<vmem>>, vector<16x1xi32>
    %c0_1 = arith.constant 0 : index
    %c0_2 = arith.constant 0 : index
    %1 = vector.load %arg6[%c0_1, %c0_2] : memref<1x384xf32, #tpu.memory_space<vmem>>, vector<1x384xf32>
    %2 = vector.shape_cast %1 : vector<1x384xf32> to vector<1x384xf32>
    %3 = vector.broadcast %2 : vector<1x384xf32> to vector<16x384xf32>
    %c0_3 = arith.constant 0 : index
    %c0_4 = arith.constant 0 : index
    %4 = vector.load %arg7[%c0_3, %c0_4] : memref<1x128xf32, #tpu.memory_space<vmem>>, vector<1x128xf32>
    %5 = vector.shape_cast %4 : vector<1x128xf32> to vector<1x128xf32>
    %6 = vector.broadcast %5 : vector<1x128xf32> to vector<16x128xf32>
    %c0_5 = arith.constant 0 : index
    %c0_6 = arith.constant 0 : index
    %7 = vector.load %arg8[%c0_5, %c0_6] : memref<1x128xf32, #tpu.memory_space<vmem>>, vector<1x128xf32>
    %8 = vector.shape_cast %7 : vector<1x128xf32> to vector<1x128xf32>
    %9 = vector.broadcast %8 : vector<1x128xf32> to vector<16x128xf32>
    %c0_i32 = arith.constant 0 : i32
    %10 = arith.cmpi eq, %arg1, %c0_i32 : i32
    %11 = arith.extui %10 : i1 to i32
    %c0_i32_7 = arith.constant 0 : i32
    %12 = arith.cmpi ne, %11, %c0_i32_7 : i32
    scf.if %12 {
      %cst = arith.constant 0.000000e+00 : f32
      %22 = vector.broadcast %cst : f32 to vector<16x256xf32>
      %c0_11 = arith.constant 0 : index
      %c0_12 = arith.constant 0 : index
      %23 = vector.load %arg12[%c0_11, %c0_12] : memref<16x256xf32, #tpu.memory_space<vmem>>, vector<16x256xf32>
      tpu.vector_store %arg12[%c0_11, %c0_12], %22 {strides = array<i32>} : memref<16x256xf32, #tpu.memory_space<vmem>>, vector<16x256xf32>,
    } else {
    }
    %c8_i32 = arith.constant 8 : i32
    %13 = arith.muli %arg1, %c8_i32 : i32
    %14 = arith.index_cast %arg0 : i32 to index
    %15 = memref.load %arg2[%14] : memref<1xi32, #tpu.memory_space<smem>>
    %16 = arith.cmpi sle, %13, %15 : i32
    %17 = arith.extui %16 : i1 to i32
    %c0_i32_8 = arith.constant 0 : i32
    %18 = arith.cmpi ne, %17, %c0_i32_8 : i32
    scf.if %18 {
      %c0_11 = arith.constant 0 : index
      %c0_12 = arith.constant 0 : index
      %22 = vector.load %arg12[%c0_11, %c0_12] : memref<16x256xf32, #tpu.memory_space<vmem>>, vector<16x256xf32>
      %c0_i32_13 = arith.constant 0 : i32
      %23 = arith.addi %13, %c0_i32_13 : i32
      %24 = arith.truncf %22 : vector<16x256xf32> to vector<16x256xbf16>
      %c0_14 = arith.constant 0 : index
      %c0_15 = arith.constant 0 : index
      %25 = vector.load %arg5[%c0_14, %c0_15] : memref<256x1152xbf16, #tpu.memory_space<vmem>>, vector<256x1152xbf16>
      %cst = arith.constant dense<0.000000e+00> : vector<16x1152xf32>
      %26 = tpu.matmul %24, %25, %cst {dimension_numbers = #tpu.dot_dimension_numbers<[1], [0], [0], [1], [0, 0, 1, 1], [], []>} : vector<16x256xbf16>, vector<256x1152xbf16>, vector<16x1152xf32> -> vector<16x1152xf32>
      %27 = vector.extract_strided_slice %22 {offsets = [0, 0], sizes = [16, 128], strides = [1, 1]} : vector<16x256xf32> to vector<16x128xf32>
      %28 = vector.extract_strided_slice %22 {offsets = [0, 128], sizes = [16, 128], strides = [1, 1]} : vector<16x256xf32> to vector<16x128xf32>
      %29 = arith.index_cast %c0_i32_13 : i32 to index
      %c0_16 = arith.constant 0 : index
      %c0_17 = arith.constant 0 : index
      %30 = vector.load %arg4[%29, %c0_16, %c0_17] : memref<8x16x384xbf16, #tpu.memory_space<vmem>>, vector<1x16x384xbf16>
      %31 = vector.shape_cast %30 : vector<1x16x384xbf16> to vector<16x384xbf16>
      %32 = arith.extf %31 : vector<16x384xbf16> to vector<16x384xf32>
      %33 = vector.extract_strided_slice %32 {offsets = [0, 0], sizes = [16, 256], strides = [1, 1]} : vector<16x384xf32> to vector<16x256xf32>
      %34 = vector.extract_strided_slice %26 {offsets = [0, 0], sizes = [16, 256], strides = [1, 1]} : vector<16x1152xf32> to vector<16x256xf32>
      %35 = arith.addf %33, %34 : vector<16x256xf32>
      %36 = arith.negf %35 : vector<16x256xf32>
      %37 = math.exp %36 : vector<16x256xf32>
      %cst_18 = arith.constant 1.000000e+00 : f32
      %38 = vector.broadcast %cst_18 : f32 to vector<16x256xf32>
      %39 = arith.addf %38, %37 : vector<16x256xf32>
      %40 = arith.divf %38, %39 : vector<16x256xf32>
      %41 = vector.extract_strided_slice %40 {offsets = [0, 0], sizes = [16, 128], strides = [1, 1]} : vector<16x256xf32> to vector<16x128xf32>
      %42 = vector.extract_strided_slice %40 {offsets = [0, 128], sizes = [16, 128], strides = [1, 1]} : vector<16x256xf32> to vector<16x128xf32>
      %43 = vector.extract_strided_slice %32 {offsets = [0, 256], sizes = [16, 128], strides = [1, 1]} : vector<16x384xf32> to vector<16x128xf32>
      %44 = vector.extract_strided_slice %26 {offsets = [0, 256], sizes = [16, 128], strides = [1, 1]} : vector<16x1152xf32> to vector<16x128xf32>
      %45 = arith.addf %44, %6 : vector<16x128xf32>
      %46 = arith.mulf %41, %45 : vector<16x128xf32>
      %47 = arith.addf %43, %46 : vector<16x128xf32>
      %48 = math.tanh %47 : vector<16x128xf32>
      %49 = vector.broadcast %23 : i32 to vector<16x1xi32>
      %50 = arith.cmpi slt, %49, %0 : vector<16x1xi32>
      %cst_19 = arith.constant 1.000000e+00 : f32
      %51 = vector.broadcast %cst_19 : f32 to vector<16x128xf32>
      %52 = arith.subf %51, %42 : vector<16x128xf32>
      %53 = arith.mulf %52, %48 : vector<16x128xf32>
      %54 = arith.mulf %42, %27 : vector<16x128xf32>
      %55 = arith.addf %53, %54 : vector<16x128xf32>
      %56 = vector.shape_cast %50 : vector<16x1xi1> to vector<16x1xi1>
      %57 = vector.broadcast %56 : vector<16x1xi1> to vector<16x128xi1>
      %58 = arith.select %57, %55, %27 : vector<16x128xi1>, vector<16x128xf32>
      %c1_i32 = arith.constant 1 : i32
      %59 = arith.cmpi sge, %23, %c1_i32 : i32
      %c1_i32_20 = arith.constant 1 : i32
      %60 = arith.subi %23, %c1_i32_20 : i32
      %61 = vector.broadcast %60 : i32 to vector<16x1xi32>
      %62 = arith.cmpi slt, %61, %0 : vector<16x1xi32>
      %63 = vector.broadcast %59 : i1 to vector<16x1xi1>
      %64 = arith.andi %63, %62 : vector<16x1xi1>
      %65 = vector.extract_strided_slice %26 {offsets = [0, 384], sizes = [16, 384], strides = [1, 1]} : vector<16x1152xf32> to vector<16x384xf32>
      %66 = arith.addf %65, %3 : vector<16x384xf32>
      %67 = vector.extract_strided_slice %66 {offsets = [0, 0], sizes = [16, 256], strides = [1, 1]} : vector<16x384xf32> to vector<16x256xf32>
      %68 = vector.extract_strided_slice %26 {offsets = [0, 768], sizes = [16, 256], strides = [1, 1]} : vector<16x1152xf32> to vector<16x256xf32>
      %69 = arith.addf %67, %68 : vector<16x256xf32>
      %70 = arith.negf %69 : vector<16x256xf32>
      %71 = math.exp %70 : vector<16x256xf32>
      %cst_21 = arith.constant 1.000000e+00 : f32
      %72 = vector.broadcast %cst_21 : f32 to vector<16x256xf32>
      %73 = arith.addf %72, %71 : vector<16x256xf32>
      %74 = arith.divf %72, %73 : vector<16x256xf32>
      %75 = vector.extract_strided_slice %74 {offsets = [0, 0], sizes = [16, 128], strides = [1, 1]} : vector<16x256xf32> to vector<16x128xf32>
      %76 = vector.extract_strided_slice %74 {offsets = [0, 128], sizes = [16, 128], strides = [1, 1]} : vector<16x256xf32> to vector<16x128xf32>
      %77 = vector.extract_strided_slice %66 {offsets = [0, 256], sizes = [16, 128], strides = [1, 1]} : vector<16x384xf32> to vector<16x128xf32>
      %78 = vector.extract_strided_slice %26 {offsets = [0, 1024], sizes = [16, 128], strides = [1, 1]} : vector<16x1152xf32> to vector<16x128xf32>
      %79 = arith.addf %78, %9 : vector<16x128xf32>
      %80 = arith.mulf %75, %79 : vector<16x128xf32>
      %81 = arith.addf %77, %80 : vector<16x128xf32>
      %82 = math.tanh %81 : vector<16x128xf32>
      %cst_22 = arith.constant 1.000000e+00 : f32
      %83 = vector.broadcast %cst_22 : f32 to vector<16x128xf32>
      %84 = arith.subf %83, %76 : vector<16x128xf32>
      %85 = arith.mulf %84, %82 : vector<16x128xf32>
      %86 = arith.mulf %76, %28 : vector<16x128xf32>
      %87 = arith.addf %85, %86 : vector<16x128xf32>
      %88 = vector.shape_cast %64 : vector<16x1xi1> to vector<16x1xi1>
      %89 = vector.broadcast %88 : vector<16x1xi1> to vector<16x128xi1>
      %90 = arith.select %89, %87, %28 : vector<16x128xi1>, vector<16x128xf32>
      %91 = tpu.concatenate %58, %90 in 1 : vector<16x128xf32>, vector<16x128xf32> -> vector<16x256xf32>
      %c1_i32_23 = arith.constant 1 : i32
      %92 = arith.addi %13, %c1_i32_23 : i32
      %93 = arith.truncf %91 : vector<16x256xf32> to vector<16x256xbf16>
      %c0_24 = arith.constant 0 : index
      %c0_25 = arith.constant 0 : index
      %94 = vector.load %arg5[%c0_24, %c0_25] : memref<256x1152xbf16, #tpu.memory_space<vmem>>, vector<256x1152xbf16>
      %cst_26 = arith.constant dense<0.000000e+00> : vector<16x1152xf32>
      %95 = tpu.matmul %93, %94, %cst_26 {dimension_numbers = #tpu.dot_dimension_numbers<[1], [0], [0], [1], [0, 0, 1, 1], [], []>} : vector<16x256xbf16>, vector<256x1152xbf16>, vector<16x1152xf32> -> vector<16x1152xf32>
      %96 = vector.extract_strided_slice %91 {offsets = [0, 0], sizes = [16, 128], strides = [1, 1]} : vector<16x256xf32> to vector<16x128xf32>
      %97 = vector.extract_strided_slice %91 {offsets = [0, 128], sizes = [16, 128], strides = [1, 1]} : vector<16x256xf32> to vector<16x128xf32>
      %98 = arith.index_cast %c1_i32_23 : i32 to index
      %c0_27 = arith.constant 0 : index
      %c0_28 = arith.constant 0 : index
      %99 = vector.load %arg4[%98, %c0_27, %c0_28] : memref<8x16x384xbf16, #tpu.memory_space<vmem>>, vector<1x16x384xbf16>
      %100 = vector.shape_cast %99 : vector<1x16x384xbf16> to vector<16x384xbf16>
      %101 = arith.extf %100 : vector<16x384xbf16> to vector<16x384xf32>
      %102 = vector.extract_strided_slice %101 {offsets = [0, 0], sizes = [16, 256], strides = [1, 1]} : vector<16x384xf32> to vector<16x256xf32>
      %103 = vector.extract_strided_slice %95 {offsets = [0, 0], sizes = [16, 256], strides = [1, 1]} : vector<16x1152xf32> to vector<16x256xf32>
      %104 = arith.addf %102, %103 : vector<16x256xf32>
      %105 = arith.negf %104 : vector<16x256xf32>
      %106 = math.exp %105 : vector<16x256xf32>
      %cst_29 = arith.constant 1.000000e+00 : f32
      %107 = vector.broadcast %cst_29 : f32 to vector<16x256xf32>
      %108 = arith.addf %107, %106 : vector<16x256xf32>
      %109 = arith.divf %107, %108 : vector<16x256xf32>
      %110 = vector.extract_strided_slice %109 {offsets = [0, 0], sizes = [16, 128], strides = [1, 1]} : vector<16x256xf32> to vector<16x128xf32>
      %111 = vector.extract_strided_slice %109 {offsets = [0, 128], sizes = [16, 128], strides = [1, 1]} : vector<16x256xf32> to vector<16x128xf32>
      %112 = vector.extract_strided_slice %101 {offsets = [0, 256], sizes = [16, 128], strides = [1, 1]} : vector<16x384xf32> to vector<16x128xf32>
      %113 = vector.extract_strided_slice %95 {offsets = [0, 256], sizes = [16, 128], strides = [1, 1]} : vector<16x1152xf32> to vector<16x128xf32>
      %114 = arith.addf %113, %6 : vector<16x128xf32>
      %115 = arith.mulf %110, %114 : vector<16x128xf32>
      %116 = arith.addf %112, %115 : vector<16x128xf32>
      %117 = math.tanh %116 : vector<16x128xf32>
      %118 = vector.broadcast %92 : i32 to vector<16x1xi32>
      %119 = arith.cmpi slt, %118, %0 : vector<16x1xi32>
      %cst_30 = arith.constant 1.000000e+00 : f32
      %120 = vector.broadcast %cst_30 : f32 to vector<16x128xf32>
      %121 = arith.subf %120, %111 : vector<16x128xf32>
      %122 = arith.mulf %121, %117 : vector<16x128xf32>
      %123 = arith.mulf %111, %96 : vector<16x128xf32>
      %124 = arith.addf %122, %123 : vector<16x128xf32>
      %125 = vector.shape_cast %119 : vector<16x1xi1> to vector<16x1xi1>
      %126 = vector.broadcast %125 : vector<16x1xi1> to vector<16x128xi1>
      %127 = arith.select %126, %124, %96 : vector<16x128xi1>, vector<16x128xf32>
      %c1_i32_31 = arith.constant 1 : i32
      %128 = arith.cmpi sge, %92, %c1_i32_31 : i32
      %c1_i32_32 = arith.constant 1 : i32
      %129 = arith.subi %92, %c1_i32_32 : i32
      %130 = vector.broadcast %129 : i32 to vector<16x1xi32>
      %131 = arith.cmpi slt, %130, %0 : vector<16x1xi32>
      %132 = vector.broadcast %128 : i1 to vector<16x1xi1>
      %133 = arith.andi %132, %131 : vector<16x1xi1>
      %134 = vector.extract_strided_slice %95 {offsets = [0, 384], sizes = [16, 384], strides = [1, 1]} : vector<16x1152xf32> to vector<16x384xf32>
      %135 = arith.addf %134, %3 : vector<16x384xf32>
      %136 = vector.extract_strided_slice %135 {offsets = [0, 0], sizes = [16, 256], strides = [1, 1]} : vector<16x384xf32> to vector<16x256xf32>
      %137 = vector.extract_strided_slice %95 {offsets = [0, 768], sizes = [16, 256], strides = [1, 1]} : vector<16x1152xf32> to vector<16x256xf32>
      %138 = arith.addf %136, %137 : vector<16x256xf32>
      %139 = arith.negf %138 : vector<16x256xf32>
      %140 = math.exp %139 : vector<16x256xf32>
      %cst_33 = arith.constant 1.000000e+00 : f32
      %141 = vector.broadcast %cst_33 : f32 to vector<16x256xf32>
      %142 = arith.addf %141, %140 : vector<16x256xf32>
      %143 = arith.divf %141, %142 : vector<16x256xf32>
      %144 = vector.extract_strided_slice %143 {offsets = [0, 0], sizes = [16, 128], strides = [1, 1]} : vector<16x256xf32> to vector<16x128xf32>
      %145 = vector.extract_strided_slice %143 {offsets = [0, 128], sizes = [16, 128], strides = [1, 1]} : vector<16x256xf32> to vector<16x128xf32>
      %146 = vector.extract_strided_slice %135 {offsets = [0, 256], sizes = [16, 128], strides = [1, 1]} : vector<16x384xf32> to vector<16x128xf32>
      %147 = vector.extract_strided_slice %95 {offsets = [0, 1024], sizes = [16, 128], strides = [1, 1]} : vector<16x1152xf32> to vector<16x128xf32>
      %148 = arith.addf %147, %9 : vector<16x128xf32>
      %149 = arith.mulf %144, %148 : vector<16x128xf32>
      %150 = arith.addf %146, %149 : vector<16x128xf32>
      %151 = math.tanh %150 : vector<16x128xf32>
      %cst_34 = arith.constant 1.000000e+00 : f32
      %152 = vector.broadcast %cst_34 : f32 to vector<16x128xf32>
      %153 = arith.subf %152, %145 : vector<16x128xf32>
      %154 = arith.mulf %153, %151 : vector<16x128xf32>
      %155 = arith.mulf %145, %97 : vector<16x128xf32>
      %156 = arith.addf %154, %155 : vector<16x128xf32>
      %157 = vector.shape_cast %133 : vector<16x1xi1> to vector<16x1xi1>
      %158 = vector.broadcast %157 : vector<16x1xi1> to vector<16x128xi1>
      %159 = arith.select %158, %156, %97 : vector<16x128xi1>, vector<16x128xf32>
      %160 = tpu.concatenate %127, %159 in 1 : vector<16x128xf32>, vector<16x128xf32> -> vector<16x256xf32>
      %c2_i32 = arith.constant 2 : i32
      %161 = arith.addi %13, %c2_i32 : i32
      %162 = arith.truncf %160 : vector<16x256xf32> to vector<16x256xbf16>
      %c0_35 = arith.constant 0 : index
      %c0_36 = arith.constant 0 : index
      %163 = vector.load %arg5[%c0_35, %c0_36] : memref<256x1152xbf16, #tpu.memory_space<vmem>>, vector<256x1152xbf16>
      %cst_37 = arith.constant dense<0.000000e+00> : vector<16x1152xf32>
      %164 = tpu.matmul %162, %163, %cst_37 {dimension_numbers = #tpu.dot_dimension_numbers<[1], [0], [0], [1], [0, 0, 1, 1], [], []>} : vector<16x256xbf16>, vector<256x1152xbf16>, vector<16x1152xf32> -> vector<16x1152xf32>
      %165 = vector.extract_strided_slice %160 {offsets = [0, 0], sizes = [16, 128], strides = [1, 1]} : vector<16x256xf32> to vector<16x128xf32>
      %166 = vector.extract_strided_slice %160 {offsets = [0, 128], sizes = [16, 128], strides = [1, 1]} : vector<16x256xf32> to vector<16x128xf32>
      %167 = arith.index_cast %c2_i32 : i32 to index
      %c0_38 = arith.constant 0 : index
      %c0_39 = arith.constant 0 : index
      %168 = vector.load %arg4[%167, %c0_38, %c0_39] : memref<8x16x384xbf16, #tpu.memory_space<vmem>>, vector<1x16x384xbf16>
      %169 = vector.shape_cast %168 : vector<1x16x384xbf16> to vector<16x384xbf16>
      %170 = arith.extf %169 : vector<16x384xbf16> to vector<16x384xf32>
      %171 = vector.extract_strided_slice %170 {offsets = [0, 0], sizes = [16, 256], strides = [1, 1]} : vector<16x384xf32> to vector<16x256xf32>
      %172 = vector.extract_strided_slice %164 {offsets = [0, 0], sizes = [16, 256], strides = [1, 1]} : vector<16x1152xf32> to vector<16x256xf32>
      %173 = arith.addf %171, %172 : vector<16x256xf32>
      %174 = arith.negf %173 : vector<16x256xf32>
      %175 = math.exp %174 : vector<16x256xf32>
      %cst_40 = arith.constant 1.000000e+00 : f32
      %176 = vector.broadcast %cst_40 : f32 to vector<16x256xf32>
      %177 = arith.addf %176, %175 : vector<16x256xf32>
      %178 = arith.divf %176, %177 : vector<16x256xf32>
      %179 = vector.extract_strided_slice %178 {offsets = [0, 0], sizes = [16, 128], strides = [1, 1]} : vector<16x256xf32> to vector<16x128xf32>
      %180 = vector.extract_strided_slice %178 {offsets = [0, 128], sizes = [16, 128], strides = [1, 1]} : vector<16x256xf32> to vector<16x128xf32>
      %181 = vector.extract_strided_slice %170 {offsets = [0, 256], sizes = [16, 128], strides = [1, 1]} : vector<16x384xf32> to vector<16x128xf32>
      %182 = vector.extract_strided_slice %164 {offsets = [0, 256], sizes = [16, 128], strides = [1, 1]} : vector<16x1152xf32> to vector<16x128xf32>
      %183 = arith.addf %182, %6 : vector<16x128xf32>
      %184 = arith.mulf %179, %183 : vector<16x128xf32>
      %185 = arith.addf %181, %184 : vector<16x128xf32>
      %186 = math.tanh %185 : vector<16x128xf32>
      %187 = vector.broadcast %161 : i32 to vector<16x1xi32>
      %188 = arith.cmpi slt, %187, %0 : vector<16x1xi32>
      %cst_41 = arith.constant 1.000000e+00 : f32
      %189 = vector.broadcast %cst_41 : f32 to vector<16x128xf32>
      %190 = arith.subf %189, %180 : vector<16x128xf32>
      %191 = arith.mulf %190, %186 : vector<16x128xf32>
      %192 = arith.mulf %180, %165 : vector<16x128xf32>
      %193 = arith.addf %191, %192 : vector<16x128xf32>
      %194 = vector.shape_cast %188 : vector<16x1xi1> to vector<16x1xi1>
      %195 = vector.broadcast %194 : vector<16x1xi1> to vector<16x128xi1>
      %196 = arith.select %195, %193, %165 : vector<16x128xi1>, vector<16x128xf32>
      %c1_i32_42 = arith.constant 1 : i32
      %197 = arith.cmpi sge, %161, %c1_i32_42 : i32
      %c1_i32_43 = arith.constant 1 : i32
      %198 = arith.subi %161, %c1_i32_43 : i32
      %199 = vector.broadcast %198 : i32 to vector<16x1xi32>
      %200 = arith.cmpi slt, %199, %0 : vector<16x1xi32>
      %201 = vector.broadcast %197 : i1 to vector<16x1xi1>
      %202 = arith.andi %201, %200 : vector<16x1xi1>
      %203 = vector.extract_strided_slice %164 {offsets = [0, 384], sizes = [16, 384], strides = [1, 1]} : vector<16x1152xf32> to vector<16x384xf32>
      %204 = arith.addf %203, %3 : vector<16x384xf32>
      %205 = vector.extract_strided_slice %204 {offsets = [0, 0], sizes = [16, 256], strides = [1, 1]} : vector<16x384xf32> to vector<16x256xf32>
      %206 = vector.extract_strided_slice %164 {offsets = [0, 768], sizes = [16, 256], strides = [1, 1]} : vector<16x1152xf32> to vector<16x256xf32>
      %207 = arith.addf %205, %206 : vector<16x256xf32>
      %208 = arith.negf %207 : vector<16x256xf32>
      %209 = math.exp %208 : vector<16x256xf32>
      %cst_44 = arith.constant 1.000000e+00 : f32
      %210 = vector.broadcast %cst_44 : f32 to vector<16x256xf32>
      %211 = arith.addf %210, %209 : vector<16x256xf32>
      %212 = arith.divf %210, %211 : vector<16x256xf32>
      %213 = vector.extract_strided_slice %212 {offsets = [0, 0], sizes = [16, 128], strides = [1, 1]} : vector<16x256xf32> to vector<16x128xf32>
      %214 = vector.extract_strided_slice %212 {offsets = [0, 128], sizes = [16, 128], strides = [1, 1]} : vector<16x256xf32> to vector<16x128xf32>
      %215 = vector.extract_strided_slice %204 {offsets = [0, 256], sizes = [16, 128], strides = [1, 1]} : vector<16x384xf32> to vector<16x128xf32>
      %216 = vector.extract_strided_slice %164 {offsets = [0, 1024], sizes = [16, 128], strides = [1, 1]} : vector<16x1152xf32> to vector<16x128xf32>
      %217 = arith.addf %216, %9 : vector<16x128xf32>
      %218 = arith.mulf %213, %217 : vector<16x128xf32>
      %219 = arith.addf %215, %218 : vector<16x128xf32>
      %220 = math.tanh %219 : vector<16x128xf32>
      %cst_45 = arith.constant 1.000000e+00 : f32
      %221 = vector.broadcast %cst_45 : f32 to vector<16x128xf32>
      %222 = arith.subf %221, %214 : vector<16x128xf32>
      %223 = arith.mulf %222, %220 : vector<16x128xf32>
      %224 = arith.mulf %214, %166 : vector<16x128xf32>
      %225 = arith.addf %223, %224 : vector<16x128xf32>
      %226 = vector.shape_cast %202 : vector<16x1xi1> to vector<16x1xi1>
      %227 = vector.broadcast %226 : vector<16x1xi1> to vector<16x128xi1>
      %228 = arith.select %227, %225, %166 : vector<16x128xi1>, vector<16x128xf32>
      %229 = tpu.concatenate %196, %228 in 1 : vector<16x128xf32>, vector<16x128xf32> -> vector<16x256xf32>
      %c3_i32 = arith.constant 3 : i32
      %230 = arith.addi %13, %c3_i32 : i32
      %231 = arith.truncf %229 : vector<16x256xf32> to vector<16x256xbf16>
      %c0_46 = arith.constant 0 : index
      %c0_47 = arith.constant 0 : index
      %232 = vector.load %arg5[%c0_46, %c0_47] : memref<256x1152xbf16, #tpu.memory_space<vmem>>, vector<256x1152xbf16>
      %cst_48 = arith.constant dense<0.000000e+00> : vector<16x1152xf32>
      %233 = tpu.matmul %231, %232, %cst_48 {dimension_numbers = #tpu.dot_dimension_numbers<[1], [0], [0], [1], [0, 0, 1, 1], [], []>} : vector<16x256xbf16>, vector<256x1152xbf16>, vector<16x1152xf32> -> vector<16x1152xf32>
      %234 = vector.extract_strided_slice %229 {offsets = [0, 0], sizes = [16, 128], strides = [1, 1]} : vector<16x256xf32> to vector<16x128xf32>
      %235 = vector.extract_strided_slice %229 {offsets = [0, 128], sizes = [16, 128], strides = [1, 1]} : vector<16x256xf32> to vector<16x128xf32>
      %236 = arith.index_cast %c3_i32 : i32 to index
      %c0_49 = arith.constant 0 : index
      %c0_50 = arith.constant 0 : index
      %237 = vector.load %arg4[%236, %c0_49, %c0_50] : memref<8x16x384xbf16, #tpu.memory_space<vmem>>, vector<1x16x384xbf16>
      %238 = vector.shape_cast %237 : vector<1x16x384xbf16> to vector<16x384xbf16>
      %239 = arith.extf %238 : vector<16x384xbf16> to vector<16x384xf32>
      %240 = vector.extract_strided_slice %239 {offsets = [0, 0], sizes = [16, 256], strides = [1, 1]} : vector<16x384xf32> to vector<16x256xf32>
      %241 = vector.extract_strided_slice %233 {offsets = [0, 0], sizes = [16, 256], strides = [1, 1]} : vector<16x1152xf32> to vector<16x256xf32>
      %242 = arith.addf %240, %241 : vector<16x256xf32>
      %243 = arith.negf %242 : vector<16x256xf32>
      %244 = math.exp %243 : vector<16x256xf32>
      %cst_51 = arith.constant 1.000000e+00 : f32
      %245 = vector.broadcast %cst_51 : f32 to vector<16x256xf32>
      %246 = arith.addf %245, %244 : vector<16x256xf32>
      %247 = arith.divf %245, %246 : vector<16x256xf32>
      %248 = vector.extract_strided_slice %247 {offsets = [0, 0], sizes = [16, 128], strides = [1, 1]} : vector<16x256xf32> to vector<16x128xf32>
      %249 = vector.extract_strided_slice %247 {offsets = [0, 128], sizes = [16, 128], strides = [1, 1]} : vector<16x256xf32> to vector<16x128xf32>
      %250 = vector.extract_strided_slice %239 {offsets = [0, 256], sizes = [16, 128], strides = [1, 1]} : vector<16x384xf32> to vector<16x128xf32>
      %251 = vector.extract_strided_slice %233 {offsets = [0, 256], sizes = [16, 128], strides = [1, 1]} : vector<16x1152xf32> to vector<16x128xf32>
      %252 = arith.addf %251, %6 : vector<16x128xf32>
      %253 = arith.mulf %248, %252 : vector<16x128xf32>
      %254 = arith.addf %250, %253 : vector<16x128xf32>
      %255 = math.tanh %254 : vector<16x128xf32>
      %256 = vector.broadcast %230 : i32 to vector<16x1xi32>
      %257 = arith.cmpi slt, %256, %0 : vector<16x1xi32>
      %cst_52 = arith.constant 1.000000e+00 : f32
      %258 = vector.broadcast %cst_52 : f32 to vector<16x128xf32>
      %259 = arith.subf %258, %249 : vector<16x128xf32>
      %260 = arith.mulf %259, %255 : vector<16x128xf32>
      %261 = arith.mulf %249, %234 : vector<16x128xf32>
      %262 = arith.addf %260, %261 : vector<16x128xf32>
      %263 = vector.shape_cast %257 : vector<16x1xi1> to vector<16x1xi1>
      %264 = vector.broadcast %263 : vector<16x1xi1> to vector<16x128xi1>
      %265 = arith.select %264, %262, %234 : vector<16x128xi1>, vector<16x128xf32>
      %c1_i32_53 = arith.constant 1 : i32
      %266 = arith.cmpi sge, %230, %c1_i32_53 : i32
      %c1_i32_54 = arith.constant 1 : i32
      %267 = arith.subi %230, %c1_i32_54 : i32
      %268 = vector.broadcast %267 : i32 to vector<16x1xi32>
      %269 = arith.cmpi slt, %268, %0 : vector<16x1xi32>
      %270 = vector.broadcast %266 : i1 to vector<16x1xi1>
      %271 = arith.andi %270, %269 : vector<16x1xi1>
      %272 = vector.extract_strided_slice %233 {offsets = [0, 384], sizes = [16, 384], strides = [1, 1]} : vector<16x1152xf32> to vector<16x384xf32>
      %273 = arith.addf %272, %3 : vector<16x384xf32>
      %274 = vector.extract_strided_slice %273 {offsets = [0, 0], sizes = [16, 256], strides = [1, 1]} : vector<16x384xf32> to vector<16x256xf32>
      %275 = vector.extract_strided_slice %233 {offsets = [0, 768], sizes = [16, 256], strides = [1, 1]} : vector<16x1152xf32> to vector<16x256xf32>
      %276 = arith.addf %274, %275 : vector<16x256xf32>
      %277 = arith.negf %276 : vector<16x256xf32>
      %278 = math.exp %277 : vector<16x256xf32>
      %cst_55 = arith.constant 1.000000e+00 : f32
      %279 = vector.broadcast %cst_55 : f32 to vector<16x256xf32>
      %280 = arith.addf %279, %278 : vector<16x256xf32>
      %281 = arith.divf %279, %280 : vector<16x256xf32>
      %282 = vector.extract_strided_slice %281 {offsets = [0, 0], sizes = [16, 128], strides = [1, 1]} : vector<16x256xf32> to vector<16x128xf32>
      %283 = vector.extract_strided_slice %281 {offsets = [0, 128], sizes = [16, 128], strides = [1, 1]} : vector<16x256xf32> to vector<16x128xf32>
      %284 = vector.extract_strided_slice %273 {offsets = [0, 256], sizes = [16, 128], strides = [1, 1]} : vector<16x384xf32> to vector<16x128xf32>
      %285 = vector.extract_strided_slice %233 {offsets = [0, 1024], sizes = [16, 128], strides = [1, 1]} : vector<16x1152xf32> to vector<16x128xf32>
      %286 = arith.addf %285, %9 : vector<16x128xf32>
      %287 = arith.mulf %282, %286 : vector<16x128xf32>
      %288 = arith.addf %284, %287 : vector<16x128xf32>
      %289 = math.tanh %288 : vector<16x128xf32>
      %cst_56 = arith.constant 1.000000e+00 : f32
      %290 = vector.broadcast %cst_56 : f32 to vector<16x128xf32>
      %291 = arith.subf %290, %283 : vector<16x128xf32>
      %292 = arith.mulf %291, %289 : vector<16x128xf32>
      %293 = arith.mulf %283, %235 : vector<16x128xf32>
      %294 = arith.addf %292, %293 : vector<16x128xf32>
      %295 = vector.shape_cast %271 : vector<16x1xi1> to vector<16x1xi1>
      %296 = vector.broadcast %295 : vector<16x1xi1> to vector<16x128xi1>
      %297 = arith.select %296, %294, %235 : vector<16x128xi1>, vector<16x128xf32>
      %298 = tpu.concatenate %265, %297 in 1 : vector<16x128xf32>, vector<16x128xf32> -> vector<16x256xf32>
      %c4_i32 = arith.constant 4 : i32
      %299 = arith.addi %13, %c4_i32 : i32
      %300 = arith.truncf %298 : vector<16x256xf32> to vector<16x256xbf16>
      %c0_57 = arith.constant 0 : index
      %c0_58 = arith.constant 0 : index
      %301 = vector.load %arg5[%c0_57, %c0_58] : memref<256x1152xbf16, #tpu.memory_space<vmem>>, vector<256x1152xbf16>
      %cst_59 = arith.constant dense<0.000000e+00> : vector<16x1152xf32>
      %302 = tpu.matmul %300, %301, %cst_59 {dimension_numbers = #tpu.dot_dimension_numbers<[1], [0], [0], [1], [0, 0, 1, 1], [], []>} : vector<16x256xbf16>, vector<256x1152xbf16>, vector<16x1152xf32> -> vector<16x1152xf32>
      %303 = vector.extract_strided_slice %298 {offsets = [0, 0], sizes = [16, 128], strides = [1, 1]} : vector<16x256xf32> to vector<16x128xf32>
      %304 = vector.extract_strided_slice %298 {offsets = [0, 128], sizes = [16, 128], strides = [1, 1]} : vector<16x256xf32> to vector<16x128xf32>
      %305 = arith.index_cast %c4_i32 : i32 to index
      %c0_60 = arith.constant 0 : index
      %c0_61 = arith.constant 0 : index
      %306 = vector.load %arg4[%305, %c0_60, %c0_61] : memref<8x16x384xbf16, #tpu.memory_space<vmem>>, vector<1x16x384xbf16>
      %307 = vector.shape_cast %306 : vector<1x16x384xbf16> to vector<16x384xbf16>
      %308 = arith.extf %307 : vector<16x384xbf16> to vector<16x384xf32>
      %309 = vector.extract_strided_slice %308 {offsets = [0, 0], sizes = [16, 256], strides = [1, 1]} : vector<16x384xf32> to vector<16x256xf32>
      %310 = vector.extract_strided_slice %302 {offsets = [0, 0], sizes = [16, 256], strides = [1, 1]} : vector<16x1152xf32> to vector<16x256xf32>
      %311 = arith.addf %309, %310 : vector<16x256xf32>
      %312 = arith.negf %311 : vector<16x256xf32>
      %313 = math.exp %312 : vector<16x256xf32>
      %cst_62 = arith.constant 1.000000e+00 : f32
      %314 = vector.broadcast %cst_62 : f32 to vector<16x256xf32>
      %315 = arith.addf %314, %313 : vector<16x256xf32>
      %316 = arith.divf %314, %315 : vector<16x256xf32>
      %317 = vector.extract_strided_slice %316 {offsets = [0, 0], sizes = [16, 128], strides = [1, 1]} : vector<16x256xf32> to vector<16x128xf32>
      %318 = vector.extract_strided_slice %316 {offsets = [0, 128], sizes = [16, 128], strides = [1, 1]} : vector<16x256xf32> to vector<16x128xf32>
      %319 = vector.extract_strided_slice %308 {offsets = [0, 256], sizes = [16, 128], strides = [1, 1]} : vector<16x384xf32> to vector<16x128xf32>
      %320 = vector.extract_strided_slice %302 {offsets = [0, 256], sizes = [16, 128], strides = [1, 1]} : vector<16x1152xf32> to vector<16x128xf32>
      %321 = arith.addf %320, %6 : vector<16x128xf32>
      %322 = arith.mulf %317, %321 : vector<16x128xf32>
      %323 = arith.addf %319, %322 : vector<16x128xf32>
      %324 = math.tanh %323 : vector<16x128xf32>
      %325 = vector.broadcast %299 : i32 to vector<16x1xi32>
      %326 = arith.cmpi slt, %325, %0 : vector<16x1xi32>
      %cst_63 = arith.constant 1.000000e+00 : f32
      %327 = vector.broadcast %cst_63 : f32 to vector<16x128xf32>
      %328 = arith.subf %327, %318 : vector<16x128xf32>
      %329 = arith.mulf %328, %324 : vector<16x128xf32>
      %330 = arith.mulf %318, %303 : vector<16x128xf32>
      %331 = arith.addf %329, %330 : vector<16x128xf32>
      %332 = vector.shape_cast %326 : vector<16x1xi1> to vector<16x1xi1>
      %333 = vector.broadcast %332 : vector<16x1xi1> to vector<16x128xi1>
      %334 = arith.select %333, %331, %303 : vector<16x128xi1>, vector<16x128xf32>
      %c1_i32_64 = arith.constant 1 : i32
      %335 = arith.cmpi sge, %299, %c1_i32_64 : i32
      %c1_i32_65 = arith.constant 1 : i32
      %336 = arith.subi %299, %c1_i32_65 : i32
      %337 = vector.broadcast %336 : i32 to vector<16x1xi32>
      %338 = arith.cmpi slt, %337, %0 : vector<16x1xi32>
      %339 = vector.broadcast %335 : i1 to vector<16x1xi1>
      %340 = arith.andi %339, %338 : vector<16x1xi1>
      %341 = vector.extract_strided_slice %302 {offsets = [0, 384], sizes = [16, 384], strides = [1, 1]} : vector<16x1152xf32> to vector<16x384xf32>
      %342 = arith.addf %341, %3 : vector<16x384xf32>
      %343 = vector.extract_strided_slice %342 {offsets = [0, 0], sizes = [16, 256], strides = [1, 1]} : vector<16x384xf32> to vector<16x256xf32>
      %344 = vector.extract_strided_slice %302 {offsets = [0, 768], sizes = [16, 256], strides = [1, 1]} : vector<16x1152xf32> to vector<16x256xf32>
      %345 = arith.addf %343, %344 : vector<16x256xf32>
      %346 = arith.negf %345 : vector<16x256xf32>
      %347 = math.exp %346 : vector<16x256xf32>
      %cst_66 = arith.constant 1.000000e+00 : f32
      %348 = vector.broadcast %cst_66 : f32 to vector<16x256xf32>
      %349 = arith.addf %348, %347 : vector<16x256xf32>
      %350 = arith.divf %348, %349 : vector<16x256xf32>
      %351 = vector.extract_strided_slice %350 {offsets = [0, 0], sizes = [16, 128], strides = [1, 1]} : vector<16x256xf32> to vector<16x128xf32>
      %352 = vector.extract_strided_slice %350 {offsets = [0, 128], sizes = [16, 128], strides = [1, 1]} : vector<16x256xf32> to vector<16x128xf32>
      %353 = vector.extract_strided_slice %342 {offsets = [0, 256], sizes = [16, 128], strides = [1, 1]} : vector<16x384xf32> to vector<16x128xf32>
      %354 = vector.extract_strided_slice %302 {offsets = [0, 1024], sizes = [16, 128], strides = [1, 1]} : vector<16x1152xf32> to vector<16x128xf32>
      %355 = arith.addf %354, %9 : vector<16x128xf32>
      %356 = arith.mulf %351, %355 : vector<16x128xf32>
      %357 = arith.addf %353, %356 : vector<16x128xf32>
      %358 = math.tanh %357 : vector<16x128xf32>
      %cst_67 = arith.constant 1.000000e+00 : f32
      %359 = vector.broadcast %cst_67 : f32 to vector<16x128xf32>
      %360 = arith.subf %359, %352 : vector<16x128xf32>
      %361 = arith.mulf %360, %358 : vector<16x128xf32>
      %362 = arith.mulf %352, %304 : vector<16x128xf32>
      %363 = arith.addf %361, %362 : vector<16x128xf32>
      %364 = vector.shape_cast %340 : vector<16x1xi1> to vector<16x1xi1>
      %365 = vector.broadcast %364 : vector<16x1xi1> to vector<16x128xi1>
      %366 = arith.select %365, %363, %304 : vector<16x128xi1>, vector<16x128xf32>
      %367 = tpu.concatenate %334, %366 in 1 : vector<16x128xf32>, vector<16x128xf32> -> vector<16x256xf32>
      %c5_i32 = arith.constant 5 : i32
      %368 = arith.addi %13, %c5_i32 : i32
      %369 = arith.truncf %367 : vector<16x256xf32> to vector<16x256xbf16>
      %c0_68 = arith.constant 0 : index
      %c0_69 = arith.constant 0 : index
      %370 = vector.load %arg5[%c0_68, %c0_69] : memref<256x1152xbf16, #tpu.memory_space<vmem>>, vector<256x1152xbf16>
      %cst_70 = arith.constant dense<0.000000e+00> : vector<16x1152xf32>
      %371 = tpu.matmul %369, %370, %cst_70 {dimension_numbers = #tpu.dot_dimension_numbers<[1], [0], [0], [1], [0, 0, 1, 1], [], []>} : vector<16x256xbf16>, vector<256x1152xbf16>, vector<16x1152xf32> -> vector<16x1152xf32>
      %372 = vector.extract_strided_slice %367 {offsets = [0, 0], sizes = [16, 128], strides = [1, 1]} : vector<16x256xf32> to vector<16x128xf32>
      %373 = vector.extract_strided_slice %367 {offsets = [0, 128], sizes = [16, 128], strides = [1, 1]} : vector<16x256xf32> to vector<16x128xf32>
      %374 = arith.index_cast %c5_i32 : i32 to index
      %c0_71 = arith.constant 0 : index
      %c0_72 = arith.constant 0 : index
      %375 = vector.load %arg4[%374, %c0_71, %c0_72] : memref<8x16x384xbf16, #tpu.memory_space<vmem>>, vector<1x16x384xbf16>
      %376 = vector.shape_cast %375 : vector<1x16x384xbf16> to vector<16x384xbf16>
      %377 = arith.extf %376 : vector<16x384xbf16> to vector<16x384xf32>
      %378 = vector.extract_strided_slice %377 {offsets = [0, 0], sizes = [16, 256], strides = [1, 1]} : vector<16x384xf32> to vector<16x256xf32>
      %379 = vector.extract_strided_slice %371 {offsets = [0, 0], sizes = [16, 256], strides = [1, 1]} : vector<16x1152xf32> to vector<16x256xf32>
      %380 = arith.addf %378, %379 : vector<16x256xf32>
      %381 = arith.negf %380 : vector<16x256xf32>
      %382 = math.exp %381 : vector<16x256xf32>
      %cst_73 = arith.constant 1.000000e+00 : f32
      %383 = vector.broadcast %cst_73 : f32 to vector<16x256xf32>
      %384 = arith.addf %383, %382 : vector<16x256xf32>
      %385 = arith.divf %383, %384 : vector<16x256xf32>
      %386 = vector.extract_strided_slice %385 {offsets = [0, 0], sizes = [16, 128], strides = [1, 1]} : vector<16x256xf32> to vector<16x128xf32>
      %387 = vector.extract_strided_slice %385 {offsets = [0, 128], sizes = [16, 128], strides = [1, 1]} : vector<16x256xf32> to vector<16x128xf32>
      %388 = vector.extract_strided_slice %377 {offsets = [0, 256], sizes = [16, 128], strides = [1, 1]} : vector<16x384xf32> to vector<16x128xf32>
      %389 = vector.extract_strided_slice %371 {offsets = [0, 256], sizes = [16, 128], strides = [1, 1]} : vector<16x1152xf32> to vector<16x128xf32>
      %390 = arith.addf %389, %6 : vector<16x128xf32>
      %391 = arith.mulf %386, %390 : vector<16x128xf32>
      %392 = arith.addf %388, %391 : vector<16x128xf32>
      %393 = math.tanh %392 : vector<16x128xf32>
      %394 = vector.broadcast %368 : i32 to vector<16x1xi32>
      %395 = arith.cmpi slt, %394, %0 : vector<16x1xi32>
      %cst_74 = arith.constant 1.000000e+00 : f32
      %396 = vector.broadcast %cst_74 : f32 to vector<16x128xf32>
      %397 = arith.subf %396, %387 : vector<16x128xf32>
      %398 = arith.mulf %397, %393 : vector<16x128xf32>
      %399 = arith.mulf %387, %372 : vector<16x128xf32>
      %400 = arith.addf %398, %399 : vector<16x128xf32>
      %401 = vector.shape_cast %395 : vector<16x1xi1> to vector<16x1xi1>
      %402 = vector.broadcast %401 : vector<16x1xi1> to vector<16x128xi1>
      %403 = arith.select %402, %400, %372 : vector<16x128xi1>, vector<16x128xf32>
      %c1_i32_75 = arith.constant 1 : i32
      %404 = arith.cmpi sge, %368, %c1_i32_75 : i32
      %c1_i32_76 = arith.constant 1 : i32
      %405 = arith.subi %368, %c1_i32_76 : i32
      %406 = vector.broadcast %405 : i32 to vector<16x1xi32>
      %407 = arith.cmpi slt, %406, %0 : vector<16x1xi32>
      %408 = vector.broadcast %404 : i1 to vector<16x1xi1>
      %409 = arith.andi %408, %407 : vector<16x1xi1>
      %410 = vector.extract_strided_slice %371 {offsets = [0, 384], sizes = [16, 384], strides = [1, 1]} : vector<16x1152xf32> to vector<16x384xf32>
      %411 = arith.addf %410, %3 : vector<16x384xf32>
      %412 = vector.extract_strided_slice %411 {offsets = [0, 0], sizes = [16, 256], strides = [1, 1]} : vector<16x384xf32> to vector<16x256xf32>
      %413 = vector.extract_strided_slice %371 {offsets = [0, 768], sizes = [16, 256], strides = [1, 1]} : vector<16x1152xf32> to vector<16x256xf32>
      %414 = arith.addf %412, %413 : vector<16x256xf32>
      %415 = arith.negf %414 : vector<16x256xf32>
      %416 = math.exp %415 : vector<16x256xf32>
      %cst_77 = arith.constant 1.000000e+00 : f32
      %417 = vector.broadcast %cst_77 : f32 to vector<16x256xf32>
      %418 = arith.addf %417, %416 : vector<16x256xf32>
      %419 = arith.divf %417, %418 : vector<16x256xf32>
      %420 = vector.extract_strided_slice %419 {offsets = [0, 0], sizes = [16, 128], strides = [1, 1]} : vector<16x256xf32> to vector<16x128xf32>
      %421 = vector.extract_strided_slice %419 {offsets = [0, 128], sizes = [16, 128], strides = [1, 1]} : vector<16x256xf32> to vector<16x128xf32>
      %422 = vector.extract_strided_slice %411 {offsets = [0, 256], sizes = [16, 128], strides = [1, 1]} : vector<16x384xf32> to vector<16x128xf32>
      %423 = vector.extract_strided_slice %371 {offsets = [0, 1024], sizes = [16, 128], strides = [1, 1]} : vector<16x1152xf32> to vector<16x128xf32>
      %424 = arith.addf %423, %9 : vector<16x128xf32>
      %425 = arith.mulf %420, %424 : vector<16x128xf32>
      %426 = arith.addf %422, %425 : vector<16x128xf32>
      %427 = math.tanh %426 : vector<16x128xf32>
      %cst_78 = arith.constant 1.000000e+00 : f32
      %428 = vector.broadcast %cst_78 : f32 to vector<16x128xf32>
      %429 = arith.subf %428, %421 : vector<16x128xf32>
      %430 = arith.mulf %429, %427 : vector<16x128xf32>
      %431 = arith.mulf %421, %373 : vector<16x128xf32>
      %432 = arith.addf %430, %431 : vector<16x128xf32>
      %433 = vector.shape_cast %409 : vector<16x1xi1> to vector<16x1xi1>
      %434 = vector.broadcast %433 : vector<16x1xi1> to vector<16x128xi1>
      %435 = arith.select %434, %432, %373 : vector<16x128xi1>, vector<16x128xf32>
      %436 = tpu.concatenate %403, %435 in 1 : vector<16x128xf32>, vector<16x128xf32> -> vector<16x256xf32>
      %c6_i32 = arith.constant 6 : i32
      %437 = arith.addi %13, %c6_i32 : i32
      %438 = arith.truncf %436 : vector<16x256xf32> to vector<16x256xbf16>
      %c0_79 = arith.constant 0 : index
      %c0_80 = arith.constant 0 : index
      %439 = vector.load %arg5[%c0_79, %c0_80] : memref<256x1152xbf16, #tpu.memory_space<vmem>>, vector<256x1152xbf16>
      %cst_81 = arith.constant dense<0.000000e+00> : vector<16x1152xf32>
      %440 = tpu.matmul %438, %439, %cst_81 {dimension_numbers = #tpu.dot_dimension_numbers<[1], [0], [0], [1], [0, 0, 1, 1], [], []>} : vector<16x256xbf16>, vector<256x1152xbf16>, vector<16x1152xf32> -> vector<16x1152xf32>
      %441 = vector.extract_strided_slice %436 {offsets = [0, 0], sizes = [16, 128], strides = [1, 1]} : vector<16x256xf32> to vector<16x128xf32>
      %442 = vector.extract_strided_slice %436 {offsets = [0, 128], sizes = [16, 128], strides = [1, 1]} : vector<16x256xf32> to vector<16x128xf32>
      %443 = arith.index_cast %c6_i32 : i32 to index
      %c0_82 = arith.constant 0 : index
      %c0_83 = arith.constant 0 : index
      %444 = vector.load %arg4[%443, %c0_82, %c0_83] : memref<8x16x384xbf16, #tpu.memory_space<vmem>>, vector<1x16x384xbf16>
      %445 = vector.shape_cast %444 : vector<1x16x384xbf16> to vector<16x384xbf16>
      %446 = arith.extf %445 : vector<16x384xbf16> to vector<16x384xf32>
      %447 = vector.extract_strided_slice %446 {offsets = [0, 0], sizes = [16, 256], strides = [1, 1]} : vector<16x384xf32> to vector<16x256xf32>
      %448 = vector.extract_strided_slice %440 {offsets = [0, 0], sizes = [16, 256], strides = [1, 1]} : vector<16x1152xf32> to vector<16x256xf32>
      %449 = arith.addf %447, %448 : vector<16x256xf32>
      %450 = arith.negf %449 : vector<16x256xf32>
      %451 = math.exp %450 : vector<16x256xf32>
      %cst_84 = arith.constant 1.000000e+00 : f32
      %452 = vector.broadcast %cst_84 : f32 to vector<16x256xf32>
      %453 = arith.addf %452, %451 : vector<16x256xf32>
      %454 = arith.divf %452, %453 : vector<16x256xf32>
      %455 = vector.extract_strided_slice %454 {offsets = [0, 0], sizes = [16, 128], strides = [1, 1]} : vector<16x256xf32> to vector<16x128xf32>
      %456 = vector.extract_strided_slice %454 {offsets = [0, 128], sizes = [16, 128], strides = [1, 1]} : vector<16x256xf32> to vector<16x128xf32>
      %457 = vector.extract_strided_slice %446 {offsets = [0, 256], sizes = [16, 128], strides = [1, 1]} : vector<16x384xf32> to vector<16x128xf32>
      %458 = vector.extract_strided_slice %440 {offsets = [0, 256], sizes = [16, 128], strides = [1, 1]} : vector<16x1152xf32> to vector<16x128xf32>
      %459 = arith.addf %458, %6 : vector<16x128xf32>
      %460 = arith.mulf %455, %459 : vector<16x128xf32>
      %461 = arith.addf %457, %460 : vector<16x128xf32>
      %462 = math.tanh %461 : vector<16x128xf32>
      %463 = vector.broadcast %437 : i32 to vector<16x1xi32>
      %464 = arith.cmpi slt, %463, %0 : vector<16x1xi32>
      %cst_85 = arith.constant 1.000000e+00 : f32
      %465 = vector.broadcast %cst_85 : f32 to vector<16x128xf32>
      %466 = arith.subf %465, %456 : vector<16x128xf32>
      %467 = arith.mulf %466, %462 : vector<16x128xf32>
      %468 = arith.mulf %456, %441 : vector<16x128xf32>
      %469 = arith.addf %467, %468 : vector<16x128xf32>
      %470 = vector.shape_cast %464 : vector<16x1xi1> to vector<16x1xi1>
      %471 = vector.broadcast %470 : vector<16x1xi1> to vector<16x128xi1>
      %472 = arith.select %471, %469, %441 : vector<16x128xi1>, vector<16x128xf32>
      %c1_i32_86 = arith.constant 1 : i32
      %473 = arith.cmpi sge, %437, %c1_i32_86 : i32
      %c1_i32_87 = arith.constant 1 : i32
      %474 = arith.subi %437, %c1_i32_87 : i32
      %475 = vector.broadcast %474 : i32 to vector<16x1xi32>
      %476 = arith.cmpi slt, %475, %0 : vector<16x1xi32>
      %477 = vector.broadcast %473 : i1 to vector<16x1xi1>
      %478 = arith.andi %477, %476 : vector<16x1xi1>
      %479 = vector.extract_strided_slice %440 {offsets = [0, 384], sizes = [16, 384], strides = [1, 1]} : vector<16x1152xf32> to vector<16x384xf32>
      %480 = arith.addf %479, %3 : vector<16x384xf32>
      %481 = vector.extract_strided_slice %480 {offsets = [0, 0], sizes = [16, 256], strides = [1, 1]} : vector<16x384xf32> to vector<16x256xf32>
      %482 = vector.extract_strided_slice %440 {offsets = [0, 768], sizes = [16, 256], strides = [1, 1]} : vector<16x1152xf32> to vector<16x256xf32>
      %483 = arith.addf %481, %482 : vector<16x256xf32>
      %484 = arith.negf %483 : vector<16x256xf32>
      %485 = math.exp %484 : vector<16x256xf32>
      %cst_88 = arith.constant 1.000000e+00 : f32
      %486 = vector.broadcast %cst_88 : f32 to vector<16x256xf32>
      %487 = arith.addf %486, %485 : vector<16x256xf32>
      %488 = arith.divf %486, %487 : vector<16x256xf32>
      %489 = vector.extract_strided_slice %488 {offsets = [0, 0], sizes = [16, 128], strides = [1, 1]} : vector<16x256xf32> to vector<16x128xf32>
      %490 = vector.extract_strided_slice %488 {offsets = [0, 128], sizes = [16, 128], strides = [1, 1]} : vector<16x256xf32> to vector<16x128xf32>
      %491 = vector.extract_strided_slice %480 {offsets = [0, 256], sizes = [16, 128], strides = [1, 1]} : vector<16x384xf32> to vector<16x128xf32>
      %492 = vector.extract_strided_slice %440 {offsets = [0, 1024], sizes = [16, 128], strides = [1, 1]} : vector<16x1152xf32> to vector<16x128xf32>
      %493 = arith.addf %492, %9 : vector<16x128xf32>
      %494 = arith.mulf %489, %493 : vector<16x128xf32>
      %495 = arith.addf %491, %494 : vector<16x128xf32>
      %496 = math.tanh %495 : vector<16x128xf32>
      %cst_89 = arith.constant 1.000000e+00 : f32
      %497 = vector.broadcast %cst_89 : f32 to vector<16x128xf32>
      %498 = arith.subf %497, %490 : vector<16x128xf32>
      %499 = arith.mulf %498, %496 : vector<16x128xf32>
      %500 = arith.mulf %490, %442 : vector<16x128xf32>
      %501 = arith.addf %499, %500 : vector<16x128xf32>
      %502 = vector.shape_cast %478 : vector<16x1xi1> to vector<16x1xi1>
      %503 = vector.broadcast %502 : vector<16x1xi1> to vector<16x128xi1>
      %504 = arith.select %503, %501, %442 : vector<16x128xi1>, vector<16x128xf32>
      %505 = tpu.concatenate %472, %504 in 1 : vector<16x128xf32>, vector<16x128xf32> -> vector<16x256xf32>
      %c7_i32 = arith.constant 7 : i32
      %506 = arith.addi %13, %c7_i32 : i32
      %507 = arith.truncf %505 : vector<16x256xf32> to vector<16x256xbf16>
      %c0_90 = arith.constant 0 : index
      %c0_91 = arith.constant 0 : index
      %508 = vector.load %arg5[%c0_90, %c0_91] : memref<256x1152xbf16, #tpu.memory_space<vmem>>, vector<256x1152xbf16>
      %cst_92 = arith.constant dense<0.000000e+00> : vector<16x1152xf32>
      %509 = tpu.matmul %507, %508, %cst_92 {dimension_numbers = #tpu.dot_dimension_numbers<[1], [0], [0], [1], [0, 0, 1, 1], [], []>} : vector<16x256xbf16>, vector<256x1152xbf16>, vector<16x1152xf32> -> vector<16x1152xf32>
      %510 = vector.extract_strided_slice %505 {offsets = [0, 0], sizes = [16, 128], strides = [1, 1]} : vector<16x256xf32> to vector<16x128xf32>
      %511 = vector.extract_strided_slice %505 {offsets = [0, 128], sizes = [16, 128], strides = [1, 1]} : vector<16x256xf32> to vector<16x128xf32>
      %512 = arith.index_cast %c7_i32 : i32 to index
      %c0_93 = arith.constant 0 : index
      %c0_94 = arith.constant 0 : index
      %513 = vector.load %arg4[%512, %c0_93, %c0_94] : memref<8x16x384xbf16, #tpu.memory_space<vmem>>, vector<1x16x384xbf16>
      %514 = vector.shape_cast %513 : vector<1x16x384xbf16> to vector<16x384xbf16>
      %515 = arith.extf %514 : vector<16x384xbf16> to vector<16x384xf32>
      %516 = vector.extract_strided_slice %515 {offsets = [0, 0], sizes = [16, 256], strides = [1, 1]} : vector<16x384xf32> to vector<16x256xf32>
      %517 = vector.extract_strided_slice %509 {offsets = [0, 0], sizes = [16, 256], strides = [1, 1]} : vector<16x1152xf32> to vector<16x256xf32>
      %518 = arith.addf %516, %517 : vector<16x256xf32>
      %519 = arith.negf %518 : vector<16x256xf32>
      %520 = math.exp %519 : vector<16x256xf32>
      %cst_95 = arith.constant 1.000000e+00 : f32
      %521 = vector.broadcast %cst_95 : f32 to vector<16x256xf32>
      %522 = arith.addf %521, %520 : vector<16x256xf32>
      %523 = arith.divf %521, %522 : vector<16x256xf32>
      %524 = vector.extract_strided_slice %523 {offsets = [0, 0], sizes = [16, 128], strides = [1, 1]} : vector<16x256xf32> to vector<16x128xf32>
      %525 = vector.extract_strided_slice %523 {offsets = [0, 128], sizes = [16, 128], strides = [1, 1]} : vector<16x256xf32> to vector<16x128xf32>
      %526 = vector.extract_strided_slice %515 {offsets = [0, 256], sizes = [16, 128], strides = [1, 1]} : vector<16x384xf32> to vector<16x128xf32>
      %527 = vector.extract_strided_slice %509 {offsets = [0, 256], sizes = [16, 128], strides = [1, 1]} : vector<16x1152xf32> to vector<16x128xf32>
      %528 = arith.addf %527, %6 : vector<16x128xf32>
      %529 = arith.mulf %524, %528 : vector<16x128xf32>
      %530 = arith.addf %526, %529 : vector<16x128xf32>
      %531 = math.tanh %530 : vector<16x128xf32>
      %532 = vector.broadcast %506 : i32 to vector<16x1xi32>
      %533 = arith.cmpi slt, %532, %0 : vector<16x1xi32>
      %cst_96 = arith.constant 1.000000e+00 : f32
      %534 = vector.broadcast %cst_96 : f32 to vector<16x128xf32>
      %535 = arith.subf %534, %525 : vector<16x128xf32>
      %536 = arith.mulf %535, %531 : vector<16x128xf32>
      %537 = arith.mulf %525, %510 : vector<16x128xf32>
      %538 = arith.addf %536, %537 : vector<16x128xf32>
      %539 = vector.shape_cast %533 : vector<16x1xi1> to vector<16x1xi1>
      %540 = vector.broadcast %539 : vector<16x1xi1> to vector<16x128xi1>
      %541 = arith.select %540, %538, %510 : vector<16x128xi1>, vector<16x128xf32>
      %c1_i32_97 = arith.constant 1 : i32
      %542 = arith.cmpi sge, %506, %c1_i32_97 : i32
      %c1_i32_98 = arith.constant 1 : i32
      %543 = arith.subi %506, %c1_i32_98 : i32
      %544 = vector.broadcast %543 : i32 to vector<16x1xi32>
      %545 = arith.cmpi slt, %544, %0 : vector<16x1xi32>
      %546 = vector.broadcast %542 : i1 to vector<16x1xi1>
      %547 = arith.andi %546, %545 : vector<16x1xi1>
      %548 = vector.extract_strided_slice %509 {offsets = [0, 384], sizes = [16, 384], strides = [1, 1]} : vector<16x1152xf32> to vector<16x384xf32>
      %549 = arith.addf %548, %3 : vector<16x384xf32>
      %550 = vector.extract_strided_slice %549 {offsets = [0, 0], sizes = [16, 256], strides = [1, 1]} : vector<16x384xf32> to vector<16x256xf32>
      %551 = vector.extract_strided_slice %509 {offsets = [0, 768], sizes = [16, 256], strides = [1, 1]} : vector<16x1152xf32> to vector<16x256xf32>
      %552 = arith.addf %550, %551 : vector<16x256xf32>
      %553 = arith.negf %552 : vector<16x256xf32>
      %554 = math.exp %553 : vector<16x256xf32>
      %cst_99 = arith.constant 1.000000e+00 : f32
      %555 = vector.broadcast %cst_99 : f32 to vector<16x256xf32>
      %556 = arith.addf %555, %554 : vector<16x256xf32>
      %557 = arith.divf %555, %556 : vector<16x256xf32>
      %558 = vector.extract_strided_slice %557 {offsets = [0, 0], sizes = [16, 128], strides = [1, 1]} : vector<16x256xf32> to vector<16x128xf32>
      %559 = vector.extract_strided_slice %557 {offsets = [0, 128], sizes = [16, 128], strides = [1, 1]} : vector<16x256xf32> to vector<16x128xf32>
      %560 = vector.extract_strided_slice %549 {offsets = [0, 256], sizes = [16, 128], strides = [1, 1]} : vector<16x384xf32> to vector<16x128xf32>
      %561 = vector.extract_strided_slice %509 {offsets = [0, 1024], sizes = [16, 128], strides = [1, 1]} : vector<16x1152xf32> to vector<16x128xf32>
      %562 = arith.addf %561, %9 : vector<16x128xf32>
      %563 = arith.mulf %558, %562 : vector<16x128xf32>
      %564 = arith.addf %560, %563 : vector<16x128xf32>
      %565 = math.tanh %564 : vector<16x128xf32>
      %cst_100 = arith.constant 1.000000e+00 : f32
      %566 = vector.broadcast %cst_100 : f32 to vector<16x128xf32>
      %567 = arith.subf %566, %559 : vector<16x128xf32>
      %568 = arith.mulf %567, %565 : vector<16x128xf32>
      %569 = arith.mulf %559, %511 : vector<16x128xf32>
      %570 = arith.addf %568, %569 : vector<16x128xf32>
      %571 = vector.shape_cast %547 : vector<16x1xi1> to vector<16x1xi1>
      %572 = vector.broadcast %571 : vector<16x1xi1> to vector<16x128xi1>
      %573 = arith.select %572, %570, %511 : vector<16x128xi1>, vector<16x128xf32>
      %574 = tpu.concatenate %541, %573 in 1 : vector<16x128xf32>, vector<16x128xf32> -> vector<16x256xf32>
      %c8_i32_101 = arith.constant 8 : i32
      %c0_102 = arith.constant 0 : index
      %c0_103 = arith.constant 0 : index
      %575 = vector.load %arg12[%c0_102, %c0_103] : memref<16x256xf32, #tpu.memory_space<vmem>>, vector<16x256xf32>
      tpu.vector_store %arg12[%c0_102, %c0_103], %574 {strides = array<i32>} : memref<16x256xf32, #tpu.memory_space<vmem>>, vector<16x256xf32>,
    } else {
    }
    %c0_i32_9 = arith.constant 0 : i32
    %19 = arith.cmpi eq, %arg1, %c0_i32_9 : i32
    %20 = arith.extui %19 : i1 to i32
    %c0_i32_10 = arith.constant 0 : i32
    %21 = arith.cmpi ne, %20, %c0_i32_10 : i32
    scf.if %21 {
      %c0_11 = arith.constant 0 : index
      %c0_12 = arith.constant 0 : index
      %22 = vector.load %arg12[%c0_11, %c0_12] : memref<16x256xf32, #tpu.memory_space<vmem>>, vector<16x256xf32>
      %23 = arith.truncf %22 : vector<16x256xf32> to vector<16x256xbf16>
      %c0_13 = arith.constant 0 : index
      %c0_14 = arith.constant 0 : index
      %24 = vector.load %arg5[%c0_13, %c0_14] : memref<256x1152xbf16, #tpu.memory_space<vmem>>, vector<256x1152xbf16>
      %cst = arith.constant dense<0.000000e+00> : vector<16x1152xf32>
      %25 = tpu.matmul %23, %24, %cst {dimension_numbers = #tpu.dot_dimension_numbers<[1], [0], [0], [1], [0, 0, 1, 1], [], []>} : vector<16x256xbf16>, vector<256x1152xbf16>, vector<16x1152xf32> -> vector<16x1152xf32>
      %26 = vector.extract_strided_slice %22 {offsets = [0, 128], sizes = [16, 128], strides = [1, 1]} : vector<16x256xf32> to vector<16x128xf32>
      %c7_i32 = arith.constant 7 : i32
      %27 = vector.broadcast %c7_i32 : i32 to vector<16x1xi32>
      %28 = arith.cmpi sgt, %0, %27 : vector<16x1xi32>
      %29 = vector.extract_strided_slice %25 {offsets = [0, 384], sizes = [16, 384], strides = [1, 1]} : vector<16x1152xf32> to vector<16x384xf32>
      %30 = arith.addf %29, %3 : vector<16x384xf32>
      %31 = vector.extract_strided_slice %30 {offsets = [0, 0], sizes = [16, 256], strides = [1, 1]} : vector<16x384xf32> to vector<16x256xf32>
      %32 = vector.extract_strided_slice %25 {offsets = [0, 768], sizes = [16, 256], strides = [1, 1]} : vector<16x1152xf32> to vector<16x256xf32>
      %33 = arith.addf %31, %32 : vector<16x256xf32>
      %34 = arith.negf %33 : vector<16x256xf32>
      %35 = math.exp %34 : vector<16x256xf32>
      %cst_15 = arith.constant 1.000000e+00 : f32
      %36 = vector.broadcast %cst_15 : f32 to vector<16x256xf32>
      %37 = arith.addf %36, %35 : vector<16x256xf32>
      %38 = arith.divf %36, %37 : vector<16x256xf32>
      %39 = vector.extract_strided_slice %38 {offsets = [0, 0], sizes = [16, 128], strides = [1, 1]} : vector<16x256xf32> to vector<16x128xf32>
      %40 = vector.extract_strided_slice %38 {offsets = [0, 128], sizes = [16, 128], strides = [1, 1]} : vector<16x256xf32> to vector<16x128xf32>
      %41 = vector.extract_strided_slice %30 {offsets = [0, 256], sizes = [16, 128], strides = [1, 1]} : vector<16x384xf32> to vector<16x128xf32>
      %42 = vector.extract_strided_slice %25 {offsets = [0, 1024], sizes = [16, 128], strides = [1, 1]} : vector<16x1152xf32> to vector<16x128xf32>
      %43 = arith.addf %42, %9 : vector<16x128xf32>
      %44 = arith.mulf %39, %43 : vector<16x128xf32>
      %45 = arith.addf %41, %44 : vector<16x128xf32>
      %46 = math.tanh %45 : vector<16x128xf32>
      %cst_16 = arith.constant 1.000000e+00 : f32
      %47 = vector.broadcast %cst_16 : f32 to vector<16x128xf32>
      %48 = arith.subf %47, %40 : vector<16x128xf32>
      %49 = arith.mulf %48, %46 : vector<16x128xf32>
      %50 = arith.mulf %40, %26 : vector<16x128xf32>
      %51 = arith.addf %49, %50 : vector<16x128xf32>
      %52 = vector.shape_cast %28 : vector<16x1xi1> to vector<16x1xi1>
      %53 = vector.broadcast %52 : vector<16x1xi1> to vector<16x128xi1>
      %54 = arith.select %53, %51, %26 : vector<16x128xi1>, vector<16x128xf32>
      %55 = arith.truncf %54 : vector<16x128xf32> to vector<16x128xbf16>
      %c0_17 = arith.constant 0 : index
      %c0_18 = arith.constant 0 : index
      %56 = vector.load %arg9[%c0_17, %c0_18] : memref<128x256xbf16, #tpu.memory_space<vmem>>, vector<128x256xbf16>
      %cst_19 = arith.constant dense<0.000000e+00> : vector<16x256xf32>
      %57 = tpu.matmul %55, %56, %cst_19 {dimension_numbers = #tpu.dot_dimension_numbers<[1], [0], [0], [1], [0, 0, 1, 1], [], []>} : vector<16x128xbf16>, vector<128x256xbf16>, vector<16x256xf32> -> vector<16x256xf32>
      %c0_20 = arith.constant 0 : index
      %c0_21 = arith.constant 0 : index
      %58 = vector.load %arg10[%c0_20, %c0_21] : memref<1x256xf32, #tpu.memory_space<vmem>>, vector<1x256xf32>
      %59 = vector.broadcast %58 : vector<1x256xf32> to vector<16x256xf32>
      %60 = arith.addf %57, %59 : vector<16x256xf32>
      %61 = vector.extract_strided_slice %60 {offsets = [0, 0], sizes = [16, 128], strides = [1, 1]} : vector<16x256xf32> to vector<16x128xf32>
      %62 = vector.extract_strided_slice %60 {offsets = [0, 128], sizes = [16, 128], strides = [1, 1]} : vector<16x256xf32> to vector<16x128xf32>
      %cst_22 = arith.constant -1.000000e+01 : f32
      %cst_23 = arith.constant 1.000000e+01 : f32
      %63 = vector.broadcast %cst_22 : f32 to vector<16x128xf32>
      %64 = arith.maximumf %63, %62 : vector<16x128xf32>
      %65 = vector.broadcast %cst_23 : f32 to vector<16x128xf32>
      %66 = arith.minimumf %65, %64 : vector<16x128xf32>
      %67 = tpu.concatenate %61, %66 in 1 : vector<16x128xf32>, vector<16x128xf32> -> vector<16x256xf32>
      %c0_24 = arith.constant 0 : index
      %c0_25 = arith.constant 0 : index
      %68 = vector.load %arg11[%c0_24, %c0_25] : memref<16x256xf32, #tpu.memory_space<vmem>>, vector<16x256xf32>
      tpu.vector_store %arg11[%c0_24, %c0_25], %67 {strides = array<i32>} : memref<16x256xf32, #tpu.memory_space<vmem>>, vector<16x256xf32>,
    } else {
    }
    return
  }
  func.func @transform_0(%arg0: i32, %arg1: i32, %arg2: memref<1xi32, #tpu.memory_space<smem>>) -> (i32, i32) {
    %c0_i32 = arith.constant 0 : i32
    %c0_i32_0 = arith.constant 0 : i32
    return %arg0, %c0_i32 : i32, i32
  }
  func.func @transform_1(%arg0: i32, %arg1: i32, %arg2: memref<1xi32, #tpu.memory_space<smem>>) -> (i32, i32, i32) {
    %c0_i32 = arith.constant 0 : i32
    %c0_i32_0 = arith.constant 0 : i32
    return %arg1, %arg0, %c0_i32 : i32, i32, i32
  }
  func.func @transform_2(%arg0: i32, %arg1: i32, %arg2: memref<1xi32, #tpu.memory_space<smem>>) -> (i32, i32) {
    %c0_i32 = arith.constant 0 : i32
    %c0_i32_0 = arith.constant 0 : i32
    %c0_i32_1 = arith.constant 0 : i32
    return %c0_i32, %c0_i32_0 : i32, i32
  }
  func.func @transform_3(%arg0: i32, %arg1: i32, %arg2: memref<1xi32, #tpu.memory_space<smem>>) -> (i32, i32) {
    %c0_i32 = arith.constant 0 : i32
    %c0_i32_0 = arith.constant 0 : i32
    %c0_i32_1 = arith.constant 0 : i32
    return %c0_i32, %c0_i32_0 : i32, i32
  }
  func.func @transform_4(%arg0: i32, %arg1: i32, %arg2: memref<1xi32, #tpu.memory_space<smem>>) -> (i32, i32) {
    %c0_i32 = arith.constant 0 : i32
    %c0_i32_0 = arith.constant 0 : i32
    %c0_i32_1 = arith.constant 0 : i32
    return %c0_i32, %c0_i32_0 : i32, i32
  }
  func.func @transform_5(%arg0: i32, %arg1: i32, %arg2: memref<1xi32, #tpu.memory_space<smem>>) -> (i32, i32) {
    %c0_i32 = arith.constant 0 : i32
    %c0_i32_0 = arith.constant 0 : i32
    %c0_i32_1 = arith.constant 0 : i32
    return %c0_i32, %c0_i32_0 : i32, i32
  }
  func.func @transform_6(%arg0: i32, %arg1: i32, %arg2: memref<1xi32, #tpu.memory_space<smem>>) -> (i32, i32) {
    %c0_i32 = arith.constant 0 : i32
    %c0_i32_0 = arith.constant 0 : i32
    %c0_i32_1 = arith.constant 0 : i32
    return %c0_i32, %c0_i32_0 : i32, i32
  }
  func.func @transform_7(%arg0: i32, %arg1: i32, %arg2: memref<1xi32, #tpu.memory_space<smem>>) -> (i32, i32) {
    %c0_i32 = arith.constant 0 : i32
    %c0_i32_0 = arith.constant 0 : i32
    %c0_i32_1 = arith.constant 0 : i32
    return %c0_i32, %c0_i32_0 : i32, i32
  }
  func.func @transform_8(%arg0: i32, %arg1: i32, %arg2: memref<1xi32, #tpu.memory_space<smem>>) -> (i32, i32) {
    %c0_i32 = arith.constant 0 : i32
    %c0_i32_0 = arith.constant 0 : i32
    return %arg0, %c0_i32 : i32, i32
  }
}

</mosaic_0001>

<bundles_post_ra>
// kernel: tpu_custom_call.1
= control target key start
LH: loop header
LB: loop body
LE: loop exit
PB: predicated region body
PF: predicated region fallthrough
CT: control target
= control target key end

     0   :  { %15 = vsyncpa [#allocation6], 0  ;;  %s9960_s0 = inlined_call_operand.<no memory space> [shape: s32[1], index: 0, kind: input, shape index: {}]   ;;  %s9961_s1 = inlined_call_operand.hbm [shape: s32[16,1], index: 1, kind: input, shape index: {}]   ;;  %s9962_s2 = inlined_call_operand.hbm [shape: bf16[8,16,384], index: 2, kind: input, shape index: {}]   ;;  %s9963_s3 = inlined_call_operand.hbm [shape: bf16[256,1152], index: 3, kind: input, shape index: {}]   ;;  %s9964_s4 = inlined_call_operand.hbm [shape: f32[1,384], index: 4, kind: input, shape index: {}]   ;;  %s9965_s5 = inlined_call_operand.hbm [shape: f32[1,128], index: 5, kind: input, shape index: {}]   ;;  %s9966_s6 = inlined_call_operand.hbm [shape: f32[1,128], index: 6, kind: input, shape index: {}]   ;;  %s9967_s7 = inlined_call_operand.hbm [shape: bf16[128,256], index: 7, kind: input, shape index: {}]   ;;  %s9968_s8 = inlined_call_operand.hbm [shape: f32[1,256], index: 8, kind: input, shape index: {}]   ;;  %s9969_s9 = inlined_call_operand.hbm [shape: f32[16,256], index: 9, kind: output, shape index: {}]  }
   0x1   :  { %16 = vsyncpa [#allocation9], 0 }
   0x2   :  { %17 = vsyncpa [#allocation12], 0 }
   0x3   :  { %18 = vsyncpa [#allocation15], 0 }
   0x4   :  { %19 = vsyncpa [#allocation18], 0 }
   0x5   :  { %20 = vsyncpa [#allocation7], 0  ;;  %s7019_s30 = smov [#allocation8]   ;;  %s6809_s13 = scalar_lea.hbm %s9962_s2, 3072 }
   0x6   :  { %s38_s10 = sshll.u32 %s7019_s30, 4  ;;  %p6810_p0 = scmp.ne.s32.totalorder %s9962_s2, %s6809_s13  ;;  %s39_s10 = int_to_ptr.vmem [resolvable:$true] %s38_s10 }
   0x7   :  { %p6813_p1 = scmp.lt.u32.totalorder %s6809_s13, %s9962_s2 }
   0x9   :  { %p6815_p2 = pnand %p6813_p1, %p6810_p0 }
   0xb   :  { %6818 = shalt.err (!%p6815_p2)
}
   0xc   :  { %s6819_s18 = scalar_lea.vmem %s39_s10, 3072  ;;  %p6824_p4 = scmp.lt.s32.totalorder %s39_s10, %s39_s10 }
   0xd   :  { %p6820_p3 = scmp.ne.s32.totalorder %s39_s10, %s6819_s18  ;;  %p6825_p5 = scmp.lt.s32.totalorder %s6819_s18, %s6819_s18 }
   0xf   :  { %p6826_p6 = por %p6825_p5, %p6824_p4 }
  0x11   :  { %p6827_p7 = pnand %p6826_p6, %p6820_p3 }
  0x13   :  { %6830 = shalt.err (!%p6827_p7)
}
  0x14   :  { %s7020_s19 = smov 192   ;;  %s7021_s20 = smov 12  }
  0x15   :  { %44 = dma.hbm_to_vmem [thread:$0]  %s9962_s2, 3072, %s39_s10, [#allocation9], %s7020_s19, %s7020_s19, %s7021_s20  }
  0x16   :  { %s7022_s23 = smov [#allocation11]   ;;  %s7023_s25 = smov [#allocation14]  }
  0x17   :  { %s63_s24 = sshll.u32 %s7022_s23, 4  ;;  %s83_s26 = sshll.u32 %s7023_s25, 4  ;;  %s64_s24 = int_to_ptr.vmem [resolvable:$true] %s63_s24  ;;  %s84_s26 = int_to_ptr.vmem [resolvable:$true] %s83_s26 }
  0x18   :  { %s6831_s29 = scalar_lea.hbm %s9964_s4, 48 }
  0x19   :  { %p6832_p8 = scmp.ne.s32.totalorder %s9964_s4, %s6831_s29  ;;  %p6835_p9 = scmp.lt.u32.totalorder %s6831_s29, %s9964_s4 }
  0x1b   :  { %p6837_p10 = pnand %p6835_p9, %p6832_p8 }
  0x1d   :  { %6840 = shalt.err (!%p6837_p10)
}
  0x1e   :  { %s6841_s2 = scalar_lea.vmem %s64_s24, 48  ;;  %s6845_s10 = scalar_lea.vmem %s64_s24, 64 }
  0x1f   :  { %p6842_p11 = scmp.ne.s32.totalorder %s64_s24, %s6841_s2  ;;  %p6846_p12 = scmp.lt.s32.totalorder %s64_s24, %s64_s24 }
  0x20   :  { %p6847_p13 = scmp.lt.s32.totalorder %s6845_s10, %s6841_s2 }
  0x22   :  { %p6848_p0 = por %p6847_p13, %p6846_p12 }
  0x24   :  { %p6849_p1 = pnand %p6848_p0, %p6842_p11 }
  0x26   :  { %6852 = shalt.err (!%p6849_p1)
}
  0x27   :  { %66 = dma.hbm_to_vmem [thread:$0]  %s9964_s4, 48, %s64_s24, [#allocation12]  }
  0x28   :  { %s6853_s18 = scalar_lea.hbm %s9966_s6, 16 }
  0x29   :  { %p6854_p2 = scmp.ne.s32.totalorder %s9966_s6, %s6853_s18  ;;  %p6857_p3 = scmp.lt.u32.totalorder %s6853_s18, %s9966_s6 }
  0x2b   :  { %p6859_p4 = pnand %p6857_p3, %p6854_p2 }
  0x2d   :  { %6862 = shalt.err (!%p6859_p4)
}
  0x2e   :  { %s6863_s23 = scalar_lea.vmem %s84_s26, 16  ;;  %s6867_s25 = scalar_lea.vmem %s84_s26, 32 }
  0x2f   :  { %p6864_p5 = scmp.ne.s32.totalorder %s84_s26, %s6863_s23  ;;  %p6868_p6 = scmp.lt.s32.totalorder %s84_s26, %s84_s26 }
  0x30   :  { %p6869_p7 = scmp.lt.s32.totalorder %s6867_s25, %s6863_s23 }
  0x32   :  { %p6870_p8 = por %p6869_p7, %p6868_p6 }
  0x34   :  { %p6871_p9 = pnand %p6870_p8, %p6864_p5 }
  0x36   :  { %6874 = shalt.err (!%p6871_p9)
}
  0x37   :  { %86 = dma.hbm_to_vmem [thread:$0]  %s9966_s6, 16, %s84_s26, [#allocation15]  }
  0x38   :  { %s7024_s27 = smov [#allocation5]   ;;  %s6875_s11 = scalar_lea.hbm %s9961_s1, 256 }
  0x39   :  { %s26_s28 = sshll.u32 %s7024_s27, 4  ;;  %p6876_p10 = scmp.ne.s32.totalorder %s9961_s1, %s6875_s11  ;;  %s27_s28 = int_to_ptr.vmem [resolvable:$true] %s26_s28 }
  0x3a   :  { %p6879_p11 = scmp.lt.u32.totalorder %s6875_s11, %s9961_s1 }
  0x3c   :  { %p6881_p12 = pnand %p6879_p11, %p6876_p10 }
  0x3e   :  { %6884 = shalt.err (!%p6881_p12)
}
  0x3f   :  { %s6885_s14 = scalar_lea.vmem %s27_s28, 256  ;;  %p6890_p0 = scmp.lt.s32.totalorder %s27_s28, %s27_s28 }
  0x40   :  { %p6886_p13 = scmp.ne.s32.totalorder %s27_s28, %s6885_s14  ;;  %p6891_p1 = scmp.lt.s32.totalorder %s6885_s14, %s6885_s14 }
  0x42   :  { %p6892_p2 = por %p6891_p1, %p6890_p0 }
  0x44   :  { %p6893_p3 = pnand %p6892_p2, %p6886_p13 }
  0x46   :  { %6896 = shalt.err (!%p6893_p3)
}
  0x47   :  { %s7025_s6 = smov 128   ;;  %s7026_s26 = smov 8  }
  0x48   :  { %32 = dma.hbm_to_vmem [thread:$0]  %s9961_s1, 256, %s27_s28, [#allocation6], %s7025_s6, %s7025_s6, %s7026_s26  }
  0x49   :  { %s7027_s17 = smov [#allocation10]   ;;  %s6897_s21 = scalar_lea.hbm %s9963_s3, 18432 }
  0x4a   :  { %s50_s18 = sshll.u32 %s7027_s17, 4  ;;  %p6898_p4 = scmp.ne.s32.totalorder %s9963_s3, %s6897_s21  ;;  %s51_s18 = int_to_ptr.vmem [resolvable:$true] %s50_s18 }
  0x4b   :  { %p6901_p5 = scmp.lt.u32.totalorder %s6897_s21, %s9963_s3 }
  0x4d   :  { %p6903_p6 = pnand %p6901_p5, %p6898_p4 }
  0x4f   :  { %6906 = shalt.err (!%p6903_p6)
}
  0x50   :  { %s6907_s24 = scalar_lea.vmem %s51_s18, 18432  ;;  %p6912_p8 = scmp.lt.s32.totalorder %s51_s18, %s51_s18 }
  0x51   :  { %p6908_p7 = scmp.ne.s32.totalorder %s51_s18, %s6907_s24  ;;  %p6913_p9 = scmp.lt.s32.totalorder %s6907_s24, %s6907_s24 }
  0x53   :  { %p6914_p10 = por %p6913_p9, %p6912_p8 }
  0x55   :  { %p6915_p11 = pnand %p6914_p10, %p6908_p7 }
  0x57   :  { %6918 = shalt.err (!%p6915_p11)
}
  0x58   :  { %s7028_s1 = smov 576   ;;  %s7029_s27 = smov 36  }
  0x59   :  { %56 = dma.hbm_to_vmem [thread:$0]  %s9963_s3, 18432, %s51_s18, [#allocation9], %s7028_s1, %s7028_s1, %s7029_s27  }
  0x5a   :  { %s7030_s30 = smov [#allocation13]   ;;  %s7031_s12 = smov [#allocation16]  }
  0x5b   :  { %s73_s11 = sshll.u32 %s7030_s30, 4  ;;  %s92_s13 = sshll.u32 %s7031_s12, 4  ;;  %s74_s11 = int_to_ptr.vmem [resolvable:$true] %s73_s11  ;;  %s93_s13 = int_to_ptr.vmem [resolvable:$true] %s92_s13 }
  0x5c   :  { %s6919_s14 = scalar_lea.hbm %s9965_s5, 16 }
  0x5d   :  { %p6920_p12 = scmp.ne.s32.totalorder %s9965_s5, %s6919_s14  ;;  %p6923_p13 = scmp.lt.u32.totalorder %s6919_s14, %s9965_s5 }
  0x5f   :  { %p6925_p0 = pnand %p6923_p13, %p6920_p12 }
  0x61   :  { %6928 = shalt.err (!%p6925_p0)
}
  0x62   :  { %s6929_s3 = scalar_lea.vmem %s74_s11, 16  ;;  %s6933_s18 = scalar_lea.vmem %s74_s11, 32 }
  0x63   :  { %p6930_p1 = scmp.ne.s32.totalorder %s74_s11, %s6929_s3  ;;  %p6934_p2 = scmp.lt.s32.totalorder %s74_s11, %s74_s11 }
  0x64   :  { %p6935_p3 = scmp.lt.s32.totalorder %s6933_s18, %s6929_s3 }
  0x66   :  { %p6936_p4 = por %p6935_p3, %p6934_p2 }
  0x68   :  { %p6937_p5 = pnand %p6936_p4, %p6930_p1 }
  0x6a   :  { %6940 = shalt.err (!%p6937_p5)
}
  0x6b   :  { %76 = dma.hbm_to_vmem [thread:$0]  %s9965_s5, 16, %s74_s11, [#allocation12]  }
  0x6c   :  { %s6941_s25 = scalar_lea.hbm %s9967_s7, 2048 }
  0x6d   :  { %p6942_p6 = scmp.ne.s32.totalorder %s9967_s7, %s6941_s25  ;;  %p6945_p7 = scmp.lt.u32.totalorder %s6941_s25, %s9967_s7 }
  0x6f   :  { %p6947_p8 = pnand %p6945_p7, %p6942_p6 }
  0x71   :  { %6950 = shalt.err (!%p6947_p8)
}
  0x72   :  { %s6951_s28 = scalar_lea.vmem %s93_s13, 2048  ;;  %p6956_p10 = scmp.lt.s32.totalorder %s93_s13, %s93_s13 }
  0x73   :  { %p6952_p9 = scmp.ne.s32.totalorder %s93_s13, %s6951_s28  ;;  %p6957_p11 = scmp.lt.s32.totalorder %s6951_s28, %s6951_s28 }
  0x75   :  { %p6958_p12 = por %p6957_p11, %p6956_p10 }
  0x77   :  { %p6959_p13 = pnand %p6958_p12, %p6952_p9 }
  0x79   :  { %6962 = shalt.err (!%p6959_p13)
}
  0x7a   :  { %98 = dma.hbm_to_vmem [thread:$0]  %s9967_s7, 2048, %s93_s13, [#allocation15], %s7025_s6, %s7025_s6, %s7026_s26  }
  0x7b   :  { %s7032_s30 = smov [#allocation17]   ;;  %s6963_s10 = scalar_lea.hbm %s9968_s8, 32 }
  0x7c   :  { %s105_s11 = sshll.u32 %s7032_s30, 4  ;;  %p6964_p0 = scmp.ne.s32.totalorder %s9968_s8, %s6963_s10  ;;  %s106_s11 = int_to_ptr.vmem [resolvable:$true] %s105_s11 }
  0x7d   :  { %p6967_p1 = scmp.lt.u32.totalorder %s6963_s10, %s9968_s8 }
  0x7f   :  { %p6969_p2 = pnand %p6967_p1, %p6964_p0 }
  0x81   :  { %6972 = shalt.err (!%p6969_p2)
}
  0x82   :  { %s6973_s19 = scalar_lea.vmem %s106_s11, 32  ;;  %p6978_p4 = scmp.lt.s32.totalorder %s106_s11, %s106_s11 }
  0x83   :  { %p6974_p3 = scmp.ne.s32.totalorder %s106_s11, %s6973_s19  ;;  %p6979_p5 = scmp.lt.s32.totalorder %s6973_s19, %s6973_s19 }
  0x85   :  { %p6980_p6 = por %p6979_p5, %p6978_p4 }
  0x87   :  { %p6981_p7 = pnand %p6980_p6, %p6974_p3 }
  0x89   :  { %6984 = shalt.err (!%p6981_p7)
}
  0x8a   :  { %108 = dma.hbm_to_vmem [thread:$0]  %s9968_s8, 32, %s106_s11, [#allocation18]  }
  0x8b   :  { %7007 = dma.done.wait [#allocation6], 256  }
  0x8c   :  { %7008 = vsyncadd [#allocation6], 4294967040 }
  0x8d   :  { %7009 = dma.done.wait [#allocation9], 21504  }
  0x8e   :  { %7010 = vsyncadd [#allocation9], 4294945792 }
  0x8f   :  { %7011 = dma.done.wait [#allocation12], 64  }
  0x90   :  { %7012 = vsyncadd [#allocation12], 4294967232 }
  0x91   :  { %7013 = dma.done.wait [#allocation15], 2064  }
  0x92   :  { %7014 = vsyncadd [#allocation15], 4294965232 }
  0x93   :  { %7015 = dma.done.wait [#allocation18], 32  }
  0x94   :  { %7016 = vsyncadd [#allocation18], 4294967264  ;;  %v138_v0 = vlaneseq  ;;  %v7033_v1 = vmov 0.0   ;;  %v7196_v6 = vld [vmem:[#allocation5] sm:$0xff]  ;;  %v7198_v7 = vld [vmem:[#allocation5 + $0x8] sm:$0xff]  ;;  %p5048_p8 = scmp.lt.s32.totalorder %s9960_s0, 0 }
  0x95   :  { %171 = vst [vmem:[#allocation2] sm:$0xff] %v7033_v1  ;;  %172 = vst [vmem:[#allocation2 + $0x8] sm:$0xff] %v7033_v1  ;;  %v136_v8 = vld [vmem:[#allocation11] sm:$0x7]  ;;  %v7210_v12 = vld [vmem:[#allocation13] ss:$0 sm:$0xff] }
  0x96   :  { %173 = vst [vmem:[#allocation2 + $0x10] sm:$0xff] %v7033_v1  ;;  %174 = vst [vmem:[#allocation2 + $0x18] sm:$0xff] %v7033_v1  ;;  %v7191_v2 = vshrl.u32 %v138_v0, 7  ;;  %v7212_v13 = vld [vmem:[#allocation14] ss:$0 sm:$0xff] }
  0x97   :  { %10294 = vst [vmem:[#allocation27_spill] sm:$0xff] %v7196_v6  ;;  %10295 = vst [vmem:[#allocation28_spill] sm:$0xff] %v7198_v7  ;;  %180 = sbr.rel (%p5048_p8) target bundleno = 2925 (0xb6d), region = 73 }
  0x98   :  { %10293 = vst [vmem:[#allocation26_spill] sm:$0xff] %v7191_v2  ;;  %v9971_v3 = vsub.s32 0, %v7191_v2  ;;  %v9970_v4 = vsub.s32 1, %v7191_v2  ;;  %v148_v5 = vsub.s32 2, %v7191_v2  ;;  %10299 = vst [vmem:[#allocation32_spill] sm:$0xff] %v7210_v12 }
  0x99   :  { %10300 = vst [vmem:[#allocation33_spill] sm:$0xff] %v7212_v13 }
  0x9a   :  { %v7202_v9 = vrot.slane %v136_v8, %v9971_v3  ;;  %v7206_v10 = vrot.slane %v136_v8, %v9970_v4  ;;  %v7208_v11 = vrot.slane %v136_v8, %v148_v5 }
  0x9c   :  { %10296 = vst [vmem:[#allocation29_spill] sm:$0xff] %v7202_v9  ;;  %10297 = vst [vmem:[#allocation30_spill] sm:$0xff] %v7206_v10 }
  0x9d   :  { %10298 = vst [vmem:[#allocation31_spill] sm:$0xff] %v7208_v11 }
  0x9e   :  { %v7217_v14 = vld [vmem:[#allocation10 + $0x4] ss:$36 sps:$4 sm:$0xff]   ;;  %v5636_v15 = vld [vmem:[#allocation10 + $0xc] ss:$36 sps:$4 sm:$0xff]   ;;  %v5642_v19 = vld [vmem:[#allocation10 + $0x54] ss:$36 sps:$4 sm:$0xff]  }
  0x9f   :  { %1083 = vmatprep.subr.bf16.mxu0 %v7217_v14  ;;  %v7220_v16 = vld [vmem:[#allocation10] ss:$36 sps:$4 sm:$0xff]   ;;  %v5639_v17 = vld [vmem:[#allocation10 + $0x8] ss:$36 sps:$4 sm:$0xff]   ;;  %1126 = vmatprep.subr.bf16.mxu1 %v5636_v15  ;;  %v5645_v21 = vld [vmem:[#allocation10 + $0x50] ss:$36 sps:$4 sm:$0xff]  }
  0xa0   :  { %v7222_v18 = vld [vmem:[#allocation10 + $0x4c] ss:$36 sps:$4 sm:$0xff]   ;;  %1084 = vmatpush1.bf16.msra.mxu0 %v7220_v16  ;;  %1127 = vmatpush1.bf16.msra.mxu1 %v5639_v17  ;;  %v7228_v22 = vld [vmem:[#allocation10 + $0x94] ss:$36 sps:$4 sm:$0xff]   ;;  %v5648_v23 = vld [vmem:[#allocation10 + $0x9c] ss:$36 sps:$4 sm:$0xff]  }
  0xa1   :  { %v7225_v20 = vld [vmem:[#allocation10 + $0x48] ss:$36 sps:$4 sm:$0xff]   ;;  %1085 = vmatprep.subr.bf16.mxu0 %v7222_v18  ;;  %1128 = vmatprep.subr.bf16.mxu1 %v5642_v19  ;;  %v7230_v24 = vld [vmem:[#allocation10 + $0x90] ss:$36 sps:$4 sm:$0xff]   ;;  %v5651_v25 = vld [vmem:[#allocation10 + $0x98] ss:$36 sps:$4 sm:$0xff]  }
  0xa2   :  { %v7233_v26 = vld [vmem:[#allocation10 + $0xdc] ss:$36 sps:$4 sm:$0xff]   ;;  %v5654_v27 = vld [vmem:[#allocation10 + $0xe4] ss:$36 sps:$4 sm:$0xff]   ;;  %v7242_v31 = vld [vmem:[#allocation10 + $0x12c] ss:$36 sps:$4 sm:$0xff]  }
  0xa3   :  { %v7236_v28 = vld [vmem:[#allocation10 + $0xd8] ss:$36 sps:$4 sm:$0xff]   ;;  %v5657_v29 = vld [vmem:[#allocation10 + $0xe0] ss:$36 sps:$4 sm:$0xff]   ;;  %v7246_v33 = vld [vmem:[#allocation10 + $0x128] ss:$36 sps:$4 sm:$0xff]  }
  0xa4   :  { %1086 = vmatpush1.bf16.msra.mxu0 %v7225_v20  ;;  %1129 = vmatpush1.bf16.msra.mxu1 %v5645_v21  ;;  %v7239_v30 = vld [vmem:[#allocation10 + $0x124] ss:$36 sps:$4 sm:$0xff]   ;;  %v7249_v34 = vld [vmem:[#allocation10 + $0x16c] ss:$36 sps:$4 sm:$0xff]   ;;  %v7253_v35 = vld [vmem:[#allocation10 + $0x174] ss:$36 sps:$4 sm:$0xff]  }
  0xa5   :  { %1087 = vmatprep.subr.bf16.mxu0 %v7228_v22  ;;  %1130 = vmatprep.subr.bf16.mxu1 %v5648_v23  ;;  %v7244_v32 = vld [vmem:[#allocation10 + $0x120] ss:$36 sps:$4 sm:$0xff]   ;;  %v7255_v36 = vld [vmem:[#allocation10 + $0x168] ss:$36 sps:$4 sm:$0xff]   ;;  %v7259_v37 = vld [vmem:[#allocation10 + $0x170] ss:$36 sps:$4 sm:$0xff]  }
  0xa6   :  { %v7261_v38 = vld [vmem:[#allocation10 + $0x1b4] ss:$36 sps:$4 sm:$0xff]   ;;  %v7265_v39 = vld [vmem:[#allocation10 + $0x1bc] ss:$36 sps:$4 sm:$0xff]   ;;  %v7277_v43 = vld [vmem:[#allocation10 + $0x204] ss:$36 sps:$4 sm:$0xff]  }
  0xa7   :  { %v7267_v40 = vld [vmem:[#allocation10 + $0x1b0] ss:$36 sps:$4 sm:$0xff]   ;;  %v7269_v41 = vld [vmem:[#allocation10 + $0x1b8] ss:$36 sps:$4 sm:$0xff]   ;;  %v7283_v45 = vld [vmem:[#allocation10 + $0x200] ss:$36 sps:$4 sm:$0xff]  }
  0xa8   :  { %1088 = vmatpush1.bf16.msra.mxu0 %v7230_v24  ;;  %1131 = vmatpush1.bf16.msra.mxu1 %v5651_v25  ;;  %v7273_v42 = vld [vmem:[#allocation10 + $0x1fc] ss:$36 sps:$4 sm:$0xff]   ;;  %v7285_v46 = vld [vmem:[#allocation10 + $0x244] ss:$36 sps:$4 sm:$0xff]   ;;  %v7289_v47 = vld [vmem:[#allocation10 + $0x24c] ss:$36 sps:$4 sm:$0xff]  }
  0xa9   :  { %1089 = vmatprep.subr.bf16.mxu0 %v7233_v26  ;;  %1132 = vmatprep.subr.bf16.mxu1 %v5654_v27  ;;  %v7279_v44 = vld [vmem:[#allocation10 + $0x1f8] ss:$36 sps:$4 sm:$0xff]   ;;  %v7291_v48 = vld [vmem:[#allocation10 + $0x240] ss:$36 sps:$4 sm:$0xff]   ;;  %v7293_v49 = vld [vmem:[#allocation10 + $0x248] ss:$36 sps:$4 sm:$0xff]  }
  0xaa   :  { %v7297_v50 = vld [vmem:[#allocation10 + $0x28c] ss:$36 sps:$4 sm:$0xff]   ;;  %v7301_v51 = vld [vmem:[#allocation10 + $0x294] ss:$36 sps:$4 sm:$0xff]   ;;  %v7313_v55 = vld [vmem:[#allocation10 + $0x2dc] ss:$36 sps:$4 sm:$0xff]  }
  0xab   :  { %v7303_v52 = vld [vmem:[#allocation10 + $0x288] ss:$36 sps:$4 sm:$0xff]   ;;  %v7307_v53 = vld [vmem:[#allocation10 + $0x290] ss:$36 sps:$4 sm:$0xff]   ;;  %10301 = vst [vmem:[#allocation34_spill] sm:$0xff] %v7313_v55  ;;  %vm5197_vm0 = vcmp.gt.s32.totalorder %v7196_v6, 0 }
  0xac   :  { %1090 = vmatpush1.bf16.msra.mxu0 %v7236_v28  ;;  %1133 = vmatpush1.bf16.msra.mxu1 %v5657_v29  ;;  %v7309_v54 = vld [vmem:[#allocation10 + $0x2d4] ss:$36 sps:$4 sm:$0xff]   ;;  %vm5198_vm1 = vcmp.gt.s32.totalorder %v7198_v7, 0  ;;  %v9983_v56 = vmov 0   ;;  %v7327_v60 = vld [vmem:[#allocation10 + $0x31c] ss:$36 sps:$4 sm:$0xff]  }
  0xad   :  { %1091 = vmatprep.subr.bf16.mxu0 %v7239_v30  ;;  %1134 = vmatprep.subr.bf16.mxu1 %v7242_v31  ;;  %v1354_v57 = vsel %vm5198_vm1, 1, %v9983_v56  ;;  %v7320_v58 = vld [vmem:[#allocation10 + $0x2d0] ss:$36 sps:$4 sm:$0xff]   ;;  %v7322_v59 = vld [vmem:[#allocation10 + $0x2d8] ss:$36 sps:$4 sm:$0xff]   ;;  %v1353_v61 = vsel %vm5197_vm0, 1, %v9983_v56 }
  0xae   :  { %5627 = vset.pattern.permute.xlu0 %v9983_v56  ;;  %5633 = vset.pattern.permute.xlu1 %v9983_v56  ;;  %10302 = vst [vmem:[#allocation35_spill] sm:$0xff] %v7322_v59  ;;  %v7332_v62 = vld [vmem:[#allocation10 + $0x324] ss:$36 sps:$4 sm:$0xff]   ;;  %vm5209_vm2 = vcmp.gt.s32.totalorder %v7196_v6, 1  ;;  %v182_v63 = vld [vmem:[#allocation2 + $0x8] sm:$0xff]  ;;  %vm5210_vm3 = vcmp.gt.s32.totalorder %v7198_v7, 1 }
  0xaf   :  { %5629 = vperm.xlu0 %5627, %v9983_v56   ;;  %1359 = vperm.xlu1 %5633, %v1354_v57   ;;  %10303 = vst [vmem:[#allocation36_spill] sm:$0xff] %v7332_v62  ;;  %v7335_v0 = vld [vmem:[#allocation10 + $0x318] ss:$36 sps:$4 sm:$0xff]   ;;  %v7337_v1 = vld [vmem:[#allocation10 + $0x320] ss:$36 sps:$4 sm:$0xff]   ;;  %v184_v5 = vld [vmem:[#allocation2 + $0x18] sm:$0xff] }
  0xb0   :  { %1092 = vmatpush1.bf16.msra.mxu0 %v7244_v32  ;;  %1135 = vmatpush1.bf16.msra.mxu1 %v7246_v33  ;;  %10304 = vst [vmem:[#allocation37_spill] sm:$0xff] %v7337_v1  ;;  %v7341_v8 = vld [vmem:[#allocation10 + $0x364] ss:$36 sps:$4 sm:$0xff]   ;;  %v7343_v15 = vpack.c.bf16 %v184_v5, %v182_v63  ;;  %v1711_v17 = vsel %vm5209_vm2, 1, %v9983_v56  ;;  %v7348_v19 = vld [vmem:[#allocation10 + $0x36c] ss:$36 sps:$4 sm:$0xff]  }
  0xb1   :  { %1093 = vmatprep.subr.bf16.mxu0 %v7249_v34  ;;  %1136 = vmatprep.subr.bf16.mxu1 %v7253_v35  ;;  %10305 = vst [vmem:[#allocation38_spill] sm:$0xff] %v7348_v19  ;;  %v7353_v21 = vld [vmem:[#allocation10 + $0x360] ss:$36 sps:$4 sm:$0xff]   ;;  %v7357_v23 = vld [vmem:[#allocation10 + $0x368] ss:$36 sps:$4 sm:$0xff]   ;;  %v1712_v27 = vsel %vm5210_vm3, 1, %v9983_v56 }
  0xb2   :  { %1115 = vmatprep.mubr.bf16.mxu0 %v7343_v15  ;;  %1158 = vmatprep.mubr.bf16.mxu1 %v7343_v15  ;;  %10306 = vst [vmem:[#allocation39_spill] sm:$0xff] %v7357_v23  ;;  %v7359_v25 = vld [vmem:[#allocation10 + $0x3ac] ss:$36 sps:$4 sm:$0xff]   ;;  %v7364_v29 = vld [vmem:[#allocation10 + $0x3b4] ss:$36 sps:$4 sm:$0xff]   ;;  %vm5219_vm4 = vcmp.gt.s32.totalorder %v7196_v6, 2 }
  0xb3   :  { %1356 = vperm.xlu0 %5627, %v1353_v61   ;;  %1782 = vperm.xlu1 %5633, %v1353_v61   ;;  %10307 = vst [vmem:[#allocation40_spill] sm:$0xff] %v7364_v29  ;;  %v7369_v61 = vld [vmem:[#allocation10 + $0x3b0] ss:$36 sps:$4 sm:$0xff]   ;;  %v2065_v5 = vsel %vm5219_vm4, 1, %v9983_v56  ;;  %v7378_v4 = vld [vmem:[#allocation10 + $0x3fc] ss:$36 sps:$4 sm:$0xff]  }
  0xb4   :  { %1094 = vmatpush1.bf16.msra.mxu0 %v7255_v36  ;;  %1137 = vmatpush1.bf16.msra.mxu1 %v7259_v37  ;;  %10308 = vst [vmem:[#allocation41_spill] sm:$0xff] %v7369_v61  ;;  %v7373_v63 = vld [vmem:[#allocation10 + $0x3f4] ss:$36 sps:$4 sm:$0xff]   ;;  %10309 = vst [vmem:[#allocation42_spill] sm:$0xff] %v7378_v4  ;;  %vm5220_vm5 = vcmp.gt.s32.totalorder %v7198_v7, 2  ;;  %vm5229_vm6 = vcmp.gt.s32.totalorder %v7196_v6, 3 }
  0xb5   :  { %1095 = vmatprep.subr.bf16.mxu0 %v7261_v38  ;;  %1138 = vmatprep.subr.bf16.mxu1 %v7265_v39  ;;  %v7381_v3 = vld [vmem:[#allocation10 + $0x3f0] ss:$36 sps:$4 sm:$0xff]   ;;  %v7387_v2 = vld [vmem:[#allocation10 + $0x43c] ss:$36 sps:$4 sm:$0xff]   ;;  %v2066_v11 = vsel %vm5220_vm5, 1, %v9983_v56  ;;  %vm5230_vm7 = vcmp.gt.s32.totalorder %v7198_v7, 3 }
  0xb6   :  { %v7392_v13 = vld [vmem:[#allocation10 + $0x444] ss:$36 sps:$4 sm:$0xff]   ;;  %v7399_v9 = vld [vmem:[#allocation2] sm:$0xff]  ;;  %vm5239_vm8 = vcmp.gt.s32.totalorder %v7196_v6, 4  ;;  %vm5240_vm9 = vcmp.gt.s32.totalorder %v7198_v7, 4  ;;  %vm5249_vm10 = vcmp.gt.s32.totalorder %v7196_v6, 5 }
  0xb7   :  { %1785 = vperm.xlu0 %5627, %v1354_v57   ;;  %1714 = vperm.xlu1 %5633, %v1711_v17   ;;  %v7367_v57 = vld [vmem:[#allocation10 + $0x3a8] ss:$36 sps:$4 sm:$0xff]   ;;  %10311 = vst [vmem:[#allocation44_spill] sm:$0xff] %v7392_v13  ;;  %v7397_v10 = vld [vmem:[#allocation10 + $0x440] ss:$36 sps:$4 sm:$0xff]   ;;  %10313 = vst [vmem:[#allocation46_spill] sm:$0xff] %v7399_v9 }
  0xb8   :  { %1096 = vmatpush1.bf16.msra.mxu0 %v7267_v40  ;;  %1139 = vmatpush1.bf16.msra.mxu1 %v7269_v41  ;;  %10312 = vst [vmem:[#allocation45_spill] sm:$0xff] %v7397_v10  ;;  %v7401_v12 = vld [vmem:[#allocation2 + $0x10] sm:$0xff]  ;;  %v7405_v56 = vld [vmem:[#allocation10 + $0x14] ss:$36 sps:$4 sm:$0xff]   ;;  %vm5250_vm11 = vcmp.gt.s32.totalorder %v7198_v7, 5  ;;  %vm5260_vm12 = vcmp.gt.s32.totalorder %v7198_v7, 6 }
  0xb9   :  { %1097 = vmatprep.subr.bf16.mxu0 %v7273_v42  ;;  %1140 = vmatprep.subr.bf16.mxu1 %v7277_v43  ;;  %10314 = vst [vmem:[#allocation47_spill] sm:$0xff] %v7401_v12  ;;  %vm5259_vm13 = vcmp.gt.s32.totalorder %v7196_v6, 6  ;;  %vm5270_vm14 = vcmp.gt.s32.totalorder %v7198_v7, 7  ;;  %vm5269_vm15 = vcmp.gt.s32.totalorder %v7196_v6, 7 }
  0xbb   :  { %1717 = vperm.xlu0 %5627, %v1712_v27   ;;  %2136 = vperm.xlu1 %5633, %v1711_v17   ;;  %v7385_v17 = vld [vmem:[#allocation10 + $0x3f8] ss:$36 sps:$4 sm:$0xff]  }
  0xbc   :  { %1098 = vmatpush1.bf16.msra.mxu0 %v7279_v44  ;;  %1141 = vmatpush1.bf16.msra.mxu1 %v7283_v45  ;;  %10310 = vst [vmem:[#allocation43_spill] sm:$0xff] %v7385_v17 }
  0xbd   :  { %1099 = vmatprep.subr.bf16.mxu0 %v7285_v46  ;;  %1142 = vmatprep.subr.bf16.mxu1 %v7289_v47 }
  0xbf   :  { %2139 = vperm.xlu0 %5627, %v1712_v27   ;;  %2068 = vperm.xlu1 %5633, %v2065_v5   ;;  %v7395_v27 = vld [vmem:[#allocation10 + $0x438] ss:$36 sps:$4 sm:$0xff]  }
  0xc0   :  { %1100 = vmatpush1.bf16.msra.mxu0 %v7291_v48  ;;  %1143 = vmatpush1.bf16.msra.mxu1 %v7293_v49 }
  0xc1   :  { %1101 = vmatprep.subr.bf16.mxu0 %v7297_v50  ;;  %1144 = vmatprep.subr.bf16.mxu1 %v7301_v51 }
  0xc3   :  { %2071 = vperm.xlu0 %5627, %v2066_v11   ;;  %2490 = vperm.xlu1 %5633, %v2065_v5   ;;  %v7420_v5 = vld [vmem:[#allocation10 + $0x18] ss:$36 sps:$4 sm:$0xff]  }
  0xc4   :  { %1102 = vmatpush1.bf16.msra.mxu0 %v7303_v52  ;;  %1145 = vmatpush1.bf16.msra.mxu1 %v7307_v53  ;;  %10318 = vst [vmem:[#allocation50_spill] sm:$0xff] %v7420_v5 }
  0xc5   :  { %1103 = vmatprep.subr.bf16.mxu0 %v7309_v54  ;;  %1146 = vmatprep.subr.bf16.mxu1 %v7313_v55  ;;  %v7524_v55 = vld [vmem:[#allocation10 + $0x210] ss:$36 sps:$4 sm:$0xff]  }
  0xc7   :  { %2493 = vperm.xlu0 %5627, %v2066_v11   ;;  %v7431_v11 = vld [vmem:[#allocation10 + $0x58] ss:$36 sps:$4 sm:$0xff]  }
  0xc8   :  { %1104 = vmatpush1.bf16.msra.mxu0 %v7320_v58  ;;  %1147 = vmatpush1.bf16.msra.mxu1 %v7322_v59  ;;  %10321 = vst [vmem:[#allocation53_spill] sm:$0xff] %v7431_v11  ;;  %v7522_v59 = vld [vmem:[#allocation10 + $0x208] ss:$36 sps:$4 sm:$0xff]  }
  0xc9   :  { %1105 = vmatprep.subr.bf16.mxu0 %v7327_v60  ;;  %1148 = vmatprep.subr.bf16.mxu1 %v7332_v62  ;;  %v7461_v62 = vld [vmem:[#allocation10 + $0xe8] ss:$36 sps:$4 sm:$0xff]  }
  0xca   :  { %10329 = vst [vmem:[#allocation61_spill] sm:$0xff] %v7461_v62 }
  0xcc   :  { %1106 = vmatpush1.bf16.msra.mxu0 %v7335_v0  ;;  %1149 = vmatpush1.bf16.msra.mxu1 %v7337_v1  ;;  %v7447_v1 = vld [vmem:[#allocation10 + $0xa0] ss:$36 sps:$4 sm:$0xff]  }
  0xcd   :  { %1107 = vmatprep.subr.bf16.mxu0 %v7341_v8  ;;  %1150 = vmatprep.subr.bf16.mxu1 %v7348_v19  ;;  %v7416_v19 = vld [vmem:[#allocation10 + $0x10] ss:$36 sps:$4 sm:$0xff]   ;;  %10325 = vst [vmem:[#allocation57_spill] sm:$0xff] %v7447_v1 }
  0xce   :  { %10317 = vst [vmem:[#allocation49_spill] sm:$0xff] %v7416_v19 }
  0xd0   :  { %1108 = vmatpush1.bf16.msra.mxu0 %v7353_v21  ;;  %1151 = vmatpush1.bf16.msra.mxu1 %v7357_v23  ;;  %v7414_v23 = vpack.c.bf16 %v7401_v12, %v7399_v9  ;;  %v7433_v12 = vld [vmem:[#allocation10 + $0x60] ss:$36 sps:$4 sm:$0xff]  }
  0xd1   :  { %1109 = vmatprep.subr.bf16.mxu0 %v7359_v25  ;;  %1152 = vmatprep.subr.bf16.mxu1 %v7364_v29  ;;  %v7410_v29 = vld [vmem:[#allocation10 + $0x1c] ss:$36 sps:$4 sm:$0xff]   ;;  %10322 = vst [vmem:[#allocation54_spill] sm:$0xff] %v7433_v12  ;;  %v7437_v9 = vld [vmem:[#allocation10 + $0xa4] ss:$36 sps:$4 sm:$0xff]  }
  0xd2   :  { %10316 = vst [vmem:[#allocation48_spill] sm:$0xff] %v7410_v29  ;;  %10323 = vst [vmem:[#allocation55_spill] sm:$0xff] %v7437_v9 }
  0xd4   :  { %1110 = vmatpush1.bf16.msra.mxu0 %v7367_v57  ;;  %1153 = vmatpush1.bf16.msra.mxu1 %v7369_v61 }
  0xd5   :  { %1111 = vmatprep.subr.bf16.mxu0 %v7373_v63  ;;  %1154 = vmatprep.subr.bf16.mxu1 %v7378_v4  ;;  %v10315_v4 = vmov 0  }
  0xd6   :  { %v2419_v61 = vsel %vm5229_vm6, 1, %v10315_v4  ;;  %v3481_v7 = vsel %vm5259_vm13, 1, %v10315_v4  ;;  %v3836_v6 = vsel %vm5270_vm14, 1, %v10315_v4 }
  0xd7   :  { %2422 = vperm.xlu1 %5633, %v2419_v61  }
  0xd8   :  { %1112 = vmatpush1.bf16.msra.mxu0 %v7381_v3  ;;  %1155 = vmatpush1.bf16.msra.mxu1 %v7385_v17  ;;  %v7422_v17 = vld [vmem:[#allocation10 + $0x5c] ss:$36 sps:$4 sm:$0xff]  }
  0xd9   :  { %1113 = vmatprep.subr.bf16.mxu0 %v7387_v2  ;;  %1156 = vmatprep.subr.bf16.mxu1 %v7392_v13  ;;  %10319 = vst [vmem:[#allocation51_spill] sm:$0xff] %v7422_v17  ;;  %v7426_v13 = vld [vmem:[#allocation10 + $0x64] ss:$36 sps:$4 sm:$0xff]  }
  0xda   :  { %10320 = vst [vmem:[#allocation52_spill] sm:$0xff] %v7426_v13 }
  0xdb   :  { %2844 = vperm.xlu1 %5633, %v2419_v61   ;;  %v7463_v61 = vld [vmem:[#allocation10 + $0xf0] ss:$36 sps:$4 sm:$0xff]  }
  0xdc   :  { %1114 = vmatpush1.bf16.msra.mxu0 %v7395_v27  ;;  %1157 = vmatpush1.bf16.msra.mxu1 %v7397_v10  ;;  %v7442_v10 = vld [vmem:[#allocation10 + $0xac] ss:$36 sps:$4 sm:$0xff]   ;;  %10330 = vst [vmem:[#allocation62_spill] sm:$0xff] %v7463_v61 }
  0xdd   :  { %1169 = vmatprep.subr.bf16.mxu0 %v7405_v56  ;;  %1212 = vmatprep.subr.bf16.mxu1 %v7410_v29  ;;  %v2420_v29 = vsel %vm5230_vm7, 1, %v10315_v4  ;;  %10324 = vst [vmem:[#allocation56_spill] sm:$0xff] %v7442_v10 }
  0xde   :  { %2425 = vperm.xlu0 %5627, %v2420_v29  }
  0xdf   :  { %1116 = vmatmul.mubr.bf16.vlgmr.msra.gmra.mrb[0].mxu0 %v7414_v23  ;;  %1159 = vmatmul.mubr.bf16.vlgmr.msra.gmra.mrb[0].mxu1 %v7414_v23 }
  0xe0   :  { %1170 = vmatpush1.bf16.msra.mxu0 %v7416_v19  ;;  %1213 = vmatpush1.bf16.msra.mxu1 %v7420_v5  ;;  %v7451_v5 = vld [vmem:[#allocation10 + $0xa8] ss:$36 sps:$4 sm:$0xff]   ;;  %v7458_v19 = vld [vmem:[#allocation10 + $0xf4] ss:$36 sps:$4 sm:$0xff]  }
  0xe1   :  { %1171 = vmatprep.subr.bf16.mxu0 %v7422_v17  ;;  %1214 = vmatprep.subr.bf16.mxu1 %v7426_v13  ;;  %10326 = vst [vmem:[#allocation58_spill] sm:$0xff] %v7451_v5  ;;  %v7453_v17 = vld [vmem:[#allocation10 + $0xec] ss:$36 sps:$4 sm:$0xff]   ;;  %v2773_v13 = vsel %vm5239_vm8, 1, %v10315_v4  ;;  %10328 = vst [vmem:[#allocation60_spill] sm:$0xff] %v7458_v19 }
  0xe2   :  { %1201 = vmatprep.mubr.bf16.mxu0 %v7343_v15  ;;  %1244 = vmatprep.mubr.bf16.mxu1 %v7343_v15  ;;  %10327 = vst [vmem:[#allocation59_spill] sm:$0xff] %v7453_v17 }
  0xe3   :  { %2847 = vperm.xlu0 %5627, %v2420_v29   ;;  %2776 = vperm.xlu1 %5633, %v2773_v13   ;;  %v7479_v29 = vld [vmem:[#allocation10 + $0x138] ss:$36 sps:$4 sm:$0xff]  }
  0xe4   :  { %1172 = vmatpush1.bf16.msra.mxu0 %v7431_v11  ;;  %1215 = vmatpush1.bf16.msra.mxu1 %v7433_v12  ;;  %v7467_v12 = vld [vmem:[#allocation10 + $0x134] ss:$36 sps:$4 sm:$0xff]   ;;  %10334 = vst [vmem:[#allocation66_spill] sm:$0xff] %v7479_v29 }
  0xe5   :  { %1173 = vmatprep.subr.bf16.mxu0 %v7437_v9  ;;  %1216 = vmatprep.subr.bf16.mxu1 %v7442_v10  ;;  %10331 = vst [vmem:[#allocation63_spill] sm:$0xff] %v7467_v12  ;;  %v2774_v9 = vsel %vm5240_vm9, 1, %v10315_v4  ;;  %v7472_v10 = vld [vmem:[#allocation10 + $0x13c] ss:$36 sps:$4 sm:$0xff]   ;;  %v7475_v11 = vld [vmem:[#allocation10 + $0x130] ss:$36 sps:$4 sm:$0xff]  }
  0xe6   :  { %10332 = vst [vmem:[#allocation64_spill] sm:$0xff] %v7472_v10  ;;  %10333 = vst [vmem:[#allocation65_spill] sm:$0xff] %v7475_v11 }
  0xe7   :  { %2779 = vperm.xlu0 %5627, %v2774_v9   ;;  %3198 = vperm.xlu1 %5633, %v2773_v13   ;;  %v7491_v13 = vld [vmem:[#allocation10 + $0x178] ss:$36 sps:$4 sm:$0xff]  }
  0xe8   :  { %1174 = vmatpush1.bf16.msra.mxu0 %v7447_v1  ;;  %1217 = vmatpush1.bf16.msra.mxu1 %v7451_v5  ;;  %v7481_v5 = vld [vmem:[#allocation10 + $0x17c] ss:$36 sps:$4 sm:$0xff]  }
  0xe9   :  { %1175 = vmatprep.subr.bf16.mxu0 %v7453_v17  ;;  %1218 = vmatprep.subr.bf16.mxu1 %v7458_v19  ;;  %10335 = vst [vmem:[#allocation67_spill] sm:$0xff] %v7481_v5  ;;  %v3127_v17 = vsel %vm5249_vm10, 1, %v10315_v4  ;;  %v7486_v19 = vld [vmem:[#allocation10 + $0x184] ss:$36 sps:$4 sm:$0xff]  }
  0xea   :  { %10336 = vst [vmem:[#allocation68_spill] sm:$0xff] %v7486_v19  ;;  %v7508_v1 = vld [vmem:[#allocation10 + $0x1c0] ss:$36 sps:$4 sm:$0xff]  }
  0xeb   :  { %3201 = vperm.xlu0 %5627, %v2774_v9   ;;  %3130 = vperm.xlu1 %5633, %v3127_v17   ;;  %v3482_v9 = vsel %vm5260_vm12, 1, %v10315_v4 }
  0xec   :  { %1176 = vmatpush1.bf16.msra.mxu0 %v7461_v62  ;;  %1219 = vmatpush1.bf16.msra.mxu1 %v7463_v61  ;;  %v7493_v61 = vld [vmem:[#allocation10 + $0x180] ss:$36 sps:$4 sm:$0xff]   ;;  %v7504_v62 = vld [vmem:[#allocation10 + $0x1cc] ss:$36 sps:$4 sm:$0xff]  }
  0xed   :  { %1177 = vmatprep.subr.bf16.mxu0 %v7467_v12  ;;  %1220 = vmatprep.subr.bf16.mxu1 %v7472_v10  ;;  %v7499_v10 = vld [vmem:[#allocation10 + $0x1c4] ss:$36 sps:$4 sm:$0xff]   ;;  %v3128_v12 = vsel %vm5250_vm11, 1, %v10315_v4  ;;  %10338 = vst [vmem:[#allocation70_spill] sm:$0xff] %v7504_v62 }
  0xee   :  { %10337 = vst [vmem:[#allocation69_spill] sm:$0xff] %v7499_v10 }
  0xef   :  { %3133 = vperm.xlu0 %5627, %v3128_v12   ;;  %3552 = vperm.xlu1 %5633, %v3127_v17   ;;  %v7532_v17 = vld [vmem:[#allocation10 + $0x25c] ss:$36 sps:$4 sm:$0xff]  }
  0xf0   :  { %1178 = vmatpush1.bf16.msra.mxu0 %v7475_v11  ;;  %1221 = vmatpush1.bf16.msra.mxu1 %v7479_v29  ;;  %v3835_v29 = vsel %vm5269_vm15, 1, %v10315_v4  ;;  %v7512_v11 = vld [vmem:[#allocation10 + $0x1c8] ss:$36 sps:$4 sm:$0xff]   ;;  %v7528_v4 = vld [vmem:[#allocation10 + $0x254] ss:$36 sps:$4 sm:$0xff]   ;;  %10343 = vst [vmem:[#allocation75_spill] sm:$0xff] %v7532_v17 }
  0xf1   :  { %1179 = vmatprep.subr.bf16.mxu0 %v7481_v5  ;;  %1222 = vmatprep.subr.bf16.mxu1 %v7486_v19  ;;  %10339 = vst [vmem:[#allocation71_spill] sm:$0xff] %v7512_v11  ;;  %v7516_v19 = vld [vmem:[#allocation10 + $0x20c] ss:$36 sps:$4 sm:$0xff]   ;;  %v7520_v5 = vld [vmem:[#allocation10 + $0x214] ss:$36 sps:$4 sm:$0xff]   ;;  %10342 = vst [vmem:[#allocation74_spill] sm:$0xff] %v7528_v4 }
  0xf2   :  { %10340 = vst [vmem:[#allocation72_spill] sm:$0xff] %v7516_v19  ;;  %10341 = vst [vmem:[#allocation73_spill] sm:$0xff] %v7520_v5 }
  0xf3   :  { %3555 = vperm.xlu0 %5627, %v3128_v12   ;;  %3484 = vperm.xlu1 %5633, %v3481_v7   ;;  %v7540_v12 = vld [vmem:[#allocation10 + $0x29c] ss:$36 sps:$4 sm:$0xff]  }
  0xf4   :  { %1180 = vmatpush1.bf16.msra.mxu0 %v7491_v13  ;;  %1223 = vmatpush1.bf16.msra.mxu1 %v7493_v61  ;;  %10344 = vst [vmem:[#allocation76_spill] sm:$0xff] %v7540_v12 }
  0xf5   :  { %1181 = vmatprep.subr.bf16.mxu0 %v7499_v10  ;;  %1224 = vmatprep.subr.bf16.mxu1 %v7504_v62  ;;  %v7534_v62 = vld [vmem:[#allocation10 + $0x250] ss:$36 sps:$4 sm:$0xff]   ;;  %v7536_v10 = vld [vmem:[#allocation10 + $0x258] ss:$36 sps:$4 sm:$0xff]  }
  0xf7   :  { %3487 = vperm.xlu0 %5627, %v3482_v9   ;;  %3838 = vperm.xlu1 %5633, %v3835_v29   ;;  %v7552_v29 = vld [vmem:[#allocation10 + $0x2e4] ss:$36 sps:$4 sm:$0xff]  }
  0xf8   :  { %1182 = vmatpush1.bf16.msra.mxu0 %v7508_v1  ;;  %1225 = vmatpush1.bf16.msra.mxu1 %v7512_v11  ;;  %v7548_v11 = vld [vmem:[#allocation10 + $0x2a0] ss:$36 sps:$4 sm:$0xff]   ;;  %10347 = vst [vmem:[#allocation79_spill] sm:$0xff] %v7552_v29 }
  0xf9   :  { %1183 = vmatprep.subr.bf16.mxu0 %v7516_v19  ;;  %1226 = vmatprep.subr.bf16.mxu1 %v7520_v5  ;;  %v7544_v19 = vld [vmem:[#allocation10 + $0x2a4] ss:$36 sps:$4 sm:$0xff]   ;;  %v7546_v5 = vld [vmem:[#allocation10 + $0x298] ss:$36 sps:$4 sm:$0xff]   ;;  %10346 = vst [vmem:[#allocation78_spill] sm:$0xff] %v7548_v11 }
  0xfa   :  { %10345 = vst [vmem:[#allocation77_spill] sm:$0xff] %v7546_v5 }
  0xfb   :  { %3841 = vperm.xlu0 %5627, %v3836_v6   ;;  %3906 = vperm.xlu1 %5633, %v3481_v7   ;;  %v7562_v6 = vld [vmem:[#allocation10 + $0x2e8] ss:$36 sps:$4 sm:$0xff]  }
  0xfc   :  { %1184 = vmatpush1.bf16.msra.mxu0 %v7522_v59  ;;  %1227 = vmatpush1.bf16.msra.mxu1 %v7524_v55  ;;  %10350 = vst [vmem:[#allocation82_spill] sm:$0xff] %v7562_v6  ;;  %v7566_v7 = vld [vmem:[#allocation10 + $0x32c] ss:$36 sps:$4 sm:$0xff]  }
  0xfd   :  { %1185 = vmatprep.subr.bf16.mxu0 %v7528_v4  ;;  %1228 = vmatprep.subr.bf16.mxu1 %v7532_v17  ;;  %v7556_v4 = vld [vmem:[#allocation10 + $0x2ec] ss:$36 sps:$4 sm:$0xff]   ;;  %v7560_v17 = vld [vmem:[#allocation10 + $0x2e0] ss:$36 sps:$4 sm:$0xff]   ;;  %10351 = vst [vmem:[#allocation83_spill] sm:$0xff] %v7566_v7 }
  0xfe   :  { %10348 = vst [vmem:[#allocation80_spill] sm:$0xff] %v7556_v4  ;;  %10349 = vst [vmem:[#allocation81_spill] sm:$0xff] %v7560_v17 }
  0xff   :  { %3909 = vperm.xlu0 %5627, %v3482_v9   ;;  %v7572_v9 = vld [vmem:[#allocation10 + $0x328] ss:$36 sps:$4 sm:$0xff]  }
 0x100   :  { %1186 = vmatpush1.bf16.msra.mxu0 %v7534_v62  ;;  %1229 = vmatpush1.bf16.msra.mxu1 %v7536_v10  ;;  %10353 = vst [vmem:[#allocation85_spill] sm:$0xff] %v7572_v9 }
 0x101   :  { %1187 = vmatprep.subr.bf16.mxu0 %v7540_v12  ;;  %1230 = vmatprep.subr.bf16.mxu1 %v7544_v19  ;;  %v7568_v12 = vld [vmem:[#allocation10 + $0x334] ss:$36 sps:$4 sm:$0xff]  }
 0x102   :  { %10352 = vst [vmem:[#allocation84_spill] sm:$0xff] %v7568_v12 }
 0x104   :  { %1188 = vmatpush1.bf16.msra.mxu0 %v7546_v5  ;;  %1231 = vmatpush1.bf16.msra.mxu1 %v7548_v11  ;;  %v7574_v5 = vld [vmem:[#allocation10 + $0x330] ss:$36 sps:$4 sm:$0xff]  }
 0x105   :  { %1189 = vmatprep.subr.bf16.mxu0 %v7552_v29  ;;  %1232 = vmatprep.subr.bf16.mxu1 %v7556_v4  ;;  %10354 = vst [vmem:[#allocation86_spill] sm:$0xff] %v7574_v5  ;;  %v7578_v11 = vld [vmem:[#allocation10 + $0x374] ss:$36 sps:$4 sm:$0xff]   ;;  %v7580_v29 = vld [vmem:[#allocation10 + $0x37c] ss:$36 sps:$4 sm:$0xff]  }
 0x106   :  { %10355 = vst [vmem:[#allocation87_spill] sm:$0xff] %v7578_v11  ;;  %10356 = vst [vmem:[#allocation88_spill] sm:$0xff] %v7580_v29  ;;  %v7584_v4 = vld [vmem:[#allocation10 + $0x370] ss:$36 sps:$4 sm:$0xff]  }
 0x107   :  { %10357 = vst [vmem:[#allocation89_spill] sm:$0xff] %v7584_v4 }
 0x108   :  { %1190 = vmatpush1.bf16.msra.mxu0 %v7560_v17  ;;  %1233 = vmatpush1.bf16.msra.mxu1 %v7562_v6  ;;  %v7586_v17 = vld [vmem:[#allocation10 + $0x378] ss:$36 sps:$4 sm:$0xff]  }
 0x109   :  { %1191 = vmatprep.subr.bf16.mxu0 %v7566_v7  ;;  %1234 = vmatprep.subr.bf16.mxu1 %v7568_v12  ;;  %10358 = vst [vmem:[#allocation90_spill] sm:$0xff] %v7586_v17  ;;  %v7590_v6 = vld [vmem:[#allocation10 + $0x3bc] ss:$36 sps:$4 sm:$0xff]   ;;  %v7592_v7 = vld [vmem:[#allocation10 + $0x3c4] ss:$36 sps:$4 sm:$0xff]  }
 0x10a   :  { %10359 = vst [vmem:[#allocation91_spill] sm:$0xff] %v7590_v6  ;;  %10360 = vst [vmem:[#allocation92_spill] sm:$0xff] %v7592_v7  ;;  %v7596_v12 = vld [vmem:[#allocation10 + $0x3b8] ss:$36 sps:$4 sm:$0xff]  }
 0x10b   :  { %10361 = vst [vmem:[#allocation93_spill] sm:$0xff] %v7596_v12 }
 0x10c   :  { %1192 = vmatpush1.bf16.msra.mxu0 %v7572_v9  ;;  %1235 = vmatpush1.bf16.msra.mxu1 %v7574_v5  ;;  %v7598_v9 = vld [vmem:[#allocation10 + $0x3c0] ss:$36 sps:$4 sm:$0xff]  }
 0x10d   :  { %1193 = vmatprep.subr.bf16.mxu0 %v7578_v11  ;;  %1236 = vmatprep.subr.bf16.mxu1 %v7580_v29  ;;  %10362 = vst [vmem:[#allocation94_spill] sm:$0xff] %v7598_v9  ;;  %v7602_v5 = vld [vmem:[#allocation10 + $0x404] ss:$36 sps:$4 sm:$0xff]   ;;  %v7604_v11 = vld [vmem:[#allocation10 + $0x40c] ss:$36 sps:$4 sm:$0xff]  }
 0x10e   :  { %10363 = vst [vmem:[#allocation95_spill] sm:$0xff] %v7604_v11  ;;  %v7608_v29 = vld [vmem:[#allocation10 + $0x400] ss:$36 sps:$4 sm:$0xff]  }
 0x10f   :  { %10364 = vst [vmem:[#allocation96_spill] sm:$0xff] %v7608_v29 }
 0x110   :  { %1194 = vmatpush1.bf16.msra.mxu0 %v7584_v4  ;;  %1237 = vmatpush1.bf16.msra.mxu1 %v7586_v17  ;;  %v7610_v4 = vld [vmem:[#allocation10 + $0x408] ss:$36 sps:$4 sm:$0xff]  }
 0x111   :  { %1195 = vmatprep.subr.bf16.mxu0 %v7590_v6  ;;  %1238 = vmatprep.subr.bf16.mxu1 %v7592_v7  ;;  %v7614_v17 = vld [vmem:[#allocation10 + $0x44c] ss:$36 sps:$4 sm:$0xff]   ;;  %v7616_v6 = vld [vmem:[#allocation10 + $0x454] ss:$36 sps:$4 sm:$0xff]  }
 0x112   :  { %10365 = vst [vmem:[#allocation97_spill] sm:$0xff] %v7616_v6  ;;  %v7620_v7 = vld [vmem:[#allocation10 + $0x448] ss:$36 sps:$4 sm:$0xff]  }
 0x114   :  { %1196 = vmatpush1.bf16.msra.mxu0 %v7596_v12  ;;  %1239 = vmatpush1.bf16.msra.mxu1 %v7598_v9  ;;  %v7622_v12 = vld [vmem:[#allocation10 + $0x450] ss:$36 sps:$4 sm:$0xff]   ;;  %v7626_v9 = vld [vmem:[#allocation10 + $0x260] ss:$36 sps:$4 sm:$0xff]  }
 0x115   :  { %1197 = vmatprep.subr.bf16.mxu0 %v7602_v5  ;;  %1240 = vmatprep.subr.bf16.mxu1 %v7604_v11  ;;  %10366 = vst [vmem:[#allocation98_spill] sm:$0xff] %v7622_v12  ;;  %10367 = vst [vmem:[#allocation99_spill] sm:$0xff] %v7626_v9  ;;  %v7630_v11 = vld [vmem:[#allocation10 + $0x20] ss:$36 sps:$4 sm:$0xff]  }
 0x118   :  { %1198 = vmatpush1.bf16.msra.mxu0 %v7608_v29  ;;  %1241 = vmatpush1.bf16.msra.mxu1 %v7610_v4  ;;  %v7633_v29 = vld [vmem:[#allocation10 + $0x2a8] ss:$36 sps:$4 sm:$0xff]  }
 0x119   :  { %1199 = vmatprep.subr.bf16.mxu0 %v7614_v17  ;;  %1242 = vmatprep.subr.bf16.mxu1 %v7616_v6  ;;  %v7639_v6 = vld [vmem:[#allocation10 + $0x68] ss:$36 sps:$4 sm:$0xff]  }
 0x11c   :  { %1200 = vmatpush1.bf16.msra.mxu0 %v7620_v7  ;;  %1243 = vmatpush1.bf16.msra.mxu1 %v7622_v12  ;;  %v7643_v12 = vld [vmem:[#allocation10 + $0x2f0] ss:$36 sps:$4 sm:$0xff]  }
 0x11d   :  { %5409 = vmatprep.subr.bf16.mxu0 %v7626_v9  ;;  %1440 = vmatprep.subr.bf16.mxu1 %v7217_v14  ;;  %v7648_v14 = vld [vmem:[#allocation10 + $0xb0] ss:$36 sps:$4 sm:$0xff]   ;;  %v7651_v9 = vld [vmem:[#allocation10 + $0x338] ss:$36 sps:$4 sm:$0xff]  }
 0x11f   :  { %1202 = vmatmul.mubr.bf16.vlgmr.msra.gmra.mrb[4].mxu0 %v7414_v23  ;;  %1245 = vmatmul.mubr.bf16.vlgmr.msra.gmra.mrb[4].mxu1 %v7414_v23 }
 0x120   :  { %5410 = vmatpush3.bf16.msra.mxu0 %v7630_v11  ;;  %1287 = vmatprep.mubr.bf16.mxu0 %v7343_v15  ;;  %v7656_v15 = vld [vmem:[#allocation10 + $0xf8] ss:$36 sps:$4 sm:$0xff]  }
 0x121   :  { %5411 = vmatprep.subr.bf16.mxu0 %v7633_v29  ;;  %1441 = vmatpush1.bf16.msra.mxu1 %v7220_v16  ;;  %v7659_v16 = vld [vmem:[#allocation10 + $0x380] ss:$36 sps:$4 sm:$0xff]  }
 0x122   :  { %1442 = vmatprep.subr.bf16.mxu1 %v7222_v18  ;;  %v7664_v18 = vld [vmem:[#allocation10 + $0x140] ss:$36 sps:$4 sm:$0xff]  }
 0x124   :  { %5412 = vmatpush3.bf16.msra.mxu0 %v7639_v6 }
 0x125   :  { %5413 = vmatprep.subr.bf16.mxu0 %v7643_v12  ;;  %1443 = vmatpush1.bf16.msra.mxu1 %v7225_v20  ;;  %v7667_v20 = vld [vmem:[#allocation10 + $0x3c8] ss:$36 sps:$4 sm:$0xff]  }
 0x126   :  { %1444 = vmatprep.subr.bf16.mxu1 %v7228_v22  ;;  %v7672_v22 = vld [vmem:[#allocation10 + $0x188] ss:$36 sps:$4 sm:$0xff]  }
 0x128   :  { %5414 = vmatpush3.bf16.msra.mxu0 %v7648_v14 }
 0x129   :  { %5415 = vmatprep.subr.bf16.mxu0 %v7651_v9  ;;  %1445 = vmatpush1.bf16.msra.mxu1 %v7230_v24  ;;  %v7675_v24 = vld [vmem:[#allocation10 + $0x410] ss:$36 sps:$4 sm:$0xff]  }
 0x12a   :  { %1446 = vmatprep.subr.bf16.mxu1 %v7233_v26  ;;  %v7680_v26 = vld [vmem:[#allocation10 + $0x1d0] ss:$36 sps:$4 sm:$0xff]  }
 0x12c   :  { %5416 = vmatpush3.bf16.msra.mxu0 %v7656_v15 }
 0x12d   :  { %5417 = vmatprep.subr.bf16.mxu0 %v7659_v16  ;;  %1447 = vmatpush1.bf16.msra.mxu1 %v7236_v28  ;;  %v7683_v28 = vld [vmem:[#allocation10 + $0x458] ss:$36 sps:$4 sm:$0xff]  }
 0x12e   :  { %1448 = vmatprep.subr.bf16.mxu1 %v7239_v30  ;;  %v7688_v30 = vld [vmem:[#allocation10 + $0x218] ss:$36 sps:$4 sm:$0xff]  }
 0x130   :  { %5418 = vmatpush3.bf16.msra.mxu0 %v7664_v18 }
 0x131   :  { %5419 = vmatprep.subr.bf16.mxu0 %v7667_v20  ;;  %1449 = vmatpush1.bf16.msra.mxu1 %v7244_v32  ;;  %v7694_v32 = vld [vmem:[#allocation10 + $0xc] ss:$36 sps:$4 sm:$0xff]  }
 0x132   :  { %1450 = vmatprep.subr.bf16.mxu1 %v7249_v34  ;;  %v7700_v34 = vld [vmem:[#allocation10 + $0x8] ss:$36 sps:$4 sm:$0xff]  }
 0x134   :  { %5420 = vmatpush3.bf16.msra.mxu0 %v7672_v22 }
 0x135   :  { %5421 = vmatprep.subr.bf16.mxu0 %v7675_v24  ;;  %1451 = vmatpush1.bf16.msra.mxu1 %v7255_v36  ;;  %v7703_v36 = vld [vmem:[#allocation10 + $0x54] ss:$36 sps:$4 sm:$0xff]  }
 0x136   :  { %1452 = vmatprep.subr.bf16.mxu1 %v7261_v38  ;;  %v7708_v38 = vld [vmem:[#allocation10 + $0x50] ss:$36 sps:$4 sm:$0xff]  }
 0x138   :  { %5422 = vmatpush3.bf16.msra.mxu0 %v7680_v26 }
 0x139   :  { %5423 = vmatprep.subr.bf16.mxu0 %v7683_v28  ;;  %1453 = vmatpush1.bf16.msra.mxu1 %v7267_v40  ;;  %v7711_v40 = vld [vmem:[#allocation10 + $0x9c] ss:$36 sps:$4 sm:$0xff]  }
 0x13a   :  { %1454 = vmatprep.subr.bf16.mxu1 %v7273_v42  ;;  %v7716_v42 = vld [vmem:[#allocation10 + $0x98] ss:$36 sps:$4 sm:$0xff]  }
 0x13c   :  { %5424 = vmatpush3.bf16.msra.mxu0 %v7688_v30 }
 0x13d   :  { %1483 = vmatprep.subr.bf16.mxu0 %v7694_v32  ;;  %1455 = vmatpush1.bf16.msra.mxu1 %v7279_v44  ;;  %v7719_v44 = vld [vmem:[#allocation10 + $0xe4] ss:$36 sps:$4 sm:$0xff]  }
 0x13e   :  { %1456 = vmatprep.subr.bf16.mxu1 %v7285_v46  ;;  %v7724_v46 = vld [vmem:[#allocation10 + $0xe0] ss:$36 sps:$4 sm:$0xff]  }
 0x13f   :  { %1288 = vmatmul.mubr.bf16.vlgmr.msra.gmra.mrb[8].mxu0 %v7414_v23 }
 0x140   :  { %1484 = vmatpush1.bf16.msra.mxu0 %v7700_v34 }
 0x141   :  { %1485 = vmatprep.subr.bf16.mxu0 %v7703_v36  ;;  %1457 = vmatpush1.bf16.msra.mxu1 %v7291_v48  ;;  %v10379_v48 = vld [vmem:[#allocation45_spill] sm:$0xff] }
 0x142   :  { %1458 = vmatprep.subr.bf16.mxu1 %v7297_v50  ;;  %v1296_v50 = vld [vmem:[#allocation8] sm:$0xff] }
 0x144   :  { %1486 = vmatpush1.bf16.msra.mxu0 %v7708_v38 }
 0x145   :  { %1487 = vmatprep.subr.bf16.mxu0 %v7711_v40  ;;  %1459 = vmatpush1.bf16.msra.mxu1 %v7303_v52  ;;  %v1300_v52 = vunpack.c.l.bf16 %v1296_v50 }
 0x146   :  { %1460 = vmatprep.subr.bf16.mxu1 %v7309_v54 }
 0x148   :  { %1488 = vmatpush1.bf16.msra.mxu0 %v7716_v42 }
 0x149   :  { %1489 = vmatprep.subr.bf16.mxu0 %v7719_v44  ;;  %1461 = vmatpush1.bf16.msra.mxu1 %v7320_v58 }
 0x14a   :  { %1462 = vmatprep.subr.bf16.mxu1 %v7327_v60 }
 0x14c   :  { %1490 = vmatpush1.bf16.msra.mxu0 %v7724_v46 }
 0x14d   :  { %1491 = vmatprep.subr.bf16.mxu0 %v7242_v31  ;;  %1463 = vmatpush1.bf16.msra.mxu1 %v7335_v0  ;;  %v10368_v31 = vld [vmem:[#allocation34_spill] sm:$0xff] }
 0x14e   :  { %1464 = vmatprep.subr.bf16.mxu1 %v7341_v8 }
 0x150   :  { %1492 = vmatpush1.bf16.msra.mxu0 %v7246_v33  ;;  %v10369_v33 = vld [vmem:[#allocation35_spill] sm:$0xff] }
 0x151   :  { %1493 = vmatprep.subr.bf16.mxu0 %v7253_v35  ;;  %1465 = vmatpush1.bf16.msra.mxu1 %v7353_v21  ;;  %v10372_v35 = vld [vmem:[#allocation38_spill] sm:$0xff] }
 0x152   :  { %1466 = vmatprep.subr.bf16.mxu1 %v7359_v25 }
 0x154   :  { %1494 = vmatpush1.bf16.msra.mxu0 %v7259_v37  ;;  %v10373_v37 = vld [vmem:[#allocation39_spill] sm:$0xff] }
 0x155   :  { %1495 = vmatprep.subr.bf16.mxu0 %v7265_v39  ;;  %1467 = vmatpush1.bf16.msra.mxu1 %v7367_v57  ;;  %v10374_v39 = vld [vmem:[#allocation40_spill] sm:$0xff] }
 0x156   :  { %1468 = vmatprep.subr.bf16.mxu1 %v7373_v63 }
 0x158   :  { %1496 = vmatpush1.bf16.msra.mxu0 %v7269_v41  ;;  %v10375_v41 = vld [vmem:[#allocation41_spill] sm:$0xff] }
 0x159   :  { %1497 = vmatprep.subr.bf16.mxu0 %v7277_v43  ;;  %1469 = vmatpush1.bf16.msra.mxu1 %v7381_v3  ;;  %v10370_v3 = vld [vmem:[#allocation36_spill] sm:$0xff]  ;;  %v10376_v43 = vld [vmem:[#allocation42_spill] sm:$0xff] }
 0x15a   :  { %1470 = vmatprep.subr.bf16.mxu1 %v7387_v2  ;;  %v10371_v2 = vld [vmem:[#allocation37_spill] sm:$0xff] }
 0x15c   :  { %1498 = vmatpush1.bf16.msra.mxu0 %v7283_v45  ;;  %v10377_v45 = vld [vmem:[#allocation43_spill] sm:$0xff] }
 0x15d   :  { %1499 = vmatprep.subr.bf16.mxu0 %v7289_v47  ;;  %1471 = vmatpush1.bf16.msra.mxu1 %v7395_v27  ;;  %v10378_v47 = vld [vmem:[#allocation44_spill] sm:$0xff] }
 0x15e   :  { %1526 = vmatprep.subr.bf16.mxu1 %v7405_v56  ;;  %v1301_v56 = vunpack.c.h.bf16 %v1296_v50 }
 0x160   :  { %1500 = vmatpush1.bf16.msra.mxu0 %v7293_v49  ;;  %v10380_v49 = vld [vmem:[#allocation48_spill] sm:$0xff] }
 0x161   :  { %1501 = vmatprep.subr.bf16.mxu0 %v7301_v51  ;;  %v1298_v51 = vld [vmem:[#allocation8 + $0xc] sm:$0xff] }
 0x162   :  { %v1304_v23 = vunpack.c.h.bf16 %v1298_v51 }
 0x164   :  { %1502 = vmatpush1.bf16.msra.mxu0 %v7307_v53  ;;  %v1303_v53 = vunpack.c.l.bf16 %v1298_v51 }
 0x165   :  { %1503 = vmatprep.subr.bf16.mxu0 %v10368_v31 }
 0x168   :  { %1504 = vmatpush1.bf16.msra.mxu0 %v10369_v33 }
 0x169   :  { %1505 = vmatprep.subr.bf16.mxu0 %v10370_v3 }
 0x16c   :  { %1506 = vmatpush1.bf16.msra.mxu0 %v10371_v2 }
 0x16d   :  { %1507 = vmatprep.subr.bf16.mxu0 %v10372_v35 }
 0x170   :  { %1508 = vmatpush1.bf16.msra.mxu0 %v10373_v37 }
 0x171   :  { %1509 = vmatprep.subr.bf16.mxu0 %v10374_v39 }
 0x174   :  { %1510 = vmatpush1.bf16.msra.mxu0 %v10375_v41 }
 0x175   :  { %1511 = vmatprep.subr.bf16.mxu0 %v10376_v43 }
 0x178   :  { %1512 = vmatpush1.bf16.msra.mxu0 %v10377_v45 }
 0x179   :  { %1513 = vmatprep.subr.bf16.mxu0 %v10378_v47 }
 0x17c   :  { %1514 = vmatpush1.bf16.msra.mxu0 %v10379_v48 }
 0x17d   :  { %1569 = vmatprep.subr.bf16.mxu0 %v10380_v49  ;;  %v1297_v49 = vld [vmem:[#allocation8 + $0x8] ss:$12 sps:$4 sm:$0xff]  }
 0x1b2   :  { %v1117_v54 = vpop.f32.mrb[0].mxu0  ;;  %v1160_v58 = vpop.f32.mrb[0].mxu1 }
 0x1b3   :  { %v1306_v60 = vadd.f32 %v1300_v52, %v1117_v54  ;;  %v1119_v0 = vpop.f32.mrb[1].mxu0  ;;  %v1162_v8 = vpop.f32.mrb[1].mxu1  ;;  %v1302_v52 = vunpack.c.l.bf16 %v1297_v49 }
 0x1b4   :  { %v1121_v21 = vpop.f32.mrb[2].mxu0  ;;  %v1164_v25 = vpop.f32.mrb[2].mxu1  ;;  %v1307_v33 = vadd.f32 %v1301_v56, %v1119_v0  ;;  %v1305_v0 = vunpack.c.h.bf16 %v1297_v49 }
 0x1b5   :  { %v5193_v57 = vmul.f32 -1.442695, %v1306_v60  ;;  %v1308_v63 = vadd.f32 %v1303_v53, %v1121_v21  ;;  %v1123_v27 = vpop.f32.mrb[3].mxu0  ;;  %v1166_v31 = vpop.f32.mrb[3].mxu1  ;;  %v10381_v53 = vld [vmem:[#allocation32_spill] sm:$0xff] }
 0x1b6   :  { %v1309_v2 = vadd.f32 %v1304_v23, %v1123_v27  ;;  %v5194_v35 = vmul.f32 -1.442695, %v1307_v33  ;;  %v1334_v54 = vadd.f32 %v10381_v53, %v1160_v58  ;;  %v1335_v21 = vadd.f32 %v10381_v53, %v1164_v25  ;;  %v10383_v25 = vld [vmem:[#allocation47_spill] sm:$0xff] }
 0x1b7   :  { %5842 = vpow2.f32 %v5193_v57  ;;  %v5195_v3 = vmul.f32 -1.442695, %v1308_v63 }
 0x1b8   :  { %v5196_v37 = vmul.f32 -1.442695, %v1309_v2 }
 0x1b9   :  { %5844 = vpow2.f32 %v5195_v3 }
 0x1ba   :  { %5846 = vpow2.f32 %v5194_v35 }
 0x1bb   :  { %5848 = vpow2.f32 %v5196_v37 }
 0x1c1   :  { %v5843_v39 = vpop.eup %5842 }
 0x1c2   :  { %v1322_v41 = vadd.f32 1.0, %v5843_v39  ;;  %v10382_v39 = vld [vmem:[#allocation46_spill] sm:$0xff] }
 0x1c3   :  { %v5845_v43 = vpop.eup %5844 }
 0x1c4   :  { %5850 = vrcp.f32 %v1322_v41  ;;  %v1324_v45 = vadd.f32 1.0, %v5845_v43  ;;  %v5847_v47 = vpop.eup %5846 }
 0x1c5   :  { %v5849_v48 = vpop.eup %5848  ;;  %v1323_v50 = vadd.f32 1.0, %v5847_v47 }
 0x1c6   :  { %5852 = vrcp.f32 %v1324_v45  ;;  %v1325_v51 = vadd.f32 1.0, %v5849_v48 }
 0x1c7   :  { %5854 = vrcp.f32 %v1323_v50  ;;  %v10384_v50 = vld [vmem:[#allocation29_spill] sm:$0xff] }
 0x1c8   :  { %5856 = vrcp.f32 %v1325_v51  ;;  %v1375_v51 = vadd.f32 %v1162_v8, %v10384_v50 }
 0x1ce   :  { %v5851_v56 = vpop.eup %5850 }
 0x1cf   :  { %v1336_v60 = vmul.f32 %v5851_v56, %v1334_v54  ;;  %v1378_v56 = vadd.f32 %v1166_v31, %v10384_v50 }
 0x1d0   :  { %v5853_v23 = vpop.eup %5852 }
 0x1d1   :  { %v1338_v57 = vadd.f32 %v1336_v60, %v1302_v52  ;;  %v1337_v63 = vmul.f32 %v5853_v23, %v1335_v21  ;;  %v5855_v33 = vpop.eup %5854  ;;  %v10385_v60 = vld [vmem:[#allocation30_spill] sm:$0xff] }
 0x1d2   :  { %v5857_v3 = vpop.eup %5856  ;;  %v1345_v2 = vsub.f32 1.0, %v5855_v33  ;;  %v1349_v58 = vmul.f32 %v5855_v33, %v10382_v39 }
 0x1d3   :  { %5858 = vtanh.f32 %v1338_v57  ;;  %v1339_v27 = vadd.f32 %v1337_v63, %v1305_v0  ;;  %v1346_v41 = vsub.f32 1.0, %v5857_v3  ;;  %v1350_v48 = vmul.f32 %v5857_v3, %v10383_v25 }
 0x1d5   :  { %5860 = vtanh.f32 %v1339_v27 }
 0x1dd   :  { %v5859_v35 = vpop.eup %5858 }
 0x1de   :  { %v1347_v37 = vmul.f32 %v5859_v35, %v1345_v2 }
 0x1df   :  { %v5861_v43 = vpop.eup %5860 }
 0x1e0   :  { %v7765_v45 = vadd.f32 %v1349_v58, %v1347_v37  ;;  %v1348_v47 = vmul.f32 %v5861_v43, %v1346_v41 }
 0x1e2   :  { %v7768_v49 = vadd.f32 %v1350_v48, %v1348_v47 }
 0x1f2   :  { %v1203_v52 = vpop.f32.mrb[4].mxu0  ;;  %v1246_v54 = vpop.f32.mrb[4].mxu1 }
 0x1f3   :  { %v1376_v0 = vadd.f32 %v1203_v52, %v10385_v60  ;;  %v1381_v21 = vadd.f32 %v1375_v51, %v1246_v54  ;;  %v1205_v23 = vpop.f32.mrb[5].mxu0  ;;  %v1248_v57 = vpop.f32.mrb[5].mxu1 }
 0x1f4   :  { %v1207_v63 = vpop.f32.mrb[6].mxu0  ;;  %v1250_v27 = vpop.f32.mrb[6].mxu1 }
 0x1f5   :  { %v1382_v33 = vadd.f32 %v1376_v0, %v1248_v57  ;;  %v1379_v2 = vadd.f32 %v1207_v63, %v10385_v60  ;;  %v1383_v35 = vadd.f32 %v1378_v56, %v1250_v27  ;;  %v1209_v3 = vpop.f32.mrb[7].mxu0  ;;  %v1252_v37 = vpop.f32.mrb[7].mxu1  ;;  %v5201_v41 = vmul.f32 -1.442695, %v1381_v21 }
 0x1f7   :  { %v1384_v58 = vadd.f32 %v1379_v2, %v1252_v37  ;;  %v5203_v8 = vmul.f32 -1.442695, %v1383_v35  ;;  %5862 = vpow2.f32 %v5201_v41  ;;  %v5202_v43 = vmul.f32 -1.442695, %v1382_v33  ;;  %v10386_v37 = vld [vmem:[#allocation33_spill] sm:$0xff] }
 0x1f9   :  { %5864 = vpow2.f32 %v5203_v8  ;;  %v5204_v31 = vmul.f32 -1.442695, %v1384_v58  ;;  %v10387_v8 = vld [vmem:[#allocation31_spill] sm:$0xff] }
 0x1fa   :  { %5866 = vpow2.f32 %v5202_v43  ;;  %v1377_v43 = vadd.f32 %v1205_v23, %v10387_v8 }
 0x1fb   :  { %5868 = vpow2.f32 %v5204_v31 }
 0x201   :  { %v5863_v47 = vpop.eup %5862 }
 0x202   :  { %v1397_v51 = vadd.f32 1.0, %v5863_v47 }
 0x203   :  { %v5865_v48 = vpop.eup %5864 }
 0x204   :  { %v1399_v52 = vadd.f32 1.0, %v5865_v48  ;;  %5870 = vrcp.f32 %v1397_v51  ;;  %v5867_v54 = vpop.eup %5866  ;;  %v1380_v51 = vadd.f32 %v1209_v3, %v10387_v8 }
 0x205   :  { %v5869_v56 = vpop.eup %5868  ;;  %v1398_v63 = vadd.f32 1.0, %v5867_v54 }
 0x206   :  { %5872 = vrcp.f32 %v1399_v52  ;;  %v1400_v35 = vadd.f32 1.0, %v5869_v56 }
 0x207   :  { %5874 = vrcp.f32 %v1398_v63  ;;  %v1360_v63 = vpop.permute.xlu1 %1359 }
 0x208   :  { %5876 = vrcp.f32 %v1400_v35  ;;  %vm1362_vm0 = vcmp.eq.s32.totalorder %v1360_v63, 1  ;;  %v6171_v35 = vld [vmem:[#allocation2 + $0x18] sm:$0xff]  ;;  %v10399_v63 = vld [vmem:[#allocation60_spill] sm:$0xff] }
 0x20e   :  { %v5871_v41 = vpop.eup %5870 }
 0x210   :  { %v5873_v48 = vpop.eup %5872 }
 0x211   :  { %v5875_v56 = vpop.eup %5874 }
 0x212   :  { %v5425_v0 = vpop.f32.mrb[8].mxu0 }
 0x213   :  { %v5426_v57 = vpop.f32.mrb[9].mxu0 }
 0x214   :  { %v5427_v27 = vadd.f32 %v5426_v57, %v5425_v0  ;;  %v5428_v21 = vpop.f32.mrb[10].mxu0  ;;  %v5630_v57 = vpop.permute.xlu0 %5629 }
 0x215   :  { %v5429_v2 = vpop.f32.mrb[11].mxu0  ;;  %v5632_v60 = vunpack.i.h.bf16 %v5630_v57  ;;  %v5631_v23 = vunpack.i.l.bf16 %v5630_v57  ;;  %v10394_v57 = vld [vmem:[#allocation55_spill] sm:$0xff] }
 0x216   :  { %v1409_v33 = vadd.f32 %v5427_v27, %v10386_v37  ;;  %v5430_v58 = vadd.f32 %v5429_v2, %v5428_v21  ;;  %v5877_v27 = vpop.eup %5876  ;;  %v1417_v21 = vsub.f32 1.0, %v5875_v56 }
 0x217   :  { %vm1434_vm1 = vcmp.eq.s32.totalorder %v5632_v60, 1  ;;  %vm1433_vm2 = vcmp.eq.s32.totalorder %v5631_v23, 1  ;;  %v10392_v60 = vld [vmem:[#allocation53_spill] sm:$0xff]  ;;  %v10398_v23 = vld [vmem:[#allocation59_spill] sm:$0xff] }
 0x218   :  { %v1411_v31 = vmul.f32 %v5871_v41, %v1409_v33  ;;  %v1410_v47 = vadd.f32 %v5430_v58, %v10386_v37  ;;  %v6170_v33 = vld [vmem:[#allocation2 + $0x8] sm:$0xff]  ;;  %v1418_v58 = vsub.f32 1.0, %v5877_v27  ;;  %v1357_v3 = vpop.permute.xlu0 %1356 }
 0x219   :  { %v1421_v41 = vmul.f32 %v6170_v33, %v5875_v56  ;;  %vm1361_vm3 = vcmp.eq.s32.totalorder %v1357_v3, 1  ;;  %v10393_v56 = vld [vmem:[#allocation54_spill] sm:$0xff]  ;;  %v10403_v3 = vld [vmem:[#allocation64_spill] sm:$0xff] }
 0x21a   :  { %v1413_v52 = vadd.f32 %v1411_v31, %v1377_v43  ;;  %v1412_v54 = vmul.f32 %v5873_v48, %v1410_v47  ;;  %v1422_v43 = vmul.f32 %v6171_v35, %v5877_v27  ;;  %v10395_v27 = vld [vmem:[#allocation56_spill] sm:$0xff] }
 0x21c   :  { %5878 = vtanh.f32 %v1413_v52  ;;  %v1414_v0 = vadd.f32 %v1412_v54, %v1380_v51  ;;  %v7780_v51 = vsel %vm1362_vm0, %v7768_v49, %v10383_v25  ;;  %v10388_v25 = vld [vmem:[#allocation49_spill] sm:$0xff]  ;;  %v10391_v49 = vld [vmem:[#allocation52_spill] sm:$0xff] }
 0x21e   :  { %5880 = vtanh.f32 %v1414_v0  ;;  %v7788_v0 = vsel %vm1361_vm3, %v7765_v45, %v10382_v39  ;;  %v10389_v39 = vld [vmem:[#allocation50_spill] sm:$0xff]  ;;  %v10390_v45 = vld [vmem:[#allocation51_spill] sm:$0xff] }
 0x226   :  { %v5879_v2 = vpop.eup %5878 }
 0x227   :  { %v1419_v37 = vmul.f32 %v5879_v2, %v1417_v21  ;;  %v10396_v21 = vld [vmem:[#allocation57_spill] sm:$0xff]  ;;  %v10397_v2 = vld [vmem:[#allocation58_spill] sm:$0xff] }
 0x228   :  { %v5881_v50 = vpop.eup %5880 }
 0x229   :  { %v1423_v31 = vadd.f32 %v1421_v41, %v1419_v37  ;;  %v1420_v47 = vmul.f32 %v5881_v50, %v1418_v58  ;;  %v7796_v50 = vpack.c.bf16 %v7780_v51, %v7788_v0  ;;  %v10401_v41 = vld [vmem:[#allocation62_spill] sm:$0xff]  ;;  %v10402_v58 = vld [vmem:[#allocation63_spill] sm:$0xff] }
 0x22b   :  { %v1424_v48 = vadd.f32 %v1422_v43, %v1420_v47  ;;  %v7782_v52 = vsel %vm1433_vm2, %v1423_v31, %v6170_v33  ;;  %v10400_v33 = vld [vmem:[#allocation61_spill] sm:$0xff]  ;;  %v10405_v43 = vld [vmem:[#allocation66_spill] sm:$0xff]  ;;  %v10406_v31 = vld [vmem:[#allocation67_spill] sm:$0xff] }
 0x22c   :  { %v10407_v47 = vld [vmem:[#allocation68_spill] sm:$0xff] }
 0x22d   :  { %v7784_v54 = vsel %vm1434_vm1, %v1424_v48, %v6171_v35  ;;  %v10404_v35 = vld [vmem:[#allocation65_spill] sm:$0xff] }
 0x22e   :  { %v7792_v37 = vpack.c.bf16 %v7784_v54, %v7782_v52  ;;  %v10408_v48 = vld [vmem:[#allocation69_spill] sm:$0xff] }
 0x230   :  { %1472 = vmatprep.mubr.bf16.mxu1 %v7792_v37  ;;  %1515 = vmatprep.mubr.bf16.mxu0 %v7792_v37 }
 0x231   :  { %1473 = vmatmul.mubr.bf16.vlgmr.msra.gmra.mrb[8].mxu1 %v7796_v50  ;;  %1516 = vmatmul.mubr.bf16.vlgmr.msra.gmra.mrb[12].mxu0 %v7796_v50 }
 0x232   :  { %1527 = vmatpush1.bf16.msra.mxu1 %v10388_v25  ;;  %1570 = vmatpush1.bf16.msra.mxu0 %v10389_v39  ;;  %v10409_v25 = vld [vmem:[#allocation70_spill] sm:$0xff]  ;;  %v10410_v39 = vld [vmem:[#allocation71_spill] sm:$0xff] }
 0x233   :  { %1558 = vmatprep.mubr.bf16.mxu1 %v7792_v37  ;;  %1601 = vmatprep.mubr.bf16.mxu0 %v7792_v37 }
 0x234   :  { %1528 = vmatprep.subr.bf16.mxu1 %v10390_v45  ;;  %1571 = vmatprep.subr.bf16.mxu0 %v10391_v49  ;;  %v10411_v45 = vld [vmem:[#allocation72_spill] sm:$0xff]  ;;  %v10412_v49 = vld [vmem:[#allocation73_spill] sm:$0xff] }
 0x236   :  { %1529 = vmatpush1.bf16.msra.mxu1 %v10392_v60  ;;  %1572 = vmatpush1.bf16.msra.mxu0 %v10393_v56  ;;  %v10413_v60 = vld [vmem:[#allocation74_spill] sm:$0xff] }
 0x237   :  { %1530 = vmatprep.subr.bf16.mxu1 %v10394_v57  ;;  %1573 = vmatprep.subr.bf16.mxu0 %v10395_v27  ;;  %v10417_v56 = vld [vmem:[#allocation78_spill] sm:$0xff]  ;;  %v10418_v57 = vld [vmem:[#allocation79_spill] sm:$0xff] }
 0x238   :  { %v10421_v27 = vld [vmem:[#allocation82_spill] sm:$0xff] }
 0x23a   :  { %1531 = vmatpush1.bf16.msra.mxu1 %v10396_v21  ;;  %1574 = vmatpush1.bf16.msra.mxu0 %v10397_v2  ;;  %v10422_v21 = vld [vmem:[#allocation83_spill] sm:$0xff]  ;;  %v10425_v2 = vld [vmem:[#allocation86_spill] sm:$0xff] }
 0x23b   :  { %1532 = vmatprep.subr.bf16.mxu1 %v10398_v23  ;;  %1575 = vmatprep.subr.bf16.mxu0 %v10399_v63  ;;  %v10427_v23 = vld [vmem:[#allocation88_spill] sm:$0xff]  ;;  %v10428_v63 = vld [vmem:[#allocation89_spill] sm:$0xff] }
 0x23e   :  { %1533 = vmatpush1.bf16.msra.mxu1 %v10400_v33  ;;  %1576 = vmatpush1.bf16.msra.mxu0 %v10401_v41  ;;  %v10429_v33 = vld [vmem:[#allocation90_spill] sm:$0xff]  ;;  %v10430_v41 = vld [vmem:[#allocation91_spill] sm:$0xff] }
 0x23f   :  { %1534 = vmatprep.subr.bf16.mxu1 %v10402_v58  ;;  %1577 = vmatprep.subr.bf16.mxu0 %v10403_v3  ;;  %v10431_v58 = vld [vmem:[#allocation92_spill] sm:$0xff]  ;;  %v10432_v3 = vld [vmem:[#allocation93_spill] sm:$0xff] }
 0x242   :  { %1535 = vmatpush1.bf16.msra.mxu1 %v10404_v35  ;;  %1578 = vmatpush1.bf16.msra.mxu0 %v10405_v43  ;;  %v10433_v35 = vld [vmem:[#allocation94_spill] sm:$0xff]  ;;  %v10434_v43 = vld [vmem:[#allocation95_spill] sm:$0xff] }
 0x243   :  { %1536 = vmatprep.subr.bf16.mxu1 %v10406_v31  ;;  %1579 = vmatprep.subr.bf16.mxu0 %v10407_v47  ;;  %v10435_v31 = vld [vmem:[#allocation96_spill] sm:$0xff]  ;;  %v10436_v47 = vld [vmem:[#allocation97_spill] sm:$0xff] }
 0x246   :  { %1537 = vmatpush1.bf16.msra.mxu1 %v7491_v13  ;;  %1580 = vmatpush1.bf16.msra.mxu0 %v7493_v61  ;;  %v10414_v13 = vld [vmem:[#allocation75_spill] sm:$0xff]  ;;  %v10415_v61 = vld [vmem:[#allocation76_spill] sm:$0xff] }
 0x247   :  { %1538 = vmatprep.subr.bf16.mxu1 %v10408_v48  ;;  %1581 = vmatprep.subr.bf16.mxu0 %v10409_v25  ;;  %v10437_v48 = vld [vmem:[#allocation98_spill] sm:$0xff]  ;;  %v10438_v25 = vld [vmem:[#allocation99_spill] sm:$0xff] }
 0x24a   :  { %1539 = vmatpush1.bf16.msra.mxu1 %v7508_v1  ;;  %1582 = vmatpush1.bf16.msra.mxu0 %v10410_v39  ;;  %v10416_v1 = vld [vmem:[#allocation77_spill] sm:$0xff] }
 0x24b   :  { %1540 = vmatprep.subr.bf16.mxu1 %v10411_v45  ;;  %1583 = vmatprep.subr.bf16.mxu0 %v10412_v49  ;;  %v7867_v39 = vld [vmem:[#allocation10 + $0x4] ss:$36 sps:$4 sm:$0xff]   ;;  %v7984_v45 = vld [vmem:[#allocation10 + $0x170] ss:$36 sps:$4 sm:$0xff]   ;;  %v7987_v49 = vld [vmem:[#allocation10 + $0x1bc] ss:$36 sps:$4 sm:$0xff]  }
 0x24e   :  { %1541 = vmatpush1.bf16.msra.mxu1 %v7522_v59  ;;  %1584 = vmatpush1.bf16.msra.mxu0 %v7524_v55  ;;  %v10419_v59 = vld [vmem:[#allocation80_spill] sm:$0xff]  ;;  %v10420_v55 = vld [vmem:[#allocation81_spill] sm:$0xff] }
 0x24f   :  { %1542 = vmatprep.subr.bf16.mxu1 %v10413_v60  ;;  %1585 = vmatprep.subr.bf16.mxu0 %v10414_v13  ;;  %v7990_v60 = vld [vmem:[#allocation10 + $0x3a8] ss:$36 sps:$4 sm:$0xff]   ;;  %v7993_v13 = vld [vmem:[#allocation10 + $0x3f4] ss:$36 sps:$4 sm:$0xff]  }
 0x252   :  { %1543 = vmatpush1.bf16.msra.mxu1 %v7534_v62  ;;  %1586 = vmatpush1.bf16.msra.mxu0 %v7536_v10  ;;  %v10423_v62 = vld [vmem:[#allocation84_spill] sm:$0xff]  ;;  %v10424_v10 = vld [vmem:[#allocation85_spill] sm:$0xff] }
 0x253   :  { %1544 = vmatprep.subr.bf16.mxu1 %v10415_v61  ;;  %1587 = vmatprep.subr.bf16.mxu0 %v7544_v19  ;;  %v10426_v19 = vld [vmem:[#allocation87_spill] sm:$0xff] }
 0x254   :  { %v7996_v61 = vld [vmem:[#allocation10 + $0x1b8] ss:$36 sps:$4 sm:$0xff]  }
 0x255   :  { %10439 = vst [vmem:[#allocation34_spill] sm:$0xff] %v7996_v61 }
 0x256   :  { %1545 = vmatpush1.bf16.msra.mxu1 %v10416_v1  ;;  %1588 = vmatpush1.bf16.msra.mxu0 %v10417_v56  ;;  %v7999_v1 = vld [vmem:[#allocation10 + $0x204] ss:$36 sps:$4 sm:$0xff]   ;;  %v8002_v56 = vld [vmem:[#allocation10 + $0x3f0] ss:$36 sps:$4 sm:$0xff]  }
 0x257   :  { %1546 = vmatprep.subr.bf16.mxu1 %v10418_v57  ;;  %1589 = vmatprep.subr.bf16.mxu0 %v10419_v59  ;;  %10440 = vst [vmem:[#allocation35_spill] sm:$0xff] %v7999_v1  ;;  %10441 = vst [vmem:[#allocation36_spill] sm:$0xff] %v8002_v56  ;;  %v8005_v57 = vld [vmem:[#allocation10 + $0x43c] ss:$36 sps:$4 sm:$0xff]  }
 0x258   :  { %10442 = vst [vmem:[#allocation37_spill] sm:$0xff] %v8005_v57  ;;  %v8008_v59 = vld [vmem:[#allocation10 + $0x200] ss:$36 sps:$4 sm:$0xff]  }
 0x259   :  { %10443 = vst [vmem:[#allocation38_spill] sm:$0xff] %v8008_v59 }
 0x25a   :  { %1547 = vmatpush1.bf16.msra.mxu1 %v10420_v55  ;;  %1590 = vmatpush1.bf16.msra.mxu0 %v10421_v27  ;;  %v8011_v55 = vld [vmem:[#allocation10 + $0x24c] ss:$36 sps:$4 sm:$0xff]   ;;  %v8014_v27 = vld [vmem:[#allocation10 + $0x438] ss:$36 sps:$4 sm:$0xff]  }
 0x25b   :  { %1548 = vmatprep.subr.bf16.mxu1 %v10422_v21  ;;  %1591 = vmatprep.subr.bf16.mxu0 %v10423_v62  ;;  %10444 = vst [vmem:[#allocation39_spill] sm:$0xff] %v8011_v55  ;;  %10445 = vst [vmem:[#allocation40_spill] sm:$0xff] %v8014_v27  ;;  %v8017_v21 = vld [vmem:[#allocation10 + $0x14] ss:$36 sps:$4 sm:$0xff]   ;;  %v8020_v62 = vld [vmem:[#allocation10 + $0x248] ss:$36 sps:$4 sm:$0xff]  }
 0x25c   :  { %10446 = vst [vmem:[#allocation41_spill] sm:$0xff] %v8017_v21  ;;  %10447 = vst [vmem:[#allocation42_spill] sm:$0xff] %v8020_v62 }
 0x25e   :  { %1549 = vmatpush1.bf16.msra.mxu1 %v10424_v10  ;;  %1592 = vmatpush1.bf16.msra.mxu0 %v10425_v2  ;;  %v8023_v10 = vld [vmem:[#allocation10 + $0x294] ss:$36 sps:$4 sm:$0xff]  }
 0x25f   :  { %1550 = vmatprep.subr.bf16.mxu1 %v10426_v19  ;;  %1593 = vmatprep.subr.bf16.mxu0 %v10427_v23  ;;  %10448 = vst [vmem:[#allocation43_spill] sm:$0xff] %v8023_v10  ;;  %v8026_v2 = vld [vmem:[#allocation10 + $0x290] ss:$36 sps:$4 sm:$0xff]   ;;  %v8029_v19 = vld [vmem:[#allocation10 + $0x2dc] ss:$36 sps:$4 sm:$0xff]  }
 0x260   :  { %10449 = vst [vmem:[#allocation44_spill] sm:$0xff] %v8026_v2  ;;  %10450 = vst [vmem:[#allocation45_spill] sm:$0xff] %v8029_v19  ;;  %v8032_v23 = vld [vmem:[#allocation10 + $0x2d8] ss:$36 sps:$4 sm:$0xff]  }
 0x261   :  { %10451 = vst [vmem:[#allocation48_spill] sm:$0xff] %v8032_v23 }
 0x262   :  { %1551 = vmatpush1.bf16.msra.mxu1 %v10428_v63  ;;  %1594 = vmatpush1.bf16.msra.mxu0 %v10429_v33  ;;  %v8035_v63 = vld [vmem:[#allocation10 + $0x324] ss:$36 sps:$4 sm:$0xff]  }
 0x263   :  { %1552 = vmatprep.subr.bf16.mxu1 %v10430_v41  ;;  %1595 = vmatprep.subr.bf16.mxu0 %v10431_v58  ;;  %10452 = vst [vmem:[#allocation46_spill] sm:$0xff] %v8035_v63  ;;  %v8038_v33 = vld [vmem:[#allocation10 + $0x320] ss:$36 sps:$4 sm:$0xff]   ;;  %v8041_v41 = vld [vmem:[#allocation10 + $0x36c] ss:$36 sps:$4 sm:$0xff]  }
 0x264   :  { %10453 = vst [vmem:[#allocation47_spill] sm:$0xff] %v8038_v33  ;;  %10454 = vst [vmem:[#allocation49_spill] sm:$0xff] %v8041_v41  ;;  %v8044_v58 = vld [vmem:[#allocation10 + $0x368] ss:$36 sps:$4 sm:$0xff]  }
 0x265   :  { %10455 = vst [vmem:[#allocation50_spill] sm:$0xff] %v8044_v58 }
 0x266   :  { %1553 = vmatpush1.bf16.msra.mxu1 %v10432_v3  ;;  %1596 = vmatpush1.bf16.msra.mxu0 %v10433_v35  ;;  %v8047_v3 = vld [vmem:[#allocation10 + $0x3b4] ss:$36 sps:$4 sm:$0xff]  }
 0x267   :  { %1554 = vmatprep.subr.bf16.mxu1 %v7602_v5  ;;  %1597 = vmatprep.subr.bf16.mxu0 %v10434_v43  ;;  %v7875_v5 = vld [vmem:[#allocation10] ss:$36 sps:$4 sm:$0xff]   ;;  %10456 = vst [vmem:[#allocation51_spill] sm:$0xff] %v8047_v3  ;;  %v8050_v35 = vld [vmem:[#allocation10 + $0x3b0] ss:$36 sps:$4 sm:$0xff]  }
 0x268   :  { %10457 = vst [vmem:[#allocation52_spill] sm:$0xff] %v8050_v35  ;;  %v8053_v43 = vld [vmem:[#allocation10 + $0x3fc] ss:$36 sps:$4 sm:$0xff]  }
 0x269   :  { %10458 = vst [vmem:[#allocation53_spill] sm:$0xff] %v8053_v43 }
 0x26a   :  { %1555 = vmatpush1.bf16.msra.mxu1 %v10435_v31  ;;  %1598 = vmatpush1.bf16.msra.mxu0 %v7610_v4  ;;  %v7878_v4 = vld [vmem:[#allocation10 + $0x4c] ss:$36 sps:$4 sm:$0xff]   ;;  %v8056_v31 = vld [vmem:[#allocation10 + $0x3f8] ss:$36 sps:$4 sm:$0xff]  }
 0x26b   :  { %1556 = vmatprep.subr.bf16.mxu1 %v7614_v17  ;;  %1599 = vmatprep.subr.bf16.mxu0 %v10436_v47  ;;  %v7883_v17 = vld [vmem:[#allocation10 + $0x48] ss:$36 sps:$4 sm:$0xff]   ;;  %10459 = vst [vmem:[#allocation54_spill] sm:$0xff] %v8056_v31 }
 0x26c   :  { %v8059_v47 = vld [vmem:[#allocation10 + $0x444] ss:$36 sps:$4 sm:$0xff]  }
 0x26d   :  { %10460 = vst [vmem:[#allocation55_spill] sm:$0xff] %v8059_v47 }
 0x26e   :  { %1557 = vmatpush1.bf16.msra.mxu1 %v7620_v7  ;;  %1600 = vmatpush1.bf16.msra.mxu0 %v10437_v48  ;;  %v7894_v7 = vld [vmem:[#allocation10 + $0xdc] ss:$36 sps:$4 sm:$0xff]  }
 0x26f   :  { %5431 = vmatprep.subr.bf16.mxu1 %v10438_v25  ;;  %1794 = vmatprep.subr.bf16.mxu0 %v7867_v39  ;;  %v8062_v48 = vld [vmem:[#allocation10 + $0x440] ss:$36 sps:$4 sm:$0xff]  }
 0x270   :  { %10461 = vst [vmem:[#allocation56_spill] sm:$0xff] %v8062_v48  ;;  %v8065_v25 = vld [vmem:[#allocation10 + $0x1c] ss:$36 sps:$4 sm:$0xff]  }
 0x271   :  { %1559 = vmatmul.mubr.bf16.vlgmr.msra.gmra.mrb[12].mxu1 %v7796_v50  ;;  %1602 = vmatmul.mubr.bf16.vlgmr.msra.gmra.mrb[16].mxu0 %v7796_v50  ;;  %10462 = vst [vmem:[#allocation57_spill] sm:$0xff] %v8065_v25 }
 0x272   :  { %5432 = vmatpush3.bf16.msra.mxu1 %v7630_v11  ;;  %1644 = vmatprep.mubr.bf16.mxu1 %v7792_v37  ;;  %v7886_v11 = vld [vmem:[#allocation10 + $0x94] ss:$36 sps:$4 sm:$0xff]  }
 0x273   :  { %5433 = vmatprep.subr.bf16.mxu1 %v7633_v29  ;;  %1795 = vmatpush1.bf16.msra.mxu0 %v7875_v5  ;;  %v7891_v29 = vld [vmem:[#allocation10 + $0x90] ss:$36 sps:$4 sm:$0xff]  }
 0x274   :  { %1796 = vmatprep.subr.bf16.mxu0 %v7878_v4  ;;  %v7975_v37 = vld [vmem:[#allocation10 + $0x174] ss:$36 sps:$4 sm:$0xff]  }
 0x276   :  { %5434 = vmatpush3.bf16.msra.mxu1 %v7639_v6  ;;  %v7902_v6 = vld [vmem:[#allocation10 + $0x124] ss:$36 sps:$4 sm:$0xff]  }
 0x277   :  { %5435 = vmatprep.subr.bf16.mxu1 %v7643_v12  ;;  %1797 = vmatpush1.bf16.msra.mxu0 %v7883_v17  ;;  %v7899_v12 = vld [vmem:[#allocation10 + $0xd8] ss:$36 sps:$4 sm:$0xff]  }
 0x278   :  { %1798 = vmatprep.subr.bf16.mxu0 %v7886_v11 }
 0x27a   :  { %5436 = vmatpush3.bf16.msra.mxu1 %v7648_v14  ;;  %v7910_v14 = vld [vmem:[#allocation10 + $0x16c] ss:$36 sps:$4 sm:$0xff]  }
 0x27b   :  { %5437 = vmatprep.subr.bf16.mxu1 %v7651_v9  ;;  %1799 = vmatpush1.bf16.msra.mxu0 %v7891_v29  ;;  %v7907_v9 = vld [vmem:[#allocation10 + $0x120] ss:$36 sps:$4 sm:$0xff]  }
 0x27c   :  { %1800 = vmatprep.subr.bf16.mxu0 %v7894_v7 }
 0x27e   :  { %5438 = vmatpush3.bf16.msra.mxu1 %v7656_v15  ;;  %v7915_v15 = vld [vmem:[#allocation10 + $0x168] ss:$36 sps:$4 sm:$0xff]  }
 0x27f   :  { %5439 = vmatprep.subr.bf16.mxu1 %v7659_v16  ;;  %1801 = vmatpush1.bf16.msra.mxu0 %v7899_v12  ;;  %v7918_v16 = vld [vmem:[#allocation10 + $0x1b4] ss:$36 sps:$4 sm:$0xff]  }
 0x280   :  { %1802 = vmatprep.subr.bf16.mxu0 %v7902_v6 }
 0x282   :  { %5440 = vmatpush3.bf16.msra.mxu1 %v7664_v18  ;;  %v7923_v18 = vld [vmem:[#allocation10 + $0x1b0] ss:$36 sps:$4 sm:$0xff]  }
 0x283   :  { %5441 = vmatprep.subr.bf16.mxu1 %v7667_v20  ;;  %1803 = vmatpush1.bf16.msra.mxu0 %v7907_v9  ;;  %v7926_v20 = vld [vmem:[#allocation10 + $0x1fc] ss:$36 sps:$4 sm:$0xff]  }
 0x284   :  { %1804 = vmatprep.subr.bf16.mxu0 %v7910_v14 }
 0x286   :  { %5442 = vmatpush3.bf16.msra.mxu1 %v7672_v22  ;;  %v7931_v22 = vld [vmem:[#allocation10 + $0x1f8] ss:$36 sps:$4 sm:$0xff]  }
 0x287   :  { %5443 = vmatprep.subr.bf16.mxu1 %v7675_v24  ;;  %1805 = vmatpush1.bf16.msra.mxu0 %v7915_v15  ;;  %v7934_v24 = vld [vmem:[#allocation10 + $0x244] ss:$36 sps:$4 sm:$0xff]  }
 0x288   :  { %1806 = vmatprep.subr.bf16.mxu0 %v7918_v16 }
 0x28a   :  { %5444 = vmatpush3.bf16.msra.mxu1 %v7680_v26  ;;  %v7940_v26 = vld [vmem:[#allocation10 + $0x240] ss:$36 sps:$4 sm:$0xff]  }
 0x28b   :  { %5445 = vmatprep.subr.bf16.mxu1 %v7683_v28  ;;  %1807 = vmatpush1.bf16.msra.mxu0 %v7923_v18  ;;  %v7943_v28 = vld [vmem:[#allocation10 + $0x28c] ss:$36 sps:$4 sm:$0xff]  }
 0x28c   :  { %1808 = vmatprep.subr.bf16.mxu0 %v7926_v20 }
 0x28e   :  { %5446 = vmatpush3.bf16.msra.mxu1 %v7688_v30  ;;  %v7948_v30 = vld [vmem:[#allocation10 + $0x288] ss:$36 sps:$4 sm:$0xff]  }
 0x28f   :  { %1837 = vmatprep.subr.bf16.mxu1 %v7694_v32  ;;  %1809 = vmatpush1.bf16.msra.mxu0 %v7931_v22  ;;  %v7951_v32 = vld [vmem:[#allocation10 + $0x2d4] ss:$36 sps:$4 sm:$0xff]  }
 0x290   :  { %1810 = vmatprep.subr.bf16.mxu0 %v7934_v24 }
 0x291   :  { %1645 = vmatmul.mubr.bf16.vlgmr.msra.gmra.mrb[16].mxu1 %v7796_v50  ;;  %v7981_v50 = vld [vmem:[#allocation10 + $0x3ac] ss:$36 sps:$4 sm:$0xff]  }
 0x292   :  { %1838 = vmatpush1.bf16.msra.mxu1 %v7700_v34  ;;  %v7956_v34 = vld [vmem:[#allocation10 + $0x2d0] ss:$36 sps:$4 sm:$0xff]  }
 0x293   :  { %1839 = vmatprep.subr.bf16.mxu1 %v7703_v36  ;;  %1811 = vmatpush1.bf16.msra.mxu0 %v7940_v26  ;;  %v7959_v36 = vld [vmem:[#allocation10 + $0x31c] ss:$36 sps:$4 sm:$0xff]  }
 0x294   :  { %1812 = vmatprep.subr.bf16.mxu0 %v7943_v28 }
 0x296   :  { %1840 = vmatpush1.bf16.msra.mxu1 %v7708_v38  ;;  %v7963_v38 = vld [vmem:[#allocation10 + $0x12c] ss:$36 sps:$4 sm:$0xff]  }
 0x297   :  { %1841 = vmatprep.subr.bf16.mxu1 %v7711_v40  ;;  %1813 = vmatpush1.bf16.msra.mxu0 %v7948_v30  ;;  %v7966_v40 = vld [vmem:[#allocation10 + $0x318] ss:$36 sps:$4 sm:$0xff]  }
 0x298   :  { %1814 = vmatprep.subr.bf16.mxu0 %v7951_v32 }
 0x29a   :  { %1842 = vmatpush1.bf16.msra.mxu1 %v7716_v42  ;;  %v7969_v42 = vld [vmem:[#allocation10 + $0x364] ss:$36 sps:$4 sm:$0xff]  }
 0x29b   :  { %1843 = vmatprep.subr.bf16.mxu1 %v7719_v44  ;;  %1815 = vmatpush1.bf16.msra.mxu0 %v7956_v34  ;;  %v7972_v44 = vld [vmem:[#allocation10 + $0x128] ss:$36 sps:$4 sm:$0xff]  }
 0x29c   :  { %1816 = vmatprep.subr.bf16.mxu0 %v7959_v36 }
 0x29e   :  { %1844 = vmatpush1.bf16.msra.mxu1 %v7724_v46  ;;  %v7978_v46 = vld [vmem:[#allocation10 + $0x360] ss:$36 sps:$4 sm:$0xff]  }
 0x29f   :  { %1845 = vmatprep.subr.bf16.mxu1 %v7963_v38  ;;  %1817 = vmatpush1.bf16.msra.mxu0 %v7966_v40 }
 0x2a0   :  { %1818 = vmatprep.subr.bf16.mxu0 %v7969_v42 }
 0x2a2   :  { %1846 = vmatpush1.bf16.msra.mxu1 %v7972_v44 }
 0x2a3   :  { %1847 = vmatprep.subr.bf16.mxu1 %v7975_v37  ;;  %1819 = vmatpush1.bf16.msra.mxu0 %v7978_v46 }
 0x2a4   :  { %1820 = vmatprep.subr.bf16.mxu0 %v7981_v50 }
 0x2a6   :  { %1848 = vmatpush1.bf16.msra.mxu1 %v7984_v45 }
 0x2a7   :  { %1849 = vmatprep.subr.bf16.mxu1 %v7987_v49  ;;  %1821 = vmatpush1.bf16.msra.mxu0 %v7990_v60 }
 0x2a8   :  { %1822 = vmatprep.subr.bf16.mxu0 %v7993_v13 }
 0x2aa   :  { %1850 = vmatpush1.bf16.msra.mxu1 %v7996_v61 }
 0x2ab   :  { %1851 = vmatprep.subr.bf16.mxu1 %v7999_v1  ;;  %1823 = vmatpush1.bf16.msra.mxu0 %v8002_v56 }
 0x2ac   :  { %1824 = vmatprep.subr.bf16.mxu0 %v8005_v57 }
 0x2ae   :  { %1852 = vmatpush1.bf16.msra.mxu1 %v8008_v59 }
 0x2af   :  { %1853 = vmatprep.subr.bf16.mxu1 %v8011_v55  ;;  %1825 = vmatpush1.bf16.msra.mxu0 %v8014_v27 }
 0x2b0   :  { %1880 = vmatprep.subr.bf16.mxu0 %v8017_v21 }
 0x2b2   :  { %1854 = vmatpush1.bf16.msra.mxu1 %v8020_v62 }
 0x2b3   :  { %1855 = vmatprep.subr.bf16.mxu1 %v8023_v10 }
 0x2b6   :  { %1856 = vmatpush1.bf16.msra.mxu1 %v8026_v2 }
 0x2b7   :  { %1857 = vmatprep.subr.bf16.mxu1 %v8029_v19 }
 0x2ba   :  { %1858 = vmatpush1.bf16.msra.mxu1 %v8032_v23 }
 0x2bb   :  { %1859 = vmatprep.subr.bf16.mxu1 %v8035_v63 }
 0x2be   :  { %1860 = vmatpush1.bf16.msra.mxu1 %v8038_v33 }
 0x2bf   :  { %1861 = vmatprep.subr.bf16.mxu1 %v8041_v41 }
 0x2c2   :  { %1862 = vmatpush1.bf16.msra.mxu1 %v8044_v58 }
 0x2c3   :  { %1863 = vmatprep.subr.bf16.mxu1 %v8047_v3  ;;  %v1656_v3 = vld [vmem:[#allocation8 + $0x24] sm:$0xff] }
 0x2c4   :  { %v1662_v10 = vunpack.c.h.bf16 %v1656_v3 }
 0x2c6   :  { %1864 = vmatpush1.bf16.msra.mxu1 %v8050_v35  ;;  %v1654_v35 = vld [vmem:[#allocation8 + $0x18] sm:$0xff] }
 0x2c7   :  { %1865 = vmatprep.subr.bf16.mxu1 %v8053_v43  ;;  %v1658_v58 = vunpack.c.l.bf16 %v1654_v35  ;;  %v1661_v43 = vunpack.c.l.bf16 %v1656_v3  ;;  %v1659_v63 = vunpack.c.h.bf16 %v1654_v35 }
 0x2ca   :  { %1866 = vmatpush1.bf16.msra.mxu1 %v8056_v31 }
 0x2cb   :  { %1867 = vmatprep.subr.bf16.mxu1 %v8059_v47 }
 0x2ce   :  { %1868 = vmatpush1.bf16.msra.mxu1 %v8062_v48 }
 0x2cf   :  { %1923 = vmatprep.subr.bf16.mxu1 %v8065_v25 }
 0x304   :  { %v1474_v41 = vpop.f32.mrb[8].mxu1  ;;  %v1517_v33 = vpop.f32.mrb[12].mxu0 }
 0x305   :  { %v1664_v31 = vadd.f32 %v1658_v58, %v1474_v41  ;;  %v1476_v23 = vpop.f32.mrb[9].mxu1  ;;  %v1519_v19 = vpop.f32.mrb[13].mxu0 }
 0x306   :  { %v1478_v2 = vpop.f32.mrb[10].mxu1  ;;  %v1521_v47 = vpop.f32.mrb[14].mxu0  ;;  %v1665_v55 = vadd.f32 %v1659_v63, %v1476_v23 }
 0x307   :  { %v5205_v62 = vmul.f32 -1.442695, %v1664_v31  ;;  %v1666_v21 = vadd.f32 %v1661_v43, %v1478_v2  ;;  %v1480_v48 = vpop.f32.mrb[11].mxu1  ;;  %v1523_v27 = vpop.f32.mrb[15].mxu0  ;;  %v1655_v2 = vld [vmem:[#allocation8 + $0x20] ss:$12 sps:$4 sm:$0xff]  }
 0x308   :  { %v1667_v59 = vadd.f32 %v1662_v10, %v1480_v48  ;;  %v5206_v57 = vmul.f32 -1.442695, %v1665_v55  ;;  %v1660_v61 = vunpack.c.l.bf16 %v1655_v2 }
 0x309   :  { %5882 = vpow2.f32 %v5205_v62  ;;  %v5207_v25 = vmul.f32 -1.442695, %v1666_v21  ;;  %v1692_v62 = vadd.f32 %v10381_v53, %v1517_v33 }
 0x30a   :  { %v5208_v56 = vmul.f32 -1.442695, %v1667_v59  ;;  %v1663_v59 = vunpack.c.h.bf16 %v1655_v2 }
 0x30b   :  { %5884 = vpow2.f32 %v5207_v25 }
 0x30c   :  { %5886 = vpow2.f32 %v5206_v57 }
 0x30d   :  { %5888 = vpow2.f32 %v5208_v56  ;;  %v1693_v56 = vadd.f32 %v10381_v53, %v1521_v47 }
 0x313   :  { %v5883_v35 = vpop.eup %5882 }
 0x314   :  { %v1680_v41 = vadd.f32 1.0, %v5883_v35 }
 0x315   :  { %v5885_v58 = vpop.eup %5884 }
 0x316   :  { %5890 = vrcp.f32 %v1680_v41  ;;  %v1682_v1 = vadd.f32 1.0, %v5885_v58  ;;  %v5887_v3 = vpop.eup %5886 }
 0x317   :  { %v5889_v31 = vpop.eup %5888  ;;  %v1681_v43 = vadd.f32 1.0, %v5887_v3 }
 0x318   :  { %5892 = vrcp.f32 %v1682_v1  ;;  %v1683_v21 = vadd.f32 1.0, %v5889_v31 }
 0x319   :  { %5894 = vrcp.f32 %v1681_v43 }
 0x31a   :  { %5896 = vrcp.f32 %v1683_v21 }
 0x320   :  { %v5891_v10 = vpop.eup %5890 }
 0x321   :  { %v1694_v23 = vmul.f32 %v5891_v10, %v1692_v62  ;;  %v10463_v62 = vld [vmem:[#allocation29_spill] sm:$0xff] }
 0x322   :  { %v5893_v57 = vpop.eup %5892  ;;  %v1729_v21 = vadd.f32 %v1519_v19, %v10463_v62 }
 0x323   :  { %v1696_v55 = vadd.f32 %v1694_v23, %v1660_v61  ;;  %v1695_v63 = vmul.f32 %v5893_v57, %v1693_v56  ;;  %v5895_v48 = vpop.eup %5894  ;;  %v10464_v56 = vld [vmem:[#allocation30_spill] sm:$0xff] }
 0x324   :  { %v5897_v25 = vpop.eup %5896  ;;  %v1703_v35 = vsub.f32 1.0, %v5895_v48  ;;  %v1707_v33 = vmul.f32 %v5895_v48, %v7788_v0 }
 0x325   :  { %5898 = vtanh.f32 %v1696_v55  ;;  %v1697_v1 = vadd.f32 %v1695_v63, %v1663_v59  ;;  %v1704_v3 = vsub.f32 1.0, %v5897_v25  ;;  %v1708_v47 = vmul.f32 %v5897_v25, %v7780_v51 }
 0x326   :  { %v1732_v59 = vadd.f32 %v1523_v27, %v10463_v62 }
 0x327   :  { %5900 = vtanh.f32 %v1697_v1 }
 0x32f   :  { %v5899_v41 = vpop.eup %5898 }
 0x330   :  { %v1705_v58 = vmul.f32 %v5899_v41, %v1703_v35 }
 0x331   :  { %v5901_v31 = vpop.eup %5900 }
 0x332   :  { %v8071_v43 = vadd.f32 %v1707_v33, %v1705_v58  ;;  %v1706_v2 = vmul.f32 %v5901_v31, %v1704_v3 }
 0x334   :  { %v8074_v61 = vadd.f32 %v1708_v47, %v1706_v2 }
 0x344   :  { %v1560_v10 = vpop.f32.mrb[12].mxu1  ;;  %v1603_v23 = vpop.f32.mrb[16].mxu0 }
 0x345   :  { %v1730_v57 = vadd.f32 %v1560_v10, %v10464_v56  ;;  %v1735_v55 = vadd.f32 %v1729_v21, %v1603_v23  ;;  %v1562_v63 = vpop.f32.mrb[13].mxu1  ;;  %v1605_v1 = vpop.f32.mrb[17].mxu0 }
 0x346   :  { %v1564_v48 = vpop.f32.mrb[14].mxu1  ;;  %v1607_v35 = vpop.f32.mrb[18].mxu0 }
 0x347   :  { %v1736_v41 = vadd.f32 %v1730_v57, %v1605_v1  ;;  %v1733_v58 = vadd.f32 %v1564_v48, %v10464_v56  ;;  %v1737_v33 = vadd.f32 %v1732_v59, %v1607_v35  ;;  %v1566_v25 = vpop.f32.mrb[15].mxu1  ;;  %v1609_v3 = vpop.f32.mrb[19].mxu0  ;;  %v5211_v2 = vmul.f32 -1.442695, %v1735_v55 }
 0x348   :  { %v1783_v56 = vpop.permute.xlu1 %1782 }
 0x349   :  { %v1738_v31 = vadd.f32 %v1733_v58, %v1609_v3  ;;  %v5213_v19 = vmul.f32 -1.442695, %v1737_v33  ;;  %5902 = vpow2.f32 %v5211_v2  ;;  %v5212_v47 = vmul.f32 -1.442695, %v1736_v41  ;;  %v10465_v2 = vld [vmem:[#allocation33_spill] sm:$0xff] }
 0x34a   :  { %vm1787_vm6 = vcmp.eq.s32.totalorder %v1783_v56, 1 }
 0x34b   :  { %5904 = vpow2.f32 %v5213_v19  ;;  %v5214_v27 = vmul.f32 -1.442695, %v1738_v31 }
 0x34c   :  { %5906 = vpow2.f32 %v5212_v47  ;;  %v1731_v47 = vadd.f32 %v1562_v63, %v10387_v8 }
 0x34d   :  { %5908 = vpow2.f32 %v5214_v27 }
 0x353   :  { %v5903_v62 = vpop.eup %5902 }
 0x354   :  { %v1751_v10 = vadd.f32 1.0, %v5903_v62 }
 0x355   :  { %v5905_v21 = vpop.eup %5904 }
 0x356   :  { %v1753_v23 = vadd.f32 1.0, %v5905_v21  ;;  %5910 = vrcp.f32 %v1751_v10  ;;  %v5907_v57 = vpop.eup %5906  ;;  %v1734_v10 = vadd.f32 %v1566_v25, %v10387_v8 }
 0x357   :  { %v5909_v59 = vpop.eup %5908  ;;  %v1752_v35 = vadd.f32 1.0, %v5907_v57 }
 0x358   :  { %5912 = vrcp.f32 %v1753_v23  ;;  %v1754_v3 = vadd.f32 1.0, %v5909_v59 }
 0x359   :  { %5914 = vrcp.f32 %v1752_v35 }
 0x35a   :  { %5916 = vrcp.f32 %v1754_v3 }
 0x360   :  { %v5911_v19 = vpop.eup %5910 }
 0x362   :  { %v5913_v21 = vpop.eup %5912 }
 0x363   :  { %v5915_v59 = vpop.eup %5914 }
 0x364   :  { %v5447_v1 = vpop.f32.mrb[16].mxu1  ;;  %v1775_v63 = vmul.f32 %v5915_v59, %v7782_v52 }
 0x365   :  { %v5448_v48 = vpop.f32.mrb[17].mxu1 }
 0x366   :  { %v5449_v58 = vadd.f32 %v5448_v48, %v5447_v1  ;;  %v5450_v55 = vpop.f32.mrb[18].mxu1  ;;  %v5917_v48 = vpop.eup %5916 }
 0x367   :  { %v5451_v33 = vpop.f32.mrb[19].mxu1  ;;  %v1772_v35 = vsub.f32 1.0, %v5917_v48 }
 0x368   :  { %v1763_v41 = vadd.f32 %v5449_v58, %v10465_v2  ;;  %v5452_v31 = vadd.f32 %v5451_v33, %v5450_v55  ;;  %v1786_v58 = vpop.permute.xlu0 %1785  ;;  %v1771_v55 = vsub.f32 1.0, %v5915_v59  ;;  %v8132_v59 = vld [vmem:[#allocation10 + $0xa4] ss:$36 sps:$4 sm:$0xff]  }
 0x369   :  { %vm1788_vm5 = vcmp.eq.s32.totalorder %v1786_v58, 1  ;;  %v8138_v58 = vld [vmem:[#allocation10 + $0xa0] ss:$36 sps:$4 sm:$0xff]  }
 0x36a   :  { %v1765_v62 = vmul.f32 %v5911_v19, %v1763_v41  ;;  %v1764_v27 = vadd.f32 %v5452_v31, %v10465_v2  ;;  %v1776_v19 = vmul.f32 %v5917_v48, %v7784_v54  ;;  %v8135_v48 = vld [vmem:[#allocation10 + $0xac] ss:$36 sps:$4 sm:$0xff]  }
 0x36c   :  { %v1767_v23 = vadd.f32 %v1765_v62, %v1731_v47  ;;  %v1766_v57 = vmul.f32 %v5913_v21, %v1764_v27  ;;  %v1718_v47 = vpop.permute.xlu0 %1717  ;;  %v1715_v27 = vpop.permute.xlu1 %1714 }
 0x36d   :  { %vm1720_vm4 = vcmp.eq.s32.totalorder %v1718_v47, 1  ;;  %vm1719_vm7 = vcmp.eq.s32.totalorder %v1715_v27, 1  ;;  %v8168_v47 = vld [vmem:[#allocation10 + $0x17c] ss:$36 sps:$4 sm:$0xff]  }
 0x36e   :  { %5918 = vtanh.f32 %v1767_v23  ;;  %v1768_v1 = vadd.f32 %v1766_v57, %v1734_v10  ;;  %v8088_v21 = vsel %vm1720_vm4, %v8074_v61, %v7780_v51  ;;  %v8112_v51 = vld [vmem:[#allocation10 + $0x10] ss:$36 sps:$4 sm:$0xff]   ;;  %v8129_v61 = vld [vmem:[#allocation10 + $0x60] ss:$36 sps:$4 sm:$0xff]   ;;  %10469 = vst [vmem:[#allocation61_spill] sm:$0xff] %v8168_v47 }
 0x36f   :  { %v8174_v27 = vld [vmem:[#allocation10 + $0x178] ss:$36 sps:$4 sm:$0xff]  }
 0x370   :  { %5920 = vtanh.f32 %v1768_v1  ;;  %v8102_v1 = vsel %vm1719_vm7, %v8071_v43, %v7788_v0  ;;  %v8123_v0 = vld [vmem:[#allocation10 + $0x64] ss:$36 sps:$4 sm:$0xff]   ;;  %v8126_v43 = vld [vmem:[#allocation10 + $0x58] ss:$36 sps:$4 sm:$0xff]   ;;  %10471 = vst [vmem:[#allocation63_spill] sm:$0xff] %v8174_v27 }
 0x371   :  { %v8106_v56 = vpack.c.bf16 %v8088_v21, %v8102_v1 }
 0x378   :  { %v5919_v33 = vpop.eup %5918 }
 0x379   :  { %v1773_v41 = vmul.f32 %v5919_v33, %v1771_v55  ;;  %v8141_v55 = vld [vmem:[#allocation10 + $0xa8] ss:$36 sps:$4 sm:$0xff]  }
 0x37a   :  { %v5921_v31 = vpop.eup %5920  ;;  %v8144_v33 = vld [vmem:[#allocation10 + $0xec] ss:$36 sps:$4 sm:$0xff]  }
 0x37b   :  { %v1777_v25 = vadd.f32 %v1775_v63, %v1773_v41  ;;  %v1774_v3 = vmul.f32 %v5921_v31, %v1772_v35  ;;  %v8147_v63 = vld [vmem:[#allocation10 + $0xf4] ss:$36 sps:$4 sm:$0xff]   ;;  %v8150_v35 = vld [vmem:[#allocation10 + $0xe8] ss:$36 sps:$4 sm:$0xff]  }
 0x37c   :  { %v8153_v41 = vld [vmem:[#allocation10 + $0xf0] ss:$36 sps:$4 sm:$0xff]  }
 0x37d   :  { %v1778_v62 = vadd.f32 %v1776_v19, %v1774_v3  ;;  %v8091_v10 = vsel %vm1787_vm6, %v1777_v25, %v7782_v52  ;;  %v8115_v52 = vld [vmem:[#allocation10 + $0x18] ss:$36 sps:$4 sm:$0xff]   ;;  %v8162_v25 = vld [vmem:[#allocation10 + $0x130] ss:$36 sps:$4 sm:$0xff]  }
 0x37e   :  { %v8156_v31 = vld [vmem:[#allocation10 + $0x134] ss:$36 sps:$4 sm:$0xff]   ;;  %v8159_v19 = vld [vmem:[#allocation10 + $0x13c] ss:$36 sps:$4 sm:$0xff]   ;;  %10467 = vst [vmem:[#allocation59_spill] sm:$0xff] %v8162_v25 }
 0x37f   :  { %v8094_v23 = vsel %vm1788_vm5, %v1778_v62, %v7784_v54  ;;  %v8120_v54 = vld [vmem:[#allocation10 + $0x5c] ss:$36 sps:$4 sm:$0xff]   ;;  %10466 = vst [vmem:[#allocation58_spill] sm:$0xff] %v8159_v19  ;;  %v8171_v62 = vld [vmem:[#allocation10 + $0x184] ss:$36 sps:$4 sm:$0xff]  }
 0x380   :  { %v8098_v57 = vpack.c.bf16 %v8094_v23, %v8091_v10  ;;  %v8165_v3 = vld [vmem:[#allocation10 + $0x138] ss:$36 sps:$4 sm:$0xff]   ;;  %10470 = vst [vmem:[#allocation62_spill] sm:$0xff] %v8171_v62 }
 0x381   :  { %10468 = vst [vmem:[#allocation60_spill] sm:$0xff] %v8165_v3 }
 0x382   :  { %1826 = vmatprep.mubr.bf16.mxu0 %v8098_v57  ;;  %1869 = vmatprep.mubr.bf16.mxu1 %v8098_v57 }
 0x383   :  { %1827 = vmatmul.mubr.bf16.vlgmr.msra.gmra.mrb[20].mxu0 %v8106_v56  ;;  %1870 = vmatmul.mubr.bf16.vlgmr.msra.gmra.mrb[20].mxu1 %v8106_v56 }
 0x384   :  { %1881 = vmatpush1.bf16.msra.mxu0 %v8112_v51  ;;  %1924 = vmatpush1.bf16.msra.mxu1 %v8115_v52 }
 0x385   :  { %1912 = vmatprep.mubr.bf16.mxu0 %v8098_v57  ;;  %1955 = vmatprep.mubr.bf16.mxu1 %v8098_v57 }
 0x386   :  { %1882 = vmatprep.subr.bf16.mxu0 %v8120_v54  ;;  %1925 = vmatprep.subr.bf16.mxu1 %v8123_v0 }
 0x388   :  { %1883 = vmatpush1.bf16.msra.mxu0 %v8126_v43  ;;  %1926 = vmatpush1.bf16.msra.mxu1 %v8129_v61 }
 0x389   :  { %1884 = vmatprep.subr.bf16.mxu0 %v8132_v59  ;;  %1927 = vmatprep.subr.bf16.mxu1 %v8135_v48 }
 0x38c   :  { %1885 = vmatpush1.bf16.msra.mxu0 %v8138_v58  ;;  %1928 = vmatpush1.bf16.msra.mxu1 %v8141_v55 }
 0x38d   :  { %1886 = vmatprep.subr.bf16.mxu0 %v8144_v33  ;;  %1929 = vmatprep.subr.bf16.mxu1 %v8147_v63 }
 0x390   :  { %1887 = vmatpush1.bf16.msra.mxu0 %v8150_v35  ;;  %1930 = vmatpush1.bf16.msra.mxu1 %v8153_v41 }
 0x391   :  { %1888 = vmatprep.subr.bf16.mxu0 %v8156_v31  ;;  %1931 = vmatprep.subr.bf16.mxu1 %v8159_v19  ;;  %v8177_v19 = vld [vmem:[#allocation10 + $0x180] ss:$36 sps:$4 sm:$0xff]  }
 0x392   :  { %10472 = vst [vmem:[#allocation64_spill] sm:$0xff] %v8177_v19 }
 0x394   :  { %1889 = vmatpush1.bf16.msra.mxu0 %v8162_v25  ;;  %1932 = vmatpush1.bf16.msra.mxu1 %v8165_v3  ;;  %v8180_v25 = vld [vmem:[#allocation10 + $0x1c4] ss:$36 sps:$4 sm:$0xff]   ;;  %v8183_v3 = vld [vmem:[#allocation10 + $0x1cc] ss:$36 sps:$4 sm:$0xff]  }
 0x395   :  { %1890 = vmatprep.subr.bf16.mxu0 %v8168_v47  ;;  %1933 = vmatprep.subr.bf16.mxu1 %v8171_v62  ;;  %10473 = vst [vmem:[#allocation65_spill] sm:$0xff] %v8180_v25  ;;  %10474 = vst [vmem:[#allocation66_spill] sm:$0xff] %v8183_v3  ;;  %v8186_v47 = vld [vmem:[#allocation10 + $0x1c0] ss:$36 sps:$4 sm:$0xff]   ;;  %v8189_v62 = vld [vmem:[#allocation10 + $0x1c8] ss:$36 sps:$4 sm:$0xff]  }
 0x396   :  { %10475 = vst [vmem:[#allocation67_spill] sm:$0xff] %v8186_v47  ;;  %10476 = vst [vmem:[#allocation68_spill] sm:$0xff] %v8189_v62 }
 0x398   :  { %1891 = vmatpush1.bf16.msra.mxu0 %v8174_v27  ;;  %1934 = vmatpush1.bf16.msra.mxu1 %v8177_v19  ;;  %v8192_v27 = vld [vmem:[#allocation10 + $0x20c] ss:$36 sps:$4 sm:$0xff]   ;;  %v8195_v19 = vld [vmem:[#allocation10 + $0x214] ss:$36 sps:$4 sm:$0xff]  }
 0x399   :  { %1892 = vmatprep.subr.bf16.mxu0 %v8180_v25  ;;  %1935 = vmatprep.subr.bf16.mxu1 %v8183_v3  ;;  %10477 = vst [vmem:[#allocation69_spill] sm:$0xff] %v8192_v27  ;;  %10478 = vst [vmem:[#allocation70_spill] sm:$0xff] %v8195_v19  ;;  %v8198_v25 = vld [vmem:[#allocation10 + $0x208] ss:$36 sps:$4 sm:$0xff]   ;;  %v8201_v3 = vld [vmem:[#allocation10 + $0x210] ss:$36 sps:$4 sm:$0xff]  }
 0x39a   :  { %10479 = vst [vmem:[#allocation71_spill] sm:$0xff] %v8198_v25  ;;  %10480 = vst [vmem:[#allocation72_spill] sm:$0xff] %v8201_v3 }
 0x39c   :  { %1893 = vmatpush1.bf16.msra.mxu0 %v8186_v47  ;;  %1936 = vmatpush1.bf16.msra.mxu1 %v8189_v62  ;;  %v8204_v47 = vld [vmem:[#allocation10 + $0x254] ss:$36 sps:$4 sm:$0xff]   ;;  %v8207_v62 = vld [vmem:[#allocation10 + $0x25c] ss:$36 sps:$4 sm:$0xff]  }
 0x39d   :  { %1894 = vmatprep.subr.bf16.mxu0 %v8192_v27  ;;  %1937 = vmatprep.subr.bf16.mxu1 %v8195_v19  ;;  %10481 = vst [vmem:[#allocation73_spill] sm:$0xff] %v8204_v47  ;;  %10482 = vst [vmem:[#allocation74_spill] sm:$0xff] %v8207_v62  ;;  %v8210_v27 = vld [vmem:[#allocation10 + $0x250] ss:$36 sps:$4 sm:$0xff]   ;;  %v8213_v19 = vld [vmem:[#allocation10 + $0x258] ss:$36 sps:$4 sm:$0xff]  }
 0x39e   :  { %10483 = vst [vmem:[#allocation75_spill] sm:$0xff] %v8210_v27  ;;  %10484 = vst [vmem:[#allocation76_spill] sm:$0xff] %v8213_v19 }
 0x3a0   :  { %1895 = vmatpush1.bf16.msra.mxu0 %v8198_v25  ;;  %1938 = vmatpush1.bf16.msra.mxu1 %v8201_v3  ;;  %v8216_v25 = vld [vmem:[#allocation10 + $0x29c] ss:$36 sps:$4 sm:$0xff]   ;;  %v8219_v3 = vld [vmem:[#allocation10 + $0x2a4] ss:$36 sps:$4 sm:$0xff]  }
 0x3a1   :  { %1896 = vmatprep.subr.bf16.mxu0 %v8204_v47  ;;  %1939 = vmatprep.subr.bf16.mxu1 %v8207_v62  ;;  %10485 = vst [vmem:[#allocation77_spill] sm:$0xff] %v8216_v25  ;;  %10486 = vst [vmem:[#allocation78_spill] sm:$0xff] %v8219_v3  ;;  %v8222_v47 = vld [vmem:[#allocation10 + $0x298] ss:$36 sps:$4 sm:$0xff]   ;;  %v8225_v62 = vld [vmem:[#allocation10 + $0x2a0] ss:$36 sps:$4 sm:$0xff]  }
 0x3a2   :  { %10487 = vst [vmem:[#allocation79_spill] sm:$0xff] %v8222_v47  ;;  %10488 = vst [vmem:[#allocation80_spill] sm:$0xff] %v8225_v62 }
 0x3a4   :  { %1897 = vmatpush1.bf16.msra.mxu0 %v8210_v27  ;;  %1940 = vmatpush1.bf16.msra.mxu1 %v8213_v19  ;;  %v8228_v27 = vld [vmem:[#allocation10 + $0x2e4] ss:$36 sps:$4 sm:$0xff]   ;;  %v8231_v19 = vld [vmem:[#allocation10 + $0x2ec] ss:$36 sps:$4 sm:$0xff]  }
 0x3a5   :  { %1898 = vmatprep.subr.bf16.mxu0 %v8216_v25  ;;  %1941 = vmatprep.subr.bf16.mxu1 %v8219_v3  ;;  %10489 = vst [vmem:[#allocation81_spill] sm:$0xff] %v8228_v27  ;;  %10490 = vst [vmem:[#allocation82_spill] sm:$0xff] %v8231_v19  ;;  %v8234_v25 = vld [vmem:[#allocation10 + $0x2e0] ss:$36 sps:$4 sm:$0xff]   ;;  %v8237_v3 = vld [vmem:[#allocation10 + $0x2e8] ss:$36 sps:$4 sm:$0xff]  }
 0x3a6   :  { %10491 = vst [vmem:[#allocation83_spill] sm:$0xff] %v8234_v25  ;;  %10492 = vst [vmem:[#allocation84_spill] sm:$0xff] %v8237_v3 }
 0x3a8   :  { %1899 = vmatpush1.bf16.msra.mxu0 %v8222_v47  ;;  %1942 = vmatpush1.bf16.msra.mxu1 %v8225_v62  ;;  %v8240_v47 = vld [vmem:[#allocation10 + $0x32c] ss:$36 sps:$4 sm:$0xff]   ;;  %v8243_v62 = vld [vmem:[#allocation10 + $0x334] ss:$36 sps:$4 sm:$0xff]  }
 0x3a9   :  { %1900 = vmatprep.subr.bf16.mxu0 %v8228_v27  ;;  %1943 = vmatprep.subr.bf16.mxu1 %v8231_v19  ;;  %10493 = vst [vmem:[#allocation85_spill] sm:$0xff] %v8240_v47  ;;  %10494 = vst [vmem:[#allocation86_spill] sm:$0xff] %v8243_v62  ;;  %v8246_v27 = vld [vmem:[#allocation10 + $0x328] ss:$36 sps:$4 sm:$0xff]   ;;  %v8249_v19 = vld [vmem:[#allocation10 + $0x330] ss:$36 sps:$4 sm:$0xff]  }
 0x3aa   :  { %10495 = vst [vmem:[#allocation87_spill] sm:$0xff] %v8246_v27  ;;  %10496 = vst [vmem:[#allocation88_spill] sm:$0xff] %v8249_v19 }
 0x3ac   :  { %1901 = vmatpush1.bf16.msra.mxu0 %v8234_v25  ;;  %1944 = vmatpush1.bf16.msra.mxu1 %v8237_v3  ;;  %v8252_v25 = vld [vmem:[#allocation10 + $0x374] ss:$36 sps:$4 sm:$0xff]   ;;  %v8255_v3 = vld [vmem:[#allocation10 + $0x37c] ss:$36 sps:$4 sm:$0xff]  }
 0x3ad   :  { %1902 = vmatprep.subr.bf16.mxu0 %v8240_v47  ;;  %1945 = vmatprep.subr.bf16.mxu1 %v8243_v62  ;;  %10497 = vst [vmem:[#allocation89_spill] sm:$0xff] %v8252_v25  ;;  %10498 = vst [vmem:[#allocation90_spill] sm:$0xff] %v8255_v3  ;;  %v8258_v47 = vld [vmem:[#allocation10 + $0x370] ss:$36 sps:$4 sm:$0xff]   ;;  %v8261_v62 = vld [vmem:[#allocation10 + $0x378] ss:$36 sps:$4 sm:$0xff]  }
 0x3ae   :  { %10499 = vst [vmem:[#allocation91_spill] sm:$0xff] %v8258_v47  ;;  %10500 = vst [vmem:[#allocation92_spill] sm:$0xff] %v8261_v62 }
 0x3b0   :  { %1903 = vmatpush1.bf16.msra.mxu0 %v8246_v27  ;;  %1946 = vmatpush1.bf16.msra.mxu1 %v8249_v19  ;;  %v8264_v27 = vld [vmem:[#allocation10 + $0x3bc] ss:$36 sps:$4 sm:$0xff]   ;;  %v8267_v19 = vld [vmem:[#allocation10 + $0x3c4] ss:$36 sps:$4 sm:$0xff]  }
 0x3b1   :  { %1904 = vmatprep.subr.bf16.mxu0 %v8252_v25  ;;  %1947 = vmatprep.subr.bf16.mxu1 %v8255_v3  ;;  %10501 = vst [vmem:[#allocation93_spill] sm:$0xff] %v8264_v27  ;;  %10502 = vst [vmem:[#allocation94_spill] sm:$0xff] %v8267_v19  ;;  %v8270_v25 = vld [vmem:[#allocation10 + $0x3b8] ss:$36 sps:$4 sm:$0xff]   ;;  %v8273_v3 = vld [vmem:[#allocation10 + $0x3c0] ss:$36 sps:$4 sm:$0xff]  }
 0x3b2   :  { %10503 = vst [vmem:[#allocation95_spill] sm:$0xff] %v8270_v25  ;;  %10504 = vst [vmem:[#allocation96_spill] sm:$0xff] %v8273_v3 }
 0x3b4   :  { %1905 = vmatpush1.bf16.msra.mxu0 %v8258_v47  ;;  %1948 = vmatpush1.bf16.msra.mxu1 %v8261_v62  ;;  %v8276_v47 = vld [vmem:[#allocation10 + $0x404] ss:$36 sps:$4 sm:$0xff]   ;;  %v8279_v62 = vld [vmem:[#allocation10 + $0x40c] ss:$36 sps:$4 sm:$0xff]  }
 0x3b5   :  { %1906 = vmatprep.subr.bf16.mxu0 %v8264_v27  ;;  %1949 = vmatprep.subr.bf16.mxu1 %v8267_v19  ;;  %10505 = vst [vmem:[#allocation97_spill] sm:$0xff] %v8276_v47  ;;  %10506 = vst [vmem:[#allocation98_spill] sm:$0xff] %v8279_v62  ;;  %v8282_v27 = vld [vmem:[#allocation10 + $0x400] ss:$36 sps:$4 sm:$0xff]   ;;  %v8285_v19 = vld [vmem:[#allocation10 + $0x408] ss:$36 sps:$4 sm:$0xff]  }
 0x3b6   :  { %10507 = vst [vmem:[#allocation99_spill] sm:$0xff] %v8282_v27 }
 0x3b8   :  { %1907 = vmatpush1.bf16.msra.mxu0 %v8270_v25  ;;  %1950 = vmatpush1.bf16.msra.mxu1 %v8273_v3  ;;  %v8288_v25 = vld [vmem:[#allocation10 + $0x44c] ss:$36 sps:$4 sm:$0xff]   ;;  %v8291_v3 = vld [vmem:[#allocation10 + $0x454] ss:$36 sps:$4 sm:$0xff]  }
 0x3b9   :  { %1908 = vmatprep.subr.bf16.mxu0 %v8276_v47  ;;  %1951 = vmatprep.subr.bf16.mxu1 %v8279_v62  ;;  %10508 = vst [vmem:[#allocation100_spill] sm:$0xff] %v8288_v25  ;;  %v8294_v47 = vld [vmem:[#allocation10 + $0x448] ss:$36 sps:$4 sm:$0xff]   ;;  %v8297_v62 = vld [vmem:[#allocation10 + $0x450] ss:$36 sps:$4 sm:$0xff]  }
 0x3ba   :  { %10509 = vst [vmem:[#allocation101_spill] sm:$0xff] %v8294_v47 }
 0x3bc   :  { %1909 = vmatpush1.bf16.msra.mxu0 %v8282_v27  ;;  %1952 = vmatpush1.bf16.msra.mxu1 %v8285_v19  ;;  %v8300_v27 = vld [vmem:[#allocation10 + $0x260] ss:$36 sps:$4 sm:$0xff]  }
 0x3bd   :  { %1910 = vmatprep.subr.bf16.mxu0 %v8288_v25  ;;  %1953 = vmatprep.subr.bf16.mxu1 %v8291_v3  ;;  %10510 = vst [vmem:[#allocation102_spill] sm:$0xff] %v8300_v27  ;;  %v8306_v25 = vld [vmem:[#allocation10 + $0x20] ss:$36 sps:$4 sm:$0xff]  }
 0x3c0   :  { %1911 = vmatpush1.bf16.msra.mxu0 %v8294_v47  ;;  %1954 = vmatpush1.bf16.msra.mxu1 %v8297_v62  ;;  %v8310_v47 = vld [vmem:[#allocation10 + $0x2a8] ss:$36 sps:$4 sm:$0xff]  }
 0x3c1   :  { %5453 = vmatprep.subr.bf16.mxu0 %v8300_v27  ;;  %2148 = vmatprep.subr.bf16.mxu1 %v7867_v39  ;;  %10511 = vst [vmem:[#allocation103_spill] sm:$0xff] %v8310_v47  ;;  %v8315_v27 = vld [vmem:[#allocation10 + $0x68] ss:$36 sps:$4 sm:$0xff]   ;;  %v8318_v39 = vld [vmem:[#allocation10 + $0x2f0] ss:$36 sps:$4 sm:$0xff]  }
 0x3c3   :  { %1913 = vmatmul.mubr.bf16.vlgmr.msra.gmra.mrb[24].mxu0 %v8106_v56  ;;  %1956 = vmatmul.mubr.bf16.vlgmr.msra.gmra.mrb[24].mxu1 %v8106_v56 }
 0x3c4   :  { %5454 = vmatpush3.bf16.msra.mxu0 %v8306_v25  ;;  %1998 = vmatprep.mubr.bf16.mxu0 %v8098_v57  ;;  %v8323_v57 = vld [vmem:[#allocation10 + $0xb0] ss:$36 sps:$4 sm:$0xff]  }
 0x3c5   :  { %5455 = vmatprep.subr.bf16.mxu0 %v8310_v47  ;;  %2149 = vmatpush1.bf16.msra.mxu1 %v7875_v5  ;;  %v8326_v47 = vld [vmem:[#allocation10 + $0x338] ss:$36 sps:$4 sm:$0xff]  }
 0x3c6   :  { %2150 = vmatprep.subr.bf16.mxu1 %v7878_v4  ;;  %v8331_v5 = vld [vmem:[#allocation10 + $0xf8] ss:$36 sps:$4 sm:$0xff]   ;;  %v8334_v4 = vld [vmem:[#allocation10 + $0x380] ss:$36 sps:$4 sm:$0xff]  }
 0x3c8   :  { %5456 = vmatpush3.bf16.msra.mxu0 %v8315_v27 }
 0x3c9   :  { %5457 = vmatprep.subr.bf16.mxu0 %v8318_v39  ;;  %2151 = vmatpush1.bf16.msra.mxu1 %v7883_v17  ;;  %v8339_v17 = vld [vmem:[#allocation10 + $0x140] ss:$36 sps:$4 sm:$0xff]  }
 0x3ca   :  { %2152 = vmatprep.subr.bf16.mxu1 %v7886_v11  ;;  %v8342_v11 = vld [vmem:[#allocation10 + $0x3c8] ss:$36 sps:$4 sm:$0xff]  }
 0x3cc   :  { %5458 = vmatpush3.bf16.msra.mxu0 %v8323_v57 }
 0x3cd   :  { %5459 = vmatprep.subr.bf16.mxu0 %v8326_v47  ;;  %2153 = vmatpush1.bf16.msra.mxu1 %v7891_v29  ;;  %v8347_v29 = vld [vmem:[#allocation10 + $0x188] ss:$36 sps:$4 sm:$0xff]  }
 0x3ce   :  { %2154 = vmatprep.subr.bf16.mxu1 %v7894_v7  ;;  %v8350_v7 = vld [vmem:[#allocation10 + $0x410] ss:$36 sps:$4 sm:$0xff]  }
 0x3d0   :  { %5460 = vmatpush3.bf16.msra.mxu0 %v8331_v5 }
 0x3d1   :  { %5461 = vmatprep.subr.bf16.mxu0 %v8334_v4  ;;  %2155 = vmatpush1.bf16.msra.mxu1 %v7899_v12  ;;  %v8355_v12 = vld [vmem:[#allocation10 + $0x1d0] ss:$36 sps:$4 sm:$0xff]  }
 0x3d2   :  { %2156 = vmatprep.subr.bf16.mxu1 %v7902_v6  ;;  %v8358_v6 = vld [vmem:[#allocation10 + $0x458] ss:$36 sps:$4 sm:$0xff]  }
 0x3d4   :  { %5462 = vmatpush3.bf16.msra.mxu0 %v8339_v17 }
 0x3d5   :  { %5463 = vmatprep.subr.bf16.mxu0 %v8342_v11  ;;  %2157 = vmatpush1.bf16.msra.mxu1 %v7907_v9  ;;  %v8363_v9 = vld [vmem:[#allocation10 + $0x218] ss:$36 sps:$4 sm:$0xff]  }
 0x3d6   :  { %2158 = vmatprep.subr.bf16.mxu1 %v7910_v14  ;;  %v8366_v14 = vld [vmem:[#allocation10 + $0xc] ss:$36 sps:$4 sm:$0xff]  }
 0x3d8   :  { %5464 = vmatpush3.bf16.msra.mxu0 %v8347_v29 }
 0x3d9   :  { %5465 = vmatprep.subr.bf16.mxu0 %v8350_v7  ;;  %2159 = vmatpush1.bf16.msra.mxu1 %v7915_v15  ;;  %v8372_v15 = vld [vmem:[#allocation10 + $0x8] ss:$36 sps:$4 sm:$0xff]  }
 0x3da   :  { %2160 = vmatprep.subr.bf16.mxu1 %v7918_v16  ;;  %10512 = vst [vmem:[#allocation104_spill] sm:$0xff] %v8372_v15  ;;  %v8375_v16 = vld [vmem:[#allocation10 + $0x54] ss:$36 sps:$4 sm:$0xff]  }
 0x3db   :  { %10513 = vst [vmem:[#allocation105_spill] sm:$0xff] %v8375_v16 }
 0x3dc   :  { %5466 = vmatpush3.bf16.msra.mxu0 %v8355_v12 }
 0x3dd   :  { %5467 = vmatprep.subr.bf16.mxu0 %v8358_v6  ;;  %2161 = vmatpush1.bf16.msra.mxu1 %v7923_v18  ;;  %v8380_v18 = vld [vmem:[#allocation10 + $0x50] ss:$36 sps:$4 sm:$0xff]  }
 0x3de   :  { %2162 = vmatprep.subr.bf16.mxu1 %v7926_v20  ;;  %10514 = vst [vmem:[#allocation106_spill] sm:$0xff] %v8380_v18  ;;  %v8383_v20 = vld [vmem:[#allocation10 + $0x9c] ss:$36 sps:$4 sm:$0xff]  }
 0x3df   :  { %10515 = vst [vmem:[#allocation107_spill] sm:$0xff] %v8383_v20 }
 0x3e0   :  { %5468 = vmatpush3.bf16.msra.mxu0 %v8363_v9 }
 0x3e1   :  { %2191 = vmatprep.subr.bf16.mxu0 %v8366_v14  ;;  %2163 = vmatpush1.bf16.msra.mxu1 %v7931_v22  ;;  %v8388_v22 = vld [vmem:[#allocation10 + $0x98] ss:$36 sps:$4 sm:$0xff]  }
 0x3e2   :  { %2164 = vmatprep.subr.bf16.mxu1 %v7934_v24  ;;  %10516 = vst [vmem:[#allocation108_spill] sm:$0xff] %v8388_v22  ;;  %v8391_v24 = vld [vmem:[#allocation10 + $0xe4] ss:$36 sps:$4 sm:$0xff]  }
 0x3e3   :  { %1999 = vmatmul.mubr.bf16.vlgmr.msra.gmra.mrb[28].mxu0 %v8106_v56  ;;  %10517 = vst [vmem:[#allocation109_spill] sm:$0xff] %v8391_v24  ;;  %v10535_v56 = vld [vmem:[#allocation50_spill] sm:$0xff] }
 0x3e4   :  { %2192 = vmatpush1.bf16.msra.mxu0 %v8372_v15 }
 0x3e5   :  { %2193 = vmatprep.subr.bf16.mxu0 %v8375_v16  ;;  %2165 = vmatpush1.bf16.msra.mxu1 %v7940_v26  ;;  %v8396_v26 = vld [vmem:[#allocation10 + $0xe0] ss:$36 sps:$4 sm:$0xff]  }
 0x3e6   :  { %2166 = vmatprep.subr.bf16.mxu1 %v7943_v28  ;;  %10518 = vst [vmem:[#allocation110_spill] sm:$0xff] %v8396_v26  ;;  %v10519_v28 = vld [vmem:[#allocation34_spill] sm:$0xff] }
 0x3e8   :  { %2194 = vmatpush1.bf16.msra.mxu0 %v8380_v18 }
 0x3e9   :  { %2195 = vmatprep.subr.bf16.mxu0 %v8383_v20  ;;  %2167 = vmatpush1.bf16.msra.mxu1 %v7948_v30  ;;  %v10520_v30 = vld [vmem:[#allocation35_spill] sm:$0xff] }
 0x3ea   :  { %2168 = vmatprep.subr.bf16.mxu1 %v7951_v32  ;;  %v10521_v32 = vld [vmem:[#allocation36_spill] sm:$0xff] }
 0x3ec   :  { %2196 = vmatpush1.bf16.msra.mxu0 %v8388_v22 }
 0x3ed   :  { %2197 = vmatprep.subr.bf16.mxu0 %v8391_v24  ;;  %2169 = vmatpush1.bf16.msra.mxu1 %v7956_v34  ;;  %v10522_v34 = vld [vmem:[#allocation37_spill] sm:$0xff] }
 0x3ee   :  { %2170 = vmatprep.subr.bf16.mxu1 %v7959_v36  ;;  %v10523_v36 = vld [vmem:[#allocation38_spill] sm:$0xff] }
 0x3f0   :  { %2198 = vmatpush1.bf16.msra.mxu0 %v8396_v26 }
 0x3f1   :  { %2199 = vmatprep.subr.bf16.mxu0 %v7963_v38  ;;  %2171 = vmatpush1.bf16.msra.mxu1 %v7966_v40  ;;  %v10524_v38 = vld [vmem:[#allocation39_spill] sm:$0xff]  ;;  %v10525_v40 = vld [vmem:[#allocation40_spill] sm:$0xff] }
 0x3f2   :  { %2172 = vmatprep.subr.bf16.mxu1 %v7969_v42  ;;  %v10526_v42 = vld [vmem:[#allocation41_spill] sm:$0xff] }
 0x3f4   :  { %2200 = vmatpush1.bf16.msra.mxu0 %v7972_v44  ;;  %v10527_v44 = vld [vmem:[#allocation42_spill] sm:$0xff] }
 0x3f5   :  { %2201 = vmatprep.subr.bf16.mxu0 %v7975_v37  ;;  %2173 = vmatpush1.bf16.msra.mxu1 %v7978_v46  ;;  %v10528_v37 = vld [vmem:[#allocation43_spill] sm:$0xff]  ;;  %v10529_v46 = vld [vmem:[#allocation44_spill] sm:$0xff] }
 0x3f6   :  { %2174 = vmatprep.subr.bf16.mxu1 %v7981_v50  ;;  %v10530_v50 = vld [vmem:[#allocation45_spill] sm:$0xff] }
 0x3f8   :  { %2202 = vmatpush1.bf16.msra.mxu0 %v7984_v45  ;;  %v10531_v45 = vld [vmem:[#allocation48_spill] sm:$0xff] }
 0x3f9   :  { %2203 = vmatprep.subr.bf16.mxu0 %v7987_v49  ;;  %2175 = vmatpush1.bf16.msra.mxu1 %v7990_v60  ;;  %v10532_v49 = vld [vmem:[#allocation46_spill] sm:$0xff]  ;;  %v10533_v60 = vld [vmem:[#allocation47_spill] sm:$0xff] }
 0x3fa   :  { %2176 = vmatprep.subr.bf16.mxu1 %v7993_v13  ;;  %v10534_v13 = vld [vmem:[#allocation49_spill] sm:$0xff] }
 0x3fc   :  { %2204 = vmatpush1.bf16.msra.mxu0 %v10519_v28  ;;  %v10536_v28 = vld [vmem:[#allocation51_spill] sm:$0xff] }
 0x3fd   :  { %2205 = vmatprep.subr.bf16.mxu0 %v10520_v30  ;;  %2177 = vmatpush1.bf16.msra.mxu1 %v10521_v32  ;;  %v10537_v30 = vld [vmem:[#allocation52_spill] sm:$0xff]  ;;  %v10538_v32 = vld [vmem:[#allocation53_spill] sm:$0xff] }
 0x3fe   :  { %2178 = vmatprep.subr.bf16.mxu1 %v10522_v34  ;;  %v10539_v34 = vld [vmem:[#allocation54_spill] sm:$0xff] }
 0x400   :  { %2206 = vmatpush1.bf16.msra.mxu0 %v10523_v36  ;;  %v10540_v36 = vld [vmem:[#allocation55_spill] sm:$0xff] }
 0x401   :  { %2207 = vmatprep.subr.bf16.mxu0 %v10524_v38  ;;  %2179 = vmatpush1.bf16.msra.mxu1 %v10525_v40  ;;  %v10541_v38 = vld [vmem:[#allocation56_spill] sm:$0xff]  ;;  %v10542_v40 = vld [vmem:[#allocation57_spill] sm:$0xff] }
 0x402   :  { %2234 = vmatprep.subr.bf16.mxu1 %v10526_v42  ;;  %v2008_v42 = vld [vmem:[#allocation8 + $0x30] sm:$0xff] }
 0x404   :  { %2208 = vmatpush1.bf16.msra.mxu0 %v10527_v44  ;;  %v2010_v44 = vld [vmem:[#allocation8 + $0x3c] sm:$0xff] }
 0x405   :  { %2209 = vmatprep.subr.bf16.mxu0 %v10528_v37  ;;  %v2012_v37 = vunpack.c.l.bf16 %v2008_v42 }
 0x408   :  { %2210 = vmatpush1.bf16.msra.mxu0 %v10529_v46  ;;  %v2015_v46 = vunpack.c.l.bf16 %v2010_v44 }
 0x409   :  { %2211 = vmatprep.subr.bf16.mxu0 %v10530_v50 }
 0x40c   :  { %2212 = vmatpush1.bf16.msra.mxu0 %v10531_v45 }
 0x40d   :  { %2213 = vmatprep.subr.bf16.mxu0 %v10532_v49  ;;  %v2013_v49 = vunpack.c.h.bf16 %v2008_v42 }
 0x410   :  { %2214 = vmatpush1.bf16.msra.mxu0 %v10533_v60 }
 0x411   :  { %2215 = vmatprep.subr.bf16.mxu0 %v10534_v13 }
 0x414   :  { %2216 = vmatpush1.bf16.msra.mxu0 %v10535_v56 }
 0x415   :  { %2217 = vmatprep.subr.bf16.mxu0 %v10536_v28 }
 0x418   :  { %2218 = vmatpush1.bf16.msra.mxu0 %v10537_v30 }
 0x419   :  { %2219 = vmatprep.subr.bf16.mxu0 %v10538_v32  ;;  %v2016_v32 = vunpack.c.h.bf16 %v2010_v44 }
 0x41c   :  { %2220 = vmatpush1.bf16.msra.mxu0 %v10539_v34 }
 0x41d   :  { %2221 = vmatprep.subr.bf16.mxu0 %v10540_v36 }
 0x420   :  { %2222 = vmatpush1.bf16.msra.mxu0 %v10541_v38 }
 0x421   :  { %2277 = vmatprep.subr.bf16.mxu0 %v10542_v40 }
 0x456   :  { %v1828_v50 = vpop.f32.mrb[20].mxu0  ;;  %v1871_v45 = vpop.f32.mrb[20].mxu1 }
 0x457   :  { %v2018_v60 = vadd.f32 %v2012_v37, %v1828_v50  ;;  %v1830_v13 = vpop.f32.mrb[21].mxu0  ;;  %v1873_v56 = vpop.f32.mrb[21].mxu1 }
 0x458   :  { %v1832_v28 = vpop.f32.mrb[22].mxu0  ;;  %v1875_v30 = vpop.f32.mrb[22].mxu1  ;;  %v2019_v38 = vadd.f32 %v2013_v49, %v1830_v13  ;;  %v2046_v49 = vadd.f32 %v10381_v53, %v1871_v45 }
 0x459   :  { %v5215_v34 = vmul.f32 -1.442695, %v2018_v60  ;;  %v2020_v26 = vadd.f32 %v2015_v46, %v1832_v28  ;;  %v1834_v36 = vpop.f32.mrb[23].mxu0  ;;  %v1877_v24 = vpop.f32.mrb[23].mxu1  ;;  %v2009_v46 = vld [vmem:[#allocation8 + $0x38] ss:$12 sps:$4 sm:$0xff]  }
 0x45a   :  { %v2021_v22 = vadd.f32 %v2016_v32, %v1834_v36  ;;  %v5216_v20 = vmul.f32 -1.442695, %v2019_v38  ;;  %v2014_v15 = vunpack.c.l.bf16 %v2009_v46 }
 0x45b   :  { %5922 = vpow2.f32 %v5215_v34  ;;  %v5217_v40 = vmul.f32 -1.442695, %v2020_v26 }
 0x45c   :  { %v5218_v18 = vmul.f32 -1.442695, %v2021_v22  ;;  %v2017_v22 = vunpack.c.h.bf16 %v2009_v46 }
 0x45d   :  { %5924 = vpow2.f32 %v5217_v40 }
 0x45e   :  { %5926 = vpow2.f32 %v5216_v20 }
 0x45f   :  { %5928 = vpow2.f32 %v5218_v18  ;;  %v2047_v18 = vadd.f32 %v10381_v53, %v1875_v30 }
 0x465   :  { %v5923_v42 = vpop.eup %5922 }
 0x466   :  { %v2034_v37 = vadd.f32 1.0, %v5923_v42 }
 0x467   :  { %v5925_v50 = vpop.eup %5924 }
 0x468   :  { %5930 = vrcp.f32 %v2034_v37  ;;  %v2036_v16 = vadd.f32 1.0, %v5925_v50  ;;  %v5927_v44 = vpop.eup %5926 }
 0x469   :  { %v5929_v60 = vpop.eup %5928  ;;  %v2035_v28 = vadd.f32 1.0, %v5927_v44 }
 0x46a   :  { %5932 = vrcp.f32 %v2036_v16  ;;  %v2037_v26 = vadd.f32 1.0, %v5929_v60 }
 0x46b   :  { %5934 = vrcp.f32 %v2035_v28 }
 0x46c   :  { %5936 = vrcp.f32 %v2037_v26 }
 0x472   :  { %v5931_v13 = vpop.eup %5930 }
 0x473   :  { %v2048_v32 = vmul.f32 %v5931_v13, %v2046_v49  ;;  %v10543_v49 = vld [vmem:[#allocation29_spill] sm:$0xff] }
 0x474   :  { %v5933_v20 = vpop.eup %5932  ;;  %v2083_v26 = vadd.f32 %v1873_v56, %v10543_v49 }
 0x475   :  { %v2050_v34 = vadd.f32 %v2048_v32, %v2014_v15  ;;  %v2049_v36 = vmul.f32 %v5933_v20, %v2047_v18  ;;  %v5935_v38 = vpop.eup %5934  ;;  %v10544_v18 = vld [vmem:[#allocation30_spill] sm:$0xff] }
 0x476   :  { %v5937_v40 = vpop.eup %5936  ;;  %v2057_v42 = vsub.f32 1.0, %v5935_v38  ;;  %v2061_v45 = vmul.f32 %v5935_v38, %v8102_v1 }
 0x477   :  { %5938 = vtanh.f32 %v2050_v34  ;;  %v2051_v16 = vadd.f32 %v2049_v36, %v2017_v22  ;;  %v2058_v44 = vsub.f32 1.0, %v5937_v40  ;;  %v2062_v30 = vmul.f32 %v5937_v40, %v8088_v21 }
 0x478   :  { %v2086_v22 = vadd.f32 %v1877_v24, %v10543_v49 }
 0x479   :  { %5940 = vtanh.f32 %v2051_v16 }
 0x481   :  { %v5939_v37 = vpop.eup %5938 }
 0x482   :  { %v2059_v50 = vmul.f32 %v5939_v37, %v2057_v42 }
 0x483   :  { %v5941_v60 = vpop.eup %5940 }
 0x484   :  { %v8437_v28 = vadd.f32 %v2061_v45, %v2059_v50  ;;  %v2060_v46 = vmul.f32 %v5941_v60, %v2058_v44 }
 0x486   :  { %v8440_v15 = vadd.f32 %v2062_v30, %v2060_v46 }
 0x496   :  { %v1914_v13 = vpop.f32.mrb[24].mxu0  ;;  %v1957_v32 = vpop.f32.mrb[24].mxu1 }
 0x497   :  { %v2084_v20 = vadd.f32 %v1914_v13, %v10544_v18  ;;  %v2089_v34 = vadd.f32 %v2083_v26, %v1957_v32  ;;  %v1916_v36 = vpop.f32.mrb[25].mxu0  ;;  %v1959_v16 = vpop.f32.mrb[25].mxu1 }
 0x498   :  { %v1918_v38 = vpop.f32.mrb[26].mxu0  ;;  %v1961_v42 = vpop.f32.mrb[26].mxu1 }
 0x499   :  { %v2090_v37 = vadd.f32 %v2084_v20, %v1959_v16  ;;  %v2087_v50 = vadd.f32 %v1918_v38, %v10544_v18  ;;  %v2091_v45 = vadd.f32 %v2086_v22, %v1961_v42  ;;  %v1920_v40 = vpop.f32.mrb[27].mxu0  ;;  %v1963_v44 = vpop.f32.mrb[27].mxu1  ;;  %v5221_v46 = vmul.f32 -1.442695, %v2089_v34 }
 0x49b   :  { %v2092_v60 = vadd.f32 %v2087_v50, %v1963_v44  ;;  %v5223_v56 = vmul.f32 -1.442695, %v2091_v45  ;;  %5942 = vpow2.f32 %v5221_v46  ;;  %v5222_v30 = vmul.f32 -1.442695, %v2090_v37 }
 0x49d   :  { %5944 = vpow2.f32 %v5223_v56  ;;  %v5224_v24 = vmul.f32 -1.442695, %v2092_v60  ;;  %v2085_v56 = vadd.f32 %v1916_v36, %v10387_v8 }
 0x49e   :  { %5946 = vpow2.f32 %v5222_v30 }
 0x49f   :  { %5948 = vpow2.f32 %v5224_v24 }
 0x4a5   :  { %v5943_v49 = vpop.eup %5942 }
 0x4a6   :  { %v2105_v13 = vadd.f32 1.0, %v5943_v49 }
 0x4a7   :  { %v5945_v26 = vpop.eup %5944 }
 0x4a8   :  { %v2107_v32 = vadd.f32 1.0, %v5945_v26  ;;  %5950 = vrcp.f32 %v2105_v13  ;;  %v5947_v20 = vpop.eup %5946  ;;  %v2088_v26 = vadd.f32 %v1920_v40, %v10387_v8 }
 0x4a9   :  { %v5949_v22 = vpop.eup %5948  ;;  %v2106_v42 = vadd.f32 1.0, %v5947_v20 }
 0x4aa   :  { %5952 = vrcp.f32 %v2107_v32  ;;  %v2108_v44 = vadd.f32 1.0, %v5949_v22 }
 0x4ab   :  { %5954 = vrcp.f32 %v2106_v42 }
 0x4ac   :  { %5956 = vrcp.f32 %v2108_v44 }
 0x4b2   :  { %v5951_v46 = vpop.eup %5950 }
 0x4b4   :  { %v5953_v24 = vpop.eup %5952 }
 0x4b6   :  { %v5469_v16 = vpop.f32.mrb[28].mxu0 }
 0x4b7   :  { %v5470_v38 = vpop.f32.mrb[29].mxu0 }
 0x4b8   :  { %v5471_v50 = vadd.f32 %v5470_v38, %v5469_v16  ;;  %v5472_v34 = vpop.f32.mrb[30].mxu0  ;;  %v5955_v16 = vpop.eup %5954 }
 0x4b9   :  { %v5473_v45 = vpop.f32.mrb[31].mxu0  ;;  %v5957_v22 = vpop.eup %5956  ;;  %v2129_v36 = vmul.f32 %v5955_v16, %v8091_v10 }
 0x4ba   :  { %v2117_v37 = vadd.f32 %v5471_v50, %v10465_v2  ;;  %v5474_v60 = vadd.f32 %v5473_v45, %v5472_v34  ;;  %v2140_v38 = vpop.permute.xlu0 %2139  ;;  %v2125_v50 = vsub.f32 1.0, %v5955_v16  ;;  %v2137_v45 = vpop.permute.xlu1 %2136  ;;  %v2126_v42 = vsub.f32 1.0, %v5957_v22 }
 0x4bb   :  { %vm2142_vm9 = vcmp.eq.s32.totalorder %v2140_v38, 1  ;;  %vm2141_vm10 = vcmp.eq.s32.totalorder %v2137_v45, 1  ;;  %v10567_v38 = vld [vmem:[#allocation80_spill] sm:$0xff]  ;;  %v10570_v45 = vld [vmem:[#allocation83_spill] sm:$0xff] }
 0x4bc   :  { %v2119_v49 = vmul.f32 %v5951_v46, %v2117_v37  ;;  %v2118_v30 = vadd.f32 %v5474_v60, %v10465_v2  ;;  %v2130_v46 = vmul.f32 %v5957_v22, %v8094_v23  ;;  %v10566_v22 = vld [vmem:[#allocation79_spill] sm:$0xff] }
 0x4be   :  { %v2121_v13 = vadd.f32 %v2119_v49, %v2085_v56  ;;  %v2120_v32 = vmul.f32 %v5953_v24, %v2118_v30  ;;  %v2072_v56 = vpop.permute.xlu0 %2071  ;;  %v2069_v30 = vpop.permute.xlu1 %2068 }
 0x4bf   :  { %vm2074_vm8 = vcmp.eq.s32.totalorder %v2072_v56, 1  ;;  %vm2073_vm11 = vcmp.eq.s32.totalorder %v2069_v30, 1  ;;  %v10578_v56 = vld [vmem:[#allocation91_spill] sm:$0xff]  ;;  %v10580_v30 = vld [vmem:[#allocation93_spill] sm:$0xff] }
 0x4c0   :  { %5958 = vtanh.f32 %v2121_v13  ;;  %v2122_v20 = vadd.f32 %v2120_v32, %v2088_v26  ;;  %v8454_v24 = vsel %vm2074_vm8, %v8440_v15, %v8088_v21  ;;  %v10545_v21 = vld [vmem:[#allocation58_spill] sm:$0xff] }
 0x4c1   :  { %v10565_v15 = vld [vmem:[#allocation78_spill] sm:$0xff] }
 0x4c2   :  { %5960 = vtanh.f32 %v2122_v20  ;;  %v8468_v20 = vsel %vm2073_vm11, %v8437_v28, %v8102_v1  ;;  %v10548_v1 = vld [vmem:[#allocation61_spill] sm:$0xff] }
 0x4c3   :  { %v8472_v16 = vpack.c.bf16 %v8454_v24, %v8468_v20  ;;  %v10564_v28 = vld [vmem:[#allocation77_spill] sm:$0xff] }
 0x4ca   :  { %v5959_v34 = vpop.eup %5958 }
 0x4cb   :  { %v2127_v37 = vmul.f32 %v5959_v34, %v2125_v50  ;;  %v10568_v50 = vld [vmem:[#allocation81_spill] sm:$0xff]  ;;  %v10569_v34 = vld [vmem:[#allocation82_spill] sm:$0xff] }
 0x4cc   :  { %v5961_v60 = vpop.eup %5960 }
 0x4cd   :  { %v2131_v40 = vadd.f32 %v2129_v36, %v2127_v37  ;;  %v2128_v44 = vmul.f32 %v5961_v60, %v2126_v42  ;;  %v10571_v36 = vld [vmem:[#allocation84_spill] sm:$0xff]  ;;  %v10572_v42 = vld [vmem:[#allocation85_spill] sm:$0xff]  ;;  %v10573_v37 = vld [vmem:[#allocation86_spill] sm:$0xff] }
 0x4ce   :  { %v10574_v60 = vld [vmem:[#allocation87_spill] sm:$0xff] }
 0x4cf   :  { %v2132_v49 = vadd.f32 %v2130_v46, %v2128_v44  ;;  %v8457_v26 = vsel %vm2141_vm10, %v2131_v40, %v8091_v10  ;;  %v10546_v10 = vld [vmem:[#allocation59_spill] sm:$0xff]  ;;  %v10575_v46 = vld [vmem:[#allocation88_spill] sm:$0xff]  ;;  %v10576_v40 = vld [vmem:[#allocation89_spill] sm:$0xff] }
 0x4d0   :  { %v10577_v44 = vld [vmem:[#allocation90_spill] sm:$0xff] }
 0x4d1   :  { %v8460_v13 = vsel %vm2142_vm9, %v2132_v49, %v8094_v23  ;;  %v10547_v23 = vld [vmem:[#allocation60_spill] sm:$0xff] }
 0x4d2   :  { %v8464_v32 = vpack.c.bf16 %v8460_v13, %v8457_v26  ;;  %v10579_v49 = vld [vmem:[#allocation92_spill] sm:$0xff] }
 0x4d4   :  { %2180 = vmatprep.mubr.bf16.mxu1 %v8464_v32  ;;  %2223 = vmatprep.mubr.bf16.mxu0 %v8464_v32 }
 0x4d5   :  { %2181 = vmatmul.mubr.bf16.vlgmr.msra.gmra.mrb[28].mxu1 %v8472_v16  ;;  %2224 = vmatmul.mubr.bf16.vlgmr.msra.gmra.mrb[32].mxu0 %v8472_v16 }
 0x4d6   :  { %2235 = vmatpush1.bf16.msra.mxu1 %v8112_v51  ;;  %2278 = vmatpush1.bf16.msra.mxu0 %v8115_v52  ;;  %v10549_v51 = vld [vmem:[#allocation62_spill] sm:$0xff]  ;;  %v10550_v52 = vld [vmem:[#allocation63_spill] sm:$0xff] }
 0x4d7   :  { %2266 = vmatprep.mubr.bf16.mxu1 %v8464_v32  ;;  %2309 = vmatprep.mubr.bf16.mxu0 %v8464_v32 }
 0x4d8   :  { %2236 = vmatprep.subr.bf16.mxu1 %v8120_v54  ;;  %2279 = vmatprep.subr.bf16.mxu0 %v8123_v0  ;;  %v10551_v54 = vld [vmem:[#allocation64_spill] sm:$0xff]  ;;  %v10552_v0 = vld [vmem:[#allocation65_spill] sm:$0xff] }
 0x4da   :  { %2237 = vmatpush1.bf16.msra.mxu1 %v8126_v43  ;;  %2280 = vmatpush1.bf16.msra.mxu0 %v8129_v61  ;;  %v10553_v43 = vld [vmem:[#allocation66_spill] sm:$0xff]  ;;  %v10554_v61 = vld [vmem:[#allocation67_spill] sm:$0xff] }
 0x4db   :  { %2238 = vmatprep.subr.bf16.mxu1 %v8132_v59  ;;  %2281 = vmatprep.subr.bf16.mxu0 %v8135_v48  ;;  %v10555_v59 = vld [vmem:[#allocation68_spill] sm:$0xff]  ;;  %v10556_v48 = vld [vmem:[#allocation69_spill] sm:$0xff] }
 0x4de   :  { %2239 = vmatpush1.bf16.msra.mxu1 %v8138_v58  ;;  %2282 = vmatpush1.bf16.msra.mxu0 %v8141_v55  ;;  %v10557_v58 = vld [vmem:[#allocation70_spill] sm:$0xff]  ;;  %v10558_v55 = vld [vmem:[#allocation71_spill] sm:$0xff] }
 0x4df   :  { %2240 = vmatprep.subr.bf16.mxu1 %v8144_v33  ;;  %2283 = vmatprep.subr.bf16.mxu0 %v8147_v63  ;;  %v10559_v33 = vld [vmem:[#allocation72_spill] sm:$0xff]  ;;  %v10560_v63 = vld [vmem:[#allocation73_spill] sm:$0xff] }
 0x4e2   :  { %2241 = vmatpush1.bf16.msra.mxu1 %v8150_v35  ;;  %2284 = vmatpush1.bf16.msra.mxu0 %v8153_v41  ;;  %v10561_v35 = vld [vmem:[#allocation74_spill] sm:$0xff]  ;;  %v10562_v41 = vld [vmem:[#allocation75_spill] sm:$0xff] }
 0x4e3   :  { %2242 = vmatprep.subr.bf16.mxu1 %v8156_v31  ;;  %2285 = vmatprep.subr.bf16.mxu0 %v10545_v21  ;;  %v10563_v31 = vld [vmem:[#allocation76_spill] sm:$0xff]  ;;  %v10581_v21 = vld [vmem:[#allocation94_spill] sm:$0xff] }
 0x4e6   :  { %2243 = vmatpush1.bf16.msra.mxu1 %v10546_v10  ;;  %2286 = vmatpush1.bf16.msra.mxu0 %v10547_v23  ;;  %v10582_v10 = vld [vmem:[#allocation95_spill] sm:$0xff]  ;;  %v10583_v23 = vld [vmem:[#allocation96_spill] sm:$0xff] }
 0x4e7   :  { %2244 = vmatprep.subr.bf16.mxu1 %v10548_v1  ;;  %2287 = vmatprep.subr.bf16.mxu0 %v10549_v51  ;;  %v10584_v1 = vld [vmem:[#allocation97_spill] sm:$0xff]  ;;  %v10585_v51 = vld [vmem:[#allocation98_spill] sm:$0xff] }
 0x4ea   :  { %2245 = vmatpush1.bf16.msra.mxu1 %v10550_v52  ;;  %2288 = vmatpush1.bf16.msra.mxu0 %v10551_v54  ;;  %v10586_v52 = vld [vmem:[#allocation99_spill] sm:$0xff]  ;;  %v10587_v54 = vld [vmem:[#allocation100_spill] sm:$0xff] }
 0x4eb   :  { %2246 = vmatprep.subr.bf16.mxu1 %v10552_v0  ;;  %2289 = vmatprep.subr.bf16.mxu0 %v10553_v43  ;;  %v10588_v0 = vld [vmem:[#allocation101_spill] sm:$0xff]  ;;  %v10589_v43 = vld [vmem:[#allocation102_spill] sm:$0xff] }
 0x4ee   :  { %2247 = vmatpush1.bf16.msra.mxu1 %v10554_v61  ;;  %2290 = vmatpush1.bf16.msra.mxu0 %v10555_v59  ;;  %v8543_v61 = vld [vmem:[#allocation10 + $0x4] ss:$36 sps:$4 sm:$0xff]  }
 0x4ef   :  { %2248 = vmatprep.subr.bf16.mxu1 %v10556_v48  ;;  %2291 = vmatprep.subr.bf16.mxu0 %v10557_v58  ;;  %v8559_v59 = vld [vmem:[#allocation10 + $0x48] ss:$36 sps:$4 sm:$0xff]   ;;  %v8570_v48 = vld [vmem:[#allocation10 + $0xdc] ss:$36 sps:$4 sm:$0xff]  }
 0x4f0   :  { %v8616_v58 = vld [vmem:[#allocation10 + $0x240] ss:$36 sps:$4 sm:$0xff]  }
 0x4f2   :  { %2249 = vmatpush1.bf16.msra.mxu1 %v10558_v55  ;;  %2292 = vmatpush1.bf16.msra.mxu0 %v10559_v33  ;;  %v10594_v55 = vld [vmem:[#allocation107_spill] sm:$0xff]  ;;  %v8624_v33 = vld [vmem:[#allocation10 + $0x288] ss:$36 sps:$4 sm:$0xff]  }
 0x4f3   :  { %2250 = vmatprep.subr.bf16.mxu1 %v10560_v63  ;;  %2293 = vmatprep.subr.bf16.mxu0 %v10561_v35  ;;  %v10595_v63 = vld [vmem:[#allocation108_spill] sm:$0xff]  ;;  %v10596_v35 = vld [vmem:[#allocation109_spill] sm:$0xff] }
 0x4f6   :  { %2251 = vmatpush1.bf16.msra.mxu1 %v10562_v41  ;;  %2294 = vmatpush1.bf16.msra.mxu0 %v10563_v31  ;;  %v8632_v41 = vld [vmem:[#allocation10 + $0x2d0] ss:$36 sps:$4 sm:$0xff]   ;;  %v8635_v31 = vld [vmem:[#allocation10 + $0x31c] ss:$36 sps:$4 sm:$0xff]  }
 0x4f7   :  { %2252 = vmatprep.subr.bf16.mxu1 %v10564_v28  ;;  %2295 = vmatprep.subr.bf16.mxu0 %v10565_v15  ;;  %v10597_v28 = vld [vmem:[#allocation110_spill] sm:$0xff] }
 0x4f8   :  { %v8639_v15 = vld [vmem:[#allocation10 + $0x12c] ss:$36 sps:$4 sm:$0xff]  }
 0x4fa   :  { %2253 = vmatpush1.bf16.msra.mxu1 %v10566_v22  ;;  %2296 = vmatpush1.bf16.msra.mxu0 %v10567_v38  ;;  %v8642_v22 = vld [vmem:[#allocation10 + $0x318] ss:$36 sps:$4 sm:$0xff]   ;;  %v8645_v38 = vld [vmem:[#allocation10 + $0x364] ss:$36 sps:$4 sm:$0xff]  }
 0x4fb   :  { %2254 = vmatprep.subr.bf16.mxu1 %v10568_v50  ;;  %2297 = vmatprep.subr.bf16.mxu0 %v10569_v34  ;;  %v8648_v50 = vld [vmem:[#allocation10 + $0x128] ss:$36 sps:$4 sm:$0xff]   ;;  %v8651_v34 = vld [vmem:[#allocation10 + $0x174] ss:$36 sps:$4 sm:$0xff]  }
 0x4fe   :  { %2255 = vmatpush1.bf16.msra.mxu1 %v10570_v45  ;;  %2298 = vmatpush1.bf16.msra.mxu0 %v10571_v36  ;;  %v8654_v45 = vld [vmem:[#allocation10 + $0x360] ss:$36 sps:$4 sm:$0xff]   ;;  %v8657_v36 = vld [vmem:[#allocation10 + $0x3ac] ss:$36 sps:$4 sm:$0xff]  }
 0x4ff   :  { %2256 = vmatprep.subr.bf16.mxu1 %v10572_v42  ;;  %2299 = vmatprep.subr.bf16.mxu0 %v10573_v37  ;;  %v8660_v42 = vld [vmem:[#allocation10 + $0x170] ss:$36 sps:$4 sm:$0xff]   ;;  %v8663_v37 = vld [vmem:[#allocation10 + $0x1bc] ss:$36 sps:$4 sm:$0xff]  }
 0x502   :  { %2257 = vmatpush1.bf16.msra.mxu1 %v10574_v60  ;;  %2300 = vmatpush1.bf16.msra.mxu0 %v10575_v46  ;;  %v8666_v60 = vld [vmem:[#allocation10 + $0x3a8] ss:$36 sps:$4 sm:$0xff]   ;;  %v8669_v46 = vld [vmem:[#allocation10 + $0x3f4] ss:$36 sps:$4 sm:$0xff]  }
 0x503   :  { %2258 = vmatprep.subr.bf16.mxu1 %v10576_v40  ;;  %2301 = vmatprep.subr.bf16.mxu0 %v10577_v44  ;;  %10598 = vst [vmem:[#allocation34_spill] sm:$0xff] %v8666_v60  ;;  %10599 = vst [vmem:[#allocation35_spill] sm:$0xff] %v8669_v46  ;;  %v8672_v40 = vld [vmem:[#allocation10 + $0x1b8] ss:$36 sps:$4 sm:$0xff]   ;;  %v8675_v44 = vld [vmem:[#allocation10 + $0x204] ss:$36 sps:$4 sm:$0xff]  }
 0x504   :  { %10600 = vst [vmem:[#allocation36_spill] sm:$0xff] %v8672_v40  ;;  %10601 = vst [vmem:[#allocation37_spill] sm:$0xff] %v8675_v44 }
 0x506   :  { %2259 = vmatpush1.bf16.msra.mxu1 %v10578_v56  ;;  %2302 = vmatpush1.bf16.msra.mxu0 %v10579_v49  ;;  %v8678_v56 = vld [vmem:[#allocation10 + $0x3f0] ss:$36 sps:$4 sm:$0xff]   ;;  %v8681_v49 = vld [vmem:[#allocation10 + $0x43c] ss:$36 sps:$4 sm:$0xff]  }
 0x507   :  { %2260 = vmatprep.subr.bf16.mxu1 %v10580_v30  ;;  %2303 = vmatprep.subr.bf16.mxu0 %v10581_v21  ;;  %10602 = vst [vmem:[#allocation38_spill] sm:$0xff] %v8678_v56  ;;  %10603 = vst [vmem:[#allocation39_spill] sm:$0xff] %v8681_v49  ;;  %v8684_v30 = vld [vmem:[#allocation10 + $0x200] ss:$36 sps:$4 sm:$0xff]   ;;  %v8687_v21 = vld [vmem:[#allocation10 + $0x24c] ss:$36 sps:$4 sm:$0xff]  }
 0x508   :  { %10604 = vst [vmem:[#allocation40_spill] sm:$0xff] %v8684_v30  ;;  %10605 = vst [vmem:[#allocation41_spill] sm:$0xff] %v8687_v21 }
 0x50a   :  { %2261 = vmatpush1.bf16.msra.mxu1 %v10582_v10  ;;  %2304 = vmatpush1.bf16.msra.mxu0 %v10583_v23  ;;  %v8690_v10 = vld [vmem:[#allocation10 + $0x438] ss:$36 sps:$4 sm:$0xff]  }
 0x50b   :  { %2262 = vmatprep.subr.bf16.mxu1 %v10584_v1  ;;  %2305 = vmatprep.subr.bf16.mxu0 %v10585_v51  ;;  %10606 = vst [vmem:[#allocation42_spill] sm:$0xff] %v8690_v10  ;;  %v8693_v23 = vld [vmem:[#allocation10 + $0x14] ss:$36 sps:$4 sm:$0xff]   ;;  %v8696_v1 = vld [vmem:[#allocation10 + $0x248] ss:$36 sps:$4 sm:$0xff]  }
 0x50c   :  { %10607 = vst [vmem:[#allocation43_spill] sm:$0xff] %v8693_v23  ;;  %10608 = vst [vmem:[#allocation44_spill] sm:$0xff] %v8696_v1  ;;  %v8699_v51 = vld [vmem:[#allocation10 + $0x294] ss:$36 sps:$4 sm:$0xff]  }
 0x50d   :  { %10609 = vst [vmem:[#allocation45_spill] sm:$0xff] %v8699_v51 }
 0x50e   :  { %2263 = vmatpush1.bf16.msra.mxu1 %v10586_v52  ;;  %2306 = vmatpush1.bf16.msra.mxu0 %v8285_v19  ;;  %v10590_v19 = vld [vmem:[#allocation103_spill] sm:$0xff] }
 0x50f   :  { %2264 = vmatprep.subr.bf16.mxu1 %v10587_v54  ;;  %2307 = vmatprep.subr.bf16.mxu0 %v8291_v3  ;;  %v8551_v3 = vld [vmem:[#allocation10] ss:$36 sps:$4 sm:$0xff]   ;;  %v8702_v52 = vld [vmem:[#allocation10 + $0x290] ss:$36 sps:$4 sm:$0xff]  }
 0x510   :  { %10610 = vst [vmem:[#allocation48_spill] sm:$0xff] %v8702_v52  ;;  %v8705_v54 = vld [vmem:[#allocation10 + $0x2dc] ss:$36 sps:$4 sm:$0xff]  }
 0x511   :  { %10611 = vst [vmem:[#allocation46_spill] sm:$0xff] %v8705_v54 }
 0x512   :  { %2265 = vmatpush1.bf16.msra.mxu1 %v10588_v0  ;;  %2308 = vmatpush1.bf16.msra.mxu0 %v8297_v62  ;;  %v8554_v62 = vld [vmem:[#allocation10 + $0x4c] ss:$36 sps:$4 sm:$0xff]   ;;  %v8708_v0 = vld [vmem:[#allocation10 + $0x2d8] ss:$36 sps:$4 sm:$0xff]  }
 0x513   :  { %5475 = vmatprep.subr.bf16.mxu1 %v10589_v43  ;;  %2502 = vmatprep.subr.bf16.mxu0 %v8543_v61  ;;  %10612 = vst [vmem:[#allocation47_spill] sm:$0xff] %v8708_v0  ;;  %v8711_v43 = vld [vmem:[#allocation10 + $0x324] ss:$36 sps:$4 sm:$0xff]  }
 0x514   :  { %10613 = vst [vmem:[#allocation49_spill] sm:$0xff] %v8711_v43 }
 0x515   :  { %2267 = vmatmul.mubr.bf16.vlgmr.msra.gmra.mrb[32].mxu1 %v8472_v16  ;;  %2310 = vmatmul.mubr.bf16.vlgmr.msra.gmra.mrb[36].mxu0 %v8472_v16 }
 0x516   :  { %5476 = vmatpush3.bf16.msra.mxu1 %v8306_v25  ;;  %2352 = vmatprep.mubr.bf16.mxu1 %v8464_v32  ;;  %v8562_v25 = vld [vmem:[#allocation10 + $0x94] ss:$36 sps:$4 sm:$0xff]  }
 0x517   :  { %5477 = vmatprep.subr.bf16.mxu1 %v10590_v19  ;;  %2503 = vmatpush1.bf16.msra.mxu0 %v8551_v3  ;;  %v8567_v32 = vld [vmem:[#allocation10 + $0x90] ss:$36 sps:$4 sm:$0xff]   ;;  %v8714_v19 = vld [vmem:[#allocation10 + $0x320] ss:$36 sps:$4 sm:$0xff]  }
 0x518   :  { %2504 = vmatprep.subr.bf16.mxu0 %v8554_v62  ;;  %10614 = vst [vmem:[#allocation50_spill] sm:$0xff] %v8714_v19 }
 0x51a   :  { %5478 = vmatpush3.bf16.msra.mxu1 %v8315_v27  ;;  %v8575_v27 = vld [vmem:[#allocation10 + $0xd8] ss:$36 sps:$4 sm:$0xff]  }
 0x51b   :  { %5479 = vmatprep.subr.bf16.mxu1 %v8318_v39  ;;  %2505 = vmatpush1.bf16.msra.mxu0 %v8559_v59  ;;  %v8578_v39 = vld [vmem:[#allocation10 + $0x124] ss:$36 sps:$4 sm:$0xff]  }
 0x51c   :  { %2506 = vmatprep.subr.bf16.mxu0 %v8562_v25 }
 0x51e   :  { %5480 = vmatpush3.bf16.msra.mxu1 %v8323_v57  ;;  %v8586_v57 = vld [vmem:[#allocation10 + $0x16c] ss:$36 sps:$4 sm:$0xff]  }
 0x51f   :  { %5481 = vmatprep.subr.bf16.mxu1 %v8326_v47  ;;  %2507 = vmatpush1.bf16.msra.mxu0 %v8567_v32  ;;  %v8583_v47 = vld [vmem:[#allocation10 + $0x120] ss:$36 sps:$4 sm:$0xff]  }
 0x520   :  { %2508 = vmatprep.subr.bf16.mxu0 %v8570_v48 }
 0x522   :  { %5482 = vmatpush3.bf16.msra.mxu1 %v8331_v5  ;;  %v8591_v5 = vld [vmem:[#allocation10 + $0x168] ss:$36 sps:$4 sm:$0xff]  }
 0x523   :  { %5483 = vmatprep.subr.bf16.mxu1 %v8334_v4  ;;  %2509 = vmatpush1.bf16.msra.mxu0 %v8575_v27  ;;  %v8594_v4 = vld [vmem:[#allocation10 + $0x1b4] ss:$36 sps:$4 sm:$0xff]  }
 0x524   :  { %2510 = vmatprep.subr.bf16.mxu0 %v8578_v39 }
 0x526   :  { %5484 = vmatpush3.bf16.msra.mxu1 %v8339_v17  ;;  %v8599_v17 = vld [vmem:[#allocation10 + $0x1b0] ss:$36 sps:$4 sm:$0xff]  }
 0x527   :  { %5485 = vmatprep.subr.bf16.mxu1 %v8342_v11  ;;  %2511 = vmatpush1.bf16.msra.mxu0 %v8583_v47  ;;  %v8602_v11 = vld [vmem:[#allocation10 + $0x1fc] ss:$36 sps:$4 sm:$0xff]  }
 0x528   :  { %2512 = vmatprep.subr.bf16.mxu0 %v8586_v57 }
 0x52a   :  { %5486 = vmatpush3.bf16.msra.mxu1 %v8347_v29  ;;  %v8607_v29 = vld [vmem:[#allocation10 + $0x1f8] ss:$36 sps:$4 sm:$0xff]  }
 0x52b   :  { %5487 = vmatprep.subr.bf16.mxu1 %v8350_v7  ;;  %2513 = vmatpush1.bf16.msra.mxu0 %v8591_v5  ;;  %v8610_v7 = vld [vmem:[#allocation10 + $0x244] ss:$36 sps:$4 sm:$0xff]  }
 0x52c   :  { %2514 = vmatprep.subr.bf16.mxu0 %v8594_v4 }
 0x52e   :  { %5488 = vmatpush3.bf16.msra.mxu1 %v8355_v12  ;;  %v10591_v12 = vld [vmem:[#allocation104_spill] sm:$0xff] }
 0x52f   :  { %5489 = vmatprep.subr.bf16.mxu1 %v8358_v6  ;;  %2515 = vmatpush1.bf16.msra.mxu0 %v8599_v17  ;;  %v10592_v6 = vld [vmem:[#allocation105_spill] sm:$0xff] }
 0x530   :  { %2516 = vmatprep.subr.bf16.mxu0 %v8602_v11 }
 0x532   :  { %5490 = vmatpush3.bf16.msra.mxu1 %v8363_v9  ;;  %v8619_v9 = vld [vmem:[#allocation10 + $0x28c] ss:$36 sps:$4 sm:$0xff]  }
 0x533   :  { %2545 = vmatprep.subr.bf16.mxu1 %v8366_v14  ;;  %2517 = vmatpush1.bf16.msra.mxu0 %v8607_v29  ;;  %v10593_v14 = vld [vmem:[#allocation106_spill] sm:$0xff] }
 0x534   :  { %2518 = vmatprep.subr.bf16.mxu0 %v8610_v7 }
 0x535   :  { %2353 = vmatmul.mubr.bf16.vlgmr.msra.gmra.mrb[36].mxu1 %v8472_v16  ;;  %v8627_v16 = vld [vmem:[#allocation10 + $0x2d4] ss:$36 sps:$4 sm:$0xff]  }
 0x536   :  { %2546 = vmatpush1.bf16.msra.mxu1 %v10591_v12  ;;  %v8717_v12 = vld [vmem:[#allocation10 + $0x36c] ss:$36 sps:$4 sm:$0xff]  }
 0x537   :  { %2547 = vmatprep.subr.bf16.mxu1 %v10592_v6  ;;  %2519 = vmatpush1.bf16.msra.mxu0 %v8616_v58  ;;  %10615 = vst [vmem:[#allocation51_spill] sm:$0xff] %v8717_v12  ;;  %v8720_v6 = vld [vmem:[#allocation10 + $0x368] ss:$36 sps:$4 sm:$0xff]  }
 0x538   :  { %2520 = vmatprep.subr.bf16.mxu0 %v8619_v9  ;;  %10616 = vst [vmem:[#allocation52_spill] sm:$0xff] %v8720_v6 }
 0x53a   :  { %2548 = vmatpush1.bf16.msra.mxu1 %v10593_v14  ;;  %v8723_v14 = vld [vmem:[#allocation10 + $0x3b4] ss:$36 sps:$4 sm:$0xff]  }
 0x53b   :  { %2549 = vmatprep.subr.bf16.mxu1 %v10594_v55  ;;  %2521 = vmatpush1.bf16.msra.mxu0 %v8624_v33  ;;  %10617 = vst [vmem:[#allocation53_spill] sm:$0xff] %v8723_v14  ;;  %v8726_v55 = vld [vmem:[#allocation10 + $0x3b0] ss:$36 sps:$4 sm:$0xff]  }
 0x53c   :  { %2522 = vmatprep.subr.bf16.mxu0 %v8627_v16  ;;  %10618 = vst [vmem:[#allocation54_spill] sm:$0xff] %v8726_v55 }
 0x53e   :  { %2550 = vmatpush1.bf16.msra.mxu1 %v10595_v63  ;;  %v8729_v63 = vld [vmem:[#allocation10 + $0x3fc] ss:$36 sps:$4 sm:$0xff]  }
 0x53f   :  { %2551 = vmatprep.subr.bf16.mxu1 %v10596_v35  ;;  %2523 = vmatpush1.bf16.msra.mxu0 %v8632_v41  ;;  %10619 = vst [vmem:[#allocation55_spill] sm:$0xff] %v8729_v63  ;;  %v8732_v35 = vld [vmem:[#allocation10 + $0x3f8] ss:$36 sps:$4 sm:$0xff]  }
 0x540   :  { %2524 = vmatprep.subr.bf16.mxu0 %v8635_v31  ;;  %10620 = vst [vmem:[#allocation56_spill] sm:$0xff] %v8732_v35 }
 0x542   :  { %2552 = vmatpush1.bf16.msra.mxu1 %v10597_v28  ;;  %v8735_v28 = vld [vmem:[#allocation10 + $0x444] ss:$36 sps:$4 sm:$0xff]  }
 0x543   :  { %2553 = vmatprep.subr.bf16.mxu1 %v8639_v15  ;;  %2525 = vmatpush1.bf16.msra.mxu0 %v8642_v22  ;;  %10621 = vst [vmem:[#allocation57_spill] sm:$0xff] %v8735_v28 }
 0x544   :  { %2526 = vmatprep.subr.bf16.mxu0 %v8645_v38 }
 0x546   :  { %2554 = vmatpush1.bf16.msra.mxu1 %v8648_v50 }
 0x547   :  { %2555 = vmatprep.subr.bf16.mxu1 %v8651_v34  ;;  %2527 = vmatpush1.bf16.msra.mxu0 %v8654_v45 }
 0x548   :  { %2528 = vmatprep.subr.bf16.mxu0 %v8657_v36 }
 0x54a   :  { %2556 = vmatpush1.bf16.msra.mxu1 %v8660_v42 }
 0x54b   :  { %2557 = vmatprep.subr.bf16.mxu1 %v8663_v37  ;;  %2529 = vmatpush1.bf16.msra.mxu0 %v8666_v60 }
 0x54c   :  { %2530 = vmatprep.subr.bf16.mxu0 %v8669_v46 }
 0x54e   :  { %2558 = vmatpush1.bf16.msra.mxu1 %v8672_v40 }
 0x54f   :  { %2559 = vmatprep.subr.bf16.mxu1 %v8675_v44  ;;  %2531 = vmatpush1.bf16.msra.mxu0 %v8678_v56 }
 0x550   :  { %2532 = vmatprep.subr.bf16.mxu0 %v8681_v49 }
 0x552   :  { %2560 = vmatpush1.bf16.msra.mxu1 %v8684_v30 }
 0x553   :  { %2561 = vmatprep.subr.bf16.mxu1 %v8687_v21  ;;  %2533 = vmatpush1.bf16.msra.mxu0 %v8690_v10 }
 0x554   :  { %2588 = vmatprep.subr.bf16.mxu0 %v8693_v23 }
 0x556   :  { %2562 = vmatpush1.bf16.msra.mxu1 %v8696_v1 }
 0x557   :  { %2563 = vmatprep.subr.bf16.mxu1 %v8699_v51 }
 0x55a   :  { %2564 = vmatpush1.bf16.msra.mxu1 %v8702_v52 }
 0x55b   :  { %2565 = vmatprep.subr.bf16.mxu1 %v8705_v54 }
 0x55e   :  { %2566 = vmatpush1.bf16.msra.mxu1 %v8708_v0 }
 0x55f   :  { %2567 = vmatprep.subr.bf16.mxu1 %v8711_v43 }
 0x562   :  { %2568 = vmatpush1.bf16.msra.mxu1 %v8714_v19 }
 0x563   :  { %2569 = vmatprep.subr.bf16.mxu1 %v8717_v12  ;;  %v2364_v12 = vld [vmem:[#allocation8 + $0x54] sm:$0xff] }
 0x564   :  { %v2370_v23 = vunpack.c.h.bf16 %v2364_v12 }
 0x566   :  { %2570 = vmatpush1.bf16.msra.mxu1 %v8720_v6  ;;  %v8738_v6 = vld [vmem:[#allocation10 + $0x440] ss:$36 sps:$4 sm:$0xff]  }
 0x567   :  { %2571 = vmatprep.subr.bf16.mxu1 %v8723_v14  ;;  %10622 = vst [vmem:[#allocation58_spill] sm:$0xff] %v8738_v6  ;;  %v8741_v14 = vld [vmem:[#allocation10 + $0x1c] ss:$36 sps:$4 sm:$0xff]  }
 0x568   :  { %10623 = vst [vmem:[#allocation59_spill] sm:$0xff] %v8741_v14 }
 0x56a   :  { %2572 = vmatpush1.bf16.msra.mxu1 %v8726_v55  ;;  %v2362_v55 = vld [vmem:[#allocation8 + $0x48] sm:$0xff] }
 0x56b   :  { %2573 = vmatprep.subr.bf16.mxu1 %v8729_v63  ;;  %v2366_v19 = vunpack.c.l.bf16 %v2362_v55  ;;  %v2369_v63 = vunpack.c.l.bf16 %v2364_v12  ;;  %v2367_v54 = vunpack.c.h.bf16 %v2362_v55 }
 0x56e   :  { %2574 = vmatpush1.bf16.msra.mxu1 %v8732_v35 }
 0x56f   :  { %2575 = vmatprep.subr.bf16.mxu1 %v8735_v28 }
 0x572   :  { %2576 = vmatpush1.bf16.msra.mxu1 %v8738_v6 }
 0x573   :  { %2631 = vmatprep.subr.bf16.mxu1 %v8741_v14 }
 0x5a8   :  { %v2182_v43 = vpop.f32.mrb[28].mxu1  ;;  %v2225_v0 = vpop.f32.mrb[32].mxu0 }
 0x5a9   :  { %v2372_v35 = vadd.f32 %v2366_v19, %v2182_v43  ;;  %v2184_v52 = vpop.f32.mrb[29].mxu1  ;;  %v2227_v51 = vpop.f32.mrb[33].mxu0 }
 0x5aa   :  { %v2186_v1 = vpop.f32.mrb[30].mxu1  ;;  %v2229_v28 = vpop.f32.mrb[34].mxu0  ;;  %v2373_v49 = vadd.f32 %v2367_v54, %v2184_v52 }
 0x5ab   :  { %v5225_v10 = vmul.f32 -1.442695, %v2372_v35  ;;  %v2374_v21 = vadd.f32 %v2369_v63, %v2186_v1  ;;  %v2188_v6 = vpop.f32.mrb[31].mxu1  ;;  %v2231_v30 = vpop.f32.mrb[35].mxu0  ;;  %v2363_v1 = vld [vmem:[#allocation8 + $0x50] ss:$12 sps:$4 sm:$0xff]  }
 0x5ac   :  { %v2375_v56 = vadd.f32 %v2370_v23, %v2188_v6  ;;  %v5226_v44 = vmul.f32 -1.442695, %v2373_v49  ;;  %v2368_v60 = vunpack.c.l.bf16 %v2363_v1 }
 0x5ad   :  { %5962 = vpow2.f32 %v5225_v10  ;;  %v5227_v14 = vmul.f32 -1.442695, %v2374_v21  ;;  %v2400_v10 = vadd.f32 %v10381_v53, %v2225_v0 }
 0x5ae   :  { %v5228_v40 = vmul.f32 -1.442695, %v2375_v56  ;;  %v2371_v56 = vunpack.c.h.bf16 %v2363_v1 }
 0x5af   :  { %5964 = vpow2.f32 %v5227_v14 }
 0x5b0   :  { %5966 = vpow2.f32 %v5226_v44 }
 0x5b1   :  { %5968 = vpow2.f32 %v5228_v40  ;;  %v2401_v40 = vadd.f32 %v10381_v53, %v2229_v28 }
 0x5b7   :  { %v5963_v55 = vpop.eup %5962 }
 0x5b8   :  { %v2388_v43 = vadd.f32 1.0, %v5963_v55 }
 0x5b9   :  { %v5965_v19 = vpop.eup %5964 }
 0x5ba   :  { %5970 = vrcp.f32 %v2388_v43  ;;  %v2390_v46 = vadd.f32 1.0, %v5965_v19  ;;  %v5967_v12 = vpop.eup %5966 }
 0x5bb   :  { %v5969_v35 = vpop.eup %5968  ;;  %v2389_v63 = vadd.f32 1.0, %v5967_v12 }
 0x5bc   :  { %5972 = vrcp.f32 %v2390_v46  ;;  %v2391_v21 = vadd.f32 1.0, %v5969_v35 }
 0x5bd   :  { %5974 = vrcp.f32 %v2389_v63 }
 0x5be   :  { %5976 = vrcp.f32 %v2391_v21 }
 0x5c4   :  { %v5971_v23 = vpop.eup %5970 }
 0x5c5   :  { %v2402_v52 = vmul.f32 %v5971_v23, %v2400_v10  ;;  %v10624_v10 = vld [vmem:[#allocation29_spill] sm:$0xff] }
 0x5c6   :  { %v5973_v44 = vpop.eup %5972  ;;  %v2437_v21 = vadd.f32 %v2227_v51, %v10624_v10 }
 0x5c7   :  { %v2404_v49 = vadd.f32 %v2402_v52, %v2368_v60  ;;  %v2403_v54 = vmul.f32 %v5973_v44, %v2401_v40  ;;  %v5975_v6 = vpop.eup %5974 }
 0x5c8   :  { %v5977_v14 = vpop.eup %5976  ;;  %v2411_v55 = vsub.f32 1.0, %v5975_v6  ;;  %v2415_v0 = vmul.f32 %v5975_v6, %v8468_v20 }
 0x5c9   :  { %5978 = vtanh.f32 %v2404_v49  ;;  %v2405_v46 = vadd.f32 %v2403_v54, %v2371_v56  ;;  %v2412_v12 = vsub.f32 1.0, %v5977_v14  ;;  %v2416_v28 = vmul.f32 %v5977_v14, %v8454_v24 }
 0x5ca   :  { %v2440_v56 = vadd.f32 %v2231_v30, %v10624_v10 }
 0x5cb   :  { %5980 = vtanh.f32 %v2405_v46 }
 0x5d3   :  { %v5979_v43 = vpop.eup %5978 }
 0x5d4   :  { %v2413_v19 = vmul.f32 %v5979_v43, %v2411_v55 }
 0x5d5   :  { %v5981_v35 = vpop.eup %5980 }
 0x5d6   :  { %v8747_v63 = vadd.f32 %v2415_v0, %v2413_v19  ;;  %v2414_v1 = vmul.f32 %v5981_v35, %v2412_v12 }
 0x5d8   :  { %v8750_v60 = vadd.f32 %v2416_v28, %v2414_v1 }
 0x5e8   :  { %v2268_v23 = vpop.f32.mrb[32].mxu1  ;;  %v2311_v52 = vpop.f32.mrb[36].mxu0 }
 0x5e9   :  { %v2438_v40 = vadd.f32 %v2268_v23, %v10544_v18  ;;  %v2443_v44 = vadd.f32 %v2437_v21, %v2311_v52  ;;  %v2270_v49 = vpop.f32.mrb[33].mxu1  ;;  %v2313_v54 = vpop.f32.mrb[37].mxu0 }
 0x5ea   :  { %v2272_v46 = vpop.f32.mrb[34].mxu1  ;;  %v2315_v6 = vpop.f32.mrb[38].mxu0 }
 0x5eb   :  { %v2444_v55 = vadd.f32 %v2438_v40, %v2313_v54  ;;  %v2441_v43 = vadd.f32 %v2272_v46, %v10544_v18  ;;  %v2445_v19 = vadd.f32 %v2440_v56, %v2315_v6  ;;  %v2274_v14 = vpop.f32.mrb[35].mxu1  ;;  %v2317_v0 = vpop.f32.mrb[39].mxu0  ;;  %v5231_v35 = vmul.f32 -1.442695, %v2443_v44 }
 0x5ed   :  { %v2446_v12 = vadd.f32 %v2441_v43, %v2317_v0  ;;  %v5233_v51 = vmul.f32 -1.442695, %v2445_v19  ;;  %5982 = vpow2.f32 %v5231_v35  ;;  %v5232_v1 = vmul.f32 -1.442695, %v2444_v55 }
 0x5ef   :  { %5984 = vpow2.f32 %v5233_v51  ;;  %v5234_v30 = vmul.f32 -1.442695, %v2446_v12  ;;  %v2439_v51 = vadd.f32 %v2270_v49, %v10387_v8 }
 0x5f0   :  { %5986 = vpow2.f32 %v5232_v1 }
 0x5f1   :  { %5988 = vpow2.f32 %v5234_v30 }
 0x5f7   :  { %v5983_v28 = vpop.eup %5982 }
 0x5f8   :  { %v2459_v23 = vadd.f32 1.0, %v5983_v28 }
 0x5f9   :  { %v5985_v21 = vpop.eup %5984 }
 0x5fa   :  { %v2461_v52 = vadd.f32 1.0, %v5985_v21  ;;  %5990 = vrcp.f32 %v2459_v23  ;;  %v5987_v40 = vpop.eup %5986  ;;  %v2442_v21 = vadd.f32 %v2274_v14, %v10387_v8 }
 0x5fb   :  { %v5989_v56 = vpop.eup %5988  ;;  %v2460_v6 = vadd.f32 1.0, %v5987_v40 }
 0x5fc   :  { %5992 = vrcp.f32 %v2461_v52  ;;  %v2462_v0 = vadd.f32 1.0, %v5989_v56 }
 0x5fd   :  { %5994 = vrcp.f32 %v2460_v6 }
 0x5fe   :  { %5996 = vrcp.f32 %v2462_v0 }
 0x604   :  { %v5991_v35 = vpop.eup %5990 }
 0x606   :  { %v5993_v28 = vpop.eup %5992 }
 0x608   :  { %v5491_v54 = vpop.f32.mrb[36].mxu1 }
 0x609   :  { %v5492_v46 = vpop.f32.mrb[37].mxu1 }
 0x60a   :  { %v5493_v43 = vadd.f32 %v5492_v46, %v5491_v54  ;;  %v5494_v44 = vpop.f32.mrb[38].mxu1  ;;  %v5995_v54 = vpop.eup %5994 }
 0x60b   :  { %v5495_v19 = vpop.f32.mrb[39].mxu1  ;;  %v5997_v56 = vpop.eup %5996  ;;  %v2483_v49 = vmul.f32 %v5995_v54, %v8457_v26 }
 0x60c   :  { %v2471_v55 = vadd.f32 %v5493_v43, %v10465_v2  ;;  %v5496_v12 = vadd.f32 %v5495_v19, %v5494_v44  ;;  %v2494_v46 = vpop.permute.xlu0 %2493  ;;  %v2479_v43 = vsub.f32 1.0, %v5995_v54  ;;  %v2491_v19 = vpop.permute.xlu1 %2490  ;;  %v2480_v6 = vsub.f32 1.0, %v5997_v56 }
 0x60d   :  { %vm2496_vm13 = vcmp.eq.s32.totalorder %v2494_v46, 1  ;;  %vm2495_vm14 = vcmp.eq.s32.totalorder %v2491_v19, 1  ;;  %v8811_v46 = vld [vmem:[#allocation10 + $0xac] ss:$36 sps:$4 sm:$0xff]  }
 0x60e   :  { %v2473_v1 = vmul.f32 %v5991_v35, %v2471_v55  ;;  %v2472_v30 = vadd.f32 %v5496_v12, %v10465_v2  ;;  %v2484_v35 = vmul.f32 %v5997_v56, %v8460_v13  ;;  %v8808_v56 = vld [vmem:[#allocation10 + $0xa4] ss:$36 sps:$4 sm:$0xff]   ;;  %v8820_v19 = vld [vmem:[#allocation10 + $0xec] ss:$36 sps:$4 sm:$0xff]  }
 0x610   :  { %v2475_v23 = vadd.f32 %v2473_v1, %v2439_v51  ;;  %v2474_v52 = vmul.f32 %v5993_v28, %v2472_v30  ;;  %v2426_v51 = vpop.permute.xlu0 %2425  ;;  %v2423_v30 = vpop.permute.xlu1 %2422 }
 0x611   :  { %vm2428_vm12 = vcmp.eq.s32.totalorder %v2426_v51, 1  ;;  %vm2427_vm15 = vcmp.eq.s32.totalorder %v2423_v30, 1  ;;  %v8844_v51 = vld [vmem:[#allocation10 + $0x17c] ss:$36 sps:$4 sm:$0xff]  }
 0x612   :  { %5998 = vtanh.f32 %v2475_v23  ;;  %v2476_v40 = vadd.f32 %v2474_v52, %v2442_v21  ;;  %v8764_v28 = vsel %vm2428_vm12, %v8750_v60, %v8454_v24  ;;  %v8788_v24 = vld [vmem:[#allocation10 + $0x10] ss:$36 sps:$4 sm:$0xff]   ;;  %v8805_v60 = vld [vmem:[#allocation10 + $0x60] ss:$36 sps:$4 sm:$0xff]   ;;  %10628 = vst [vmem:[#allocation63_spill] sm:$0xff] %v8844_v51 }
 0x613   :  { %v8850_v30 = vld [vmem:[#allocation10 + $0x178] ss:$36 sps:$4 sm:$0xff]  }
 0x614   :  { %6000 = vtanh.f32 %v2476_v40  ;;  %v8778_v40 = vsel %vm2427_vm15, %v8747_v63, %v8468_v20  ;;  %v8799_v20 = vld [vmem:[#allocation10 + $0x64] ss:$36 sps:$4 sm:$0xff]   ;;  %v8802_v63 = vld [vmem:[#allocation10 + $0x58] ss:$36 sps:$4 sm:$0xff]   ;;  %10630 = vst [vmem:[#allocation65_spill] sm:$0xff] %v8850_v30 }
 0x615   :  { %v8782_v54 = vpack.c.bf16 %v8764_v28, %v8778_v40 }
 0x61c   :  { %v5999_v44 = vpop.eup %5998 }
 0x61d   :  { %v2481_v55 = vmul.f32 %v5999_v44, %v2479_v43  ;;  %v8814_v43 = vld [vmem:[#allocation10 + $0xa0] ss:$36 sps:$4 sm:$0xff]   ;;  %v8817_v44 = vld [vmem:[#allocation10 + $0xa8] ss:$36 sps:$4 sm:$0xff]  }
 0x61e   :  { %v6001_v12 = vpop.eup %6000 }
 0x61f   :  { %v2485_v14 = vadd.f32 %v2483_v49, %v2481_v55  ;;  %v2482_v0 = vmul.f32 %v6001_v12, %v2480_v6  ;;  %v8823_v49 = vld [vmem:[#allocation10 + $0xf4] ss:$36 sps:$4 sm:$0xff]   ;;  %v8826_v6 = vld [vmem:[#allocation10 + $0xe8] ss:$36 sps:$4 sm:$0xff]  }
 0x620   :  { %v8829_v55 = vld [vmem:[#allocation10 + $0xf0] ss:$36 sps:$4 sm:$0xff]  }
 0x621   :  { %v2486_v1 = vadd.f32 %v2484_v35, %v2482_v0  ;;  %v8767_v21 = vsel %vm2495_vm14, %v2485_v14, %v8457_v26  ;;  %v8791_v26 = vld [vmem:[#allocation10 + $0x18] ss:$36 sps:$4 sm:$0xff]   ;;  %v8838_v14 = vld [vmem:[#allocation10 + $0x130] ss:$36 sps:$4 sm:$0xff]  }
 0x622   :  { %v8832_v12 = vld [vmem:[#allocation10 + $0x134] ss:$36 sps:$4 sm:$0xff]   ;;  %v8835_v35 = vld [vmem:[#allocation10 + $0x13c] ss:$36 sps:$4 sm:$0xff]   ;;  %10626 = vst [vmem:[#allocation61_spill] sm:$0xff] %v8838_v14 }
 0x623   :  { %v8770_v23 = vsel %vm2496_vm13, %v2486_v1, %v8460_v13  ;;  %v8796_v13 = vld [vmem:[#allocation10 + $0x5c] ss:$36 sps:$4 sm:$0xff]   ;;  %10625 = vst [vmem:[#allocation60_spill] sm:$0xff] %v8835_v35  ;;  %v8847_v1 = vld [vmem:[#allocation10 + $0x184] ss:$36 sps:$4 sm:$0xff]  }
 0x624   :  { %v8774_v52 = vpack.c.bf16 %v8770_v23, %v8767_v21  ;;  %v8841_v0 = vld [vmem:[#allocation10 + $0x138] ss:$36 sps:$4 sm:$0xff]   ;;  %10629 = vst [vmem:[#allocation64_spill] sm:$0xff] %v8847_v1 }
 0x625   :  { %10627 = vst [vmem:[#allocation62_spill] sm:$0xff] %v8841_v0 }
 0x626   :  { %2534 = vmatprep.mubr.bf16.mxu0 %v8774_v52  ;;  %2577 = vmatprep.mubr.bf16.mxu1 %v8774_v52 }
 0x627   :  { %2535 = vmatmul.mubr.bf16.vlgmr.msra.gmra.mrb[40].mxu0 %v8782_v54  ;;  %2578 = vmatmul.mubr.bf16.vlgmr.msra.gmra.mrb[40].mxu1 %v8782_v54 }
 0x628   :  { %2589 = vmatpush1.bf16.msra.mxu0 %v8788_v24  ;;  %2632 = vmatpush1.bf16.msra.mxu1 %v8791_v26 }
 0x629   :  { %2620 = vmatprep.mubr.bf16.mxu0 %v8774_v52  ;;  %2663 = vmatprep.mubr.bf16.mxu1 %v8774_v52 }
 0x62a   :  { %2590 = vmatprep.subr.bf16.mxu0 %v8796_v13  ;;  %2633 = vmatprep.subr.bf16.mxu1 %v8799_v20 }
 0x62c   :  { %2591 = vmatpush1.bf16.msra.mxu0 %v8802_v63  ;;  %2634 = vmatpush1.bf16.msra.mxu1 %v8805_v60 }
 0x62d   :  { %2592 = vmatprep.subr.bf16.mxu0 %v8808_v56  ;;  %2635 = vmatprep.subr.bf16.mxu1 %v8811_v46 }
 0x630   :  { %2593 = vmatpush1.bf16.msra.mxu0 %v8814_v43  ;;  %2636 = vmatpush1.bf16.msra.mxu1 %v8817_v44 }
 0x631   :  { %2594 = vmatprep.subr.bf16.mxu0 %v8820_v19  ;;  %2637 = vmatprep.subr.bf16.mxu1 %v8823_v49 }
 0x634   :  { %2595 = vmatpush1.bf16.msra.mxu0 %v8826_v6  ;;  %2638 = vmatpush1.bf16.msra.mxu1 %v8829_v55 }
 0x635   :  { %2596 = vmatprep.subr.bf16.mxu0 %v8832_v12  ;;  %2639 = vmatprep.subr.bf16.mxu1 %v8835_v35  ;;  %v8853_v35 = vld [vmem:[#allocation10 + $0x180] ss:$36 sps:$4 sm:$0xff]  }
 0x636   :  { %10631 = vst [vmem:[#allocation66_spill] sm:$0xff] %v8853_v35 }
 0x638   :  { %2597 = vmatpush1.bf16.msra.mxu0 %v8838_v14  ;;  %2640 = vmatpush1.bf16.msra.mxu1 %v8841_v0  ;;  %v8856_v14 = vld [vmem:[#allocation10 + $0x1c4] ss:$36 sps:$4 sm:$0xff]   ;;  %v8859_v0 = vld [vmem:[#allocation10 + $0x1cc] ss:$36 sps:$4 sm:$0xff]  }
 0x639   :  { %2598 = vmatprep.subr.bf16.mxu0 %v8844_v51  ;;  %2641 = vmatprep.subr.bf16.mxu1 %v8847_v1  ;;  %10632 = vst [vmem:[#allocation67_spill] sm:$0xff] %v8856_v14  ;;  %10633 = vst [vmem:[#allocation68_spill] sm:$0xff] %v8859_v0  ;;  %v8862_v51 = vld [vmem:[#allocation10 + $0x1c0] ss:$36 sps:$4 sm:$0xff]   ;;  %v8865_v1 = vld [vmem:[#allocation10 + $0x1c8] ss:$36 sps:$4 sm:$0xff]  }
 0x63a   :  { %10634 = vst [vmem:[#allocation69_spill] sm:$0xff] %v8862_v51  ;;  %10635 = vst [vmem:[#allocation70_spill] sm:$0xff] %v8865_v1 }
 0x63c   :  { %2599 = vmatpush1.bf16.msra.mxu0 %v8850_v30  ;;  %2642 = vmatpush1.bf16.msra.mxu1 %v8853_v35  ;;  %v8868_v30 = vld [vmem:[#allocation10 + $0x20c] ss:$36 sps:$4 sm:$0xff]   ;;  %v8871_v35 = vld [vmem:[#allocation10 + $0x214] ss:$36 sps:$4 sm:$0xff]  }
 0x63d   :  { %2600 = vmatprep.subr.bf16.mxu0 %v8856_v14  ;;  %2643 = vmatprep.subr.bf16.mxu1 %v8859_v0  ;;  %10636 = vst [vmem:[#allocation71_spill] sm:$0xff] %v8868_v30  ;;  %10637 = vst [vmem:[#allocation72_spill] sm:$0xff] %v8871_v35  ;;  %v8874_v14 = vld [vmem:[#allocation10 + $0x208] ss:$36 sps:$4 sm:$0xff]   ;;  %v8877_v0 = vld [vmem:[#allocation10 + $0x210] ss:$36 sps:$4 sm:$0xff]  }
 0x63e   :  { %10638 = vst [vmem:[#allocation73_spill] sm:$0xff] %v8874_v14  ;;  %10639 = vst [vmem:[#allocation74_spill] sm:$0xff] %v8877_v0 }
 0x640   :  { %2601 = vmatpush1.bf16.msra.mxu0 %v8862_v51  ;;  %2644 = vmatpush1.bf16.msra.mxu1 %v8865_v1  ;;  %v8880_v51 = vld [vmem:[#allocation10 + $0x254] ss:$36 sps:$4 sm:$0xff]   ;;  %v8883_v1 = vld [vmem:[#allocation10 + $0x25c] ss:$36 sps:$4 sm:$0xff]  }
 0x641   :  { %2602 = vmatprep.subr.bf16.mxu0 %v8868_v30  ;;  %2645 = vmatprep.subr.bf16.mxu1 %v8871_v35  ;;  %10640 = vst [vmem:[#allocation75_spill] sm:$0xff] %v8880_v51  ;;  %10641 = vst [vmem:[#allocation76_spill] sm:$0xff] %v8883_v1  ;;  %v8886_v30 = vld [vmem:[#allocation10 + $0x250] ss:$36 sps:$4 sm:$0xff]   ;;  %v8889_v35 = vld [vmem:[#allocation10 + $0x258] ss:$36 sps:$4 sm:$0xff]  }
 0x642   :  { %10642 = vst [vmem:[#allocation77_spill] sm:$0xff] %v8886_v30  ;;  %10643 = vst [vmem:[#allocation78_spill] sm:$0xff] %v8889_v35 }
 0x644   :  { %2603 = vmatpush1.bf16.msra.mxu0 %v8874_v14  ;;  %2646 = vmatpush1.bf16.msra.mxu1 %v8877_v0  ;;  %v8892_v14 = vld [vmem:[#allocation10 + $0x29c] ss:$36 sps:$4 sm:$0xff]   ;;  %v8895_v0 = vld [vmem:[#allocation10 + $0x2a4] ss:$36 sps:$4 sm:$0xff]  }
 0x645   :  { %2604 = vmatprep.subr.bf16.mxu0 %v8880_v51  ;;  %2647 = vmatprep.subr.bf16.mxu1 %v8883_v1  ;;  %10644 = vst [vmem:[#allocation79_spill] sm:$0xff] %v8892_v14  ;;  %10645 = vst [vmem:[#allocation80_spill] sm:$0xff] %v8895_v0  ;;  %v8898_v51 = vld [vmem:[#allocation10 + $0x298] ss:$36 sps:$4 sm:$0xff]   ;;  %v8901_v1 = vld [vmem:[#allocation10 + $0x2a0] ss:$36 sps:$4 sm:$0xff]  }
 0x646   :  { %10646 = vst [vmem:[#allocation81_spill] sm:$0xff] %v8898_v51  ;;  %10647 = vst [vmem:[#allocation82_spill] sm:$0xff] %v8901_v1 }
 0x648   :  { %2605 = vmatpush1.bf16.msra.mxu0 %v8886_v30  ;;  %2648 = vmatpush1.bf16.msra.mxu1 %v8889_v35  ;;  %v8904_v30 = vld [vmem:[#allocation10 + $0x2e4] ss:$36 sps:$4 sm:$0xff]   ;;  %v8907_v35 = vld [vmem:[#allocation10 + $0x2ec] ss:$36 sps:$4 sm:$0xff]  }
 0x649   :  { %2606 = vmatprep.subr.bf16.mxu0 %v8892_v14  ;;  %2649 = vmatprep.subr.bf16.mxu1 %v8895_v0  ;;  %10648 = vst [vmem:[#allocation83_spill] sm:$0xff] %v8904_v30  ;;  %10649 = vst [vmem:[#allocation84_spill] sm:$0xff] %v8907_v35  ;;  %v8910_v14 = vld [vmem:[#allocation10 + $0x2e0] ss:$36 sps:$4 sm:$0xff]   ;;  %v8913_v0 = vld [vmem:[#allocation10 + $0x2e8] ss:$36 sps:$4 sm:$0xff]  }
 0x64a   :  { %10650 = vst [vmem:[#allocation85_spill] sm:$0xff] %v8910_v14  ;;  %10651 = vst [vmem:[#allocation86_spill] sm:$0xff] %v8913_v0 }
 0x64c   :  { %2607 = vmatpush1.bf16.msra.mxu0 %v8898_v51  ;;  %2650 = vmatpush1.bf16.msra.mxu1 %v8901_v1  ;;  %v8916_v51 = vld [vmem:[#allocation10 + $0x32c] ss:$36 sps:$4 sm:$0xff]   ;;  %v8919_v1 = vld [vmem:[#allocation10 + $0x334] ss:$36 sps:$4 sm:$0xff]  }
 0x64d   :  { %2608 = vmatprep.subr.bf16.mxu0 %v8904_v30  ;;  %2651 = vmatprep.subr.bf16.mxu1 %v8907_v35  ;;  %10652 = vst [vmem:[#allocation87_spill] sm:$0xff] %v8916_v51  ;;  %10653 = vst [vmem:[#allocation88_spill] sm:$0xff] %v8919_v1  ;;  %v8922_v30 = vld [vmem:[#allocation10 + $0x328] ss:$36 sps:$4 sm:$0xff]   ;;  %v8925_v35 = vld [vmem:[#allocation10 + $0x330] ss:$36 sps:$4 sm:$0xff]  }
 0x64e   :  { %10654 = vst [vmem:[#allocation89_spill] sm:$0xff] %v8922_v30  ;;  %10655 = vst [vmem:[#allocation90_spill] sm:$0xff] %v8925_v35 }
 0x650   :  { %2609 = vmatpush1.bf16.msra.mxu0 %v8910_v14  ;;  %2652 = vmatpush1.bf16.msra.mxu1 %v8913_v0  ;;  %v8928_v14 = vld [vmem:[#allocation10 + $0x374] ss:$36 sps:$4 sm:$0xff]   ;;  %v8931_v0 = vld [vmem:[#allocation10 + $0x37c] ss:$36 sps:$4 sm:$0xff]  }
 0x651   :  { %2610 = vmatprep.subr.bf16.mxu0 %v8916_v51  ;;  %2653 = vmatprep.subr.bf16.mxu1 %v8919_v1  ;;  %10656 = vst [vmem:[#allocation91_spill] sm:$0xff] %v8928_v14  ;;  %10657 = vst [vmem:[#allocation92_spill] sm:$0xff] %v8931_v0  ;;  %v8934_v51 = vld [vmem:[#allocation10 + $0x370] ss:$36 sps:$4 sm:$0xff]   ;;  %v8937_v1 = vld [vmem:[#allocation10 + $0x378] ss:$36 sps:$4 sm:$0xff]  }
 0x652   :  { %10658 = vst [vmem:[#allocation93_spill] sm:$0xff] %v8934_v51  ;;  %10659 = vst [vmem:[#allocation94_spill] sm:$0xff] %v8937_v1 }
 0x654   :  { %2611 = vmatpush1.bf16.msra.mxu0 %v8922_v30  ;;  %2654 = vmatpush1.bf16.msra.mxu1 %v8925_v35  ;;  %v8940_v30 = vld [vmem:[#allocation10 + $0x3bc] ss:$36 sps:$4 sm:$0xff]   ;;  %v8943_v35 = vld [vmem:[#allocation10 + $0x3c4] ss:$36 sps:$4 sm:$0xff]  }
 0x655   :  { %2612 = vmatprep.subr.bf16.mxu0 %v8928_v14  ;;  %2655 = vmatprep.subr.bf16.mxu1 %v8931_v0  ;;  %10660 = vst [vmem:[#allocation95_spill] sm:$0xff] %v8940_v30  ;;  %10661 = vst [vmem:[#allocation96_spill] sm:$0xff] %v8943_v35  ;;  %v8946_v14 = vld [vmem:[#allocation10 + $0x3b8] ss:$36 sps:$4 sm:$0xff]   ;;  %v8949_v0 = vld [vmem:[#allocation10 + $0x3c0] ss:$36 sps:$4 sm:$0xff]  }
 0x656   :  { %10662 = vst [vmem:[#allocation97_spill] sm:$0xff] %v8946_v14  ;;  %10663 = vst [vmem:[#allocation98_spill] sm:$0xff] %v8949_v0 }
 0x658   :  { %2613 = vmatpush1.bf16.msra.mxu0 %v8934_v51  ;;  %2656 = vmatpush1.bf16.msra.mxu1 %v8937_v1  ;;  %v8952_v51 = vld [vmem:[#allocation10 + $0x404] ss:$36 sps:$4 sm:$0xff]   ;;  %v8955_v1 = vld [vmem:[#allocation10 + $0x40c] ss:$36 sps:$4 sm:$0xff]  }
 0x659   :  { %2614 = vmatprep.subr.bf16.mxu0 %v8940_v30  ;;  %2657 = vmatprep.subr.bf16.mxu1 %v8943_v35  ;;  %10664 = vst [vmem:[#allocation99_spill] sm:$0xff] %v8952_v51  ;;  %10665 = vst [vmem:[#allocation100_spill] sm:$0xff] %v8955_v1  ;;  %v8958_v30 = vld [vmem:[#allocation10 + $0x400] ss:$36 sps:$4 sm:$0xff]   ;;  %v8961_v35 = vld [vmem:[#allocation10 + $0x408] ss:$36 sps:$4 sm:$0xff]  }
 0x65a   :  { %10666 = vst [vmem:[#allocation101_spill] sm:$0xff] %v8958_v30 }
 0x65c   :  { %2615 = vmatpush1.bf16.msra.mxu0 %v8946_v14  ;;  %2658 = vmatpush1.bf16.msra.mxu1 %v8949_v0  ;;  %v8964_v14 = vld [vmem:[#allocation10 + $0x44c] ss:$36 sps:$4 sm:$0xff]   ;;  %v8967_v0 = vld [vmem:[#allocation10 + $0x454] ss:$36 sps:$4 sm:$0xff]  }
 0x65d   :  { %2616 = vmatprep.subr.bf16.mxu0 %v8952_v51  ;;  %2659 = vmatprep.subr.bf16.mxu1 %v8955_v1  ;;  %10667 = vst [vmem:[#allocation102_spill] sm:$0xff] %v8964_v14  ;;  %v8970_v51 = vld [vmem:[#allocation10 + $0x448] ss:$36 sps:$4 sm:$0xff]   ;;  %v8973_v1 = vld [vmem:[#allocation10 + $0x450] ss:$36 sps:$4 sm:$0xff]  }
 0x65e   :  { %10668 = vst [vmem:[#allocation103_spill] sm:$0xff] %v8970_v51 }
 0x660   :  { %2617 = vmatpush1.bf16.msra.mxu0 %v8958_v30  ;;  %2660 = vmatpush1.bf16.msra.mxu1 %v8961_v35  ;;  %v8976_v30 = vld [vmem:[#allocation10 + $0x260] ss:$36 sps:$4 sm:$0xff]  }
 0x661   :  { %2618 = vmatprep.subr.bf16.mxu0 %v8964_v14  ;;  %2661 = vmatprep.subr.bf16.mxu1 %v8967_v0  ;;  %10669 = vst [vmem:[#allocation104_spill] sm:$0xff] %v8976_v30  ;;  %v8982_v14 = vld [vmem:[#allocation10 + $0x20] ss:$36 sps:$4 sm:$0xff]  }
 0x664   :  { %2619 = vmatpush1.bf16.msra.mxu0 %v8970_v51  ;;  %2662 = vmatpush1.bf16.msra.mxu1 %v8973_v1  ;;  %v8986_v51 = vld [vmem:[#allocation10 + $0x2a8] ss:$36 sps:$4 sm:$0xff]  }
 0x665   :  { %5497 = vmatprep.subr.bf16.mxu0 %v8976_v30  ;;  %2856 = vmatprep.subr.bf16.mxu1 %v8543_v61  ;;  %10670 = vst [vmem:[#allocation105_spill] sm:$0xff] %v8986_v51  ;;  %v8991_v30 = vld [vmem:[#allocation10 + $0x68] ss:$36 sps:$4 sm:$0xff]   ;;  %v8994_v61 = vld [vmem:[#allocation10 + $0x2f0] ss:$36 sps:$4 sm:$0xff]  }
 0x667   :  { %2621 = vmatmul.mubr.bf16.vlgmr.msra.gmra.mrb[44].mxu0 %v8782_v54  ;;  %2664 = vmatmul.mubr.bf16.vlgmr.msra.gmra.mrb[44].mxu1 %v8782_v54 }
 0x668   :  { %5498 = vmatpush3.bf16.msra.mxu0 %v8982_v14  ;;  %2706 = vmatprep.mubr.bf16.mxu0 %v8774_v52  ;;  %v8999_v52 = vld [vmem:[#allocation10 + $0xb0] ss:$36 sps:$4 sm:$0xff]  }
 0x669   :  { %5499 = vmatprep.subr.bf16.mxu0 %v8986_v51  ;;  %2857 = vmatpush1.bf16.msra.mxu1 %v8551_v3  ;;  %v9002_v51 = vld [vmem:[#allocation10 + $0x338] ss:$36 sps:$4 sm:$0xff]  }
 0x66a   :  { %2858 = vmatprep.subr.bf16.mxu1 %v8554_v62  ;;  %v9007_v3 = vld [vmem:[#allocation10 + $0xf8] ss:$36 sps:$4 sm:$0xff]   ;;  %v9010_v62 = vld [vmem:[#allocation10 + $0x380] ss:$36 sps:$4 sm:$0xff]  }
 0x66c   :  { %5500 = vmatpush3.bf16.msra.mxu0 %v8991_v30 }
 0x66d   :  { %5501 = vmatprep.subr.bf16.mxu0 %v8994_v61  ;;  %2859 = vmatpush1.bf16.msra.mxu1 %v8559_v59  ;;  %v9015_v59 = vld [vmem:[#allocation10 + $0x140] ss:$36 sps:$4 sm:$0xff]  }
 0x66e   :  { %2860 = vmatprep.subr.bf16.mxu1 %v8562_v25  ;;  %v9018_v25 = vld [vmem:[#allocation10 + $0x3c8] ss:$36 sps:$4 sm:$0xff]  }
 0x670   :  { %5502 = vmatpush3.bf16.msra.mxu0 %v8999_v52 }
 0x671   :  { %5503 = vmatprep.subr.bf16.mxu0 %v9002_v51  ;;  %2861 = vmatpush1.bf16.msra.mxu1 %v8567_v32  ;;  %v9023_v32 = vld [vmem:[#allocation10 + $0x188] ss:$36 sps:$4 sm:$0xff]  }
 0x672   :  { %2862 = vmatprep.subr.bf16.mxu1 %v8570_v48  ;;  %v9026_v48 = vld [vmem:[#allocation10 + $0x410] ss:$36 sps:$4 sm:$0xff]  }
 0x674   :  { %5504 = vmatpush3.bf16.msra.mxu0 %v9007_v3 }
 0x675   :  { %5505 = vmatprep.subr.bf16.mxu0 %v9010_v62  ;;  %2863 = vmatpush1.bf16.msra.mxu1 %v8575_v27  ;;  %v9031_v27 = vld [vmem:[#allocation10 + $0x1d0] ss:$36 sps:$4 sm:$0xff]  }
 0x676   :  { %2864 = vmatprep.subr.bf16.mxu1 %v8578_v39  ;;  %v9034_v39 = vld [vmem:[#allocation10 + $0x458] ss:$36 sps:$4 sm:$0xff]  }
 0x678   :  { %5506 = vmatpush3.bf16.msra.mxu0 %v9015_v59 }
 0x679   :  { %5507 = vmatprep.subr.bf16.mxu0 %v9018_v25  ;;  %2865 = vmatpush1.bf16.msra.mxu1 %v8583_v47  ;;  %v9039_v47 = vld [vmem:[#allocation10 + $0x218] ss:$36 sps:$4 sm:$0xff]  }
 0x67a   :  { %2866 = vmatprep.subr.bf16.mxu1 %v8586_v57  ;;  %10671 = vst [vmem:[#allocation106_spill] sm:$0xff] %v9039_v47  ;;  %v9042_v57 = vld [vmem:[#allocation10 + $0xc] ss:$36 sps:$4 sm:$0xff]  }
 0x67b   :  { %10672 = vst [vmem:[#allocation107_spill] sm:$0xff] %v9042_v57 }
 0x67c   :  { %5508 = vmatpush3.bf16.msra.mxu0 %v9023_v32 }
 0x67d   :  { %5509 = vmatprep.subr.bf16.mxu0 %v9026_v48  ;;  %2867 = vmatpush1.bf16.msra.mxu1 %v8591_v5  ;;  %v9048_v5 = vld [vmem:[#allocation10 + $0x8] ss:$36 sps:$4 sm:$0xff]  }
 0x67e   :  { %2868 = vmatprep.subr.bf16.mxu1 %v8594_v4  ;;  %10673 = vst [vmem:[#allocation108_spill] sm:$0xff] %v9048_v5  ;;  %v9051_v4 = vld [vmem:[#allocation10 + $0x54] ss:$36 sps:$4 sm:$0xff]  }
 0x67f   :  { %10674 = vst [vmem:[#allocation109_spill] sm:$0xff] %v9051_v4 }
 0x680   :  { %5510 = vmatpush3.bf16.msra.mxu0 %v9031_v27 }
 0x681   :  { %5511 = vmatprep.subr.bf16.mxu0 %v9034_v39  ;;  %2869 = vmatpush1.bf16.msra.mxu1 %v8599_v17  ;;  %v9056_v17 = vld [vmem:[#allocation10 + $0x50] ss:$36 sps:$4 sm:$0xff]  }
 0x682   :  { %2870 = vmatprep.subr.bf16.mxu1 %v8602_v11  ;;  %10675 = vst [vmem:[#allocation110_spill] sm:$0xff] %v9056_v17  ;;  %v9059_v11 = vld [vmem:[#allocation10 + $0x9c] ss:$36 sps:$4 sm:$0xff]  }
 0x683   :  { %10676 = vst [vmem:[#allocation111_spill] sm:$0xff] %v9059_v11 }
 0x684   :  { %5512 = vmatpush3.bf16.msra.mxu0 %v9039_v47 }
 0x685   :  { %2899 = vmatprep.subr.bf16.mxu0 %v9042_v57  ;;  %2871 = vmatpush1.bf16.msra.mxu1 %v8607_v29  ;;  %v9064_v29 = vld [vmem:[#allocation10 + $0x98] ss:$36 sps:$4 sm:$0xff]  }
 0x686   :  { %2872 = vmatprep.subr.bf16.mxu1 %v8610_v7  ;;  %10677 = vst [vmem:[#allocation112_spill] sm:$0xff] %v9064_v29  ;;  %v9067_v7 = vld [vmem:[#allocation10 + $0xe4] ss:$36 sps:$4 sm:$0xff]  }
 0x687   :  { %2707 = vmatmul.mubr.bf16.vlgmr.msra.gmra.mrb[48].mxu0 %v8782_v54  ;;  %10678 = vst [vmem:[#allocation113_spill] sm:$0xff] %v9067_v7  ;;  %v10694_v54 = vld [vmem:[#allocation47_spill] sm:$0xff] }
 0x688   :  { %2900 = vmatpush1.bf16.msra.mxu0 %v9048_v5 }
 0x689   :  { %2901 = vmatprep.subr.bf16.mxu0 %v9051_v4  ;;  %2873 = vmatpush1.bf16.msra.mxu1 %v8616_v58  ;;  %v9072_v58 = vld [vmem:[#allocation10 + $0xe0] ss:$36 sps:$4 sm:$0xff]  }
 0x68a   :  { %2874 = vmatprep.subr.bf16.mxu1 %v8619_v9  ;;  %10679 = vst [vmem:[#allocation114_spill] sm:$0xff] %v9072_v58  ;;  %v10680_v9 = vld [vmem:[#allocation34_spill] sm:$0xff] }
 0x68c   :  { %2902 = vmatpush1.bf16.msra.mxu0 %v9056_v17 }
 0x68d   :  { %2903 = vmatprep.subr.bf16.mxu0 %v9059_v11  ;;  %2875 = vmatpush1.bf16.msra.mxu1 %v8624_v33  ;;  %v10681_v33 = vld [vmem:[#allocation35_spill] sm:$0xff] }
 0x68e   :  { %2876 = vmatprep.subr.bf16.mxu1 %v8627_v16  ;;  %v10682_v16 = vld [vmem:[#allocation36_spill] sm:$0xff] }
 0x690   :  { %2904 = vmatpush1.bf16.msra.mxu0 %v9064_v29 }
 0x691   :  { %2905 = vmatprep.subr.bf16.mxu0 %v9067_v7  ;;  %2877 = vmatpush1.bf16.msra.mxu1 %v8632_v41  ;;  %v10683_v41 = vld [vmem:[#allocation37_spill] sm:$0xff] }
 0x692   :  { %2878 = vmatprep.subr.bf16.mxu1 %v8635_v31  ;;  %v10684_v31 = vld [vmem:[#allocation38_spill] sm:$0xff] }
 0x694   :  { %2906 = vmatpush1.bf16.msra.mxu0 %v9072_v58 }
 0x695   :  { %2907 = vmatprep.subr.bf16.mxu0 %v8639_v15  ;;  %2879 = vmatpush1.bf16.msra.mxu1 %v8642_v22  ;;  %v10685_v15 = vld [vmem:[#allocation39_spill] sm:$0xff]  ;;  %v10686_v22 = vld [vmem:[#allocation40_spill] sm:$0xff] }
 0x696   :  { %2880 = vmatprep.subr.bf16.mxu1 %v8645_v38  ;;  %v10687_v38 = vld [vmem:[#allocation41_spill] sm:$0xff] }
 0x698   :  { %2908 = vmatpush1.bf16.msra.mxu0 %v8648_v50  ;;  %v10688_v50 = vld [vmem:[#allocation42_spill] sm:$0xff] }
 0x699   :  { %2909 = vmatprep.subr.bf16.mxu0 %v8651_v34  ;;  %2881 = vmatpush1.bf16.msra.mxu1 %v8654_v45  ;;  %v10689_v34 = vld [vmem:[#allocation43_spill] sm:$0xff]  ;;  %v10690_v45 = vld [vmem:[#allocation44_spill] sm:$0xff] }
 0x69a   :  { %2882 = vmatprep.subr.bf16.mxu1 %v8657_v36  ;;  %v10691_v36 = vld [vmem:[#allocation45_spill] sm:$0xff] }
 0x69c   :  { %2910 = vmatpush1.bf16.msra.mxu0 %v8660_v42  ;;  %v10692_v42 = vld [vmem:[#allocation48_spill] sm:$0xff] }
 0x69d   :  { %2911 = vmatprep.subr.bf16.mxu0 %v8663_v37  ;;  %2883 = vmatpush1.bf16.msra.mxu1 %v10680_v9  ;;  %v10693_v37 = vld [vmem:[#allocation46_spill] sm:$0xff]  ;;  %v10695_v9 = vld [vmem:[#allocation49_spill] sm:$0xff] }
 0x69e   :  { %2884 = vmatprep.subr.bf16.mxu1 %v10681_v33  ;;  %v10696_v33 = vld [vmem:[#allocation50_spill] sm:$0xff] }
 0x6a0   :  { %2912 = vmatpush1.bf16.msra.mxu0 %v10682_v16  ;;  %v10697_v16 = vld [vmem:[#allocation51_spill] sm:$0xff] }
 0x6a1   :  { %2913 = vmatprep.subr.bf16.mxu0 %v10683_v41  ;;  %2885 = vmatpush1.bf16.msra.mxu1 %v10684_v31  ;;  %v10698_v41 = vld [vmem:[#allocation52_spill] sm:$0xff]  ;;  %v10699_v31 = vld [vmem:[#allocation53_spill] sm:$0xff] }
 0x6a2   :  { %2886 = vmatprep.subr.bf16.mxu1 %v10685_v15  ;;  %v10700_v15 = vld [vmem:[#allocation54_spill] sm:$0xff] }
 0x6a4   :  { %2914 = vmatpush1.bf16.msra.mxu0 %v10686_v22  ;;  %v10701_v22 = vld [vmem:[#allocation55_spill] sm:$0xff] }
 0x6a5   :  { %2915 = vmatprep.subr.bf16.mxu0 %v10687_v38  ;;  %2887 = vmatpush1.bf16.msra.mxu1 %v10688_v50  ;;  %v10702_v38 = vld [vmem:[#allocation56_spill] sm:$0xff]  ;;  %v10703_v50 = vld [vmem:[#allocation57_spill] sm:$0xff] }
 0x6a6   :  { %2942 = vmatprep.subr.bf16.mxu1 %v10689_v34  ;;  %v10704_v34 = vld [vmem:[#allocation58_spill] sm:$0xff] }
 0x6a8   :  { %2916 = vmatpush1.bf16.msra.mxu0 %v10690_v45  ;;  %v10705_v45 = vld [vmem:[#allocation59_spill] sm:$0xff] }
 0x6a9   :  { %2917 = vmatprep.subr.bf16.mxu0 %v10691_v36  ;;  %v2716_v36 = vld [vmem:[#allocation8 + $0x60] sm:$0xff] }
 0x6ac   :  { %2918 = vmatpush1.bf16.msra.mxu0 %v10692_v42  ;;  %v2718_v42 = vld [vmem:[#allocation8 + $0x6c] sm:$0xff] }
 0x6ad   :  { %2919 = vmatprep.subr.bf16.mxu0 %v10693_v37  ;;  %v2720_v37 = vunpack.c.l.bf16 %v2716_v36  ;;  %v2724_v7 = vunpack.c.h.bf16 %v2718_v42 }
 0x6b0   :  { %2920 = vmatpush1.bf16.msra.mxu0 %v10694_v54  ;;  %v2723_v54 = vunpack.c.l.bf16 %v2718_v42 }
 0x6b1   :  { %2921 = vmatprep.subr.bf16.mxu0 %v10695_v9 }
 0x6b4   :  { %2922 = vmatpush1.bf16.msra.mxu0 %v10696_v33 }
 0x6b5   :  { %2923 = vmatprep.subr.bf16.mxu0 %v10697_v16  ;;  %v2721_v16 = vunpack.c.h.bf16 %v2716_v36 }
 0x6b8   :  { %2924 = vmatpush1.bf16.msra.mxu0 %v10698_v41 }
 0x6b9   :  { %2925 = vmatprep.subr.bf16.mxu0 %v10699_v31 }
 0x6bc   :  { %2926 = vmatpush1.bf16.msra.mxu0 %v10700_v15 }
 0x6bd   :  { %2927 = vmatprep.subr.bf16.mxu0 %v10701_v22 }
 0x6c0   :  { %2928 = vmatpush1.bf16.msra.mxu0 %v10702_v38 }
 0x6c1   :  { %2929 = vmatprep.subr.bf16.mxu0 %v10703_v50 }
 0x6c4   :  { %2930 = vmatpush1.bf16.msra.mxu0 %v10704_v34 }
 0x6c5   :  { %2985 = vmatprep.subr.bf16.mxu0 %v10705_v45 }
 0x6fa   :  { %v2536_v9 = vpop.f32.mrb[40].mxu0  ;;  %v2579_v33 = vpop.f32.mrb[40].mxu1 }
 0x6fb   :  { %v2726_v41 = vadd.f32 %v2720_v37, %v2536_v9  ;;  %v2538_v31 = vpop.f32.mrb[41].mxu0  ;;  %v2581_v15 = vpop.f32.mrb[41].mxu1 }
 0x6fc   :  { %v2540_v58 = vpop.f32.mrb[42].mxu0  ;;  %v2583_v22 = vpop.f32.mrb[42].mxu1  ;;  %v2727_v34 = vadd.f32 %v2721_v16, %v2538_v31  ;;  %v2754_v16 = vadd.f32 %v10381_v53, %v2579_v33 }
 0x6fd   :  { %v5235_v38 = vmul.f32 -1.442695, %v2726_v41  ;;  %v2728_v29 = vadd.f32 %v2723_v54, %v2540_v58  ;;  %v2542_v50 = vpop.f32.mrb[43].mxu0  ;;  %v2585_v11 = vpop.f32.mrb[43].mxu1  ;;  %v2717_v58 = vld [vmem:[#allocation8 + $0x68] ss:$12 sps:$4 sm:$0xff]  }
 0x6fe   :  { %v2729_v17 = vadd.f32 %v2724_v7, %v2542_v50  ;;  %v5236_v4 = vmul.f32 -1.442695, %v2727_v34  ;;  %v2722_v47 = vunpack.c.l.bf16 %v2717_v58 }
 0x6ff   :  { %6002 = vpow2.f32 %v5235_v38  ;;  %v5237_v45 = vmul.f32 -1.442695, %v2728_v29 }
 0x700   :  { %v5238_v5 = vmul.f32 -1.442695, %v2729_v17  ;;  %v2725_v17 = vunpack.c.h.bf16 %v2717_v58 }
 0x701   :  { %6004 = vpow2.f32 %v5237_v45 }
 0x702   :  { %6006 = vpow2.f32 %v5236_v4 }
 0x703   :  { %6008 = vpow2.f32 %v5238_v5  ;;  %v2755_v5 = vadd.f32 %v10381_v53, %v2583_v22 }
 0x709   :  { %v6003_v36 = vpop.eup %6002 }
 0x70a   :  { %v2742_v37 = vadd.f32 1.0, %v6003_v36 }
 0x70b   :  { %v6005_v9 = vpop.eup %6004 }
 0x70c   :  { %6010 = vrcp.f32 %v2742_v37  ;;  %v2744_v57 = vadd.f32 1.0, %v6005_v9  ;;  %v6007_v42 = vpop.eup %6006 }
 0x70d   :  { %v6009_v41 = vpop.eup %6008  ;;  %v2743_v54 = vadd.f32 1.0, %v6007_v42 }
 0x70e   :  { %6012 = vrcp.f32 %v2744_v57  ;;  %v2745_v29 = vadd.f32 1.0, %v6009_v41 }
 0x70f   :  { %6014 = vrcp.f32 %v2743_v54 }
 0x710   :  { %6016 = vrcp.f32 %v2745_v29 }
 0x716   :  { %v6011_v7 = vpop.eup %6010 }
 0x717   :  { %v2756_v31 = vmul.f32 %v6011_v7, %v2754_v16  ;;  %v2791_v16 = vadd.f32 %v2581_v15, %v10624_v10 }
 0x718   :  { %v6013_v4 = vpop.eup %6012 }
 0x719   :  { %v2758_v38 = vadd.f32 %v2756_v31, %v2722_v47  ;;  %v2757_v50 = vmul.f32 %v6013_v4, %v2755_v5  ;;  %v6015_v34 = vpop.eup %6014  ;;  %v2794_v31 = vadd.f32 %v2585_v11, %v10624_v10 }
 0x71a   :  { %v6017_v45 = vpop.eup %6016  ;;  %v2765_v36 = vsub.f32 1.0, %v6015_v34  ;;  %v2769_v33 = vmul.f32 %v6015_v34, %v8778_v40 }
 0x71b   :  { %6018 = vtanh.f32 %v2758_v38  ;;  %v2759_v57 = vadd.f32 %v2757_v50, %v2725_v17  ;;  %v2766_v42 = vsub.f32 1.0, %v6017_v45  ;;  %v2770_v22 = vmul.f32 %v6017_v45, %v8764_v28 }
 0x71d   :  { %6020 = vtanh.f32 %v2759_v57 }
 0x725   :  { %v6019_v37 = vpop.eup %6018 }
 0x726   :  { %v2767_v9 = vmul.f32 %v6019_v37, %v2765_v36 }
 0x727   :  { %v6021_v41 = vpop.eup %6020 }
 0x728   :  { %v9113_v54 = vadd.f32 %v2769_v33, %v2767_v9  ;;  %v2768_v58 = vmul.f32 %v6021_v41, %v2766_v42 }
 0x72a   :  { %v9116_v47 = vadd.f32 %v2770_v22, %v2768_v58 }
 0x73a   :  { %v2622_v29 = vpop.f32.mrb[44].mxu0  ;;  %v2665_v7 = vpop.f32.mrb[44].mxu1 }
 0x73b   :  { %v2792_v17 = vadd.f32 %v2622_v29, %v10544_v18  ;;  %v2797_v5 = vadd.f32 %v2791_v16, %v2665_v7  ;;  %v2624_v4 = vpop.f32.mrb[45].mxu0  ;;  %v2667_v38 = vpop.f32.mrb[45].mxu1 }
 0x73c   :  { %v2626_v50 = vpop.f32.mrb[46].mxu0  ;;  %v2669_v57 = vpop.f32.mrb[46].mxu1 }
 0x73d   :  { %v2798_v34 = vadd.f32 %v2792_v17, %v2667_v38  ;;  %v2795_v36 = vadd.f32 %v2626_v50, %v10544_v18  ;;  %v2799_v37 = vadd.f32 %v2794_v31, %v2669_v57  ;;  %v2628_v45 = vpop.f32.mrb[47].mxu0  ;;  %v2671_v9 = vpop.f32.mrb[47].mxu1  ;;  %v5241_v42 = vmul.f32 -1.442695, %v2797_v5 }
 0x73f   :  { %v2800_v33 = vadd.f32 %v2795_v36, %v2671_v9  ;;  %v5243_v15 = vmul.f32 -1.442695, %v2799_v37  ;;  %6022 = vpow2.f32 %v5241_v42  ;;  %v5242_v41 = vmul.f32 -1.442695, %v2798_v34 }
 0x740   :  { %v2793_v42 = vadd.f32 %v2624_v4, %v10387_v8 }
 0x741   :  { %6024 = vpow2.f32 %v5243_v15  ;;  %v5244_v11 = vmul.f32 -1.442695, %v2800_v33 }
 0x742   :  { %6026 = vpow2.f32 %v5242_v41 }
 0x743   :  { %6028 = vpow2.f32 %v5244_v11 }
 0x749   :  { %v6023_v58 = vpop.eup %6022 }
 0x74a   :  { %v2813_v16 = vadd.f32 1.0, %v6023_v58  ;;  %v2796_v58 = vadd.f32 %v2628_v45, %v10387_v8 }
 0x74b   :  { %v6025_v22 = vpop.eup %6024 }
 0x74c   :  { %v2815_v29 = vadd.f32 1.0, %v6025_v22  ;;  %6030 = vrcp.f32 %v2813_v16  ;;  %v6027_v7 = vpop.eup %6026 }
 0x74d   :  { %v6029_v31 = vpop.eup %6028  ;;  %v2814_v50 = vadd.f32 1.0, %v6027_v7 }
 0x74e   :  { %6032 = vrcp.f32 %v2815_v29  ;;  %v2816_v37 = vadd.f32 1.0, %v6029_v31  ;;  %v2848_v31 = vpop.permute.xlu0 %2847 }
 0x74f   :  { %6034 = vrcp.f32 %v2814_v50  ;;  %vm2850_vm1 = vcmp.eq.s32.totalorder %v2848_v31, 1  ;;  %v10729_v31 = vld [vmem:[#allocation83_spill] sm:$0xff] }
 0x750   :  { %6036 = vrcp.f32 %v2816_v37 }
 0x756   :  { %v6031_v33 = vpop.eup %6030 }
 0x758   :  { %v6033_v11 = vpop.eup %6032 }
 0x759   :  { %v6035_v7 = vpop.eup %6034 }
 0x75a   :  { %v5513_v17 = vpop.f32.mrb[48].mxu0  ;;  %v2837_v4 = vmul.f32 %v6035_v7, %v8767_v21 }
 0x75b   :  { %v5514_v38 = vpop.f32.mrb[49].mxu0 }
 0x75c   :  { %v5515_v57 = vadd.f32 %v5514_v38, %v5513_v17  ;;  %v5516_v5 = vpop.f32.mrb[50].mxu0  ;;  %v6037_v17 = vpop.eup %6036  ;;  %v2833_v38 = vsub.f32 1.0, %v6035_v7  ;;  %v10727_v7 = vld [vmem:[#allocation81_spill] sm:$0xff] }
 0x75d   :  { %v5517_v36 = vpop.f32.mrb[51].mxu0  ;;  %v2834_v50 = vsub.f32 1.0, %v6037_v17 }
 0x75e   :  { %v2825_v34 = vadd.f32 %v5515_v57, %v10465_v2  ;;  %v5518_v9 = vadd.f32 %v5517_v36, %v5516_v5  ;;  %v2845_v5 = vpop.permute.xlu1 %2844 }
 0x75f   :  { %vm2849_vm2 = vcmp.eq.s32.totalorder %v2845_v5, 1  ;;  %v10732_v5 = vld [vmem:[#allocation86_spill] sm:$0xff] }
 0x760   :  { %v2827_v15 = vmul.f32 %v6031_v33, %v2825_v34  ;;  %v2826_v41 = vadd.f32 %v5518_v9, %v10465_v2  ;;  %v2838_v9 = vmul.f32 %v6037_v17, %v8770_v23  ;;  %v2780_v33 = vpop.permute.xlu0 %2779  ;;  %v10728_v17 = vld [vmem:[#allocation82_spill] sm:$0xff] }
 0x761   :  { %vm2782_vm0 = vcmp.eq.s32.totalorder %v2780_v33, 1  ;;  %v10740_v33 = vld [vmem:[#allocation94_spill] sm:$0xff] }
 0x762   :  { %v2829_v22 = vadd.f32 %v2827_v15, %v2793_v42  ;;  %v2828_v16 = vmul.f32 %v6033_v11, %v2826_v41  ;;  %v2777_v15 = vpop.permute.xlu1 %2776  ;;  %v9130_v41 = vsel %vm2782_vm0, %v9116_v47, %v8764_v28  ;;  %v10706_v28 = vld [vmem:[#allocation60_spill] sm:$0xff] }
 0x763   :  { %vm2781_vm3 = vcmp.eq.s32.totalorder %v2777_v15, 1  ;;  %v10726_v47 = vld [vmem:[#allocation80_spill] sm:$0xff] }
 0x764   :  { %6038 = vtanh.f32 %v2829_v22  ;;  %v2830_v29 = vadd.f32 %v2828_v16, %v2796_v58  ;;  %v9144_v16 = vsel %vm2781_vm3, %v9113_v54, %v8778_v40  ;;  %v10709_v40 = vld [vmem:[#allocation63_spill] sm:$0xff]  ;;  %v10742_v15 = vld [vmem:[#allocation96_spill] sm:$0xff] }
 0x765   :  { %v10725_v54 = vld [vmem:[#allocation79_spill] sm:$0xff] }
 0x766   :  { %6040 = vtanh.f32 %v2830_v29  ;;  %v9148_v29 = vpack.c.bf16 %v9130_v41, %v9144_v16 }
 0x76e   :  { %v6039_v57 = vpop.eup %6038 }
 0x76f   :  { %v2835_v36 = vmul.f32 %v6039_v57, %v2833_v38  ;;  %v10730_v38 = vld [vmem:[#allocation84_spill] sm:$0xff]  ;;  %v10731_v57 = vld [vmem:[#allocation85_spill] sm:$0xff] }
 0x770   :  { %v6041_v34 = vpop.eup %6040 }
 0x771   :  { %v2839_v45 = vadd.f32 %v2837_v4, %v2835_v36  ;;  %v2836_v37 = vmul.f32 %v6041_v34, %v2834_v50  ;;  %v10733_v4 = vld [vmem:[#allocation87_spill] sm:$0xff]  ;;  %v10734_v50 = vld [vmem:[#allocation88_spill] sm:$0xff]  ;;  %v10735_v36 = vld [vmem:[#allocation89_spill] sm:$0xff] }
 0x772   :  { %v10736_v34 = vld [vmem:[#allocation90_spill] sm:$0xff] }
 0x773   :  { %v2840_v42 = vadd.f32 %v2838_v9, %v2836_v37  ;;  %v9133_v11 = vsel %vm2849_vm2, %v2839_v45, %v8767_v21  ;;  %v10707_v21 = vld [vmem:[#allocation61_spill] sm:$0xff]  ;;  %v10737_v9 = vld [vmem:[#allocation91_spill] sm:$0xff]  ;;  %v10738_v45 = vld [vmem:[#allocation92_spill] sm:$0xff] }
 0x774   :  { %v10739_v37 = vld [vmem:[#allocation93_spill] sm:$0xff] }
 0x775   :  { %v9136_v58 = vsel %vm2850_vm1, %v2840_v42, %v8770_v23  ;;  %v10708_v23 = vld [vmem:[#allocation62_spill] sm:$0xff]  ;;  %v10741_v42 = vld [vmem:[#allocation95_spill] sm:$0xff] }
 0x776   :  { %v9140_v22 = vpack.c.bf16 %v9136_v58, %v9133_v11 }
 0x778   :  { %2888 = vmatprep.mubr.bf16.mxu1 %v9140_v22  ;;  %2931 = vmatprep.mubr.bf16.mxu0 %v9140_v22 }
 0x779   :  { %2889 = vmatmul.mubr.bf16.vlgmr.msra.gmra.mrb[48].mxu1 %v9148_v29  ;;  %2932 = vmatmul.mubr.bf16.vlgmr.msra.gmra.mrb[52].mxu0 %v9148_v29 }
 0x77a   :  { %2943 = vmatpush1.bf16.msra.mxu1 %v8788_v24  ;;  %2986 = vmatpush1.bf16.msra.mxu0 %v8791_v26  ;;  %v10710_v24 = vld [vmem:[#allocation64_spill] sm:$0xff]  ;;  %v10711_v26 = vld [vmem:[#allocation65_spill] sm:$0xff] }
 0x77b   :  { %2974 = vmatprep.mubr.bf16.mxu1 %v9140_v22  ;;  %3017 = vmatprep.mubr.bf16.mxu0 %v9140_v22 }
 0x77c   :  { %2944 = vmatprep.subr.bf16.mxu1 %v8796_v13  ;;  %2987 = vmatprep.subr.bf16.mxu0 %v8799_v20  ;;  %v10712_v13 = vld [vmem:[#allocation66_spill] sm:$0xff]  ;;  %v10713_v20 = vld [vmem:[#allocation67_spill] sm:$0xff] }
 0x77e   :  { %2945 = vmatpush1.bf16.msra.mxu1 %v8802_v63  ;;  %2988 = vmatpush1.bf16.msra.mxu0 %v8805_v60  ;;  %v10714_v63 = vld [vmem:[#allocation68_spill] sm:$0xff]  ;;  %v10715_v60 = vld [vmem:[#allocation69_spill] sm:$0xff] }
 0x77f   :  { %2946 = vmatprep.subr.bf16.mxu1 %v8808_v56  ;;  %2989 = vmatprep.subr.bf16.mxu0 %v8811_v46  ;;  %v10716_v56 = vld [vmem:[#allocation70_spill] sm:$0xff]  ;;  %v10717_v46 = vld [vmem:[#allocation71_spill] sm:$0xff] }
 0x782   :  { %2947 = vmatpush1.bf16.msra.mxu1 %v8814_v43  ;;  %2990 = vmatpush1.bf16.msra.mxu0 %v8817_v44  ;;  %v10718_v43 = vld [vmem:[#allocation72_spill] sm:$0xff]  ;;  %v10719_v44 = vld [vmem:[#allocation73_spill] sm:$0xff] }
 0x783   :  { %2948 = vmatprep.subr.bf16.mxu1 %v8820_v19  ;;  %2991 = vmatprep.subr.bf16.mxu0 %v8823_v49  ;;  %v10720_v19 = vld [vmem:[#allocation74_spill] sm:$0xff]  ;;  %v10721_v49 = vld [vmem:[#allocation75_spill] sm:$0xff] }
 0x786   :  { %2949 = vmatpush1.bf16.msra.mxu1 %v8826_v6  ;;  %2992 = vmatpush1.bf16.msra.mxu0 %v8829_v55  ;;  %v10722_v6 = vld [vmem:[#allocation76_spill] sm:$0xff]  ;;  %v10723_v55 = vld [vmem:[#allocation77_spill] sm:$0xff] }
 0x787   :  { %2950 = vmatprep.subr.bf16.mxu1 %v8832_v12  ;;  %2993 = vmatprep.subr.bf16.mxu0 %v10706_v28  ;;  %v10724_v12 = vld [vmem:[#allocation78_spill] sm:$0xff]  ;;  %v10743_v28 = vld [vmem:[#allocation97_spill] sm:$0xff] }
 0x78a   :  { %2951 = vmatpush1.bf16.msra.mxu1 %v10707_v21  ;;  %2994 = vmatpush1.bf16.msra.mxu0 %v10708_v23  ;;  %v10744_v21 = vld [vmem:[#allocation98_spill] sm:$0xff]  ;;  %v10745_v23 = vld [vmem:[#allocation99_spill] sm:$0xff] }
 0x78b   :  { %2952 = vmatprep.subr.bf16.mxu1 %v10709_v40  ;;  %2995 = vmatprep.subr.bf16.mxu0 %v10710_v24  ;;  %v10746_v40 = vld [vmem:[#allocation100_spill] sm:$0xff]  ;;  %v10747_v24 = vld [vmem:[#allocation101_spill] sm:$0xff] }
 0x78e   :  { %2953 = vmatpush1.bf16.msra.mxu1 %v10711_v26  ;;  %2996 = vmatpush1.bf16.msra.mxu0 %v10712_v13  ;;  %v10748_v26 = vld [vmem:[#allocation102_spill] sm:$0xff]  ;;  %v10749_v13 = vld [vmem:[#allocation103_spill] sm:$0xff] }
 0x78f   :  { %2954 = vmatprep.subr.bf16.mxu1 %v10713_v20  ;;  %2997 = vmatprep.subr.bf16.mxu0 %v10714_v63  ;;  %v10750_v20 = vld [vmem:[#allocation104_spill] sm:$0xff]  ;;  %v9219_v63 = vld [vmem:[#allocation10 + $0x4] ss:$36 sps:$4 sm:$0xff]  }
 0x792   :  { %2955 = vmatpush1.bf16.msra.mxu1 %v10715_v60  ;;  %2998 = vmatpush1.bf16.msra.mxu0 %v10716_v56  ;;  %v9235_v60 = vld [vmem:[#allocation10 + $0x48] ss:$36 sps:$4 sm:$0xff]   ;;  %v9246_v56 = vld [vmem:[#allocation10 + $0xdc] ss:$36 sps:$4 sm:$0xff]  }
 0x793   :  { %2956 = vmatprep.subr.bf16.mxu1 %v10717_v46  ;;  %2999 = vmatprep.subr.bf16.mxu0 %v10718_v43  ;;  %v9283_v46 = vld [vmem:[#allocation10 + $0x1f8] ss:$36 sps:$4 sm:$0xff]   ;;  %v9286_v43 = vld [vmem:[#allocation10 + $0x244] ss:$36 sps:$4 sm:$0xff]  }
 0x796   :  { %2957 = vmatpush1.bf16.msra.mxu1 %v10719_v44  ;;  %3000 = vmatpush1.bf16.msra.mxu0 %v10720_v19  ;;  %v9292_v44 = vld [vmem:[#allocation10 + $0x240] ss:$36 sps:$4 sm:$0xff]   ;;  %v9295_v19 = vld [vmem:[#allocation10 + $0x28c] ss:$36 sps:$4 sm:$0xff]  }
 0x797   :  { %2958 = vmatprep.subr.bf16.mxu1 %v10721_v49  ;;  %3001 = vmatprep.subr.bf16.mxu0 %v10722_v6  ;;  %v10756_v49 = vld [vmem:[#allocation110_spill] sm:$0xff]  ;;  %v10757_v6 = vld [vmem:[#allocation111_spill] sm:$0xff] }
 0x79a   :  { %2959 = vmatpush1.bf16.msra.mxu1 %v10723_v55  ;;  %3002 = vmatpush1.bf16.msra.mxu0 %v10724_v12  ;;  %v9300_v55 = vld [vmem:[#allocation10 + $0x288] ss:$36 sps:$4 sm:$0xff]   ;;  %v10758_v12 = vld [vmem:[#allocation112_spill] sm:$0xff] }
 0x79b   :  { %2960 = vmatprep.subr.bf16.mxu1 %v10725_v54  ;;  %3003 = vmatprep.subr.bf16.mxu0 %v10726_v47  ;;  %v10759_v54 = vld [vmem:[#allocation113_spill] sm:$0xff]  ;;  %v9308_v47 = vld [vmem:[#allocation10 + $0x2d0] ss:$36 sps:$4 sm:$0xff]  }
 0x79e   :  { %2961 = vmatpush1.bf16.msra.mxu1 %v10727_v7  ;;  %3004 = vmatpush1.bf16.msra.mxu0 %v10728_v17  ;;  %v9311_v7 = vld [vmem:[#allocation10 + $0x31c] ss:$36 sps:$4 sm:$0xff]   ;;  %v10760_v17 = vld [vmem:[#allocation114_spill] sm:$0xff] }
 0x79f   :  { %2962 = vmatprep.subr.bf16.mxu1 %v10729_v31  ;;  %3005 = vmatprep.subr.bf16.mxu0 %v10730_v38  ;;  %v9315_v31 = vld [vmem:[#allocation10 + $0x12c] ss:$36 sps:$4 sm:$0xff]   ;;  %v9318_v38 = vld [vmem:[#allocation10 + $0x318] ss:$36 sps:$4 sm:$0xff]  }
 0x7a2   :  { %2963 = vmatpush1.bf16.msra.mxu1 %v10731_v57  ;;  %3006 = vmatpush1.bf16.msra.mxu0 %v10732_v5  ;;  %v9321_v57 = vld [vmem:[#allocation10 + $0x364] ss:$36 sps:$4 sm:$0xff]  }
 0x7a3   :  { %2964 = vmatprep.subr.bf16.mxu1 %v10733_v4  ;;  %3007 = vmatprep.subr.bf16.mxu0 %v10734_v50  ;;  %v9324_v5 = vld [vmem:[#allocation10 + $0x128] ss:$36 sps:$4 sm:$0xff]   ;;  %v9327_v4 = vld [vmem:[#allocation10 + $0x174] ss:$36 sps:$4 sm:$0xff]   ;;  %v9330_v50 = vld [vmem:[#allocation10 + $0x360] ss:$36 sps:$4 sm:$0xff]  }
 0x7a6   :  { %2965 = vmatpush1.bf16.msra.mxu1 %v10735_v36  ;;  %3008 = vmatpush1.bf16.msra.mxu0 %v10736_v34  ;;  %v9333_v36 = vld [vmem:[#allocation10 + $0x3ac] ss:$36 sps:$4 sm:$0xff]  }
 0x7a7   :  { %2966 = vmatprep.subr.bf16.mxu1 %v10737_v9  ;;  %3009 = vmatprep.subr.bf16.mxu0 %v10738_v45  ;;  %v9336_v34 = vld [vmem:[#allocation10 + $0x170] ss:$36 sps:$4 sm:$0xff]   ;;  %v9339_v9 = vld [vmem:[#allocation10 + $0x1bc] ss:$36 sps:$4 sm:$0xff]   ;;  %v9342_v45 = vld [vmem:[#allocation10 + $0x3a8] ss:$36 sps:$4 sm:$0xff]  }
 0x7a8   :  { %10761 = vst [vmem:[#allocation34_spill] sm:$0xff] %v9339_v9  ;;  %10762 = vst [vmem:[#allocation35_spill] sm:$0xff] %v9342_v45 }
 0x7aa   :  { %2967 = vmatpush1.bf16.msra.mxu1 %v10739_v37  ;;  %3010 = vmatpush1.bf16.msra.mxu0 %v10740_v33  ;;  %v9345_v37 = vld [vmem:[#allocation10 + $0x3f4] ss:$36 sps:$4 sm:$0xff]  }
 0x7ab   :  { %2968 = vmatprep.subr.bf16.mxu1 %v10741_v42  ;;  %3011 = vmatprep.subr.bf16.mxu0 %v10742_v15  ;;  %10763 = vst [vmem:[#allocation36_spill] sm:$0xff] %v9345_v37  ;;  %v9348_v33 = vld [vmem:[#allocation10 + $0x1b8] ss:$36 sps:$4 sm:$0xff]   ;;  %v9351_v42 = vld [vmem:[#allocation10 + $0x204] ss:$36 sps:$4 sm:$0xff]  }
 0x7ac   :  { %10764 = vst [vmem:[#allocation37_spill] sm:$0xff] %v9348_v33  ;;  %10765 = vst [vmem:[#allocation38_spill] sm:$0xff] %v9351_v42  ;;  %v9354_v15 = vld [vmem:[#allocation10 + $0x3f0] ss:$36 sps:$4 sm:$0xff]  }
 0x7ad   :  { %10766 = vst [vmem:[#allocation39_spill] sm:$0xff] %v9354_v15 }
 0x7ae   :  { %2969 = vmatpush1.bf16.msra.mxu1 %v10743_v28  ;;  %3012 = vmatpush1.bf16.msra.mxu0 %v10744_v21  ;;  %v9357_v28 = vld [vmem:[#allocation10 + $0x43c] ss:$36 sps:$4 sm:$0xff]  }
 0x7af   :  { %2970 = vmatprep.subr.bf16.mxu1 %v10745_v23  ;;  %3013 = vmatprep.subr.bf16.mxu0 %v10746_v40  ;;  %10767 = vst [vmem:[#allocation40_spill] sm:$0xff] %v9357_v28  ;;  %v9360_v21 = vld [vmem:[#allocation10 + $0x200] ss:$36 sps:$4 sm:$0xff]   ;;  %v9363_v23 = vld [vmem:[#allocation10 + $0x24c] ss:$36 sps:$4 sm:$0xff]  }
 0x7b0   :  { %10768 = vst [vmem:[#allocation41_spill] sm:$0xff] %v9360_v21  ;;  %10769 = vst [vmem:[#allocation42_spill] sm:$0xff] %v9363_v23  ;;  %v9366_v40 = vld [vmem:[#allocation10 + $0x438] ss:$36 sps:$4 sm:$0xff]  }
 0x7b1   :  { %10770 = vst [vmem:[#allocation43_spill] sm:$0xff] %v9366_v40 }
 0x7b2   :  { %2971 = vmatpush1.bf16.msra.mxu1 %v10747_v24  ;;  %3014 = vmatpush1.bf16.msra.mxu0 %v8961_v35  ;;  %v10751_v35 = vld [vmem:[#allocation105_spill] sm:$0xff]  ;;  %v9369_v24 = vld [vmem:[#allocation10 + $0x14] ss:$36 sps:$4 sm:$0xff]  }
 0x7b3   :  { %2972 = vmatprep.subr.bf16.mxu1 %v10748_v26  ;;  %3015 = vmatprep.subr.bf16.mxu0 %v8967_v0  ;;  %v9227_v0 = vld [vmem:[#allocation10] ss:$36 sps:$4 sm:$0xff]   ;;  %10771 = vst [vmem:[#allocation44_spill] sm:$0xff] %v9369_v24  ;;  %v9372_v26 = vld [vmem:[#allocation10 + $0x248] ss:$36 sps:$4 sm:$0xff]  }
 0x7b4   :  { %10772 = vst [vmem:[#allocation45_spill] sm:$0xff] %v9372_v26 }
 0x7b6   :  { %2973 = vmatpush1.bf16.msra.mxu1 %v10749_v13  ;;  %3016 = vmatpush1.bf16.msra.mxu0 %v8973_v1  ;;  %v9230_v1 = vld [vmem:[#allocation10 + $0x4c] ss:$36 sps:$4 sm:$0xff]   ;;  %v9375_v13 = vld [vmem:[#allocation10 + $0x294] ss:$36 sps:$4 sm:$0xff]  }
 0x7b7   :  { %5519 = vmatprep.subr.bf16.mxu1 %v10750_v20  ;;  %3210 = vmatprep.subr.bf16.mxu0 %v9219_v63  ;;  %10773 = vst [vmem:[#allocation48_spill] sm:$0xff] %v9375_v13  ;;  %v9378_v20 = vld [vmem:[#allocation10 + $0x290] ss:$36 sps:$4 sm:$0xff]  }
 0x7b8   :  { %10774 = vst [vmem:[#allocation46_spill] sm:$0xff] %v9378_v20 }
 0x7b9   :  { %2975 = vmatmul.mubr.bf16.vlgmr.msra.gmra.mrb[52].mxu1 %v9148_v29  ;;  %3018 = vmatmul.mubr.bf16.vlgmr.msra.gmra.mrb[56].mxu0 %v9148_v29 }
 0x7ba   :  { %5520 = vmatpush3.bf16.msra.mxu1 %v8982_v14  ;;  %3060 = vmatprep.mubr.bf16.mxu1 %v9140_v22  ;;  %v9238_v14 = vld [vmem:[#allocation10 + $0x94] ss:$36 sps:$4 sm:$0xff]  }
 0x7bb   :  { %5521 = vmatprep.subr.bf16.mxu1 %v10751_v35  ;;  %3211 = vmatpush1.bf16.msra.mxu0 %v9227_v0  ;;  %v9243_v22 = vld [vmem:[#allocation10 + $0x90] ss:$36 sps:$4 sm:$0xff]   ;;  %v9381_v35 = vld [vmem:[#allocation10 + $0x2dc] ss:$36 sps:$4 sm:$0xff]  }
 0x7bc   :  { %3212 = vmatprep.subr.bf16.mxu0 %v9230_v1  ;;  %10775 = vst [vmem:[#allocation47_spill] sm:$0xff] %v9381_v35 }
 0x7be   :  { %5522 = vmatpush3.bf16.msra.mxu1 %v8991_v30  ;;  %v9251_v30 = vld [vmem:[#allocation10 + $0xd8] ss:$36 sps:$4 sm:$0xff]  }
 0x7bf   :  { %5523 = vmatprep.subr.bf16.mxu1 %v8994_v61  ;;  %3213 = vmatpush1.bf16.msra.mxu0 %v9235_v60  ;;  %v9254_v61 = vld [vmem:[#allocation10 + $0x124] ss:$36 sps:$4 sm:$0xff]  }
 0x7c0   :  { %3214 = vmatprep.subr.bf16.mxu0 %v9238_v14 }
 0x7c2   :  { %5524 = vmatpush3.bf16.msra.mxu1 %v8999_v52  ;;  %v9262_v52 = vld [vmem:[#allocation10 + $0x16c] ss:$36 sps:$4 sm:$0xff]  }
 0x7c3   :  { %5525 = vmatprep.subr.bf16.mxu1 %v9002_v51  ;;  %3215 = vmatpush1.bf16.msra.mxu0 %v9243_v22  ;;  %v9259_v51 = vld [vmem:[#allocation10 + $0x120] ss:$36 sps:$4 sm:$0xff]  }
 0x7c4   :  { %3216 = vmatprep.subr.bf16.mxu0 %v9246_v56 }
 0x7c6   :  { %5526 = vmatpush3.bf16.msra.mxu1 %v9007_v3  ;;  %v9267_v3 = vld [vmem:[#allocation10 + $0x168] ss:$36 sps:$4 sm:$0xff]  }
 0x7c7   :  { %5527 = vmatprep.subr.bf16.mxu1 %v9010_v62  ;;  %3217 = vmatpush1.bf16.msra.mxu0 %v9251_v30  ;;  %v9270_v62 = vld [vmem:[#allocation10 + $0x1b4] ss:$36 sps:$4 sm:$0xff]  }
 0x7c8   :  { %3218 = vmatprep.subr.bf16.mxu0 %v9254_v61 }
 0x7ca   :  { %5528 = vmatpush3.bf16.msra.mxu1 %v9015_v59  ;;  %v9275_v59 = vld [vmem:[#allocation10 + $0x1b0] ss:$36 sps:$4 sm:$0xff]  }
 0x7cb   :  { %5529 = vmatprep.subr.bf16.mxu1 %v9018_v25  ;;  %3219 = vmatpush1.bf16.msra.mxu0 %v9259_v51  ;;  %v9278_v25 = vld [vmem:[#allocation10 + $0x1fc] ss:$36 sps:$4 sm:$0xff]  }
 0x7cc   :  { %3220 = vmatprep.subr.bf16.mxu0 %v9262_v52 }
 0x7ce   :  { %5530 = vmatpush3.bf16.msra.mxu1 %v9023_v32  ;;  %v10752_v32 = vld [vmem:[#allocation106_spill] sm:$0xff] }
 0x7cf   :  { %5531 = vmatprep.subr.bf16.mxu1 %v9026_v48  ;;  %3221 = vmatpush1.bf16.msra.mxu0 %v9267_v3  ;;  %v10753_v48 = vld [vmem:[#allocation107_spill] sm:$0xff] }
 0x7d0   :  { %3222 = vmatprep.subr.bf16.mxu0 %v9270_v62 }
 0x7d2   :  { %5532 = vmatpush3.bf16.msra.mxu1 %v9031_v27  ;;  %v10754_v27 = vld [vmem:[#allocation108_spill] sm:$0xff] }
 0x7d3   :  { %5533 = vmatprep.subr.bf16.mxu1 %v9034_v39  ;;  %3223 = vmatpush1.bf16.msra.mxu0 %v9275_v59  ;;  %v10755_v39 = vld [vmem:[#allocation109_spill] sm:$0xff] }
 0x7d4   :  { %3224 = vmatprep.subr.bf16.mxu0 %v9278_v25 }
 0x7d6   :  { %5534 = vmatpush3.bf16.msra.mxu1 %v10752_v32  ;;  %v9384_v32 = vld [vmem:[#allocation10 + $0x2d8] ss:$36 sps:$4 sm:$0xff]  }
 0x7d7   :  { %3253 = vmatprep.subr.bf16.mxu1 %v10753_v48  ;;  %3225 = vmatpush1.bf16.msra.mxu0 %v9283_v46  ;;  %10776 = vst [vmem:[#allocation49_spill] sm:$0xff] %v9384_v32  ;;  %v9387_v48 = vld [vmem:[#allocation10 + $0x324] ss:$36 sps:$4 sm:$0xff]  }
 0x7d8   :  { %3226 = vmatprep.subr.bf16.mxu0 %v9286_v43  ;;  %10777 = vst [vmem:[#allocation50_spill] sm:$0xff] %v9387_v48 }
 0x7d9   :  { %3061 = vmatmul.mubr.bf16.vlgmr.msra.gmra.mrb[56].mxu1 %v9148_v29  ;;  %v9303_v29 = vld [vmem:[#allocation10 + $0x2d4] ss:$36 sps:$4 sm:$0xff]  }
 0x7da   :  { %3254 = vmatpush1.bf16.msra.mxu1 %v10754_v27  ;;  %v9390_v27 = vld [vmem:[#allocation10 + $0x320] ss:$36 sps:$4 sm:$0xff]  }
 0x7db   :  { %3255 = vmatprep.subr.bf16.mxu1 %v10755_v39  ;;  %3227 = vmatpush1.bf16.msra.mxu0 %v9292_v44  ;;  %10778 = vst [vmem:[#allocation51_spill] sm:$0xff] %v9390_v27  ;;  %v9393_v39 = vld [vmem:[#allocation10 + $0x36c] ss:$36 sps:$4 sm:$0xff]  }
 0x7dc   :  { %3228 = vmatprep.subr.bf16.mxu0 %v9295_v19  ;;  %10779 = vst [vmem:[#allocation52_spill] sm:$0xff] %v9393_v39 }
 0x7de   :  { %3256 = vmatpush1.bf16.msra.mxu1 %v10756_v49  ;;  %v9396_v49 = vld [vmem:[#allocation10 + $0x368] ss:$36 sps:$4 sm:$0xff]  }
 0x7df   :  { %3257 = vmatprep.subr.bf16.mxu1 %v10757_v6  ;;  %3229 = vmatpush1.bf16.msra.mxu0 %v9300_v55  ;;  %10780 = vst [vmem:[#allocation53_spill] sm:$0xff] %v9396_v49  ;;  %v9399_v6 = vld [vmem:[#allocation10 + $0x3b4] ss:$36 sps:$4 sm:$0xff]  }
 0x7e0   :  { %3230 = vmatprep.subr.bf16.mxu0 %v9303_v29  ;;  %10781 = vst [vmem:[#allocation54_spill] sm:$0xff] %v9399_v6 }
 0x7e2   :  { %3258 = vmatpush1.bf16.msra.mxu1 %v10758_v12  ;;  %v9402_v12 = vld [vmem:[#allocation10 + $0x3b0] ss:$36 sps:$4 sm:$0xff]  }
 0x7e3   :  { %3259 = vmatprep.subr.bf16.mxu1 %v10759_v54  ;;  %3231 = vmatpush1.bf16.msra.mxu0 %v9308_v47  ;;  %10782 = vst [vmem:[#allocation55_spill] sm:$0xff] %v9402_v12  ;;  %v9405_v54 = vld [vmem:[#allocation10 + $0x3fc] ss:$36 sps:$4 sm:$0xff]  }
 0x7e4   :  { %3232 = vmatprep.subr.bf16.mxu0 %v9311_v7  ;;  %10783 = vst [vmem:[#allocation56_spill] sm:$0xff] %v9405_v54 }
 0x7e6   :  { %3260 = vmatpush1.bf16.msra.mxu1 %v10760_v17  ;;  %v9408_v17 = vld [vmem:[#allocation10 + $0x3f8] ss:$36 sps:$4 sm:$0xff]  }
 0x7e7   :  { %3261 = vmatprep.subr.bf16.mxu1 %v9315_v31  ;;  %3233 = vmatpush1.bf16.msra.mxu0 %v9318_v38  ;;  %10784 = vst [vmem:[#allocation57_spill] sm:$0xff] %v9408_v17 }
 0x7e8   :  { %3234 = vmatprep.subr.bf16.mxu0 %v9321_v57 }
 0x7ea   :  { %3262 = vmatpush1.bf16.msra.mxu1 %v9324_v5 }
 0x7eb   :  { %3263 = vmatprep.subr.bf16.mxu1 %v9327_v4  ;;  %3235 = vmatpush1.bf16.msra.mxu0 %v9330_v50 }
 0x7ec   :  { %3236 = vmatprep.subr.bf16.mxu0 %v9333_v36 }
 0x7ee   :  { %3264 = vmatpush1.bf16.msra.mxu1 %v9336_v34 }
 0x7ef   :  { %3265 = vmatprep.subr.bf16.mxu1 %v9339_v9  ;;  %3237 = vmatpush1.bf16.msra.mxu0 %v9342_v45 }
 0x7f0   :  { %3238 = vmatprep.subr.bf16.mxu0 %v9345_v37 }
 0x7f2   :  { %3266 = vmatpush1.bf16.msra.mxu1 %v9348_v33 }
 0x7f3   :  { %3267 = vmatprep.subr.bf16.mxu1 %v9351_v42  ;;  %3239 = vmatpush1.bf16.msra.mxu0 %v9354_v15 }
 0x7f4   :  { %3240 = vmatprep.subr.bf16.mxu0 %v9357_v28 }
 0x7f6   :  { %3268 = vmatpush1.bf16.msra.mxu1 %v9360_v21 }
 0x7f7   :  { %3269 = vmatprep.subr.bf16.mxu1 %v9363_v23  ;;  %3241 = vmatpush1.bf16.msra.mxu0 %v9366_v40 }
 0x7f8   :  { %3296 = vmatprep.subr.bf16.mxu0 %v9369_v24 }
 0x7fa   :  { %3270 = vmatpush1.bf16.msra.mxu1 %v9372_v26 }
 0x7fb   :  { %3271 = vmatprep.subr.bf16.mxu1 %v9375_v13 }
 0x7fe   :  { %3272 = vmatpush1.bf16.msra.mxu1 %v9378_v20 }
 0x7ff   :  { %3273 = vmatprep.subr.bf16.mxu1 %v9381_v35 }
 0x802   :  { %3274 = vmatpush1.bf16.msra.mxu1 %v9384_v32 }
 0x803   :  { %3275 = vmatprep.subr.bf16.mxu1 %v9387_v48 }
 0x806   :  { %3276 = vmatpush1.bf16.msra.mxu1 %v9390_v27  ;;  %v3072_v27 = vld [vmem:[#allocation8 + $0x84] sm:$0xff] }
 0x807   :  { %3277 = vmatprep.subr.bf16.mxu1 %v9393_v39  ;;  %v9411_v39 = vld [vmem:[#allocation10 + $0x444] ss:$36 sps:$4 sm:$0xff]   ;;  %v3078_v40 = vunpack.c.h.bf16 %v3072_v27 }
 0x808   :  { %10785 = vst [vmem:[#allocation58_spill] sm:$0xff] %v9411_v39 }
 0x80a   :  { %3278 = vmatpush1.bf16.msra.mxu1 %v9396_v49  ;;  %v9414_v49 = vld [vmem:[#allocation10 + $0x440] ss:$36 sps:$4 sm:$0xff]  }
 0x80b   :  { %3279 = vmatprep.subr.bf16.mxu1 %v9399_v6  ;;  %10786 = vst [vmem:[#allocation59_spill] sm:$0xff] %v9414_v49  ;;  %v9417_v6 = vld [vmem:[#allocation10 + $0x1c] ss:$36 sps:$4 sm:$0xff]  }
 0x80c   :  { %10787 = vst [vmem:[#allocation60_spill] sm:$0xff] %v9417_v6 }
 0x80e   :  { %3280 = vmatpush1.bf16.msra.mxu1 %v9402_v12  ;;  %v3070_v12 = vld [vmem:[#allocation8 + $0x78] sm:$0xff] }
 0x80f   :  { %3281 = vmatprep.subr.bf16.mxu1 %v9405_v54  ;;  %v3074_v48 = vunpack.c.l.bf16 %v3070_v12  ;;  %v3077_v54 = vunpack.c.l.bf16 %v3072_v27  ;;  %v3075_v20 = vunpack.c.h.bf16 %v3070_v12 }
 0x812   :  { %3282 = vmatpush1.bf16.msra.mxu1 %v9408_v17 }
 0x813   :  { %3283 = vmatprep.subr.bf16.mxu1 %v9411_v39 }
 0x816   :  { %3284 = vmatpush1.bf16.msra.mxu1 %v9414_v49 }
 0x817   :  { %3339 = vmatprep.subr.bf16.mxu1 %v9417_v6 }
 0x84c   :  { %v2890_v32 = vpop.f32.mrb[48].mxu1  ;;  %v2933_v35 = vpop.f32.mrb[52].mxu0 }
 0x84d   :  { %v3080_v17 = vadd.f32 %v3074_v48, %v2890_v32  ;;  %v2892_v13 = vpop.f32.mrb[49].mxu1  ;;  %v2935_v26 = vpop.f32.mrb[53].mxu0 }
 0x84e   :  { %v2894_v24 = vpop.f32.mrb[50].mxu1  ;;  %v2937_v39 = vpop.f32.mrb[54].mxu0  ;;  %v3081_v15 = vadd.f32 %v3075_v20, %v2892_v13 }
 0x84f   :  { %v5245_v23 = vmul.f32 -1.442695, %v3080_v17  ;;  %v3082_v21 = vadd.f32 %v3077_v54, %v2894_v24  ;;  %v2896_v49 = vpop.f32.mrb[51].mxu1  ;;  %v2939_v28 = vpop.f32.mrb[55].mxu0  ;;  %v3071_v24 = vld [vmem:[#allocation8 + $0x80] ss:$12 sps:$4 sm:$0xff]  }
 0x850   :  { %v3083_v42 = vadd.f32 %v3078_v40, %v2896_v49  ;;  %v5246_v33 = vmul.f32 -1.442695, %v3081_v15  ;;  %v3076_v9 = vunpack.c.l.bf16 %v3071_v24 }
 0x851   :  { %6042 = vpow2.f32 %v5245_v23  ;;  %v5247_v6 = vmul.f32 -1.442695, %v3082_v21  ;;  %v3108_v23 = vadd.f32 %v10381_v53, %v2933_v35 }
 0x852   :  { %v5248_v37 = vmul.f32 -1.442695, %v3083_v42  ;;  %v3079_v42 = vunpack.c.h.bf16 %v3071_v24 }
 0x853   :  { %6044 = vpow2.f32 %v5247_v6 }
 0x854   :  { %6046 = vpow2.f32 %v5246_v33 }
 0x855   :  { %6048 = vpow2.f32 %v5248_v37  ;;  %v3109_v37 = vadd.f32 %v10381_v53, %v2937_v39 }
 0x85b   :  { %v6043_v12 = vpop.eup %6042 }
 0x85c   :  { %v3096_v32 = vadd.f32 1.0, %v6043_v12 }
 0x85d   :  { %v6045_v48 = vpop.eup %6044 }
 0x85e   :  { %6050 = vrcp.f32 %v3096_v32  ;;  %v3098_v45 = vadd.f32 1.0, %v6045_v48  ;;  %v6047_v27 = vpop.eup %6046 }
 0x85f   :  { %v6049_v17 = vpop.eup %6048  ;;  %v3097_v54 = vadd.f32 1.0, %v6047_v27 }
 0x860   :  { %6052 = vrcp.f32 %v3098_v45  ;;  %v3099_v21 = vadd.f32 1.0, %v6049_v17 }
 0x861   :  { %6054 = vrcp.f32 %v3097_v54 }
 0x862   :  { %6056 = vrcp.f32 %v3099_v21 }
 0x868   :  { %v6051_v40 = vpop.eup %6050 }
 0x869   :  { %v3110_v13 = vmul.f32 %v6051_v40, %v3108_v23  ;;  %v3145_v23 = vadd.f32 %v2935_v26, %v10624_v10 }
 0x86a   :  { %v6053_v33 = vpop.eup %6052 }
 0x86b   :  { %v3112_v15 = vadd.f32 %v3110_v13, %v3076_v9  ;;  %v3111_v20 = vmul.f32 %v6053_v33, %v3109_v37  ;;  %v6055_v49 = vpop.eup %6054  ;;  %v3148_v13 = vadd.f32 %v2939_v28, %v10624_v10 }
 0x86c   :  { %v6057_v6 = vpop.eup %6056  ;;  %v3119_v12 = vsub.f32 1.0, %v6055_v49  ;;  %v3123_v35 = vmul.f32 %v6055_v49, %v9144_v16 }
 0x86d   :  { %6058 = vtanh.f32 %v3112_v15  ;;  %v3113_v45 = vadd.f32 %v3111_v20, %v3079_v42  ;;  %v3120_v27 = vsub.f32 1.0, %v6057_v6  ;;  %v3124_v39 = vmul.f32 %v6057_v6, %v9130_v41 }
 0x86f   :  { %6060 = vtanh.f32 %v3113_v45 }
 0x877   :  { %v6059_v32 = vpop.eup %6058 }
 0x878   :  { %v3121_v48 = vmul.f32 %v6059_v32, %v3119_v12 }
 0x879   :  { %v6061_v17 = vpop.eup %6060 }
 0x87a   :  { %v9423_v54 = vadd.f32 %v3123_v35, %v3121_v48  ;;  %v3122_v24 = vmul.f32 %v6061_v17, %v3120_v27 }
 0x87c   :  { %v9426_v9 = vadd.f32 %v3124_v39, %v3122_v24 }
 0x88c   :  { %v2976_v21 = vpop.f32.mrb[52].mxu1  ;;  %v3019_v40 = vpop.f32.mrb[56].mxu0 }
 0x88d   :  { %v3146_v42 = vadd.f32 %v2976_v21, %v10544_v18  ;;  %v3151_v37 = vadd.f32 %v3145_v23, %v3019_v40  ;;  %v2978_v33 = vpop.f32.mrb[53].mxu1  ;;  %v3021_v15 = vpop.f32.mrb[57].mxu0 }
 0x88e   :  { %v2980_v20 = vpop.f32.mrb[54].mxu1  ;;  %v3023_v45 = vpop.f32.mrb[58].mxu0 }
 0x88f   :  { %v3152_v49 = vadd.f32 %v3146_v42, %v3021_v15  ;;  %v3149_v12 = vadd.f32 %v2980_v20, %v10544_v18  ;;  %v3153_v32 = vadd.f32 %v3148_v13, %v3023_v45  ;;  %v2982_v6 = vpop.f32.mrb[55].mxu1  ;;  %v3025_v48 = vpop.f32.mrb[59].mxu0  ;;  %v5251_v27 = vmul.f32 -1.442695, %v3151_v37 }
 0x891   :  { %v3154_v35 = vadd.f32 %v3149_v12, %v3025_v48  ;;  %v5253_v26 = vmul.f32 -1.442695, %v3153_v32  ;;  %6062 = vpow2.f32 %v5251_v27  ;;  %v5252_v17 = vmul.f32 -1.442695, %v3152_v49 }
 0x892   :  { %v3147_v27 = vadd.f32 %v2978_v33, %v10387_v8 }
 0x893   :  { %6064 = vpow2.f32 %v5253_v26  ;;  %v5254_v28 = vmul.f32 -1.442695, %v3154_v35 }
 0x894   :  { %6066 = vpow2.f32 %v5252_v17 }
 0x895   :  { %6068 = vpow2.f32 %v5254_v28 }
 0x89b   :  { %v6063_v24 = vpop.eup %6062 }
 0x89c   :  { %v3167_v23 = vadd.f32 1.0, %v6063_v24  ;;  %v3150_v24 = vadd.f32 %v2982_v6, %v10387_v8 }
 0x89d   :  { %v6065_v39 = vpop.eup %6064 }
 0x89e   :  { %v3169_v21 = vadd.f32 1.0, %v6065_v39  ;;  %6070 = vrcp.f32 %v3167_v23  ;;  %v6067_v40 = vpop.eup %6066 }
 0x89f   :  { %v6069_v13 = vpop.eup %6068  ;;  %v3168_v20 = vadd.f32 1.0, %v6067_v40 }
 0x8a0   :  { %6072 = vrcp.f32 %v3169_v21  ;;  %v3170_v32 = vadd.f32 1.0, %v6069_v13  ;;  %v3202_v13 = vpop.permute.xlu0 %3201 }
 0x8a1   :  { %6074 = vrcp.f32 %v3168_v20  ;;  %vm3204_vm5 = vcmp.eq.s32.totalorder %v3202_v13, 1  ;;  %v9490_v13 = vld [vmem:[#allocation10 + $0xa0] ss:$36 sps:$4 sm:$0xff]  }
 0x8a2   :  { %6076 = vrcp.f32 %v3170_v32 }
 0x8a8   :  { %v6071_v35 = vpop.eup %6070 }
 0x8aa   :  { %v6073_v28 = vpop.eup %6072 }
 0x8ab   :  { %v6075_v40 = vpop.eup %6074 }
 0x8ac   :  { %v5535_v42 = vpop.f32.mrb[56].mxu1  ;;  %v3191_v33 = vmul.f32 %v6075_v40, %v9133_v11 }
 0x8ad   :  { %v5536_v15 = vpop.f32.mrb[57].mxu1 }
 0x8ae   :  { %v5537_v45 = vadd.f32 %v5536_v15, %v5535_v42  ;;  %v5538_v37 = vpop.f32.mrb[58].mxu1  ;;  %v6077_v42 = vpop.eup %6076  ;;  %v3187_v15 = vsub.f32 1.0, %v6075_v40  ;;  %v9484_v40 = vld [vmem:[#allocation10 + $0xa4] ss:$36 sps:$4 sm:$0xff]  }
 0x8af   :  { %v5539_v12 = vpop.f32.mrb[59].mxu1  ;;  %v3188_v20 = vsub.f32 1.0, %v6077_v42 }
 0x8b0   :  { %v3179_v49 = vadd.f32 %v5537_v45, %v10465_v2  ;;  %v5540_v48 = vadd.f32 %v5539_v12, %v5538_v37  ;;  %v3199_v37 = vpop.permute.xlu1 %3198 }
 0x8b1   :  { %vm3203_vm6 = vcmp.eq.s32.totalorder %v3199_v37, 1  ;;  %v9499_v37 = vld [vmem:[#allocation10 + $0xf4] ss:$36 sps:$4 sm:$0xff]  }
 0x8b2   :  { %v3181_v26 = vmul.f32 %v6071_v35, %v3179_v49  ;;  %v3180_v17 = vadd.f32 %v5540_v48, %v10465_v2  ;;  %v3192_v48 = vmul.f32 %v6077_v42, %v9136_v58  ;;  %v3134_v35 = vpop.permute.xlu0 %3133  ;;  %v9487_v42 = vld [vmem:[#allocation10 + $0xac] ss:$36 sps:$4 sm:$0xff]  }
 0x8b3   :  { %vm3136_vm4 = vcmp.eq.s32.totalorder %v3134_v35, 1  ;;  %v9523_v35 = vld [vmem:[#allocation10 + $0x184] ss:$36 sps:$4 sm:$0xff]  }
 0x8b4   :  { %v3183_v39 = vadd.f32 %v3181_v26, %v3147_v27  ;;  %v3182_v23 = vmul.f32 %v6073_v28, %v3180_v17  ;;  %v3131_v26 = vpop.permute.xlu1 %3130  ;;  %v9440_v17 = vsel %vm3136_vm4, %v9426_v9, %v9130_v41  ;;  %v9464_v41 = vld [vmem:[#allocation10 + $0x10] ss:$36 sps:$4 sm:$0xff]   ;;  %v9481_v9 = vld [vmem:[#allocation10 + $0x60] ss:$36 sps:$4 sm:$0xff]   ;;  %10791 = vst [vmem:[#allocation64_spill] sm:$0xff] %v9523_v35 }
 0x8b5   :  { %vm3135_vm7 = vcmp.eq.s32.totalorder %v3131_v26, 1  ;;  %v9529_v26 = vld [vmem:[#allocation10 + $0x180] ss:$36 sps:$4 sm:$0xff]  }
 0x8b6   :  { %6078 = vtanh.f32 %v3183_v39  ;;  %v3184_v21 = vadd.f32 %v3182_v23, %v3150_v24  ;;  %v9454_v23 = vsel %vm3135_vm7, %v9423_v54, %v9144_v16  ;;  %v9475_v16 = vld [vmem:[#allocation10 + $0x64] ss:$36 sps:$4 sm:$0xff]   ;;  %v9478_v54 = vld [vmem:[#allocation10 + $0x58] ss:$36 sps:$4 sm:$0xff]   ;;  %10793 = vst [vmem:[#allocation66_spill] sm:$0xff] %v9529_v26 }
 0x8b8   :  { %6080 = vtanh.f32 %v3184_v21  ;;  %v9458_v21 = vpack.c.bf16 %v9440_v17, %v9454_v23 }
 0x8c0   :  { %v6079_v45 = vpop.eup %6078 }
 0x8c1   :  { %v3189_v12 = vmul.f32 %v6079_v45, %v3187_v15  ;;  %v9493_v15 = vld [vmem:[#allocation10 + $0xa8] ss:$36 sps:$4 sm:$0xff]  }
 0x8c2   :  { %v6081_v49 = vpop.eup %6080  ;;  %v9496_v45 = vld [vmem:[#allocation10 + $0xec] ss:$36 sps:$4 sm:$0xff]  }
 0x8c3   :  { %v3193_v6 = vadd.f32 %v3191_v33, %v3189_v12  ;;  %v3190_v32 = vmul.f32 %v6081_v49, %v3188_v20  ;;  %v9502_v33 = vld [vmem:[#allocation10 + $0xe8] ss:$36 sps:$4 sm:$0xff]   ;;  %v9505_v20 = vld [vmem:[#allocation10 + $0xf0] ss:$36 sps:$4 sm:$0xff]   ;;  %v9511_v49 = vld [vmem:[#allocation10 + $0x13c] ss:$36 sps:$4 sm:$0xff]  }
 0x8c4   :  { %v9508_v12 = vld [vmem:[#allocation10 + $0x134] ss:$36 sps:$4 sm:$0xff]  }
 0x8c5   :  { %v3194_v27 = vadd.f32 %v3192_v48, %v3190_v32  ;;  %v9443_v28 = vsel %vm3203_vm6, %v3193_v6, %v9133_v11  ;;  %v9467_v11 = vld [vmem:[#allocation10 + $0x18] ss:$36 sps:$4 sm:$0xff]   ;;  %v9514_v48 = vld [vmem:[#allocation10 + $0x130] ss:$36 sps:$4 sm:$0xff]  }
 0x8c6   :  { %10788 = vst [vmem:[#allocation61_spill] sm:$0xff] %v9514_v48  ;;  %v9517_v6 = vld [vmem:[#allocation10 + $0x138] ss:$36 sps:$4 sm:$0xff]  }
 0x8c7   :  { %v9446_v24 = vsel %vm3204_vm5, %v3194_v27, %v9136_v58  ;;  %v9472_v58 = vld [vmem:[#allocation10 + $0x5c] ss:$36 sps:$4 sm:$0xff]   ;;  %10789 = vst [vmem:[#allocation62_spill] sm:$0xff] %v9517_v6 }
 0x8c8   :  { %v9450_v39 = vpack.c.bf16 %v9446_v24, %v9443_v28  ;;  %v9520_v32 = vld [vmem:[#allocation10 + $0x17c] ss:$36 sps:$4 sm:$0xff]  }
 0x8c9   :  { %10790 = vst [vmem:[#allocation63_spill] sm:$0xff] %v9520_v32  ;;  %v9526_v27 = vld [vmem:[#allocation10 + $0x178] ss:$36 sps:$4 sm:$0xff]  }
 0x8ca   :  { %3242 = vmatprep.mubr.bf16.mxu0 %v9450_v39  ;;  %3285 = vmatprep.mubr.bf16.mxu1 %v9450_v39  ;;  %10792 = vst [vmem:[#allocation65_spill] sm:$0xff] %v9526_v27 }
 0x8cb   :  { %3243 = vmatmul.mubr.bf16.vlgmr.msra.gmra.mrb[60].mxu0 %v9458_v21  ;;  %3286 = vmatmul.mubr.bf16.vlgmr.msra.gmra.mrb[60].mxu1 %v9458_v21 }
 0x8cc   :  { %3297 = vmatpush1.bf16.msra.mxu0 %v9464_v41  ;;  %3340 = vmatpush1.bf16.msra.mxu1 %v9467_v11 }
 0x8cd   :  { %3328 = vmatprep.mubr.bf16.mxu0 %v9450_v39  ;;  %3371 = vmatprep.mubr.bf16.mxu1 %v9450_v39 }
 0x8ce   :  { %3298 = vmatprep.subr.bf16.mxu0 %v9472_v58  ;;  %3341 = vmatprep.subr.bf16.mxu1 %v9475_v16 }
 0x8d0   :  { %3299 = vmatpush1.bf16.msra.mxu0 %v9478_v54  ;;  %3342 = vmatpush1.bf16.msra.mxu1 %v9481_v9 }
 0x8d1   :  { %3300 = vmatprep.subr.bf16.mxu0 %v9484_v40  ;;  %3343 = vmatprep.subr.bf16.mxu1 %v9487_v42 }
 0x8d4   :  { %3301 = vmatpush1.bf16.msra.mxu0 %v9490_v13  ;;  %3344 = vmatpush1.bf16.msra.mxu1 %v9493_v15 }
 0x8d5   :  { %3302 = vmatprep.subr.bf16.mxu0 %v9496_v45  ;;  %3345 = vmatprep.subr.bf16.mxu1 %v9499_v37 }
 0x8d8   :  { %3303 = vmatpush1.bf16.msra.mxu0 %v9502_v33  ;;  %3346 = vmatpush1.bf16.msra.mxu1 %v9505_v20 }
 0x8d9   :  { %3304 = vmatprep.subr.bf16.mxu0 %v9508_v12  ;;  %3347 = vmatprep.subr.bf16.mxu1 %v9511_v49 }
 0x8dc   :  { %3305 = vmatpush1.bf16.msra.mxu0 %v9514_v48  ;;  %3348 = vmatpush1.bf16.msra.mxu1 %v9517_v6  ;;  %v9532_v48 = vld [vmem:[#allocation10 + $0x1c4] ss:$36 sps:$4 sm:$0xff]   ;;  %v9535_v6 = vld [vmem:[#allocation10 + $0x1cc] ss:$36 sps:$4 sm:$0xff]  }
 0x8dd   :  { %3306 = vmatprep.subr.bf16.mxu0 %v9520_v32  ;;  %3349 = vmatprep.subr.bf16.mxu1 %v9523_v35  ;;  %10794 = vst [vmem:[#allocation67_spill] sm:$0xff] %v9532_v48  ;;  %10795 = vst [vmem:[#allocation68_spill] sm:$0xff] %v9535_v6  ;;  %v9538_v32 = vld [vmem:[#allocation10 + $0x1c0] ss:$36 sps:$4 sm:$0xff]   ;;  %v9541_v35 = vld [vmem:[#allocation10 + $0x1c8] ss:$36 sps:$4 sm:$0xff]  }
 0x8de   :  { %10796 = vst [vmem:[#allocation69_spill] sm:$0xff] %v9538_v32  ;;  %10797 = vst [vmem:[#allocation70_spill] sm:$0xff] %v9541_v35 }
 0x8e0   :  { %3307 = vmatpush1.bf16.msra.mxu0 %v9526_v27  ;;  %3350 = vmatpush1.bf16.msra.mxu1 %v9529_v26  ;;  %v9544_v27 = vld [vmem:[#allocation10 + $0x20c] ss:$36 sps:$4 sm:$0xff]   ;;  %v9547_v26 = vld [vmem:[#allocation10 + $0x214] ss:$36 sps:$4 sm:$0xff]  }
 0x8e1   :  { %3308 = vmatprep.subr.bf16.mxu0 %v9532_v48  ;;  %3351 = vmatprep.subr.bf16.mxu1 %v9535_v6  ;;  %10798 = vst [vmem:[#allocation71_spill] sm:$0xff] %v9544_v27  ;;  %10799 = vst [vmem:[#allocation72_spill] sm:$0xff] %v9547_v26  ;;  %v9550_v48 = vld [vmem:[#allocation10 + $0x208] ss:$36 sps:$4 sm:$0xff]   ;;  %v9553_v6 = vld [vmem:[#allocation10 + $0x210] ss:$36 sps:$4 sm:$0xff]  }
 0x8e2   :  { %10800 = vst [vmem:[#allocation73_spill] sm:$0xff] %v9550_v48  ;;  %10801 = vst [vmem:[#allocation74_spill] sm:$0xff] %v9553_v6 }
 0x8e4   :  { %3309 = vmatpush1.bf16.msra.mxu0 %v9538_v32  ;;  %3352 = vmatpush1.bf16.msra.mxu1 %v9541_v35  ;;  %v9556_v32 = vld [vmem:[#allocation10 + $0x254] ss:$36 sps:$4 sm:$0xff]   ;;  %v9559_v35 = vld [vmem:[#allocation10 + $0x25c] ss:$36 sps:$4 sm:$0xff]  }
 0x8e5   :  { %3310 = vmatprep.subr.bf16.mxu0 %v9544_v27  ;;  %3353 = vmatprep.subr.bf16.mxu1 %v9547_v26  ;;  %10802 = vst [vmem:[#allocation75_spill] sm:$0xff] %v9556_v32  ;;  %10803 = vst [vmem:[#allocation76_spill] sm:$0xff] %v9559_v35  ;;  %v9562_v27 = vld [vmem:[#allocation10 + $0x250] ss:$36 sps:$4 sm:$0xff]   ;;  %v9565_v26 = vld [vmem:[#allocation10 + $0x258] ss:$36 sps:$4 sm:$0xff]  }
 0x8e6   :  { %10804 = vst [vmem:[#allocation77_spill] sm:$0xff] %v9562_v27  ;;  %10805 = vst [vmem:[#allocation78_spill] sm:$0xff] %v9565_v26 }
 0x8e8   :  { %3311 = vmatpush1.bf16.msra.mxu0 %v9550_v48  ;;  %3354 = vmatpush1.bf16.msra.mxu1 %v9553_v6  ;;  %v9568_v48 = vld [vmem:[#allocation10 + $0x29c] ss:$36 sps:$4 sm:$0xff]   ;;  %v9571_v6 = vld [vmem:[#allocation10 + $0x2a4] ss:$36 sps:$4 sm:$0xff]  }
 0x8e9   :  { %3312 = vmatprep.subr.bf16.mxu0 %v9556_v32  ;;  %3355 = vmatprep.subr.bf16.mxu1 %v9559_v35  ;;  %10806 = vst [vmem:[#allocation79_spill] sm:$0xff] %v9568_v48  ;;  %10807 = vst [vmem:[#allocation80_spill] sm:$0xff] %v9571_v6  ;;  %v9574_v32 = vld [vmem:[#allocation10 + $0x298] ss:$36 sps:$4 sm:$0xff]   ;;  %v9577_v35 = vld [vmem:[#allocation10 + $0x2a0] ss:$36 sps:$4 sm:$0xff]  }
 0x8ea   :  { %10808 = vst [vmem:[#allocation81_spill] sm:$0xff] %v9574_v32  ;;  %10809 = vst [vmem:[#allocation82_spill] sm:$0xff] %v9577_v35 }
 0x8ec   :  { %3313 = vmatpush1.bf16.msra.mxu0 %v9562_v27  ;;  %3356 = vmatpush1.bf16.msra.mxu1 %v9565_v26  ;;  %v9580_v27 = vld [vmem:[#allocation10 + $0x2e4] ss:$36 sps:$4 sm:$0xff]   ;;  %v9583_v26 = vld [vmem:[#allocation10 + $0x2ec] ss:$36 sps:$4 sm:$0xff]  }
 0x8ed   :  { %3314 = vmatprep.subr.bf16.mxu0 %v9568_v48  ;;  %3357 = vmatprep.subr.bf16.mxu1 %v9571_v6  ;;  %10810 = vst [vmem:[#allocation83_spill] sm:$0xff] %v9580_v27  ;;  %10811 = vst [vmem:[#allocation84_spill] sm:$0xff] %v9583_v26  ;;  %v9586_v48 = vld [vmem:[#allocation10 + $0x2e0] ss:$36 sps:$4 sm:$0xff]   ;;  %v9589_v6 = vld [vmem:[#allocation10 + $0x2e8] ss:$36 sps:$4 sm:$0xff]  }
 0x8ee   :  { %10812 = vst [vmem:[#allocation85_spill] sm:$0xff] %v9586_v48  ;;  %10813 = vst [vmem:[#allocation86_spill] sm:$0xff] %v9589_v6 }
 0x8f0   :  { %3315 = vmatpush1.bf16.msra.mxu0 %v9574_v32  ;;  %3358 = vmatpush1.bf16.msra.mxu1 %v9577_v35  ;;  %v9592_v32 = vld [vmem:[#allocation10 + $0x32c] ss:$36 sps:$4 sm:$0xff]   ;;  %v9595_v35 = vld [vmem:[#allocation10 + $0x334] ss:$36 sps:$4 sm:$0xff]  }
 0x8f1   :  { %3316 = vmatprep.subr.bf16.mxu0 %v9580_v27  ;;  %3359 = vmatprep.subr.bf16.mxu1 %v9583_v26  ;;  %10814 = vst [vmem:[#allocation87_spill] sm:$0xff] %v9592_v32  ;;  %10815 = vst [vmem:[#allocation88_spill] sm:$0xff] %v9595_v35  ;;  %v9598_v27 = vld [vmem:[#allocation10 + $0x328] ss:$36 sps:$4 sm:$0xff]   ;;  %v9601_v26 = vld [vmem:[#allocation10 + $0x330] ss:$36 sps:$4 sm:$0xff]  }
 0x8f2   :  { %10816 = vst [vmem:[#allocation89_spill] sm:$0xff] %v9598_v27  ;;  %10817 = vst [vmem:[#allocation90_spill] sm:$0xff] %v9601_v26 }
 0x8f4   :  { %3317 = vmatpush1.bf16.msra.mxu0 %v9586_v48  ;;  %3360 = vmatpush1.bf16.msra.mxu1 %v9589_v6  ;;  %v9604_v48 = vld [vmem:[#allocation10 + $0x374] ss:$36 sps:$4 sm:$0xff]   ;;  %v9607_v6 = vld [vmem:[#allocation10 + $0x37c] ss:$36 sps:$4 sm:$0xff]  }
 0x8f5   :  { %3318 = vmatprep.subr.bf16.mxu0 %v9592_v32  ;;  %3361 = vmatprep.subr.bf16.mxu1 %v9595_v35  ;;  %10818 = vst [vmem:[#allocation91_spill] sm:$0xff] %v9604_v48  ;;  %10819 = vst [vmem:[#allocation92_spill] sm:$0xff] %v9607_v6  ;;  %v9610_v32 = vld [vmem:[#allocation10 + $0x370] ss:$36 sps:$4 sm:$0xff]   ;;  %v9613_v35 = vld [vmem:[#allocation10 + $0x378] ss:$36 sps:$4 sm:$0xff]  }
 0x8f6   :  { %10820 = vst [vmem:[#allocation93_spill] sm:$0xff] %v9610_v32  ;;  %10821 = vst [vmem:[#allocation94_spill] sm:$0xff] %v9613_v35 }
 0x8f8   :  { %3319 = vmatpush1.bf16.msra.mxu0 %v9598_v27  ;;  %3362 = vmatpush1.bf16.msra.mxu1 %v9601_v26  ;;  %v9616_v27 = vld [vmem:[#allocation10 + $0x3bc] ss:$36 sps:$4 sm:$0xff]   ;;  %v9619_v26 = vld [vmem:[#allocation10 + $0x3c4] ss:$36 sps:$4 sm:$0xff]  }
 0x8f9   :  { %3320 = vmatprep.subr.bf16.mxu0 %v9604_v48  ;;  %3363 = vmatprep.subr.bf16.mxu1 %v9607_v6  ;;  %10822 = vst [vmem:[#allocation95_spill] sm:$0xff] %v9616_v27  ;;  %10823 = vst [vmem:[#allocation96_spill] sm:$0xff] %v9619_v26  ;;  %v9622_v48 = vld [vmem:[#allocation10 + $0x3b8] ss:$36 sps:$4 sm:$0xff]   ;;  %v9625_v6 = vld [vmem:[#allocation10 + $0x3c0] ss:$36 sps:$4 sm:$0xff]  }
 0x8fa   :  { %10824 = vst [vmem:[#allocation97_spill] sm:$0xff] %v9622_v48  ;;  %10825 = vst [vmem:[#allocation98_spill] sm:$0xff] %v9625_v6 }
 0x8fc   :  { %3321 = vmatpush1.bf16.msra.mxu0 %v9610_v32  ;;  %3364 = vmatpush1.bf16.msra.mxu1 %v9613_v35  ;;  %v9628_v32 = vld [vmem:[#allocation10 + $0x404] ss:$36 sps:$4 sm:$0xff]   ;;  %v9631_v35 = vld [vmem:[#allocation10 + $0x40c] ss:$36 sps:$4 sm:$0xff]  }
 0x8fd   :  { %3322 = vmatprep.subr.bf16.mxu0 %v9616_v27  ;;  %3365 = vmatprep.subr.bf16.mxu1 %v9619_v26  ;;  %10826 = vst [vmem:[#allocation99_spill] sm:$0xff] %v9628_v32  ;;  %10827 = vst [vmem:[#allocation100_spill] sm:$0xff] %v9631_v35  ;;  %v9634_v27 = vld [vmem:[#allocation10 + $0x400] ss:$36 sps:$4 sm:$0xff]   ;;  %v9637_v26 = vld [vmem:[#allocation10 + $0x408] ss:$36 sps:$4 sm:$0xff]  }
 0x8fe   :  { %10828 = vst [vmem:[#allocation101_spill] sm:$0xff] %v9634_v27 }
 0x900   :  { %3323 = vmatpush1.bf16.msra.mxu0 %v9622_v48  ;;  %3366 = vmatpush1.bf16.msra.mxu1 %v9625_v6  ;;  %v9640_v48 = vld [vmem:[#allocation10 + $0x44c] ss:$36 sps:$4 sm:$0xff]   ;;  %v9643_v6 = vld [vmem:[#allocation10 + $0x454] ss:$36 sps:$4 sm:$0xff]  }
 0x901   :  { %3324 = vmatprep.subr.bf16.mxu0 %v9628_v32  ;;  %3367 = vmatprep.subr.bf16.mxu1 %v9631_v35  ;;  %10829 = vst [vmem:[#allocation102_spill] sm:$0xff] %v9640_v48  ;;  %v9646_v32 = vld [vmem:[#allocation10 + $0x448] ss:$36 sps:$4 sm:$0xff]   ;;  %v9649_v35 = vld [vmem:[#allocation10 + $0x450] ss:$36 sps:$4 sm:$0xff]  }
 0x902   :  { %10830 = vst [vmem:[#allocation103_spill] sm:$0xff] %v9646_v32 }
 0x904   :  { %3325 = vmatpush1.bf16.msra.mxu0 %v9634_v27  ;;  %3368 = vmatpush1.bf16.msra.mxu1 %v9637_v26  ;;  %v9652_v27 = vld [vmem:[#allocation10 + $0x260] ss:$36 sps:$4 sm:$0xff]  }
 0x905   :  { %3326 = vmatprep.subr.bf16.mxu0 %v9640_v48  ;;  %3369 = vmatprep.subr.bf16.mxu1 %v9643_v6  ;;  %10831 = vst [vmem:[#allocation104_spill] sm:$0xff] %v9652_v27  ;;  %v9658_v48 = vld [vmem:[#allocation10 + $0x20] ss:$36 sps:$4 sm:$0xff]  }
 0x908   :  { %3327 = vmatpush1.bf16.msra.mxu0 %v9646_v32  ;;  %3370 = vmatpush1.bf16.msra.mxu1 %v9649_v35  ;;  %v9662_v32 = vld [vmem:[#allocation10 + $0x2a8] ss:$36 sps:$4 sm:$0xff]  }
 0x909   :  { %5541 = vmatprep.subr.bf16.mxu0 %v9652_v27  ;;  %3564 = vmatprep.subr.bf16.mxu1 %v9219_v63  ;;  %10832 = vst [vmem:[#allocation105_spill] sm:$0xff] %v9662_v32  ;;  %v9667_v27 = vld [vmem:[#allocation10 + $0x68] ss:$36 sps:$4 sm:$0xff]   ;;  %v9670_v63 = vld [vmem:[#allocation10 + $0x2f0] ss:$36 sps:$4 sm:$0xff]  }
 0x90b   :  { %3329 = vmatmul.mubr.bf16.vlgmr.msra.gmra.mrb[64].mxu0 %v9458_v21  ;;  %3372 = vmatmul.mubr.bf16.vlgmr.msra.gmra.mrb[64].mxu1 %v9458_v21 }
 0x90c   :  { %5542 = vmatpush3.bf16.msra.mxu0 %v9658_v48  ;;  %3414 = vmatprep.mubr.bf16.mxu0 %v9450_v39  ;;  %v9675_v39 = vld [vmem:[#allocation10 + $0xb0] ss:$36 sps:$4 sm:$0xff]  }
 0x90d   :  { %5543 = vmatprep.subr.bf16.mxu0 %v9662_v32  ;;  %3565 = vmatpush1.bf16.msra.mxu1 %v9227_v0  ;;  %v9678_v32 = vld [vmem:[#allocation10 + $0x338] ss:$36 sps:$4 sm:$0xff]  }
 0x90e   :  { %3566 = vmatprep.subr.bf16.mxu1 %v9230_v1  ;;  %v9683_v0 = vld [vmem:[#allocation10 + $0xf8] ss:$36 sps:$4 sm:$0xff]   ;;  %v9686_v1 = vld [vmem:[#allocation10 + $0x380] ss:$36 sps:$4 sm:$0xff]  }
 0x910   :  { %5544 = vmatpush3.bf16.msra.mxu0 %v9667_v27 }
 0x911   :  { %5545 = vmatprep.subr.bf16.mxu0 %v9670_v63  ;;  %3567 = vmatpush1.bf16.msra.mxu1 %v9235_v60  ;;  %v9691_v60 = vld [vmem:[#allocation10 + $0x140] ss:$36 sps:$4 sm:$0xff]  }
 0x912   :  { %3568 = vmatprep.subr.bf16.mxu1 %v9238_v14  ;;  %v9694_v14 = vld [vmem:[#allocation10 + $0x3c8] ss:$36 sps:$4 sm:$0xff]  }
 0x914   :  { %5546 = vmatpush3.bf16.msra.mxu0 %v9675_v39 }
 0x915   :  { %5547 = vmatprep.subr.bf16.mxu0 %v9678_v32  ;;  %3569 = vmatpush1.bf16.msra.mxu1 %v9243_v22  ;;  %v9699_v22 = vld [vmem:[#allocation10 + $0x188] ss:$36 sps:$4 sm:$0xff]  }
 0x916   :  { %3570 = vmatprep.subr.bf16.mxu1 %v9246_v56  ;;  %v9702_v56 = vld [vmem:[#allocation10 + $0x410] ss:$36 sps:$4 sm:$0xff]  }
 0x918   :  { %5548 = vmatpush3.bf16.msra.mxu0 %v9683_v0 }
 0x919   :  { %5549 = vmatprep.subr.bf16.mxu0 %v9686_v1  ;;  %3571 = vmatpush1.bf16.msra.mxu1 %v9251_v30  ;;  %v9707_v30 = vld [vmem:[#allocation10 + $0x1d0] ss:$36 sps:$4 sm:$0xff]  }
 0x91a   :  { %3572 = vmatprep.subr.bf16.mxu1 %v9254_v61  ;;  %v9710_v61 = vld [vmem:[#allocation10 + $0x458] ss:$36 sps:$4 sm:$0xff]  }
 0x91b   :  { %10833 = vst [vmem:[#allocation106_spill] sm:$0xff] %v9710_v61 }
 0x91c   :  { %5550 = vmatpush3.bf16.msra.mxu0 %v9691_v60 }
 0x91d   :  { %5551 = vmatprep.subr.bf16.mxu0 %v9694_v14  ;;  %3573 = vmatpush1.bf16.msra.mxu1 %v9259_v51  ;;  %v9715_v51 = vld [vmem:[#allocation10 + $0x218] ss:$36 sps:$4 sm:$0xff]  }
 0x91e   :  { %3574 = vmatprep.subr.bf16.mxu1 %v9262_v52  ;;  %10834 = vst [vmem:[#allocation107_spill] sm:$0xff] %v9715_v51  ;;  %v6596_v52 = vld [vmem:[#allocation10 + $0xc] ss:$36 sps:$4 sm:$0xff]  }
 0x920   :  { %5552 = vmatpush3.bf16.msra.mxu0 %v9699_v22 }
 0x921   :  { %5553 = vmatprep.subr.bf16.mxu0 %v9702_v56  ;;  %3575 = vmatpush1.bf16.msra.mxu1 %v9267_v3  ;;  %v6597_v3 = vld [vmem:[#allocation10 + $0x8] ss:$36 sps:$4 sm:$0xff]  }
 0x922   :  { %3576 = vmatprep.subr.bf16.mxu1 %v9270_v62  ;;  %v6598_v62 = vld [vmem:[#allocation10 + $0x54] ss:$36 sps:$4 sm:$0xff]  }
 0x924   :  { %5554 = vmatpush3.bf16.msra.mxu0 %v9707_v30 }
 0x925   :  { %5555 = vmatprep.subr.bf16.mxu0 %v9710_v61  ;;  %3577 = vmatpush1.bf16.msra.mxu1 %v9275_v59  ;;  %v6599_v59 = vld [vmem:[#allocation10 + $0x50] ss:$36 sps:$4 sm:$0xff]  }
 0x926   :  { %3578 = vmatprep.subr.bf16.mxu1 %v9278_v25  ;;  %v6600_v25 = vld [vmem:[#allocation10 + $0x9c] ss:$36 sps:$4 sm:$0xff]  }
 0x928   :  { %5556 = vmatpush3.bf16.msra.mxu0 %v9715_v51 }
 0x929   :  { %3607 = vmatprep.subr.bf16.mxu0 %v6596_v52  ;;  %3579 = vmatpush1.bf16.msra.mxu1 %v9283_v46  ;;  %v6601_v46 = vld [vmem:[#allocation10 + $0x98] ss:$36 sps:$4 sm:$0xff]  }
 0x92a   :  { %3580 = vmatprep.subr.bf16.mxu1 %v9286_v43  ;;  %v6602_v43 = vld [vmem:[#allocation10 + $0xe4] ss:$36 sps:$4 sm:$0xff]   ;;  %v10849_v52 = vld [vmem:[#allocation47_spill] sm:$0xff] }
 0x92b   :  { %3415 = vmatmul.mubr.bf16.vlgmr.msra.gmra.mrb[68].mxu0 %v9458_v21  ;;  %v6603_v21 = vld [vmem:[#allocation10 + $0xe0] ss:$36 sps:$4 sm:$0xff]  }
 0x92c   :  { %3608 = vmatpush1.bf16.msra.mxu0 %v6597_v3  ;;  %v10850_v3 = vld [vmem:[#allocation49_spill] sm:$0xff] }
 0x92d   :  { %3609 = vmatprep.subr.bf16.mxu0 %v6598_v62  ;;  %3581 = vmatpush1.bf16.msra.mxu1 %v9292_v44  ;;  %v10835_v44 = vld [vmem:[#allocation34_spill] sm:$0xff] }
 0x92e   :  { %3582 = vmatprep.subr.bf16.mxu1 %v9295_v19  ;;  %v10836_v19 = vld [vmem:[#allocation35_spill] sm:$0xff]  ;;  %v10851_v62 = vld [vmem:[#allocation50_spill] sm:$0xff] }
 0x930   :  { %3610 = vmatpush1.bf16.msra.mxu0 %v6599_v59  ;;  %v10852_v59 = vld [vmem:[#allocation51_spill] sm:$0xff] }
 0x931   :  { %3611 = vmatprep.subr.bf16.mxu0 %v6600_v25  ;;  %3583 = vmatpush1.bf16.msra.mxu1 %v9300_v55  ;;  %v10837_v55 = vld [vmem:[#allocation36_spill] sm:$0xff] }
 0x932   :  { %3584 = vmatprep.subr.bf16.mxu1 %v9303_v29  ;;  %v10838_v29 = vld [vmem:[#allocation37_spill] sm:$0xff]  ;;  %v10853_v25 = vld [vmem:[#allocation52_spill] sm:$0xff] }
 0x934   :  { %3612 = vmatpush1.bf16.msra.mxu0 %v6601_v46  ;;  %v10854_v46 = vld [vmem:[#allocation53_spill] sm:$0xff] }
 0x935   :  { %3613 = vmatprep.subr.bf16.mxu0 %v6602_v43  ;;  %3585 = vmatpush1.bf16.msra.mxu1 %v9308_v47  ;;  %v10839_v47 = vld [vmem:[#allocation38_spill] sm:$0xff] }
 0x936   :  { %3586 = vmatprep.subr.bf16.mxu1 %v9311_v7  ;;  %v10840_v7 = vld [vmem:[#allocation39_spill] sm:$0xff]  ;;  %v10855_v43 = vld [vmem:[#allocation54_spill] sm:$0xff] }
 0x938   :  { %3614 = vmatpush1.bf16.msra.mxu0 %v6603_v21  ;;  %v10856_v21 = vld [vmem:[#allocation55_spill] sm:$0xff] }
 0x939   :  { %3615 = vmatprep.subr.bf16.mxu0 %v9315_v31  ;;  %3587 = vmatpush1.bf16.msra.mxu1 %v9318_v38  ;;  %v10841_v31 = vld [vmem:[#allocation40_spill] sm:$0xff]  ;;  %v10842_v38 = vld [vmem:[#allocation41_spill] sm:$0xff] }
 0x93a   :  { %3588 = vmatprep.subr.bf16.mxu1 %v9321_v57  ;;  %v10843_v57 = vld [vmem:[#allocation42_spill] sm:$0xff] }
 0x93c   :  { %3616 = vmatpush1.bf16.msra.mxu0 %v9324_v5  ;;  %v10844_v5 = vld [vmem:[#allocation43_spill] sm:$0xff] }
 0x93d   :  { %3617 = vmatprep.subr.bf16.mxu0 %v9327_v4  ;;  %3589 = vmatpush1.bf16.msra.mxu1 %v9330_v50  ;;  %v10845_v4 = vld [vmem:[#allocation44_spill] sm:$0xff]  ;;  %v10846_v50 = vld [vmem:[#allocation45_spill] sm:$0xff] }
 0x93e   :  { %3590 = vmatprep.subr.bf16.mxu1 %v9333_v36  ;;  %v10847_v36 = vld [vmem:[#allocation48_spill] sm:$0xff] }
 0x940   :  { %3618 = vmatpush1.bf16.msra.mxu0 %v9336_v34  ;;  %v10848_v34 = vld [vmem:[#allocation46_spill] sm:$0xff] }
 0x941   :  { %3619 = vmatprep.subr.bf16.mxu0 %v10835_v44  ;;  %3591 = vmatpush1.bf16.msra.mxu1 %v10836_v19  ;;  %v10857_v44 = vld [vmem:[#allocation56_spill] sm:$0xff]  ;;  %v10858_v19 = vld [vmem:[#allocation57_spill] sm:$0xff] }
 0x942   :  { %3592 = vmatprep.subr.bf16.mxu1 %v10837_v55  ;;  %v10859_v55 = vld [vmem:[#allocation58_spill] sm:$0xff] }
 0x944   :  { %3620 = vmatpush1.bf16.msra.mxu0 %v10838_v29  ;;  %v10860_v29 = vld [vmem:[#allocation59_spill] sm:$0xff] }
 0x945   :  { %3621 = vmatprep.subr.bf16.mxu0 %v10839_v47  ;;  %3593 = vmatpush1.bf16.msra.mxu1 %v10840_v7  ;;  %v10861_v47 = vld [vmem:[#allocation60_spill] sm:$0xff]  ;;  %v3424_v7 = vld [vmem:[#allocation8 + $0x90] sm:$0xff] }
 0x946   :  { %3594 = vmatprep.subr.bf16.mxu1 %v10841_v31  ;;  %v3426_v31 = vld [vmem:[#allocation8 + $0x9c] sm:$0xff] }
 0x948   :  { %3622 = vmatpush1.bf16.msra.mxu0 %v10842_v38  ;;  %v3428_v38 = vunpack.c.l.bf16 %v3424_v7 }
 0x949   :  { %3623 = vmatprep.subr.bf16.mxu0 %v10843_v57  ;;  %3595 = vmatpush1.bf16.msra.mxu1 %v10844_v5  ;;  %v3431_v57 = vunpack.c.l.bf16 %v3426_v31 }
 0x94a   :  { %3650 = vmatprep.subr.bf16.mxu1 %v10845_v4 }
 0x94c   :  { %3624 = vmatpush1.bf16.msra.mxu0 %v10846_v50  ;;  %v3429_v50 = vunpack.c.h.bf16 %v3424_v7 }
 0x94d   :  { %3625 = vmatprep.subr.bf16.mxu0 %v10847_v36 }
 0x950   :  { %3626 = vmatpush1.bf16.msra.mxu0 %v10848_v34 }
 0x951   :  { %3627 = vmatprep.subr.bf16.mxu0 %v10849_v52 }
 0x954   :  { %3628 = vmatpush1.bf16.msra.mxu0 %v10850_v3 }
 0x955   :  { %3629 = vmatprep.subr.bf16.mxu0 %v10851_v62 }
 0x958   :  { %3630 = vmatpush1.bf16.msra.mxu0 %v10852_v59  ;;  %v3432_v59 = vunpack.c.h.bf16 %v3426_v31 }
 0x959   :  { %3631 = vmatprep.subr.bf16.mxu0 %v10853_v25 }
 0x95c   :  { %3632 = vmatpush1.bf16.msra.mxu0 %v10854_v46 }
 0x95d   :  { %3633 = vmatprep.subr.bf16.mxu0 %v10855_v43 }
 0x960   :  { %3634 = vmatpush1.bf16.msra.mxu0 %v10856_v21 }
 0x961   :  { %3635 = vmatprep.subr.bf16.mxu0 %v10857_v44 }
 0x964   :  { %3636 = vmatpush1.bf16.msra.mxu0 %v10858_v19 }
 0x965   :  { %3637 = vmatprep.subr.bf16.mxu0 %v10859_v55 }
 0x968   :  { %3638 = vmatpush1.bf16.msra.mxu0 %v10860_v29 }
 0x969   :  { %3693 = vmatprep.subr.bf16.mxu0 %v10861_v47 }
 0x99e   :  { %v3244_v5 = vpop.f32.mrb[60].mxu0  ;;  %v3287_v4 = vpop.f32.mrb[60].mxu1 }
 0x99f   :  { %v3434_v36 = vadd.f32 %v3428_v38, %v3244_v5  ;;  %v3246_v34 = vpop.f32.mrb[61].mxu0  ;;  %v3289_v52 = vpop.f32.mrb[61].mxu1 }
 0x9a0   :  { %v3248_v3 = vpop.f32.mrb[62].mxu0  ;;  %v3291_v62 = vpop.f32.mrb[62].mxu1  ;;  %v3435_v44 = vadd.f32 %v3429_v50, %v3246_v34  ;;  %v3462_v50 = vadd.f32 %v10381_v53, %v3287_v4 }
 0x9a1   :  { %v5255_v25 = vmul.f32 -1.442695, %v3434_v36  ;;  %v3436_v46 = vadd.f32 %v3431_v57, %v3248_v3  ;;  %v3250_v43 = vpop.f32.mrb[63].mxu0  ;;  %v3293_v21 = vpop.f32.mrb[63].mxu1  ;;  %v3425_v57 = vld [vmem:[#allocation8 + $0x98] ss:$12 sps:$4 sm:$0xff]  }
 0x9a2   :  { %v3437_v55 = vadd.f32 %v3432_v59, %v3250_v43  ;;  %v5256_v29 = vmul.f32 -1.442695, %v3435_v44  ;;  %v3430_v61 = vunpack.c.l.bf16 %v3425_v57  ;;  %v3463_v43 = vadd.f32 %v10381_v53, %v3291_v62 }
 0x9a3   :  { %6082 = vpow2.f32 %v5255_v25  ;;  %v5257_v19 = vmul.f32 -1.442695, %v3436_v46  ;;  %v3433_v46 = vunpack.c.h.bf16 %v3425_v57 }
 0x9a4   :  { %v5258_v47 = vmul.f32 -1.442695, %v3437_v55 }
 0x9a5   :  { %6084 = vpow2.f32 %v5257_v19 }
 0x9a6   :  { %6086 = vpow2.f32 %v5256_v29 }
 0x9a7   :  { %6088 = vpow2.f32 %v5258_v47 }
 0x9ad   :  { %v6083_v7 = vpop.eup %6082 }
 0x9ae   :  { %v3450_v38 = vadd.f32 1.0, %v6083_v7 }
 0x9af   :  { %v6085_v5 = vpop.eup %6084 }
 0x9b0   :  { %6090 = vrcp.f32 %v3450_v38  ;;  %v3452_v51 = vadd.f32 1.0, %v6085_v5  ;;  %v6087_v31 = vpop.eup %6086 }
 0x9b1   :  { %v6089_v36 = vpop.eup %6088  ;;  %v3451_v3 = vadd.f32 1.0, %v6087_v31 }
 0x9b2   :  { %6092 = vrcp.f32 %v3452_v51  ;;  %v3453_v34 = vadd.f32 1.0, %v6089_v36 }
 0x9b3   :  { %6094 = vrcp.f32 %v3451_v3 }
 0x9b4   :  { %6096 = vrcp.f32 %v3453_v34 }
 0x9ba   :  { %v6091_v59 = vpop.eup %6090 }
 0x9bb   :  { %v3464_v25 = vmul.f32 %v6091_v59, %v3462_v50  ;;  %v3499_v50 = vadd.f32 %v3289_v52, %v10624_v10 }
 0x9bc   :  { %v6093_v44 = vpop.eup %6092 }
 0x9bd   :  { %v3466_v19 = vadd.f32 %v3464_v25, %v3430_v61  ;;  %v3465_v55 = vmul.f32 %v6093_v44, %v3463_v43  ;;  %v6095_v29 = vpop.eup %6094  ;;  %v3502_v25 = vadd.f32 %v3293_v21, %v10624_v10 }
 0x9be   :  { %v6097_v47 = vpop.eup %6096  ;;  %v3473_v7 = vsub.f32 1.0, %v6095_v29  ;;  %v3477_v4 = vmul.f32 %v6095_v29, %v9454_v23 }
 0x9bf   :  { %6098 = vtanh.f32 %v3466_v19  ;;  %v3467_v51 = vadd.f32 %v3465_v55, %v3433_v46  ;;  %v3474_v31 = vsub.f32 1.0, %v6097_v47  ;;  %v3478_v62 = vmul.f32 %v6097_v47, %v9440_v17 }
 0x9c1   :  { %6100 = vtanh.f32 %v3467_v51 }
 0x9c9   :  { %v6099_v38 = vpop.eup %6098 }
 0x9ca   :  { %v3475_v5 = vmul.f32 %v6099_v38, %v3473_v7 }
 0x9cb   :  { %v6101_v36 = vpop.eup %6100 }
 0x9cc   :  { %v9765_v3 = vadd.f32 %v3477_v4, %v3475_v5  ;;  %v3476_v57 = vmul.f32 %v6101_v36, %v3474_v31 }
 0x9ce   :  { %v9768_v61 = vadd.f32 %v3478_v62, %v3476_v57 }
 0x9de   :  { %v3330_v34 = vpop.f32.mrb[64].mxu0  ;;  %v3373_v59 = vpop.f32.mrb[64].mxu1 }
 0x9df   :  { %v3500_v46 = vadd.f32 %v3330_v34, %v10544_v18  ;;  %v3505_v43 = vadd.f32 %v3499_v50, %v3373_v59  ;;  %v3332_v44 = vpop.f32.mrb[65].mxu0  ;;  %v3375_v19 = vpop.f32.mrb[65].mxu1 }
 0x9e0   :  { %v3334_v55 = vpop.f32.mrb[66].mxu0  ;;  %v3377_v51 = vpop.f32.mrb[66].mxu1 }
 0x9e1   :  { %v3506_v29 = vadd.f32 %v3500_v46, %v3375_v19  ;;  %v3503_v7 = vadd.f32 %v3334_v55, %v10544_v18  ;;  %v3507_v38 = vadd.f32 %v3502_v25, %v3377_v51  ;;  %v3336_v47 = vpop.f32.mrb[67].mxu0  ;;  %v3379_v5 = vpop.f32.mrb[67].mxu1  ;;  %v5261_v31 = vmul.f32 -1.442695, %v3505_v43 }
 0x9e3   :  { %v3508_v4 = vadd.f32 %v3503_v7, %v3379_v5  ;;  %v5263_v52 = vmul.f32 -1.442695, %v3507_v38  ;;  %6102 = vpow2.f32 %v5261_v31  ;;  %v5262_v36 = vmul.f32 -1.442695, %v3506_v29 }
 0x9e4   :  { %v3501_v31 = vadd.f32 %v3332_v44, %v10387_v8 }
 0x9e5   :  { %6104 = vpow2.f32 %v5263_v52  ;;  %v5264_v21 = vmul.f32 -1.442695, %v3508_v4 }
 0x9e6   :  { %6106 = vpow2.f32 %v5262_v36 }
 0x9e7   :  { %6108 = vpow2.f32 %v5264_v21 }
 0x9ed   :  { %v6103_v57 = vpop.eup %6102 }
 0x9ee   :  { %v3521_v50 = vadd.f32 1.0, %v6103_v57  ;;  %v3504_v57 = vadd.f32 %v3336_v47, %v10387_v8 }
 0x9ef   :  { %v6105_v62 = vpop.eup %6104 }
 0x9f0   :  { %v3523_v34 = vadd.f32 1.0, %v6105_v62  ;;  %6110 = vrcp.f32 %v3521_v50  ;;  %v6107_v59 = vpop.eup %6106 }
 0x9f1   :  { %v6109_v25 = vpop.eup %6108  ;;  %v3522_v55 = vadd.f32 1.0, %v6107_v59 }
 0x9f2   :  { %6112 = vrcp.f32 %v3523_v34  ;;  %v3524_v38 = vadd.f32 1.0, %v6109_v25  ;;  %v3556_v25 = vpop.permute.xlu0 %3555 }
 0x9f3   :  { %6114 = vrcp.f32 %v3522_v55  ;;  %vm3558_vm9 = vcmp.eq.s32.totalorder %v3556_v25, 1  ;;  %v10886_v25 = vld [vmem:[#allocation85_spill] sm:$0xff] }
 0x9f4   :  { %6116 = vrcp.f32 %v3524_v38 }
 0x9fa   :  { %v6111_v4 = vpop.eup %6110 }
 0x9fc   :  { %v6113_v21 = vpop.eup %6112 }
 0x9fd   :  { %v6115_v59 = vpop.eup %6114 }
 0x9fe   :  { %v5557_v46 = vpop.f32.mrb[68].mxu0  ;;  %v3545_v44 = vmul.f32 %v6115_v59, %v9443_v28 }
 0x9ff   :  { %v5558_v19 = vpop.f32.mrb[69].mxu0 }
 0xa00   :  { %v5559_v51 = vadd.f32 %v5558_v19, %v5557_v46  ;;  %v5560_v43 = vpop.f32.mrb[70].mxu0  ;;  %v6117_v46 = vpop.eup %6116  ;;  %v3541_v19 = vsub.f32 1.0, %v6115_v59  ;;  %v10884_v59 = vld [vmem:[#allocation83_spill] sm:$0xff] }
 0xa01   :  { %v5561_v7 = vpop.f32.mrb[71].mxu0  ;;  %v3542_v55 = vsub.f32 1.0, %v6117_v46 }
 0xa02   :  { %v3533_v29 = vadd.f32 %v5559_v51, %v10465_v2  ;;  %v5562_v5 = vadd.f32 %v5561_v7, %v5560_v43  ;;  %v3553_v43 = vpop.permute.xlu1 %3552 }
 0xa03   :  { %vm3557_vm10 = vcmp.eq.s32.totalorder %v3553_v43, 1  ;;  %v10889_v43 = vld [vmem:[#allocation88_spill] sm:$0xff] }
 0xa04   :  { %v3535_v52 = vmul.f32 %v6111_v4, %v3533_v29  ;;  %v3534_v36 = vadd.f32 %v5562_v5, %v10465_v2  ;;  %v3546_v5 = vmul.f32 %v6117_v46, %v9446_v24  ;;  %v3488_v4 = vpop.permute.xlu0 %3487  ;;  %v10885_v46 = vld [vmem:[#allocation84_spill] sm:$0xff] }
 0xa05   :  { %vm3490_vm8 = vcmp.eq.s32.totalorder %v3488_v4, 1  ;;  %v10897_v4 = vld [vmem:[#allocation96_spill] sm:$0xff] }
 0xa06   :  { %v3537_v62 = vadd.f32 %v3535_v52, %v3501_v31  ;;  %v3536_v50 = vmul.f32 %v6113_v21, %v3534_v36  ;;  %v3485_v52 = vpop.permute.xlu1 %3484  ;;  %v9782_v36 = vsel %vm3490_vm8, %v9768_v61, %v9440_v17  ;;  %v10862_v17 = vld [vmem:[#allocation61_spill] sm:$0xff]  ;;  %v10883_v61 = vld [vmem:[#allocation82_spill] sm:$0xff] }
 0xa07   :  { %vm3489_vm11 = vcmp.eq.s32.totalorder %v3485_v52, 1  ;;  %v10899_v52 = vld [vmem:[#allocation98_spill] sm:$0xff] }
 0xa08   :  { %6118 = vtanh.f32 %v3537_v62  ;;  %v3538_v34 = vadd.f32 %v3536_v50, %v3504_v57  ;;  %v9796_v50 = vsel %vm3489_vm11, %v9765_v3, %v9454_v23  ;;  %v10865_v23 = vld [vmem:[#allocation64_spill] sm:$0xff]  ;;  %v10882_v3 = vld [vmem:[#allocation81_spill] sm:$0xff] }
 0xa0a   :  { %6120 = vtanh.f32 %v3538_v34  ;;  %v9800_v34 = vpack.c.bf16 %v9782_v36, %v9796_v50 }
 0xa12   :  { %v6119_v51 = vpop.eup %6118 }
 0xa13   :  { %v3543_v7 = vmul.f32 %v6119_v51, %v3541_v19  ;;  %v10887_v19 = vld [vmem:[#allocation86_spill] sm:$0xff]  ;;  %v10888_v51 = vld [vmem:[#allocation87_spill] sm:$0xff] }
 0xa14   :  { %v6121_v29 = vpop.eup %6120 }
 0xa15   :  { %v3547_v47 = vadd.f32 %v3545_v44, %v3543_v7  ;;  %v3544_v38 = vmul.f32 %v6121_v29, %v3542_v55  ;;  %v10890_v44 = vld [vmem:[#allocation89_spill] sm:$0xff]  ;;  %v10891_v55 = vld [vmem:[#allocation90_spill] sm:$0xff]  ;;  %v10892_v7 = vld [vmem:[#allocation91_spill] sm:$0xff] }
 0xa16   :  { %v10893_v29 = vld [vmem:[#allocation92_spill] sm:$0xff] }
 0xa17   :  { %v3548_v31 = vadd.f32 %v3546_v5, %v3544_v38  ;;  %v9785_v21 = vsel %vm3557_vm10, %v3547_v47, %v9443_v28  ;;  %v10863_v28 = vld [vmem:[#allocation62_spill] sm:$0xff]  ;;  %v10894_v5 = vld [vmem:[#allocation93_spill] sm:$0xff]  ;;  %v10896_v38 = vld [vmem:[#allocation95_spill] sm:$0xff] }
 0xa18   :  { %v10895_v47 = vld [vmem:[#allocation94_spill] sm:$0xff] }
 0xa19   :  { %v9788_v57 = vsel %vm3558_vm9, %v3548_v31, %v9446_v24  ;;  %v10864_v24 = vld [vmem:[#allocation63_spill] sm:$0xff]  ;;  %v10898_v31 = vld [vmem:[#allocation97_spill] sm:$0xff] }
 0xa1a   :  { %v9792_v62 = vpack.c.bf16 %v9788_v57, %v9785_v21 }
 0xa1c   :  { %3596 = vmatprep.mubr.bf16.mxu1 %v9792_v62  ;;  %3639 = vmatprep.mubr.bf16.mxu0 %v9792_v62 }
 0xa1d   :  { %3597 = vmatmul.mubr.bf16.vlgmr.msra.gmra.mrb[68].mxu1 %v9800_v34  ;;  %3640 = vmatmul.mubr.bf16.vlgmr.msra.gmra.mrb[72].mxu0 %v9800_v34 }
 0xa1e   :  { %3651 = vmatpush1.bf16.msra.mxu1 %v9464_v41  ;;  %3694 = vmatpush1.bf16.msra.mxu0 %v9467_v11  ;;  %v10866_v41 = vld [vmem:[#allocation65_spill] sm:$0xff]  ;;  %v10867_v11 = vld [vmem:[#allocation66_spill] sm:$0xff] }
 0xa1f   :  { %3682 = vmatprep.mubr.bf16.mxu1 %v9792_v62  ;;  %3725 = vmatprep.mubr.bf16.mxu0 %v9792_v62 }
 0xa20   :  { %3652 = vmatprep.subr.bf16.mxu1 %v9472_v58  ;;  %3695 = vmatprep.subr.bf16.mxu0 %v9475_v16  ;;  %v10868_v58 = vld [vmem:[#allocation67_spill] sm:$0xff]  ;;  %v10869_v16 = vld [vmem:[#allocation68_spill] sm:$0xff] }
 0xa22   :  { %3653 = vmatpush1.bf16.msra.mxu1 %v9478_v54  ;;  %3696 = vmatpush1.bf16.msra.mxu0 %v9481_v9  ;;  %v10870_v54 = vld [vmem:[#allocation69_spill] sm:$0xff]  ;;  %v10871_v9 = vld [vmem:[#allocation70_spill] sm:$0xff] }
 0xa23   :  { %3654 = vmatprep.subr.bf16.mxu1 %v9484_v40  ;;  %3697 = vmatprep.subr.bf16.mxu0 %v9487_v42  ;;  %v10872_v40 = vld [vmem:[#allocation71_spill] sm:$0xff]  ;;  %v10873_v42 = vld [vmem:[#allocation72_spill] sm:$0xff] }
 0xa26   :  { %3655 = vmatpush1.bf16.msra.mxu1 %v9490_v13  ;;  %3698 = vmatpush1.bf16.msra.mxu0 %v9493_v15  ;;  %v10874_v13 = vld [vmem:[#allocation73_spill] sm:$0xff]  ;;  %v10875_v15 = vld [vmem:[#allocation74_spill] sm:$0xff] }
 0xa27   :  { %3656 = vmatprep.subr.bf16.mxu1 %v9496_v45  ;;  %3699 = vmatprep.subr.bf16.mxu0 %v9499_v37  ;;  %v10876_v45 = vld [vmem:[#allocation75_spill] sm:$0xff]  ;;  %v10877_v37 = vld [vmem:[#allocation76_spill] sm:$0xff] }
 0xa2a   :  { %3657 = vmatpush1.bf16.msra.mxu1 %v9502_v33  ;;  %3700 = vmatpush1.bf16.msra.mxu0 %v9505_v20  ;;  %v10878_v33 = vld [vmem:[#allocation77_spill] sm:$0xff]  ;;  %v10879_v20 = vld [vmem:[#allocation78_spill] sm:$0xff] }
 0xa2b   :  { %3658 = vmatprep.subr.bf16.mxu1 %v9508_v12  ;;  %3701 = vmatprep.subr.bf16.mxu0 %v9511_v49  ;;  %v10880_v12 = vld [vmem:[#allocation79_spill] sm:$0xff]  ;;  %v10881_v49 = vld [vmem:[#allocation80_spill] sm:$0xff] }
 0xa2e   :  { %3659 = vmatpush1.bf16.msra.mxu1 %v10862_v17  ;;  %3702 = vmatpush1.bf16.msra.mxu0 %v10863_v28  ;;  %v10900_v17 = vld [vmem:[#allocation99_spill] sm:$0xff]  ;;  %v10901_v28 = vld [vmem:[#allocation100_spill] sm:$0xff] }
 0xa2f   :  { %3660 = vmatprep.subr.bf16.mxu1 %v10864_v24  ;;  %3703 = vmatprep.subr.bf16.mxu0 %v10865_v23  ;;  %v10902_v24 = vld [vmem:[#allocation101_spill] sm:$0xff]  ;;  %v10903_v23 = vld [vmem:[#allocation102_spill] sm:$0xff] }
 0xa32   :  { %3661 = vmatpush1.bf16.msra.mxu1 %v10866_v41  ;;  %3704 = vmatpush1.bf16.msra.mxu0 %v10867_v11  ;;  %v10904_v41 = vld [vmem:[#allocation103_spill] sm:$0xff]  ;;  %v10905_v11 = vld [vmem:[#allocation104_spill] sm:$0xff] }
 0xa33   :  { %3662 = vmatprep.subr.bf16.mxu1 %v10868_v58  ;;  %3705 = vmatprep.subr.bf16.mxu0 %v10869_v16  ;;  %v10906_v58 = vld [vmem:[#allocation105_spill] sm:$0xff] }
 0xa36   :  { %3663 = vmatpush1.bf16.msra.mxu1 %v10870_v54  ;;  %3706 = vmatpush1.bf16.msra.mxu0 %v10871_v9 }
 0xa37   :  { %3664 = vmatprep.subr.bf16.mxu1 %v10872_v40  ;;  %3707 = vmatprep.subr.bf16.mxu0 %v10873_v42 }
 0xa3a   :  { %3665 = vmatpush1.bf16.msra.mxu1 %v10874_v13  ;;  %3708 = vmatpush1.bf16.msra.mxu0 %v10875_v15 }
 0xa3b   :  { %3666 = vmatprep.subr.bf16.mxu1 %v10876_v45  ;;  %3709 = vmatprep.subr.bf16.mxu0 %v10877_v37 }
 0xa3e   :  { %3667 = vmatpush1.bf16.msra.mxu1 %v10878_v33  ;;  %3710 = vmatpush1.bf16.msra.mxu0 %v10879_v20 }
 0xa3f   :  { %3668 = vmatprep.subr.bf16.mxu1 %v10880_v12  ;;  %3711 = vmatprep.subr.bf16.mxu0 %v10881_v49 }
 0xa42   :  { %3669 = vmatpush1.bf16.msra.mxu1 %v10882_v3  ;;  %3712 = vmatpush1.bf16.msra.mxu0 %v10883_v61  ;;  %v3779_v3 = vld [vmem:[#allocation8 + $0xb0] ss:$12 sps:$4 sm:$0xff]  }
 0xa43   :  { %3670 = vmatprep.subr.bf16.mxu1 %v10884_v59  ;;  %3713 = vmatprep.subr.bf16.mxu0 %v10885_v46  ;;  %v3784_v59 = vunpack.c.l.bf16 %v3779_v3 }
 0xa46   :  { %3671 = vmatpush1.bf16.msra.mxu1 %v10886_v25  ;;  %3714 = vmatpush1.bf16.msra.mxu0 %v10887_v19 }
 0xa47   :  { %3672 = vmatprep.subr.bf16.mxu1 %v10888_v51  ;;  %3715 = vmatprep.subr.bf16.mxu0 %v10889_v43  ;;  %v3787_v43 = vunpack.c.h.bf16 %v3779_v3 }
 0xa4a   :  { %3673 = vmatpush1.bf16.msra.mxu1 %v10890_v44  ;;  %3716 = vmatpush1.bf16.msra.mxu0 %v10891_v55 }
 0xa4b   :  { %3674 = vmatprep.subr.bf16.mxu1 %v10892_v7  ;;  %3717 = vmatprep.subr.bf16.mxu0 %v10893_v29 }
 0xa4e   :  { %3675 = vmatpush1.bf16.msra.mxu1 %v10894_v5  ;;  %3718 = vmatpush1.bf16.msra.mxu0 %v10895_v47 }
 0xa4f   :  { %3676 = vmatprep.subr.bf16.mxu1 %v10896_v38  ;;  %3719 = vmatprep.subr.bf16.mxu0 %v10897_v4 }
 0xa52   :  { %3677 = vmatpush1.bf16.msra.mxu1 %v10898_v31  ;;  %3720 = vmatpush1.bf16.msra.mxu0 %v10899_v52 }
 0xa53   :  { %3678 = vmatprep.subr.bf16.mxu1 %v10900_v17  ;;  %3721 = vmatprep.subr.bf16.mxu0 %v10901_v28 }
 0xa56   :  { %3679 = vmatpush1.bf16.msra.mxu1 %v10902_v24  ;;  %3722 = vmatpush1.bf16.msra.mxu0 %v9637_v26 }
 0xa57   :  { %3680 = vmatprep.subr.bf16.mxu1 %v10903_v23  ;;  %3723 = vmatprep.subr.bf16.mxu0 %v9643_v6  ;;  %v10908_v6 = vld [vmem:[#allocation107_spill] sm:$0xff]  ;;  %v3839_v23 = vpop.permute.xlu1 %3838 }
 0xa58   :  { %vm3843_vm12 = vcmp.eq.s32.totalorder %v3839_v23, 1 }
 0xa5a   :  { %3681 = vmatpush1.bf16.msra.mxu1 %v10904_v41  ;;  %3724 = vmatpush1.bf16.msra.mxu0 %v9649_v35  ;;  %v3780_v35 = vld [vmem:[#allocation8 + $0xb4] sm:$0xff] }
 0xa5b   :  { %5563 = vmatprep.subr.bf16.mxu1 %v10905_v11  ;;  %v3785_v26 = vunpack.c.l.bf16 %v3780_v35 }
 0xa5d   :  { %3683 = vmatmul.mubr.bf16.vlgmr.msra.gmra.mrb[72].mxu1 %v9800_v34  ;;  %3726 = vmatmul.mubr.bf16.vlgmr.msra.gmra.mrb[76].mxu0 %v9800_v34 }
 0xa5e   :  { %5564 = vmatpush3.bf16.msra.mxu1 %v9658_v48  ;;  %3768 = vmatprep.mubr.bf16.mxu1 %v9792_v62  ;;  %v10907_v48 = vld [vmem:[#allocation106_spill] sm:$0xff]  ;;  %v3786_v62 = vunpack.c.h.bf16 %v3780_v35 }
 0xa5f   :  { %5565 = vmatprep.subr.bf16.mxu1 %v10906_v58  ;;  %v3842_v58 = vpop.permute.xlu0 %3841 }
 0xa60   :  { %vm3844_vm13 = vcmp.eq.s32.totalorder %v3842_v58, 1 }
 0xa62   :  { %5566 = vmatpush3.bf16.msra.mxu1 %v9667_v27 }
 0xa63   :  { %5567 = vmatprep.subr.bf16.mxu1 %v9670_v63 }
 0xa66   :  { %5568 = vmatpush3.bf16.msra.mxu1 %v9675_v39 }
 0xa67   :  { %5569 = vmatprep.subr.bf16.mxu1 %v9678_v32  ;;  %v3778_v32 = vld [vmem:[#allocation8 + $0xa8] sm:$0xff] }
 0xa68   :  { %v3782_v27 = vunpack.c.l.bf16 %v3778_v32 }
 0xa6a   :  { %5570 = vmatpush3.bf16.msra.mxu1 %v9683_v0  ;;  %v3783_v0 = vunpack.c.h.bf16 %v3778_v32 }
 0xa6b   :  { %5571 = vmatprep.subr.bf16.mxu1 %v9686_v1 }
 0xa6e   :  { %5572 = vmatpush3.bf16.msra.mxu1 %v9691_v60 }
 0xa6f   :  { %5573 = vmatprep.subr.bf16.mxu1 %v9694_v14 }
 0xa72   :  { %5574 = vmatpush3.bf16.msra.mxu1 %v9699_v22 }
 0xa73   :  { %5575 = vmatprep.subr.bf16.mxu1 %v9702_v56 }
 0xa76   :  { %5576 = vmatpush3.bf16.msra.mxu1 %v9707_v30 }
 0xa77   :  { %5577 = vmatprep.subr.bf16.mxu1 %v10907_v48 }
 0xa7a   :  { %5578 = vmatpush3.bf16.msra.mxu1 %v10908_v6 }
 0xa7d   :  { %3769 = vmatmul.mubr.bf16.vlgmr.msra.gmra.mrb[76].mxu1 %v9800_v34 }
 0xaf0   :  { %v3598_v63 = vpop.f32.mrb[68].mxu1  ;;  %v3641_v39 = vpop.f32.mrb[72].mxu0 }
 0xaf1   :  { %v3788_v1 = vadd.f32 %v3782_v27, %v3598_v63  ;;  %v3600_v60 = vpop.f32.mrb[69].mxu1  ;;  %v3643_v14 = vpop.f32.mrb[73].mxu0  ;;  %v3816_v46 = vadd.f32 %v10381_v53, %v3641_v39 }
 0xaf2   :  { %v3602_v22 = vpop.f32.mrb[70].mxu1  ;;  %v3645_v56 = vpop.f32.mrb[74].mxu0  ;;  %v3789_v40 = vadd.f32 %v3783_v0, %v3600_v60  ;;  %v3853_v35 = vadd.f32 %v3643_v14, %v10624_v10 }
 0xaf3   :  { %v5265_v30 = vmul.f32 -1.442695, %v3788_v1  ;;  %v3790_v16 = vadd.f32 %v3785_v26, %v3602_v22  ;;  %v3604_v54 = vpop.f32.mrb[71].mxu1  ;;  %v3647_v9 = vpop.f32.mrb[75].mxu0  ;;  %v3817_v44 = vadd.f32 %v10381_v53, %v3645_v56 }
 0xaf4   :  { %v3791_v42 = vadd.f32 %v3786_v62, %v3604_v54  ;;  %v5266_v13 = vmul.f32 -1.442695, %v3789_v40  ;;  %v3856_v63 = vadd.f32 %v3647_v9, %v10624_v10 }
 0xaf5   :  { %6122 = vpow2.f32 %v5265_v30  ;;  %v5267_v34 = vmul.f32 -1.442695, %v3790_v16 }
 0xaf6   :  { %v5268_v15 = vmul.f32 -1.442695, %v3791_v42 }
 0xaf7   :  { %6124 = vpow2.f32 %v5267_v34 }
 0xaf8   :  { %6126 = vpow2.f32 %v5266_v13 }
 0xaf9   :  { %6128 = vpow2.f32 %v5268_v15 }
 0xaff   :  { %v6123_v45 = vpop.eup %6122 }
 0xb00   :  { %v3804_v37 = vadd.f32 1.0, %v6123_v45 }
 0xb01   :  { %v6125_v33 = vpop.eup %6124 }
 0xb02   :  { %6130 = vrcp.f32 %v3804_v37  ;;  %v3806_v20 = vadd.f32 1.0, %v6125_v33  ;;  %v6127_v12 = vpop.eup %6126 }
 0xb03   :  { %v6129_v49 = vpop.eup %6128  ;;  %v3805_v61 = vadd.f32 1.0, %v6127_v12 }
 0xb04   :  { %6132 = vrcp.f32 %v3806_v20  ;;  %v3807_v25 = vadd.f32 1.0, %v6129_v49 }
 0xb05   :  { %6134 = vrcp.f32 %v3805_v61 }
 0xb06   :  { %6136 = vrcp.f32 %v3807_v25 }
 0xb0c   :  { %v6131_v19 = vpop.eup %6130 }
 0xb0d   :  { %v3818_v51 = vmul.f32 %v6131_v19, %v3816_v46 }
 0xb0e   :  { %v6133_v55 = vpop.eup %6132 }
 0xb0f   :  { %v3820_v7 = vadd.f32 %v3818_v51, %v3784_v59  ;;  %v3819_v29 = vmul.f32 %v6133_v55, %v3817_v44  ;;  %v6135_v47 = vpop.eup %6134 }
 0xb10   :  { %v6137_v38 = vpop.eup %6136  ;;  %v3827_v4 = vsub.f32 1.0, %v6135_v47  ;;  %v3831_v17 = vmul.f32 %v6135_v47, %v9796_v50 }
 0xb11   :  { %6138 = vtanh.f32 %v3820_v7  ;;  %v3821_v5 = vadd.f32 %v3819_v29, %v3787_v43  ;;  %v3828_v28 = vsub.f32 1.0, %v6137_v38  ;;  %v3832_v53 = vmul.f32 %v6137_v38, %v9782_v36 }
 0xb13   :  { %6140 = vtanh.f32 %v3821_v5 }
 0xb1b   :  { %v6139_v31 = vpop.eup %6138 }
 0xb1c   :  { %v3829_v52 = vmul.f32 %v6139_v31, %v3827_v4 }
 0xb1d   :  { %v6141_v24 = vpop.eup %6140 }
 0xb1e   :  { %v3833_v41 = vadd.f32 %v3831_v17, %v3829_v52  ;;  %v3830_v11 = vmul.f32 %v6141_v24, %v3828_v28  ;;  %v3907_v52 = vpop.permute.xlu1 %3906 }
 0xb1f   :  { %vm3911_vm14 = vcmp.eq.s32.totalorder %v3907_v52, 1 }
 0xb20   :  { %v3845_v48 = vsel %vm3843_vm12, %v3833_v41, %v9796_v50  ;;  %v3834_v6 = vadd.f32 %v3832_v53, %v3830_v11 }
 0xb21   :  { %3915 = vst [vmem:[#allocation2] sm:$0xff] %v3845_v48 }
 0xb22   :  { %v3846_v32 = vsel %vm3844_vm13, %v3834_v6, %v9782_v36 }
 0xb23   :  { %3917 = vst [vmem:[#allocation2 + $0x10] sm:$0xff] %v3846_v32 }
 0xb30   :  { %v3684_v27 = vpop.f32.mrb[72].mxu1  ;;  %v3727_v26 = vpop.f32.mrb[76].mxu0 }
 0xb31   :  { %v3854_v39 = vadd.f32 %v3684_v27, %v10544_v18  ;;  %v3859_v0 = vadd.f32 %v3853_v35, %v3727_v26  ;;  %v3686_v1 = vpop.f32.mrb[73].mxu1  ;;  %v3729_v60 = vpop.f32.mrb[77].mxu0 }
 0xb32   :  { %v3688_v22 = vpop.f32.mrb[74].mxu1  ;;  %v3731_v56 = vpop.f32.mrb[78].mxu0  ;;  %v3855_v19 = vadd.f32 %v3686_v1, %v10387_v8 }
 0xb33   :  { %v3860_v50 = vadd.f32 %v3854_v39, %v3729_v60  ;;  %v3857_v62 = vadd.f32 %v3688_v22, %v10544_v18  ;;  %v3861_v30 = vadd.f32 %v3856_v63, %v3731_v56  ;;  %v3690_v16 = vpop.f32.mrb[75].mxu1  ;;  %v3733_v36 = vpop.f32.mrb[79].mxu0  ;;  %v5271_v40 = vmul.f32 -1.442695, %v3859_v0 }
 0xb34   :  { %v3858_v55 = vadd.f32 %v3690_v16, %v10387_v8 }
 0xb35   :  { %v3862_v54 = vadd.f32 %v3857_v62, %v3733_v36  ;;  %v5273_v14 = vmul.f32 -1.442695, %v3861_v30  ;;  %6142 = vpow2.f32 %v5271_v40  ;;  %v5272_v34 = vmul.f32 -1.442695, %v3860_v50 }
 0xb37   :  { %6144 = vpow2.f32 %v5273_v14  ;;  %v5274_v10 = vmul.f32 -1.442695, %v3862_v54 }
 0xb38   :  { %6146 = vpow2.f32 %v5272_v34 }
 0xb39   :  { %6148 = vpow2.f32 %v5274_v10 }
 0xb3f   :  { %v6143_v9 = vpop.eup %6142 }
 0xb40   :  { %v3875_v13 = vadd.f32 1.0, %v6143_v9 }
 0xb41   :  { %v6145_v42 = vpop.eup %6144 }
 0xb42   :  { %v3877_v15 = vadd.f32 1.0, %v6145_v42  ;;  %6150 = vrcp.f32 %v3875_v13  ;;  %v6147_v45 = vpop.eup %6146 }
 0xb43   :  { %v6149_v37 = vpop.eup %6148  ;;  %v3876_v20 = vadd.f32 1.0, %v6147_v45 }
 0xb44   :  { %6152 = vrcp.f32 %v3877_v15  ;;  %v3878_v61 = vadd.f32 1.0, %v6149_v37 }
 0xb45   :  { %6154 = vrcp.f32 %v3876_v20 }
 0xb46   :  { %6156 = vrcp.f32 %v3878_v61 }
 0xb4c   :  { %v6151_v25 = vpop.eup %6150 }
 0xb4e   :  { %v6153_v44 = vpop.eup %6152 }
 0xb4f   :  { %v6155_v47 = vpop.eup %6154 }
 0xb50   :  { %v5579_v18 = vpop.f32.mrb[76].mxu1  ;;  %v6157_v38 = vpop.eup %6156  ;;  %v3895_v4 = vsub.f32 1.0, %v6155_v47  ;;  %v3899_v17 = vmul.f32 %v6155_v47, %v9785_v21 }
 0xb51   :  { %v5580_v33 = vpop.f32.mrb[77].mxu1  ;;  %v3896_v28 = vsub.f32 1.0, %v6157_v38  ;;  %v3900_v41 = vmul.f32 %v6157_v38, %v9788_v57 }
 0xb52   :  { %v5581_v12 = vadd.f32 %v5580_v33, %v5579_v18  ;;  %v5582_v49 = vpop.f32.mrb[78].mxu1 }
 0xb53   :  { %v5583_v3 = vpop.f32.mrb[79].mxu1 }
 0xb54   :  { %v3887_v59 = vadd.f32 %v5581_v12, %v10465_v2  ;;  %v5584_v46 = vadd.f32 %v5583_v3, %v5582_v49 }
 0xb56   :  { %v3889_v51 = vmul.f32 %v6151_v25, %v3887_v59  ;;  %v3888_v43 = vadd.f32 %v5584_v46, %v10465_v2  ;;  %v3910_v2 = vpop.permute.xlu0 %3909 }
 0xb57   :  { %vm3912_vm15 = vcmp.eq.s32.totalorder %v3910_v2, 1 }
 0xb58   :  { %v3891_v7 = vadd.f32 %v3889_v51, %v3855_v19  ;;  %v3890_v29 = vmul.f32 %v6153_v44, %v3888_v43 }
 0xb5a   :  { %6158 = vtanh.f32 %v3891_v7  ;;  %v3892_v5 = vadd.f32 %v3890_v29, %v3858_v55 }
 0xb5c   :  { %6160 = vtanh.f32 %v3892_v5 }
 0xb64   :  { %v6159_v31 = vpop.eup %6158 }
 0xb65   :  { %v3897_v24 = vmul.f32 %v6159_v31, %v3895_v4 }
 0xb66   :  { %v6161_v23 = vpop.eup %6160 }
 0xb67   :  { %v3901_v8 = vadd.f32 %v3899_v17, %v3897_v24  ;;  %v3898_v11 = vmul.f32 %v6161_v23, %v3896_v28 }
 0xb69   :  { %v3913_v53 = vsel %vm3911_vm14, %v3901_v8, %v9785_v21  ;;  %v3902_v58 = vadd.f32 %v3900_v41, %v3898_v11 }
 0xb6a   :  { %3916 = vst [vmem:[#allocation2 + $0x8] sm:$0xff] %v3913_v53 }
 0xb6b   :  { %v3914_v48 = vsel %vm3912_vm15, %v3902_v58, %v9788_v57 }
 0xb6c   :  { %3918 = vst [vmem:[#allocation2 + $0x18] sm:$0xff] %v3914_v48 }
 0xb6d PF:  { %v6605_v6 = vld [vmem:[#allocation10 + $0xc] ss:$36 sps:$4 sm:$0xff]   ;;  %v6608_v35 = vld [vmem:[#allocation10 + $0x54] ss:$36 sps:$4 sm:$0xff]   ;;  %v7035_v26 = vmov 0   ;;  %v3924_v58 = vld [vmem:[#allocation2 + $0x10] sm:$0xff] }
 0xb6e   :  { %v6607_v32 = vld [vmem:[#allocation10 + $0x8] ss:$36 sps:$4 sm:$0xff]   ;;  %4632 = vmatprep.subr.bf16.mxu0 %v6605_v6  ;;  %v6610_v27 = vld [vmem:[#allocation10 + $0x50] ss:$36 sps:$4 sm:$0xff]   ;;  %6604 = vset.pattern.permute.xlu0 %v7035_v26  ;;  %v6611_v21 = vld [vmem:[#allocation10 + $0x9c] ss:$36 sps:$4 sm:$0xff]  }
 0xb6f   :  { %4633 = vmatpush1.bf16.msra.mxu0 %v6607_v32  ;;  %v10909_v63 = vld [vmem:[#allocation27_spill] sm:$0xff]  ;;  %v10910_v0 = vld [vmem:[#allocation28_spill] sm:$0xff]  ;;  %v6614_v60 = vld [vmem:[#allocation10 + $0xe4] ss:$36 sps:$4 sm:$0xff]   ;;  %s7036_s0 = smov [#allocation19]  }
 0xb70   :  { %vm4800_vm0 = vcmp.gt.s32.totalorder %v10909_v63, 7  ;;  %4634 = vmatprep.subr.bf16.mxu0 %v6608_v35  ;;  %vm4801_vm1 = vcmp.gt.s32.totalorder %v10910_v0, 7  ;;  %v6613_v1 = vld [vmem:[#allocation10 + $0x98] ss:$36 sps:$4 sm:$0xff]   ;;  %v6616_v22 = vld [vmem:[#allocation10 + $0xe0] ss:$36 sps:$4 sm:$0xff]  }
 0xb71   :  { %v4852_v39 = vsel %vm4800_vm0, 1, %v7035_v26  ;;  %v4853_v57 = vsel %vm4801_vm1, 1, %v7035_v26  ;;  %v6617_v56 = vld [vmem:[#allocation10 + $0x12c] ss:$36 sps:$4 sm:$0xff]   ;;  %v6620_v62 = vld [vmem:[#allocation10 + $0x174] ss:$36 sps:$4 sm:$0xff]  }
 0xb72   :  { %4855 = vperm.xlu0 %6604, %v4852_v39   ;;  %v6619_v50 = vld [vmem:[#allocation10 + $0x128] ss:$36 sps:$4 sm:$0xff]   ;;  %v6622_v30 = vld [vmem:[#allocation10 + $0x170] ss:$36 sps:$4 sm:$0xff]   ;;  %v6623_v54 = vld [vmem:[#allocation10 + $0x1bc] ss:$36 sps:$4 sm:$0xff]  }
 0xb73   :  { %4635 = vmatpush1.bf16.msra.mxu0 %v6610_v27  ;;  %v6646_v16 = vld [vmem:[#allocation10 + $0x14] ss:$36 sps:$4 sm:$0xff]   ;;  %v6652_v40 = vld [vmem:[#allocation10 + $0x5c] ss:$36 sps:$4 sm:$0xff]   ;;  %v6626_v10 = vld [vmem:[#allocation10 + $0x204] ss:$36 sps:$4 sm:$0xff]  }
 0xb74   :  { %4636 = vmatprep.subr.bf16.mxu0 %v6611_v21  ;;  %v6649_v36 = vld [vmem:[#allocation10 + $0x10] ss:$36 sps:$4 sm:$0xff]   ;;  %4673 = vmatprep.subr.bf16.mxu1 %v6646_v16  ;;  %v6655_v14 = vld [vmem:[#allocation10 + $0x58] ss:$36 sps:$4 sm:$0xff]   ;;  %v6658_v9 = vld [vmem:[#allocation10 + $0xa4] ss:$36 sps:$4 sm:$0xff]  }
 0xb75   :  { %4674 = vmatpush1.bf16.msra.mxu1 %v6649_v36  ;;  %v6625_v34 = vld [vmem:[#allocation10 + $0x1b8] ss:$36 sps:$4 sm:$0xff]   ;;  %v9915_v13 = vld [vmem:[#allocation2 + $0x18] sm:$0xff]  ;;  %v6628_v15 = vld [vmem:[#allocation10 + $0x200] ss:$36 sps:$4 sm:$0xff]   ;;  %s5029_s13 = sshll.u32 %s7036_s0, 4  ;;  %s5030_s13 = int_to_ptr.vmem [resolvable:$true] %s5029_s13 }
 0xb76   :  { %4858 = vperm.xlu0 %6604, %v4853_v57   ;;  %4675 = vmatprep.subr.bf16.mxu1 %v6652_v40  ;;  %v9913_v42 = vld [vmem:[#allocation2 + $0x8] sm:$0xff]  ;;  %v6661_v45 = vld [vmem:[#allocation10 + $0xa0] ss:$36 sps:$4 sm:$0xff]   ;;  %v6662_v37 = vld [vmem:[#allocation10 + $0xec] ss:$36 sps:$4 sm:$0xff]   ;;  %s6985_s3 = scalar_lea.vmem %s5030_s13, 512  ;;  %p6990_p10 = scmp.lt.s32.totalorder %s5030_s13, %s5030_s13 }
 0xb77   :  { %4637 = vmatpush1.bf16.msra.mxu0 %v6613_v1  ;;  %v9919_v18 = vpack.c.bf16 %v9915_v13, %v9913_v42  ;;  %v6629_v33 = vld [vmem:[#allocation10 + $0x24c] ss:$36 sps:$4 sm:$0xff]   ;;  %v6668_v49 = vld [vmem:[#allocation10 + $0x134] ss:$36 sps:$4 sm:$0xff]   ;;  %v6674_v46 = vld [vmem:[#allocation10 + $0x17c] ss:$36 sps:$4 sm:$0xff]   ;;  %p6986_p9 = scmp.ne.s32.totalorder %s5030_s13, %s6985_s3  ;;  %p6991_p11 = scmp.lt.s32.totalorder %s6985_s3, %s6985_s3 }
 0xb78   :  { %4638 = vmatprep.subr.bf16.mxu0 %v6614_v60  ;;  %v6667_v20 = vld [vmem:[#allocation10 + $0xe8] ss:$36 sps:$4 sm:$0xff]   ;;  %v6632_v3 = vld [vmem:[#allocation10 + $0x294] ss:$36 sps:$4 sm:$0xff]   ;;  %v6635_v25 = vld [vmem:[#allocation10 + $0x2dc] ss:$36 sps:$4 sm:$0xff]  }
 0xb79   :  { %4676 = vmatpush1.bf16.msra.mxu1 %v6655_v14  ;;  %4664 = vmatprep.mubr.bf16.mxu0 %v9919_v18  ;;  %v6631_v12 = vld [vmem:[#allocation10 + $0x248] ss:$36 sps:$4 sm:$0xff]   ;;  %v6634_v61 = vld [vmem:[#allocation10 + $0x290] ss:$36 sps:$4 sm:$0xff]   ;;  %v6679_v19 = vld [vmem:[#allocation10 + $0x178] ss:$36 sps:$4 sm:$0xff]   ;;  %p6992_p12 = por %p6991_p11, %p6990_p10 }
 0xb7a   :  { %4677 = vmatprep.subr.bf16.mxu1 %v6658_v9  ;;  %4705 = vmatprep.mubr.bf16.mxu1 %v9919_v18  ;;  %v6673_v59 = vld [vmem:[#allocation10 + $0x130] ss:$36 sps:$4 sm:$0xff]   ;;  %v6637_v51 = vld [vmem:[#allocation10 + $0x2d8] ss:$36 sps:$4 sm:$0xff]   ;;  %v6680_v43 = vld [vmem:[#allocation10 + $0x1c4] ss:$36 sps:$4 sm:$0xff]  }
 0xb7b   :  { %4639 = vmatpush1.bf16.msra.mxu0 %v6616_v22  ;;  %v6638_v44 = vld [vmem:[#allocation10 + $0x324] ss:$36 sps:$4 sm:$0xff]   ;;  %v6686_v29 = vld [vmem:[#allocation10 + $0x20c] ss:$36 sps:$4 sm:$0xff]   ;;  %v6692_v4 = vld [vmem:[#allocation10 + $0x254] ss:$36 sps:$4 sm:$0xff]   ;;  %p6993_p13 = pnand %p6992_p12, %p6986_p9 }
 0xb7c   :  { %4640 = vmatprep.subr.bf16.mxu0 %v6617_v56  ;;  %v6640_v55 = vld [vmem:[#allocation10 + $0x320] ss:$36 sps:$4 sm:$0xff]   ;;  %v6641_v5 = vld [vmem:[#allocation10 + $0x36c] ss:$36 sps:$4 sm:$0xff]   ;;  %v6644_v31 = vld [vmem:[#allocation10 + $0x3b4] ss:$36 sps:$4 sm:$0xff]  }
 0xb7d   :  { %4678 = vmatpush1.bf16.msra.mxu1 %v6661_v45  ;;  %v6685_v7 = vld [vmem:[#allocation10 + $0x1c0] ss:$36 sps:$4 sm:$0xff]   ;;  %v6691_v47 = vld [vmem:[#allocation10 + $0x208] ss:$36 sps:$4 sm:$0xff]   ;;  %v6648_v52 = vld [vmem:[#allocation10 + $0x3b0] ss:$36 sps:$4 sm:$0xff]  }
 0xb7e   :  { %4679 = vmatprep.subr.bf16.mxu1 %v6662_v37  ;;  %v6643_v38 = vld [vmem:[#allocation10 + $0x368] ss:$36 sps:$4 sm:$0xff]   ;;  %v6697_v17 = vld [vmem:[#allocation10 + $0x250] ss:$36 sps:$4 sm:$0xff]   ;;  %v6698_v28 = vld [vmem:[#allocation10 + $0x29c] ss:$36 sps:$4 sm:$0xff]  }
 0xb7f   :  { %4641 = vmatpush1.bf16.msra.mxu0 %v6619_v50  ;;  %v6650_v24 = vld [vmem:[#allocation10 + $0x3fc] ss:$36 sps:$4 sm:$0xff]   ;;  %v6704_v41 = vld [vmem:[#allocation10 + $0x2e4] ss:$36 sps:$4 sm:$0xff]   ;;  %v3922_v53 = vld [vmem:[#allocation2] sm:$0xff] }
 0xb80   :  { %4642 = vmatprep.subr.bf16.mxu0 %v6620_v62  ;;  %v6703_v23 = vld [vmem:[#allocation10 + $0x298] ss:$36 sps:$4 sm:$0xff]   ;;  %v6656_v8 = vld [vmem:[#allocation10 + $0x444] ss:$36 sps:$4 sm:$0xff]   ;;  %v6710_v6 = vld [vmem:[#allocation10 + $0x32c] ss:$36 sps:$4 sm:$0xff]   ;;  %v9923_v35 = vpack.c.bf16 %v3924_v58, %v3922_v53 }
 0xb81   :  { %4680 = vmatpush1.bf16.msra.mxu1 %v6667_v20  ;;  %v6654_v2 = vld [vmem:[#allocation10 + $0x3f8] ss:$36 sps:$4 sm:$0xff]   ;;  %v6660_v11 = vld [vmem:[#allocation10 + $0x440] ss:$36 sps:$4 sm:$0xff]   ;;  %v6715_v63 = vld [vmem:[#allocation10 + $0x328] ss:$36 sps:$4 sm:$0xff]  }
 0xb82   :  { %4681 = vmatprep.subr.bf16.mxu1 %v6668_v49  ;;  %v6709_v48 = vld [vmem:[#allocation10 + $0x2e0] ss:$36 sps:$4 sm:$0xff]   ;;  %v6664_v27 = vld [vmem:[#allocation10 + $0x18] ss:$36 sps:$4 sm:$0xff]   ;;  %v6721_v57 = vld [vmem:[#allocation10 + $0x370] ss:$36 sps:$4 sm:$0xff]  }
 0xb83   :  { %4643 = vmatpush1.bf16.msra.mxu0 %v6622_v30  ;;  %v6666_v32 = vld [vmem:[#allocation10 + $0x1c] ss:$36 sps:$4 sm:$0xff]   ;;  %v6716_v21 = vld [vmem:[#allocation10 + $0x374] ss:$36 sps:$4 sm:$0xff]   ;;  %v6672_v39 = vld [vmem:[#allocation10 + $0x64] ss:$36 sps:$4 sm:$0xff]  }
 0xb84   :  { %4644 = vmatprep.subr.bf16.mxu0 %v6623_v54  ;;  %v6670_v0 = vld [vmem:[#allocation10 + $0x60] ss:$36 sps:$4 sm:$0xff]   ;;  %v6678_v60 = vld [vmem:[#allocation10 + $0xac] ss:$36 sps:$4 sm:$0xff]   ;;  %v6727_v56 = vld [vmem:[#allocation10 + $0x3b8] ss:$36 sps:$4 sm:$0xff]  }
 0xb85   :  { %4682 = vmatpush1.bf16.msra.mxu1 %v6673_v59  ;;  %v6722_v1 = vld [vmem:[#allocation10 + $0x3bc] ss:$36 sps:$4 sm:$0xff]   ;;  %v6676_v22 = vld [vmem:[#allocation10 + $0xa8] ss:$36 sps:$4 sm:$0xff]   ;;  %v6684_v62 = vld [vmem:[#allocation10 + $0xf4] ss:$36 sps:$4 sm:$0xff]  }
 0xb86   :  { %4683 = vmatprep.subr.bf16.mxu1 %v6674_v46  ;;  %v6728_v50 = vld [vmem:[#allocation10 + $0x404] ss:$36 sps:$4 sm:$0xff]   ;;  %v6682_v30 = vld [vmem:[#allocation10 + $0xf0] ss:$36 sps:$4 sm:$0xff]   ;;  %v6690_v54 = vld [vmem:[#allocation10 + $0x13c] ss:$36 sps:$4 sm:$0xff]  }
 0xb87   :  { %4645 = vmatpush1.bf16.msra.mxu0 %v6625_v34  ;;  %v6733_v16 = vld [vmem:[#allocation10 + $0x400] ss:$36 sps:$4 sm:$0xff]   ;;  %v6734_v36 = vld [vmem:[#allocation10 + $0x44c] ss:$36 sps:$4 sm:$0xff]   ;;  %v6688_v40 = vld [vmem:[#allocation10 + $0x138] ss:$36 sps:$4 sm:$0xff]  }
 0xb88   :  { %4646 = vmatprep.subr.bf16.mxu0 %v6626_v10  ;;  %v6696_v14 = vld [vmem:[#allocation10 + $0x184] ss:$36 sps:$4 sm:$0xff]   ;;  %v6702_v37 = vld [vmem:[#allocation10 + $0x1cc] ss:$36 sps:$4 sm:$0xff]   ;;  %v6708_v49 = vld [vmem:[#allocation10 + $0x214] ss:$36 sps:$4 sm:$0xff]  }
 0xb89   :  { %4684 = vmatpush1.bf16.msra.mxu1 %v6679_v19  ;;  %v6739_v34 = vld [vmem:[#allocation10 + $0x448] ss:$36 sps:$4 sm:$0xff]   ;;  %v6743_v10 = vld [vmem:[#allocation10 + $0x260] ss:$36 sps:$4 sm:$0xff]   ;;  %v6755_v59 = vld [vmem:[#allocation10 + $0x338] ss:$36 sps:$4 sm:$0xff]  }
 0xb8a   :  { %4685 = vmatprep.subr.bf16.mxu1 %v6680_v43  ;;  %v6744_v9 = vld [vmem:[#allocation10 + $0x20] ss:$36 sps:$4 sm:$0xff]   ;;  %v6748_v45 = vld [vmem:[#allocation10 + $0x2a8] ss:$36 sps:$4 sm:$0xff]   ;;  %v6712_v19 = vld [vmem:[#allocation10 + $0x258] ss:$36 sps:$4 sm:$0xff]  }
 0xb8b   :  { %4647 = vmatpush1.bf16.msra.mxu0 %v6628_v15  ;;  %v6694_v15 = vld [vmem:[#allocation10 + $0x180] ss:$36 sps:$4 sm:$0xff]   ;;  %v6700_v20 = vld [vmem:[#allocation10 + $0x1c8] ss:$36 sps:$4 sm:$0xff]   ;;  %v6750_v53 = vld [vmem:[#allocation10 + $0x450] ss:$36 sps:$4 sm:$0xff]  }
 0xb8c   :  { %4648 = vmatprep.subr.bf16.mxu0 %v6629_v33  ;;  %v6749_v33 = vld [vmem:[#allocation10 + $0x68] ss:$36 sps:$4 sm:$0xff]   ;;  %v6714_v46 = vld [vmem:[#allocation10 + $0x25c] ss:$36 sps:$4 sm:$0xff]  }
 0xb8d   :  { %4686 = vmatpush1.bf16.msra.mxu1 %v6685_v7  ;;  %v6758_v43 = vld [vmem:[#allocation10 + $0x140] ss:$36 sps:$4 sm:$0xff]   ;;  %v6726_v7 = vld [vmem:[#allocation10 + $0x2ec] ss:$36 sps:$4 sm:$0xff]  }
 0xb8e   :  { %4687 = vmatprep.subr.bf16.mxu1 %v6686_v29  ;;  %v6760_v29 = vld [vmem:[#allocation10 + $0x188] ss:$36 sps:$4 sm:$0xff]  }
 0xb8f   :  { %4649 = vmatpush1.bf16.msra.mxu0 %v6631_v12  ;;  %v6753_v12 = vld [vmem:[#allocation10 + $0x2f0] ss:$36 sps:$4 sm:$0xff]  }
 0xb90   :  { %4650 = vmatprep.subr.bf16.mxu0 %v6632_v3  ;;  %v6754_v3 = vld [vmem:[#allocation10 + $0xb0] ss:$36 sps:$4 sm:$0xff]  }
 0xb91   :  { %4688 = vmatpush1.bf16.msra.mxu1 %v6691_v47  ;;  %v6761_v47 = vld [vmem:[#allocation10 + $0x410] ss:$36 sps:$4 sm:$0xff]  }
 0xb92   :  { %4689 = vmatprep.subr.bf16.mxu1 %v6692_v4  ;;  %v6762_v4 = vld [vmem:[#allocation10 + $0x1d0] ss:$36 sps:$4 sm:$0xff]  }
 0xb93   :  { %4651 = vmatpush1.bf16.msra.mxu0 %v6634_v61  ;;  %v6706_v61 = vld [vmem:[#allocation10 + $0x210] ss:$36 sps:$4 sm:$0xff]  }
 0xb94   :  { %4652 = vmatprep.subr.bf16.mxu0 %v6635_v25  ;;  %v6756_v25 = vld [vmem:[#allocation10 + $0xf8] ss:$36 sps:$4 sm:$0xff]   ;;  %v6767_v58 = vld [vmem:[#allocation16 + $0x4] ss:$8 sps:$4 sm:$0xff]  }
 0xb95   :  { %4690 = vmatpush1.bf16.msra.mxu1 %v6697_v17  ;;  %v6738_v17 = vld [vmem:[#allocation10 + $0x37c] ss:$36 sps:$4 sm:$0xff]  }
 0xb96   :  { %4691 = vmatprep.subr.bf16.mxu1 %v6698_v28  ;;  %v6764_v28 = vld [vmem:[#allocation10 + $0x218] ss:$36 sps:$4 sm:$0xff]  }
 0xb97   :  { %4653 = vmatpush1.bf16.msra.mxu0 %v6637_v51  ;;  %v6720_v51 = vld [vmem:[#allocation10 + $0x2a4] ss:$36 sps:$4 sm:$0xff]  }
 0xb98   :  { %4654 = vmatprep.subr.bf16.mxu0 %v6638_v44  ;;  %v6718_v44 = vld [vmem:[#allocation10 + $0x2a0] ss:$36 sps:$4 sm:$0xff]  }
 0xb99   :  { %4692 = vmatpush1.bf16.msra.mxu1 %v6703_v23  ;;  %v6742_v23 = vld [vmem:[#allocation10 + $0x3c4] ss:$36 sps:$4 sm:$0xff]  }
 0xb9a   :  { %4693 = vmatprep.subr.bf16.mxu1 %v6704_v41  ;;  %v6747_v41 = vld [vmem:[#allocation10 + $0x40c] ss:$36 sps:$4 sm:$0xff]  }
 0xb9b   :  { %4655 = vmatpush1.bf16.msra.mxu0 %v6640_v55  ;;  %v6759_v55 = vld [vmem:[#allocation10 + $0x3c8] ss:$36 sps:$4 sm:$0xff]  }
 0xb9c   :  { %4656 = vmatprep.subr.bf16.mxu0 %v6641_v5  ;;  %v6724_v5 = vld [vmem:[#allocation10 + $0x2e8] ss:$36 sps:$4 sm:$0xff]  }
 0xb9d   :  { %4694 = vmatpush1.bf16.msra.mxu1 %v6709_v48  ;;  %v6765_v48 = vld [vmem:[#allocation16] ss:$8 sps:$4 sm:$0xff]  }
 0xb9e   :  { %4695 = vmatprep.subr.bf16.mxu1 %v6710_v6  ;;  %v6770_v6 = vld [vmem:[#allocation16 + $0x14] ss:$8 sps:$4 sm:$0xff]  }
 0xb9f   :  { %4657 = vmatpush1.bf16.msra.mxu0 %v6643_v38  ;;  %v6732_v38 = vld [vmem:[#allocation10 + $0x334] ss:$36 sps:$4 sm:$0xff]  }
 0xba0   :  { %4658 = vmatprep.subr.bf16.mxu0 %v6644_v31  ;;  %v6730_v31 = vld [vmem:[#allocation10 + $0x330] ss:$36 sps:$4 sm:$0xff]  }
 0xba1   :  { %4696 = vmatpush1.bf16.msra.mxu1 %v6715_v63  ;;  %v6776_v63 = vld [vmem:[#allocation16 + $0x34] ss:$8 sps:$4 sm:$0xff]  }
 0xba2   :  { %4697 = vmatprep.subr.bf16.mxu1 %v6716_v21  ;;  %v6774_v21 = vld [vmem:[#allocation16 + $0x30] ss:$8 sps:$4 sm:$0xff]  }
 0xba3   :  { %4659 = vmatpush1.bf16.msra.mxu0 %v6648_v52  ;;  %v6763_v52 = vld [vmem:[#allocation10 + $0x458] ss:$36 sps:$4 sm:$0xff]  }
 0xba4   :  { %4660 = vmatprep.subr.bf16.mxu0 %v6650_v24  ;;  %v6736_v24 = vld [vmem:[#allocation10 + $0x378] ss:$36 sps:$4 sm:$0xff]  }
 0xba5   :  { %4698 = vmatpush1.bf16.msra.mxu1 %v6721_v57  ;;  %v6780_v57 = vld [vmem:[#allocation16 + $0x50] ss:$8 sps:$4 sm:$0xff]  }
 0xba6   :  { %4699 = vmatprep.subr.bf16.mxu1 %v6722_v1  ;;  %v6785_v1 = vld [vmem:[#allocation16 + $0x64] ss:$8 sps:$4 sm:$0xff]  }
 0xba7   :  { %4661 = vmatpush1.bf16.msra.mxu0 %v6654_v2  ;;  %v6740_v2 = vld [vmem:[#allocation10 + $0x3c0] ss:$36 sps:$4 sm:$0xff]  }
 0xba8   :  { %4662 = vmatprep.subr.bf16.mxu0 %v6656_v8  ;;  %v6745_v8 = vld [vmem:[#allocation10 + $0x408] ss:$36 sps:$4 sm:$0xff]  }
 0xba9   :  { %4700 = vmatpush1.bf16.msra.mxu1 %v6727_v56  ;;  %v6786_v56 = vld [vmem:[#allocation16 + $0x70] ss:$8 sps:$4 sm:$0xff]  }
 0xbaa   :  { %4701 = vmatprep.subr.bf16.mxu1 %v6728_v50 }
 0xbab   :  { %4663 = vmatpush1.bf16.msra.mxu0 %v6660_v11  ;;  %v6752_v11 = vld [vmem:[#allocation10 + $0x454] ss:$36 sps:$4 sm:$0xff]  }
 0xbac   :  { %4716 = vmatprep.subr.bf16.mxu0 %v6666_v32  ;;  %v6768_v32 = vld [vmem:[#allocation16 + $0x10] ss:$8 sps:$4 sm:$0xff]  }
 0xbad   :  { %4702 = vmatpush1.bf16.msra.mxu1 %v6733_v16 }
 0xbae   :  { %4665 = vmatmul.mubr.bf16.vlgmr.msra.gmra.mrb[0].mxu0 %v9923_v35  ;;  %4703 = vmatprep.subr.bf16.mxu1 %v6734_v36 }
 0xbaf   :  { %4717 = vmatpush1.bf16.msra.mxu0 %v6664_v27  ;;  %4748 = vmatprep.mubr.bf16.mxu0 %v9919_v18  ;;  %v6773_v27 = vld [vmem:[#allocation16 + $0x24] ss:$8 sps:$4 sm:$0xff]  }
 0xbb0   :  { %4718 = vmatprep.subr.bf16.mxu0 %v6672_v39  ;;  %v6777_v39 = vld [vmem:[#allocation16 + $0x40] ss:$8 sps:$4 sm:$0xff]  }
 0xbb1   :  { %4704 = vmatpush1.bf16.msra.mxu1 %v6739_v34 }
 0xbb2   :  { %5585 = vmatprep.subr.bf16.mxu1 %v6743_v10 }
 0xbb3   :  { %4719 = vmatpush1.bf16.msra.mxu0 %v6670_v0  ;;  %v6779_v0 = vld [vmem:[#allocation16 + $0x44] ss:$8 sps:$4 sm:$0xff]  }
 0xbb4   :  { %4720 = vmatprep.subr.bf16.mxu0 %v6678_v60  ;;  %4706 = vmatmul.mubr.bf16.vlgmr.msra.gmra.mrb[0].mxu1 %v9923_v35  ;;  %v6783_v60 = vld [vmem:[#allocation16 + $0x60] ss:$8 sps:$4 sm:$0xff]  }
 0xbb5   :  { %5586 = vmatpush3.bf16.msra.mxu1 %v6744_v9  ;;  %4791 = vmatprep.mubr.bf16.mxu1 %v9919_v18  ;;  %v6757_v18 = vld [vmem:[#allocation10 + $0x380] ss:$36 sps:$4 sm:$0xff]  }
 0xbb6   :  { %5587 = vmatprep.subr.bf16.mxu1 %v6748_v45 }
 0xbb7   :  { %4721 = vmatpush1.bf16.msra.mxu0 %v6676_v22  ;;  %v6788_v22 = vld [vmem:[#allocation16 + $0x74] ss:$8 sps:$4 sm:$0xff]  }
 0xbb8   :  { %4722 = vmatprep.subr.bf16.mxu0 %v6684_v62 }
 0xbb9   :  { %5588 = vmatpush3.bf16.msra.mxu1 %v6749_v33  ;;  %v10911_v33 = vld [vmem:[#allocation29_spill] sm:$0xff] }
 0xbba   :  { %5589 = vmatprep.subr.bf16.mxu1 %v6753_v12  ;;  %v10912_v12 = vld [vmem:[#allocation30_spill] sm:$0xff] }
 0xbbb   :  { %4723 = vmatpush1.bf16.msra.mxu0 %v6682_v30 }
 0xbbc   :  { %4724 = vmatprep.subr.bf16.mxu0 %v6690_v54 }
 0xbbd   :  { %5590 = vmatpush3.bf16.msra.mxu1 %v6754_v3 }
 0xbbe   :  { %5591 = vmatprep.subr.bf16.mxu1 %v6755_v59 }
 0xbbf   :  { %4725 = vmatpush1.bf16.msra.mxu0 %v6688_v40 }
 0xbc0   :  { %4726 = vmatprep.subr.bf16.mxu0 %v6696_v14 }
 0xbc1   :  { %5592 = vmatpush3.bf16.msra.mxu1 %v6756_v25 }
 0xbc2   :  { %5593 = vmatprep.subr.bf16.mxu1 %v6757_v18 }
 0xbc3   :  { %4727 = vmatpush1.bf16.msra.mxu0 %v6694_v15 }
 0xbc4   :  { %4728 = vmatprep.subr.bf16.mxu0 %v6702_v37 }
 0xbc5   :  { %5594 = vmatpush3.bf16.msra.mxu1 %v6758_v43 }
 0xbc6   :  { %5595 = vmatprep.subr.bf16.mxu1 %v6759_v55 }
 0xbc7   :  { %4729 = vmatpush1.bf16.msra.mxu0 %v6700_v20 }
 0xbc8   :  { %4730 = vmatprep.subr.bf16.mxu0 %v6708_v49 }
 0xbc9   :  { %5596 = vmatpush3.bf16.msra.mxu1 %v6760_v29 }
 0xbca   :  { %5597 = vmatprep.subr.bf16.mxu1 %v6761_v47 }
 0xbcb   :  { %4731 = vmatpush1.bf16.msra.mxu0 %v6706_v61 }
 0xbcc   :  { %4732 = vmatprep.subr.bf16.mxu0 %v6714_v46 }
 0xbcd   :  { %5598 = vmatpush3.bf16.msra.mxu1 %v6762_v4 }
 0xbce   :  { %5599 = vmatprep.subr.bf16.mxu1 %v6763_v52 }
 0xbcf   :  { %4733 = vmatpush1.bf16.msra.mxu0 %v6712_v19 }
 0xbd0   :  { %4734 = vmatprep.subr.bf16.mxu0 %v6720_v51 }
 0xbd1   :  { %5600 = vmatpush3.bf16.msra.mxu1 %v6764_v28 }
 0xbd2   :  { %4973 = vmatprep.subr.bf16.mxu1 %v6767_v58 }
 0xbd3   :  { %4735 = vmatpush1.bf16.msra.mxu0 %v6718_v44 }
 0xbd4   :  { %4736 = vmatprep.subr.bf16.mxu0 %v6726_v7  ;;  %4792 = vmatmul.mubr.bf16.vlgmr.msra.gmra.mrb[4].mxu1 %v9923_v35 }
 0xbd5   :  { %5005 = vmatprep.mubr.bf16.mxu1 %v7035_v26  ;;  %4974 = vmatpush1.bf16.msra.mxu1 %v6765_v48  ;;  %v6771_v26 = vld [vmem:[#allocation16 + $0x20] ss:$8 sps:$4 sm:$0xff]  }
 0xbd6   :  { %4975 = vmatprep.subr.bf16.mxu1 %v6770_v6 }
 0xbd7   :  { %4737 = vmatpush1.bf16.msra.mxu0 %v6724_v5 }
 0xbd8   :  { %4738 = vmatprep.subr.bf16.mxu0 %v6732_v38 }
 0xbd9   :  { %4976 = vmatpush1.bf16.msra.mxu1 %v6768_v32 }
 0xbda   :  { %4977 = vmatprep.subr.bf16.mxu1 %v6773_v27 }
 0xbdb   :  { %4739 = vmatpush1.bf16.msra.mxu0 %v6730_v31 }
 0xbdc   :  { %4740 = vmatprep.subr.bf16.mxu0 %v6738_v17 }
 0xbdd   :  { %4978 = vmatpush1.bf16.msra.mxu1 %v6771_v26 }
 0xbde   :  { %4979 = vmatprep.subr.bf16.mxu1 %v6776_v63 }
 0xbdf   :  { %4741 = vmatpush1.bf16.msra.mxu0 %v6736_v24  ;;  %v10913_v24 = vld [vmem:[#allocation33_spill] sm:$0xff] }
 0xbe0   :  { %4742 = vmatprep.subr.bf16.mxu0 %v6742_v23 }
 0xbe1   :  { %4980 = vmatpush1.bf16.msra.mxu1 %v6774_v21 }
 0xbe2   :  { %4981 = vmatprep.subr.bf16.mxu1 %v6779_v0 }
 0xbe3   :  { %4743 = vmatpush1.bf16.msra.mxu0 %v6740_v2 }
 0xbe4   :  { %4744 = vmatprep.subr.bf16.mxu0 %v6747_v41 }
 0xbe5   :  { %4982 = vmatpush1.bf16.msra.mxu1 %v6777_v39 }
 0xbe7   :  { %4745 = vmatpush1.bf16.msra.mxu0 %v6745_v8  ;;  %v10914_v8 = vld [vmem:[#allocation31_spill] sm:$0xff] }
 0xbe8   :  { %4746 = vmatprep.subr.bf16.mxu0 %v6752_v11 }
 0xbeb   :  { %4747 = vmatpush1.bf16.msra.mxu0 %v6750_v53 }
 0xbee   :  { %4749 = vmatmul.mubr.bf16.vlgmr.msra.gmra.mrb[4].mxu0 %v9923_v35  ;;  %v6782_v35 = vld [vmem:[#allocation16 + $0x54] ss:$8 sps:$4 sm:$0xff]  }
 0xbef   :  { %4983 = vmatprep.subr.bf16.mxu1 %v6782_v35 }
 0xbf0   :  { %4984 = vmatpush1.bf16.msra.mxu1 %v6780_v57 }
 0xbf1   :  { %4985 = vmatprep.subr.bf16.mxu1 %v6785_v1  ;;  %v4856_v21 = vpop.permute.xlu0 %4855 }
 0xbf2   :  { %vm4860_vm2 = vcmp.eq.s32.totalorder %v4856_v21, 1 }
 0xbf4   :  { %4986 = vmatpush1.bf16.msra.mxu1 %v6783_v60 }
 0xbf5   :  { %4987 = vmatprep.subr.bf16.mxu1 %v6788_v22 }
 0xbf8   :  { %4988 = vmatpush1.bf16.msra.mxu1 %v6786_v56 }
 0xc81   :  { %v4666_v50 = vpop.f32.mrb[0].mxu0 }
 0xc82   :  { %v4667_v62 = vpop.f32.mrb[1].mxu0  ;;  %v4859_v50 = vpop.permute.xlu0 %4858 }
 0xc83   :  { %v4669_v30 = vpop.f32.mrb[2].mxu0  ;;  %v4802_v20 = vadd.f32 %v4667_v62, %v10911_v33  ;;  %vm4861_vm3 = vcmp.eq.s32.totalorder %v4859_v50, 1 }
 0xc84   :  { %v4670_v16 = vpop.f32.mrb[3].mxu0 }
 0xc85   :  { %v4805_v61 = vadd.f32 %v4670_v16, %v10911_v33 }
 0xc87   :  { %v4707_v36 = vpop.f32.mrb[0].mxu1 }
 0xc88   :  { %v4709_v54 = vpop.f32.mrb[1].mxu1  ;;  %v4803_v49 = vadd.f32 %v4707_v36, %v10912_v12 }
 0xc89   :  { %v4711_v40 = vpop.f32.mrb[2].mxu1  ;;  %v4804_v11 = vadd.f32 %v4709_v54, %v10914_v8 }
 0xc8a   :  { %v4713_v14 = vpop.f32.mrb[3].mxu1  ;;  %v4806_v25 = vadd.f32 %v4711_v40, %v10912_v12 }
 0xc8b   :  { %v4807_v6 = vadd.f32 %v4713_v14, %v10914_v8  ;;  %v4881_v14 = vld [vmem:[#allocation17] sm:$0x3] }
 0xca7   :  { %v5601_v34 = vpop.f32.mrb[4].mxu1 }
 0xca8   :  { %v5602_v10 = vpop.f32.mrb[5].mxu1 }
 0xca9   :  { %v5603_v9 = vadd.f32 %v5602_v10, %v5601_v34  ;;  %v5604_v15 = vpop.f32.mrb[6].mxu1  ;;  %v10915_v34 = vld [vmem:[#allocation26_spill] sm:$0xff] }
 0xcaa   :  { %v5605_v45 = vpop.f32.mrb[7].mxu1  ;;  %v10916_v10 = vsub.s32 0, %v10915_v34 }
 0xcab   :  { %v5606_v37 = vadd.f32 %v5605_v45, %v5604_v15  ;;  %v4836_v23 = vadd.f32 %v5603_v9, %v10913_v24  ;;  %v10917_v15 = vsub.s32 1, %v10915_v34 }
 0xcac   :  { %v4886_v9 = vrot.slane %v4881_v14, %v10916_v10 }
 0xcad   :  { %v4837_v58 = vadd.f32 %v5606_v37, %v10913_v24  ;;  %v4890_v45 = vrot.slane %v4881_v14, %v10917_v15 }
 0xcc1   :  { %v4750_v3 = vpop.f32.mrb[4].mxu0 }
 0xcc2   :  { %v4808_v59 = vadd.f32 %v4802_v20, %v4750_v3  ;;  %v4752_v46 = vpop.f32.mrb[5].mxu0 }
 0xcc3   :  { %v4809_v19 = vadd.f32 %v4803_v49, %v4752_v46  ;;  %v4754_v18 = vpop.f32.mrb[6].mxu0 }
 0xcc4   :  { %v5387_v51 = vmul.f32 -1.442695, %v4808_v59  ;;  %v4810_v43 = vadd.f32 %v4805_v61, %v4754_v18  ;;  %v4756_v44 = vpop.f32.mrb[7].mxu0 }
 0xcc5   :  { %v4811_v55 = vadd.f32 %v4806_v25, %v4756_v44  ;;  %v5388_v29 = vmul.f32 -1.442695, %v4809_v19 }
 0xcc6   :  { %6789 = vpow2.f32 %v5387_v51  ;;  %v5389_v7 = vmul.f32 -1.442695, %v4810_v43 }
 0xcc7   :  { %v5390_v5 = vmul.f32 -1.442695, %v4811_v55 }
 0xcc8   :  { %6791 = vpow2.f32 %v5389_v7 }
 0xcc9   :  { %6793 = vpow2.f32 %v5388_v29 }
 0xcca   :  { %6795 = vpow2.f32 %v5390_v5 }
 0xcd0   :  { %v6790_v47 = vpop.eup %6789 }
 0xcd1   :  { %v4824_v38 = vadd.f32 1.0, %v6790_v47 }
 0xcd2   :  { %v6792_v4 = vpop.eup %6791 }
 0xcd3   :  { %6797 = vrcp.f32 %v4824_v38  ;;  %v4826_v31 = vadd.f32 1.0, %v6792_v4  ;;  %v6794_v52 = vpop.eup %6793 }
 0xcd4   :  { %v6796_v17 = vpop.eup %6795  ;;  %v4825_v28 = vadd.f32 1.0, %v6794_v52 }
 0xcd5   :  { %6799 = vrcp.f32 %v4826_v31  ;;  %v4827_v2 = vadd.f32 1.0, %v6796_v17 }
 0xcd6   :  { %6801 = vrcp.f32 %v4825_v28 }
 0xcd7   :  { %6803 = vrcp.f32 %v4827_v2 }
 0xcdd   :  { %v6798_v41 = vpop.eup %6797 }
 0xcde   :  { %v4838_v53 = vmul.f32 %v6798_v41, %v4836_v23 }
 0xcdf   :  { %v6800_v48 = vpop.eup %6799 }
 0xce0   :  { %v4840_v32 = vadd.f32 %v4838_v53, %v4804_v11  ;;  %v4839_v27 = vmul.f32 %v6800_v48, %v4837_v58  ;;  %v6802_v63 = vpop.eup %6801 }
 0xce1   :  { %v6804_v39 = vpop.eup %6803  ;;  %v4844_v0 = vsub.f32 1.0, %v6802_v63  ;;  %v4848_v1 = vmul.f32 %v6802_v63, %v9913_v42 }
 0xce2   :  { %6805 = vtanh.f32 %v4840_v32  ;;  %v4841_v26 = vadd.f32 %v4839_v27, %v4807_v6  ;;  %v4845_v60 = vsub.f32 1.0, %v6804_v39  ;;  %v4849_v30 = vmul.f32 %v6804_v39, %v9915_v13 }
 0xce4   :  { %6807 = vtanh.f32 %v4841_v26 }
 0xcec   :  { %v6806_v35 = vpop.eup %6805 }
 0xced   :  { %v4846_v57 = vmul.f32 %v6806_v35, %v4844_v0 }
 0xcee   :  { %v6808_v22 = vpop.eup %6807 }
 0xcef   :  { %v4850_v56 = vadd.f32 %v4848_v1, %v4846_v57  ;;  %v4847_v62 = vmul.f32 %v6808_v22, %v4845_v60 }
 0xcf1   :  { %v4851_v16 = vadd.f32 %v4849_v30, %v4847_v62  ;;  %v4862_v36 = vsel %vm4860_vm2, %v4850_v56, %v9913_v42 }
 0xcf3   :  { %v4863_v54 = vsel %vm4861_vm3, %v4851_v16, %v9915_v13 }
 0xcf4   :  { %v4864_v40 = vpack.c.bf16 %v4863_v54, %v4862_v36 }
 0xcf6   :  { %5006 = vmatmul.mubr.bf16.vlgmr.msra.gmra.mrb[8].mxu1 %v4864_v40 }
 0xdc9   :  { %v5007_v37 = vpop.f32.mrb[8].mxu1 }
 0xdca   :  { %v5008_v33 = vadd.f32 %v5007_v37, %v4886_v9  ;;  %v5009_v20 = vpop.f32.mrb[9].mxu1 }
 0xdcb   :  { %v5010_v12 = vadd.f32 %v5009_v20, %v4890_v45  ;;  %v5011_v49 = vpop.f32.mrb[10].mxu1 }
 0xdcc   :  { %5020 = vst [vmem:[#allocation19] sm:$0xff] %v5008_v33  ;;  %v5012_v42 = vadd.f32 %v5011_v49, %v4886_v9  ;;  %v5013_v3 = vpop.f32.mrb[11].mxu1 }
 0xdcd   :  { %v5407_v13 = vclamps-f32 %v5010_v12, 10.0  ;;  %v5014_v61 = vadd.f32 %v5013_v3, %v4890_v45 }
 0xdce   :  { %5022 = vst [vmem:[#allocation19 + $0x10] sm:$0xff] %v5012_v42 }
 0xdcf   :  { %5021 = vst [vmem:[#allocation19 + $0x8] sm:$0xff] %v5407_v13  ;;  %v5408_v59 = vclamps-f32 %v5014_v61, 10.0 }
 0xdd1   :  { %5023 = vst [vmem:[#allocation19 + $0x18] sm:$0xff] %v5408_v59 }
 0xdd2   :  { %6996 = shalt.err (!%p6993_p13)
}
 0xdd3   :  { %s6997_s21 = scalar_lea.hbm %s9969_s9, 512 }
 0xdd4   :  { %p6998_p0 = scmp.ne.s32.totalorder %s9969_s9, %s6997_s21  ;;  %p7001_p1 = scmp.lt.u32.totalorder %s6997_s21, %s9969_s9 }
 0xdd6   :  { %p7003_p2 = pnand %p7001_p1, %p6998_p0 }
 0xdd8   :  { %7006 = shalt.err (!%p7003_p2)
}
 0xdd9   :  { %s7037_s24 = smov 256   ;;  %s7038_s1 = smov 16  }
 0xdda   :  { %5035 = dma.vmem_to_hbm [thread:$0]  %s5030_s13, 512, %s9969_s9, [#allocation7], %s7037_s24, %s7037_s24, %s7038_s1  }
 0xddb   :  { %7017 = dma.done.wait [#allocation7], 512  }
 0xddc   :  { %7018 = vsyncadd [#allocation7], 4294966784 }
 0xddd   :  { %5039 = vsyncpa [#allocation6], 1 }
 0xdde   :  { %5040 = vsyncpa [#allocation9], 1 }
 0xddf   :  { %5041 = vsyncpa [#allocation12], 1 }
 0xde0   :  { %5042 = vsyncpa [#allocation15], 1 }
 0xde1   :  { %5043 = vsyncpa [#allocation18], 1 }
 0xde2   :  { %5044 = vsyncpa [#allocation7], 1 }

</bundles_post_ra>
